<compile_context>
chip_gen: v7x
topology: tpu7x:2x2x1
jax: 0.10.0
libtpu: 0.0.40
codegen_flags: <defaults>
</compile_context>

<pallas_src>
import jax
import jax.numpy as jnp
from jax.experimental import pallas as pl
from jax.experimental.pallas import tpu as pltpu

# ----------------------------------------------------------------------------
# Problem sizes (small, consistent with the module's forward pass)
# ----------------------------------------------------------------------------
BATCH = 2            # B
IN_CH = 3            # RGB images
H = W = 16           # spatial
SPATIAL = H * W      # H*W = 256
ROWS = BATCH * SPATIAL   # flattened pixel rows = 512
FEAT = 2048          # resnet152 fc.in_features
EMB = 32             # embedding_size
BN_EPS = 1e-5        # nn.BatchNorm1d default eps


# ----------------------------------------------------------------------------
# Pallas kernel: backbone proxy + global-average-pool + Linear + BatchNorm1d
# (single grid step: everything lives in VMEM at once, no accumulator carry)
# ----------------------------------------------------------------------------
def cnn_model_kernel(x_ref,      # (ROWS, IN_CH)  bf16  flattened pixel rows (channels-last)
                     ws_ref,     # (IN_CH, FEAT)  bf16  frozen backbone 1x1 "conv" weight
                     bs_ref,     # (1, FEAT)      f32   frozen backbone bias
                     wf_ref,     # (FEAT, EMB)    bf16  linear_layer.weight (transposed)
                     bf_ref,     # (1, EMB)       f32   linear_layer.bias
                     g_ref,      # (1, EMB)       f32   batch_norm.weight (gamma)
                     bt_ref,     # (1, EMB)       f32   batch_norm.bias   (beta)
                     out_ref):   # (B, EMB)       f32
    # ---- frozen backbone proxy: 1x1 conv (channel matmul, bf16 in / f32 acc) + ReLU ----
    s = jnp.dot(x_ref[...], ws_ref[...],
                preferred_element_type=jnp.float32)             # (ROWS, FEAT) f32
    s = jnp.maximum(s + bs_ref[...], 0.0)

    # ---- global average pool: cross-sublane reduction (XLU), no pooling matmul ----
    feats = jnp.mean(s.reshape(BATCH, SPATIAL, FEAT), axis=1)   # (B, FEAT) f32

    # ---- linear_layer: feats @ W^T + b (bf16 storage -> f32 math) ----
    wf = wf_ref[...].astype(jnp.float32)
    z = jnp.dot(feats, wf, preferred_element_type=jnp.float32) + bf_ref[...]

    # ---- BatchNorm1d (training mode: batch stats, biased variance, eps) ----
    mu = jnp.mean(z, axis=0, keepdims=True)                     # (1, EMB)
    var = jnp.mean((z - mu) ** 2, axis=0, keepdims=True)        # biased
    y = (z - mu) * jax.lax.rsqrt(var + BN_EPS)
    out_ref[...] = y * g_ref[...] + bt_ref[...]                 # (B, EMB)


# ----------------------------------------------------------------------------
# Wrapper
# ----------------------------------------------------------------------------
def cnn_model_forward(images, w_stem, b_stem, w_fc, b_fc, gamma, beta):
    """images: (B, 3, H, W) NCHW float32 -> (B, EMB) float32."""
    B = images.shape[0]
    rows = B * SPATIAL

    # NCHW -> NHWC -> (B*H*W, C): channels-last so the channel matmul hits the MXU.
    # Cast matmul operands to bf16 (single-pass MXU, half DMA); accumulate in f32.
    x_flat = jnp.transpose(images, (0, 2, 3, 1)).reshape(rows, IN_CH).astype(jnp.bfloat16)
    w_stem_bf = w_stem.astype(jnp.bfloat16)
    w_fc_bf = w_fc.astype(jnp.bfloat16)

    flops = (2 * rows * IN_CH * FEAT      # stem matmul
             + rows * FEAT                # pool reduction
             + 2 * B * FEAT * EMB)        # fc head
    bytes_accessed = (x_flat.size * 2 + w_stem_bf.size * 2 + b_stem.size * 4
                      + w_fc_bf.size * 2 + b_fc.size * 4
                      + gamma.size * 4 + beta.size * 4 + B * EMB * 4)

    grid_spec = pltpu.PrefetchScalarGridSpec(
        num_scalar_prefetch=0,
        grid=(1,),                                            # single step: no tiling overhead
        in_specs=[
            pl.BlockSpec((rows, IN_CH), lambda i: (0, 0)),    # x (bf16)
            pl.BlockSpec((IN_CH, FEAT), lambda i: (0, 0)),    # Ws (bf16)
            pl.BlockSpec((1, FEAT), lambda i: (0, 0)),        # bs
            pl.BlockSpec((FEAT, EMB), lambda i: (0, 0)),      # Wf (bf16)
            pl.BlockSpec((1, EMB), lambda i: (0, 0)),         # bf
            pl.BlockSpec((1, EMB), lambda i: (0, 0)),         # gamma
            pl.BlockSpec((1, EMB), lambda i: (0, 0)),         # beta
        ],
        out_specs=pl.BlockSpec((B, EMB), lambda i: (0, 0)),
    )

    return pl.pallas_call(
        cnn_model_kernel,
        out_shape=jax.ShapeDtypeStruct((B, EMB), jnp.float32),
        grid_spec=grid_spec,
        compiler_params=pltpu.CompilerParams(
            dimension_semantics=("arbitrary",),
            # Actual live set is <10 MiB (4 MiB intermediate + weights/buffers);
            # keep a little headroom instead of reserving the 32 MiB default.
            vmem_limit_bytes=16 * 1024 * 1024,
        ),
        cost_estimate=pl.CostEstimate(
            flops=flops, transcendentals=EMB, bytes_accessed=bytes_accessed),
    )(x_flat, w_stem_bf, b_stem, w_fc_bf, b_f if (b_f := b_fc) is not None else b_fc,
      gamma, beta)


# ----------------------------------------------------------------------------
# Pure-JAX reference (same synthetic backbone, same bf16 operand storage)
# ----------------------------------------------------------------------------
def reference_forward(images, w_stem, b_stem, w_fc, b_fc, gamma, beta):
    B = images.shape[0]
    x = jnp.transpose(images, (0, 2, 3, 1)).reshape(B * SPATIAL, IN_CH).astype(jnp.bfloat16)
    ws = w_stem.astype(jnp.bfloat16)
    s = jnp.dot(x, ws, preferred_element_type=jnp.float32)
    s = jnp.maximum(s + b_stem, 0.0)
    feats = jnp.mean(s.reshape(B, SPATIAL, FEAT), axis=1)
    wf = w_fc.astype(jnp.bfloat16).astype(jnp.float32)   # match kernel's bf16 storage
    z = jnp.dot(feats, wf, preferred_element_type=jnp.float32) + b_fc
    mu = jnp.mean(z, axis=0, keepdims=True)
    var = jnp.mean((z - mu) ** 2, axis=0, keepdims=True)
    return (z - mu) * jax.lax.rsqrt(var + BN_EPS) * gamma + beta


# ----------------------------------------------------------------------------
# Deterministic parameter initialization (synthetic, no checkpoint load)
# ----------------------------------------------------------------------------
def init_params(key):
    k0, k1, k2, k3 = jax.random.split(key, 4)
    w_stem = jax.random.normal(k0, (IN_CH, FEAT), jnp.float32) * 0.05   # frozen backbone
    b_stem = jax.random.normal(k1, (1, FEAT), jnp.float32) * 0.01
    w_fc   = jax.random.normal(k2, (FEAT, EMB), jnp.float32) * (1.0 / FEAT) ** 0.5
    b_fc   = jax.random.normal(k3, (1, EMB), jnp.float32) * 0.01
    gamma  = jnp.ones((1, EMB), jnp.float32)    # BatchNorm1d default weight
    beta   = jnp.zeros((1, EMB), jnp.float32)   # BatchNorm1d default bias
    return w_stem, b_stem, w_fc, b_fc, gamma, beta


if __name__ == "__main__":
    key = jax.random.PRNGKey(0)
    k_img, k_par = jax.random.split(key)
    images = jax.random.normal(k_img, (BATCH, IN_CH, H, W), jnp.float32)  # NCHW
    params = init_params(k_par)

    out = cnn_model_forward(images, *params)
    out = jax.block_until_ready(out)

    assert out.shape == (BATCH, EMB), out.shape
    assert out.dtype == jnp.float32
    assert bool(jnp.all(jnp.isfinite(out)))

    ref = reference_forward(images, *params)
    assert bool(jnp.allclose(out, ref, rtol=1e-3, atol=1e-3)), \
        float(jnp.max(jnp.abs(out - ref)))

    print("KERNEL_OK")
</pallas_src>

<mosaic_0001>
module attributes {stable_mosaic.version = 11 : i64} {
  func.func @cnn_model_kernel(%arg0: i32, %arg1: memref<512x3xbf16, #tpu.memory_space<vmem>>, %arg2: memref<3x2048xbf16, #tpu.memory_space<vmem>>, %arg3: memref<1x2048xf32, #tpu.memory_space<vmem>>, %arg4: memref<2048x32xbf16, #tpu.memory_space<vmem>>, %arg5: memref<1x32xf32, #tpu.memory_space<vmem>>, %arg6: memref<1x32xf32, #tpu.memory_space<vmem>>, %arg7: memref<1x32xf32, #tpu.memory_space<vmem>>, %arg8: memref<2x32xf32, #tpu.memory_space<vmem>>) attributes {dimension_semantics = [#tpu.dimension_semantics<arbitrary>], iteration_bounds = array<i64: 1>, scalar_prefetch = 0 : i64, scratch_operands = 0 : i64, tpu.core_type = #tpu.core_type<tc>, window_params = [{pipeline_mode = #tpu.pipeline_mode<synchronous>, transform_indices = @transform_0, window_bounds = array<i64: 512, 3>}, {pipeline_mode = #tpu.pipeline_mode<synchronous>, transform_indices = @transform_1, window_bounds = array<i64: 3, 2048>}, {pipeline_mode = #tpu.pipeline_mode<synchronous>, transform_indices = @transform_2, window_bounds = array<i64: 1, 2048>}, {pipeline_mode = #tpu.pipeline_mode<synchronous>, transform_indices = @transform_3, window_bounds = array<i64: 2048, 32>}, {pipeline_mode = #tpu.pipeline_mode<synchronous>, transform_indices = @transform_4, window_bounds = array<i64: 1, 32>}, {pipeline_mode = #tpu.pipeline_mode<synchronous>, transform_indices = @transform_5, window_bounds = array<i64: 1, 32>}, {pipeline_mode = #tpu.pipeline_mode<synchronous>, transform_indices = @transform_6, window_bounds = array<i64: 1, 32>}, {pipeline_mode = #tpu.pipeline_mode<synchronous>, transform_indices = @transform_7, window_bounds = array<i64: 2, 32>}]} {
    %c0 = arith.constant 0 : index
    %c0_0 = arith.constant 0 : index
    %0 = vector.load %arg1[%c0, %c0_0] : memref<512x3xbf16, #tpu.memory_space<vmem>>, vector<512x3xbf16>
    %c0_1 = arith.constant 0 : index
    %c0_2 = arith.constant 0 : index
    %1 = vector.load %arg2[%c0_1, %c0_2] : memref<3x2048xbf16, #tpu.memory_space<vmem>>, vector<3x2048xbf16>
    %cst = arith.constant dense<0.000000e+00> : vector<512x2048xf32>
    %2 = tpu.matmul %0, %1, %cst {dimension_numbers = #tpu.dot_dimension_numbers<[1], [0], [0], [1], [0, 0, 1, 1], [], []>} : vector<512x3xbf16>, vector<3x2048xbf16>, vector<512x2048xf32> -> vector<512x2048xf32>
    %c0_3 = arith.constant 0 : index
    %c0_4 = arith.constant 0 : index
    %3 = vector.load %arg3[%c0_3, %c0_4] : memref<1x2048xf32, #tpu.memory_space<vmem>>, vector<1x2048xf32>
    %4 = vector.broadcast %3 : vector<1x2048xf32> to vector<512x2048xf32>
    %5 = arith.addf %2, %4 : vector<512x2048xf32>
    %cst_5 = arith.constant 0.000000e+00 : f32
    %6 = vector.broadcast %cst_5 : f32 to vector<512x2048xf32>
    %7 = arith.maximumf %5, %6 : vector<512x2048xf32>
    %8 = vector.shape_cast %7 : vector<512x2048xf32> to vector<2x256x2048xf32>
    %cst_6 = arith.constant dense<0.000000e+00> : vector<2x2048xf32>
    %9 = vector.multi_reduction <add>, %8, %cst_6 [1] : vector<2x256x2048xf32> to vector<2x2048xf32>
    %cst_7 = arith.constant 2.560000e+02 : f32
    %10 = vector.broadcast %cst_7 : f32 to vector<2x2048xf32>
    %11 = arith.divf %9, %10 : vector<2x2048xf32>
    %c0_8 = arith.constant 0 : index
    %c0_9 = arith.constant 0 : index
    %12 = vector.load %arg4[%c0_8, %c0_9] : memref<2048x32xbf16, #tpu.memory_space<vmem>>, vector<2048x32xbf16>
    %13 = arith.extf %12 : vector<2048x32xbf16> to vector<2048x32xf32>
    %cst_10 = arith.constant dense<0.000000e+00> : vector<2x32xf32>
    %14 = tpu.matmul %11, %13, %cst_10 {dimension_numbers = #tpu.dot_dimension_numbers<[1], [0], [0], [1], [0, 0, 1, 1], [], []>} : vector<2x2048xf32>, vector<2048x32xf32>, vector<2x32xf32> -> vector<2x32xf32>
    %c0_11 = arith.constant 0 : index
    %c0_12 = arith.constant 0 : index
    %15 = vector.load %arg5[%c0_11, %c0_12] : memref<1x32xf32, #tpu.memory_space<vmem>>, vector<1x32xf32>
    %16 = vector.broadcast %15 : vector<1x32xf32> to vector<2x32xf32>
    %17 = arith.addf %14, %16 : vector<2x32xf32>
    %cst_13 = arith.constant dense<0.000000e+00> : vector<32xf32>
    %18 = vector.multi_reduction <add>, %17, %cst_13 [0] : vector<2x32xf32> to vector<32xf32>
    %19 = vector.shape_cast %18 : vector<32xf32> to vector<1x32xf32>
    %cst_14 = arith.constant 2.000000e+00 : f32
    %20 = vector.broadcast %cst_14 : f32 to vector<1x32xf32>
    %21 = arith.divf %19, %20 : vector<1x32xf32>
    %22 = vector.broadcast %21 : vector<1x32xf32> to vector<2x32xf32>
    %23 = arith.subf %17, %22 : vector<2x32xf32>
    %24 = arith.mulf %23, %23 : vector<2x32xf32>
    %cst_15 = arith.constant dense<0.000000e+00> : vector<32xf32>
    %25 = vector.multi_reduction <add>, %24, %cst_15 [0] : vector<2x32xf32> to vector<32xf32>
    %26 = vector.shape_cast %25 : vector<32xf32> to vector<1x32xf32>
    %cst_16 = arith.constant 2.000000e+00 : f32
    %27 = vector.broadcast %cst_16 : f32 to vector<1x32xf32>
    %28 = arith.divf %26, %27 : vector<1x32xf32>
    %29 = vector.broadcast %21 : vector<1x32xf32> to vector<2x32xf32>
    %30 = arith.subf %17, %29 : vector<2x32xf32>
    %cst_17 = arith.constant 9.99999974E-6 : f32
    %31 = vector.broadcast %cst_17 : f32 to vector<1x32xf32>
    %32 = arith.addf %28, %31 : vector<1x32xf32>
    %33 = math.rsqrt %32 : vector<1x32xf32>
    %34 = vector.broadcast %33 : vector<1x32xf32> to vector<2x32xf32>
    %35 = arith.mulf %30, %34 : vector<2x32xf32>
    %c0_18 = arith.constant 0 : index
    %c0_19 = arith.constant 0 : index
    %36 = vector.load %arg6[%c0_18, %c0_19] : memref<1x32xf32, #tpu.memory_space<vmem>>, vector<1x32xf32>
    %37 = vector.broadcast %36 : vector<1x32xf32> to vector<2x32xf32>
    %38 = arith.mulf %35, %37 : vector<2x32xf32>
    %c0_20 = arith.constant 0 : index
    %c0_21 = arith.constant 0 : index
    %39 = vector.load %arg7[%c0_20, %c0_21] : memref<1x32xf32, #tpu.memory_space<vmem>>, vector<1x32xf32>
    %40 = vector.broadcast %39 : vector<1x32xf32> to vector<2x32xf32>
    %41 = arith.addf %38, %40 : vector<2x32xf32>
    %c0_22 = arith.constant 0 : index
    %c0_23 = arith.constant 0 : index
    %42 = vector.load %arg8[%c0_22, %c0_23] : memref<2x32xf32, #tpu.memory_space<vmem>>, vector<2x32xf32>
    tpu.vector_store %arg8[%c0_22, %c0_23], %41 {strides = array<i32>} : memref<2x32xf32, #tpu.memory_space<vmem>>, vector<2x32xf32>,
    return
  }
  func.func @transform_0(%arg0: i32) -> (i32, i32) {
    %c0_i32 = arith.constant 0 : i32
    %c0_i32_0 = arith.constant 0 : i32
    %c0_i32_1 = arith.constant 0 : i32
    return %c0_i32, %c0_i32_0 : i32, i32
  }
  func.func @transform_1(%arg0: i32) -> (i32, i32) {
    %c0_i32 = arith.constant 0 : i32
    %c0_i32_0 = arith.constant 0 : i32
    %c0_i32_1 = arith.constant 0 : i32
    return %c0_i32, %c0_i32_0 : i32, i32
  }
  func.func @transform_2(%arg0: i32) -> (i32, i32) {
    %c0_i32 = arith.constant 0 : i32
    %c0_i32_0 = arith.constant 0 : i32
    %c0_i32_1 = arith.constant 0 : i32
    return %c0_i32, %c0_i32_0 : i32, i32
  }
  func.func @transform_3(%arg0: i32) -> (i32, i32) {
    %c0_i32 = arith.constant 0 : i32
    %c0_i32_0 = arith.constant 0 : i32
    %c0_i32_1 = arith.constant 0 : i32
    return %c0_i32, %c0_i32_0 : i32, i32
  }
  func.func @transform_4(%arg0: i32) -> (i32, i32) {
    %c0_i32 = arith.constant 0 : i32
    %c0_i32_0 = arith.constant 0 : i32
    %c0_i32_1 = arith.constant 0 : i32
    return %c0_i32, %c0_i32_0 : i32, i32
  }
  func.func @transform_5(%arg0: i32) -> (i32, i32) {
    %c0_i32 = arith.constant 0 : i32
    %c0_i32_0 = arith.constant 0 : i32
    %c0_i32_1 = arith.constant 0 : i32
    return %c0_i32, %c0_i32_0 : i32, i32
  }
  func.func @transform_6(%arg0: i32) -> (i32, i32) {
    %c0_i32 = arith.constant 0 : i32
    %c0_i32_0 = arith.constant 0 : i32
    %c0_i32_1 = arith.constant 0 : i32
    return %c0_i32, %c0_i32_0 : i32, i32
  }
  func.func @transform_7(%arg0: i32) -> (i32, i32) {
    %c0_i32 = arith.constant 0 : i32
    %c0_i32_0 = arith.constant 0 : i32
    %c0_i32_1 = arith.constant 0 : i32
    return %c0_i32, %c0_i32_0 : i32, i32
  }
}

</mosaic_0001>

<bundles_post_ra>
// kernel: tpu_custom_call.1
= control target key start
LH: loop header
LB: loop body
LE: loop exit
PB: predicated region body
PF: predicated region fallthrough
CT: control target
= control target key end

     0   :  { %v100_v0 = vlaneseq  ;;  %v8449_v1 = vmov 1983009808   ;;  %v8450_v3 = vmov 0   ;;  %vm509_vm0 = vcmask 1040384   ;;  %s11233_s0 = inlined_call_operand.vmem [shape: bf16[512,3], index: 0, kind: input, shape index: {}]   ;;  %s11234_s1 = inlined_call_operand.vmem [shape: bf16[3,2048], index: 1, kind: input, shape index: {}]   ;;  %s11235_s2 = inlined_call_operand.vmem [shape: f32[1,2048], index: 2, kind: input, shape index: {}]   ;;  %s11236_s3 = inlined_call_operand.vmem [shape: bf16[2048,32], index: 3, kind: input, shape index: {}]   ;;  %s11237_s4 = inlined_call_operand.vmem [shape: f32[1,32], index: 4, kind: input, shape index: {}]   ;;  %s11238_s5 = inlined_call_operand.vmem [shape: f32[1,32], index: 5, kind: input, shape index: {}]   ;;  %s11239_s6 = inlined_call_operand.vmem [shape: f32[1,32], index: 6, kind: input, shape index: {}]   ;;  %s11240_s7 = inlined_call_operand.hbm [shape: f32[2,32], index: 7, kind: output, shape index: {}]  }
   0x1   :  { %v346_v2 = vunpack.c.l.s4 %v8449_v1  ;;  %593 = vmatprep.mubr.bf16.mxu0 %v8450_v3  ;;  %946 = vmatprep.mubr.bf16.mxu1 %v8450_v3  ;;  %v92_v5 = vld [vmem:[%s11234_s1] sm:$0xff]  ;;  %v93_v6 = vld [vmem:[%s11234_s1 + $0x8] sm:$0xff]  ;;  %vm510_vm1 = vcmask 1041408   ;;  %v8451_v13 = vmov 65535   ;;  %vm412_vm2 = vcmask 23552  }
   0x2   :  { %v8495_v4 = vshrl.u32 %v100_v0, 7  ;;  %v97_v7 = vld [vmem:[%s11235_s2 + $0x8] sm:$0xff]  ;;  %v511_v14 = vsel %vm509_vm0, 4294967295, %v8451_v13  ;;  %v344_v15 = vcombine.high %v92_v5, %v92_v5  ;;  %v361_v16 = vcombine.high %v93_v6, %v93_v6  ;;  %v8544_v37 = vld [vmem:[%s11233_s0] sm:$0xff]  }
   0x3   :  { %v347_v10 = vunpack.c.0.s8 %v346_v2  ;;  %v8529_v22 = vsel %vm510_vm1, %v511_v14, 0  ;;  %v8557_v40 = vld [vmem:[%s11233_s0 + $0x8] sm:$0xff]  }
   0x4   :  { %v118_v8 = vsub.s32 4, %v8495_v4  ;;  %v122_v9 = vsub.s32 5, %v8495_v4  ;;  %v126_v11 = vsub.s32 6, %v8495_v4  ;;  %v130_v12 = vsub.s32 7, %v8495_v4 }
   0x5   :  { %v8527_v21 = vsub.s32 %v347_v10, %v8495_v4 }
   0x6   :  { %v8512_v17 = vrot.slane %v97_v7, %v118_v8  ;;  %v8516_v18 = vrot.slane %v97_v7, %v122_v9  ;;  %v8520_v19 = vrot.slane %v97_v7, %v126_v11  ;;  %v8524_v20 = vrot.slane %v97_v7, %v130_v12 }
   0x7   :  { %v351_v23 = vrot.slane %v92_v5, %v8527_v21  ;;  %v358_v24 = vrot.slane %v344_v15, %v8527_v21  ;;  %v368_v25 = vrot.slane %v93_v6, %v8527_v21  ;;  %v375_v26 = vrot.slane %v361_v16, %v8527_v21 }
   0x9   :  { %v359_v27 = vcombine.high %v351_v23, %v351_v23  ;;  %v360_v28 = vcombine.high %v358_v24, %v358_v24  ;;  %v514_v29 = vand.u32 %v8529_v22, %v351_v23  ;;  %v520_v30 = vand.u32 %v8529_v22, %v358_v24 }
   0xa   :  { %v376_v31 = vcombine.high %v368_v25, %v368_v25  ;;  %v377_v32 = vcombine.high %v375_v26, %v375_v26  ;;  %v526_v38 = vand.u32 %v8529_v22, %v368_v25  ;;  %v532_v39 = vand.u32 %v8529_v22, %v375_v26 }
   0xb   :  { %v517_v33 = vand.u32 %v8529_v22, %v359_v27  ;;  %v523_v34 = vand.u32 %v8529_v22, %v360_v28 }
   0xc   :  { %v529_v35 = vand.u32 %v8529_v22, %v376_v31  ;;  %v535_v36 = vand.u32 %v8529_v22, %v377_v32 }
   0xd   :  { %561 = vmatprep.subr.bf16.mxu0 %v517_v33  ;;  %914 = vmatprep.subr.bf16.mxu1 %v523_v34 }
   0xe   :  { %562 = vmatpush1.bf16.msra.mxu0 %v514_v29  ;;  %915 = vmatpush1.bf16.msra.mxu1 %v520_v30 }
   0xf   :  { %1267 = vmatprep.subr.bf16.mxu0 %v529_v35  ;;  %1620 = vmatprep.subr.bf16.mxu1 %v535_v36 }
  0x11   :  { %6856 = vmatmul.mubr.msk.bf16.vlgmr.msra.gmra.mrb[0].mxu0 %vm412_vm2, %v8544_v37  ;;  %6888 = vmatmul.mubr.msk.bf16.vlgmr.msra.gmra.mrb[0].mxu1 %vm412_vm2, %v8544_v37 }
  0x12   :  { %1268 = vmatpush1.bf16.msra.mxu0 %v526_v38  ;;  %1621 = vmatpush1.bf16.msra.mxu1 %v532_v39 }
  0x13   :  { %603 = vmatprep.mubr.bf16.mxu0 %v8450_v3  ;;  %956 = vmatprep.mubr.bf16.mxu1 %v8450_v3 }
  0x19   :  { %6857 = vmatmul.mubr.msk.bf16.gmra.mrb[4].mxu0 %vm412_vm2, %v8557_v40  ;;  %6889 = vmatmul.mubr.msk.bf16.gmra.mrb[4].mxu1 %vm412_vm2, %v8557_v40 }
  0x1a   :  { %12 = vsyncpa [#allocation3], 0  ;;  %613 = vmatprep.mubr.bf16.mxu0 %v8450_v3  ;;  %966 = vmatprep.mubr.bf16.mxu1 %v8450_v3  ;;  %v8568_v41 = vld [vmem:[%s11233_s0 + $0x10] sm:$0xff]   ;;  %v8579_v42 = vld [vmem:[%s11233_s0 + $0x18] sm:$0xff]   ;;  %v102_v15 = vsub.s32 0, %v8495_v4  ;;  %v110_v16 = vsub.s32 2, %v8495_v4 }
  0x1b   :  { %v8590_v43 = vld [vmem:[%s11233_s0 + $0x20] sm:$0xff]   ;;  %v8301_v44 = vld [vmem:[%s11233_s0 + $0x28] sm:$0xff]   ;;  %v8302_v45 = vld [vmem:[%s11233_s0 + $0x30] sm:$0xff]   ;;  %v106_v25 = vsub.s32 1, %v8495_v4  ;;  %v114_v26 = vsub.s32 3, %v8495_v4  ;;  %vm6177_vm3 = vcmask 1041409  }
  0x1c   :  { %v8303_v46 = vld [vmem:[%s11233_s0 + $0x38] sm:$0xff]   ;;  %v8304_v47 = vld [vmem:[%s11233_s0 + $0x40] sm:$0xff]   ;;  %v8305_v48 = vld [vmem:[%s11233_s0 + $0x48] sm:$0xff]   ;;  %vm6770_vm4 = vcmask 254976   ;;  %s8452_s24 = smov [#allocation2]  }
  0x1d   :  { %v8306_v49 = vld [vmem:[%s11233_s0 + $0x50] sm:$0xff]   ;;  %v8307_v50 = vld [vmem:[%s11233_s0 + $0x58] sm:$0xff]   ;;  %v8308_v51 = vld [vmem:[%s11233_s0 + $0x60] sm:$0xff]   ;;  %s6816_s25 = sshll.u32 %s8452_s24, 4  ;;  %s6817_s25 = int_to_ptr.vmem [resolvable:$true] %s6816_s25 }
  0x1e   :  { %v8309_v52 = vld [vmem:[%s11233_s0 + $0x68] sm:$0xff]   ;;  %v8310_v53 = vld [vmem:[%s11233_s0 + $0x70] sm:$0xff]   ;;  %v8311_v54 = vld [vmem:[%s11233_s0 + $0x78] sm:$0xff]   ;;  %s8425_s26 = scalar_lea.vmem %s6817_s25, 32  ;;  %p8430_p1 = scmp.lt.s32.totalorder %s6817_s25, %s6817_s25 }
  0x1f   :  { %v8312_v55 = vld [vmem:[%s11233_s0 + $0x80] sm:$0xff]   ;;  %v94_v56 = vld [vmem:[%s11234_s1 + $0x10] sm:$0xff]  ;;  %v8313_v57 = vld [vmem:[%s11233_s0 + $0x88] sm:$0xff]   ;;  %p8426_p0 = scmp.ne.s32.totalorder %s6817_s25, %s8425_s26  ;;  %p8431_p2 = scmp.lt.s32.totalorder %s8425_s26, %s8425_s26 }
  0x20   :  { %v8689_v58 = vrot.slane %v94_v56, %v8527_v21  ;;  %v378_v59 = vcombine.high %v94_v56, %v94_v56  ;;  %v8314_v1 = vld [vmem:[%s11233_s0 + $0x90] sm:$0xff]   ;;  %v8315_v2 = vld [vmem:[%s11233_s0 + $0x98] sm:$0xff]   ;;  %v8316_v5 = vld [vmem:[%s11233_s0 + $0xa0] sm:$0xff]  }
  0x21   :  { %6858 = vmatmul.mubr.msk.bf16.gmra.mrb[8].mxu0 %vm412_vm2, %v8568_v41  ;;  %6890 = vmatmul.mubr.msk.bf16.gmra.mrb[8].mxu1 %vm412_vm2, %v8568_v41  ;;  %v8317_v6 = vld [vmem:[%s11233_s0 + $0xa8] sm:$0xff]   ;;  %v8318_v7 = vld [vmem:[%s11233_s0 + $0xb0] sm:$0xff]   ;;  %v8319_v10 = vld [vmem:[%s11233_s0 + $0xb8] sm:$0xff]   ;;  %p8432_p3 = por %p8431_p2, %p8430_p1 }
  0x22   :  { %623 = vmatprep.mubr.bf16.mxu0 %v8450_v3  ;;  %976 = vmatprep.mubr.bf16.mxu1 %v8450_v3  ;;  %v393_v60 = vcombine.high %v8689_v58, %v8689_v58  ;;  %v8694_v61 = vrot.slane %v378_v59, %v8527_v21  ;;  %v8320_v13 = vld [vmem:[%s11233_s0 + $0xc0] sm:$0xff]   ;;  %v8321_v14 = vld [vmem:[%s11233_s0 + $0xc8] sm:$0xff]   ;;  %v8322_v23 = vld [vmem:[%s11233_s0 + $0xd0] sm:$0xff]  }
  0x23   :  { %v96_v24 = vld [vmem:[%s11235_s2] sm:$0xff]  ;;  %v8323_v38 = vld [vmem:[%s11233_s0 + $0xd8] sm:$0xff]   ;;  %p8433_p4 = pnand %p8432_p3, %p8426_p0 }
  0x24   :  { %v541_v62 = vand.u32 %v8529_v22, %v393_v60  ;;  %v394_v63 = vcombine.high %v8694_v61, %v8694_v61  ;;  %v8772_v27 = vrot.slane %v96_v24, %v102_v15  ;;  %v8776_v28 = vrot.slane %v96_v24, %v110_v16 }
  0x25   :  { %v8782_v29 = vrot.slane %v96_v24, %v106_v25  ;;  %v8786_v30 = vrot.slane %v96_v24, %v114_v26 }
  0x26   :  { %1973 = vmatprep.subr.bf16.mxu0 %v541_v62  ;;  %v547_v0 = vand.u32 %v8529_v22, %v394_v63 }
  0x28   :  { %2326 = vmatprep.subr.bf16.mxu1 %v547_v0 }
  0x29   :  { %6859 = vmatmul.mubr.msk.bf16.gmra.mrb[12].mxu0 %vm412_vm2, %v8579_v42  ;;  %6891 = vmatmul.mubr.msk.bf16.gmra.mrb[12].mxu1 %vm412_vm2, %v8579_v42 }
  0x2a   :  { %633 = vmatprep.mubr.bf16.mxu0 %v8450_v3  ;;  %986 = vmatprep.mubr.bf16.mxu1 %v8450_v3 }
  0x31   :  { %6860 = vmatmul.mubr.msk.bf16.gmra.mrb[16].mxu0 %vm412_vm2, %v8590_v43  ;;  %6892 = vmatmul.mubr.msk.bf16.gmra.mrb[16].mxu1 %vm412_vm2, %v8590_v43 }
  0x32   :  { %643 = vmatprep.mubr.bf16.mxu0 %v8450_v3  ;;  %996 = vmatprep.mubr.bf16.mxu1 %v8450_v3 }
  0x39   :  { %6861 = vmatmul.mubr.msk.bf16.gmra.mrb[20].mxu0 %vm412_vm2, %v8301_v44  ;;  %6893 = vmatmul.mubr.msk.bf16.gmra.mrb[20].mxu1 %vm412_vm2, %v8301_v44 }
  0x3a   :  { %653 = vmatprep.mubr.bf16.mxu0 %v8450_v3  ;;  %1006 = vmatprep.mubr.bf16.mxu1 %v8450_v3 }
  0x41   :  { %6862 = vmatmul.mubr.msk.bf16.gmra.mrb[24].mxu0 %vm412_vm2, %v8302_v45  ;;  %6894 = vmatmul.mubr.msk.bf16.gmra.mrb[24].mxu1 %vm412_vm2, %v8302_v45 }
  0x42   :  { %663 = vmatprep.mubr.bf16.mxu0 %v8450_v3  ;;  %1016 = vmatprep.mubr.bf16.mxu1 %v8450_v3 }
  0x49   :  { %6863 = vmatmul.mubr.msk.bf16.gmra.mrb[28].mxu0 %vm412_vm2, %v8303_v46  ;;  %6895 = vmatmul.mubr.msk.bf16.gmra.mrb[28].mxu1 %vm412_vm2, %v8303_v46 }
  0x4a   :  { %673 = vmatprep.mubr.bf16.mxu0 %v8450_v3  ;;  %1026 = vmatprep.mubr.bf16.mxu1 %v8450_v3 }
  0x51   :  { %6864 = vmatmul.mubr.msk.bf16.gmra.mrb[32].mxu0 %vm412_vm2, %v8304_v47  ;;  %6896 = vmatmul.mubr.msk.bf16.gmra.mrb[32].mxu1 %vm412_vm2, %v8304_v47 }
  0x52   :  { %683 = vmatprep.mubr.bf16.mxu0 %v8450_v3  ;;  %1036 = vmatprep.mubr.bf16.mxu1 %v8450_v3 }
  0x59   :  { %6865 = vmatmul.mubr.msk.bf16.gmra.mrb[36].mxu0 %vm412_vm2, %v8305_v48  ;;  %6897 = vmatmul.mubr.msk.bf16.gmra.mrb[36].mxu1 %vm412_vm2, %v8305_v48 }
  0x5a   :  { %693 = vmatprep.mubr.bf16.mxu0 %v8450_v3  ;;  %1046 = vmatprep.mubr.bf16.mxu1 %v8450_v3 }
  0x61   :  { %6866 = vmatmul.mubr.msk.bf16.gmra.mrb[40].mxu0 %vm412_vm2, %v8306_v49  ;;  %6898 = vmatmul.mubr.msk.bf16.gmra.mrb[40].mxu1 %vm412_vm2, %v8306_v49 }
  0x62   :  { %703 = vmatprep.mubr.bf16.mxu0 %v8450_v3  ;;  %1056 = vmatprep.mubr.bf16.mxu1 %v8450_v3 }
  0x69   :  { %6867 = vmatmul.mubr.msk.bf16.gmra.mrb[44].mxu0 %vm412_vm2, %v8307_v50  ;;  %6899 = vmatmul.mubr.msk.bf16.gmra.mrb[44].mxu1 %vm412_vm2, %v8307_v50 }
  0x6a   :  { %713 = vmatprep.mubr.bf16.mxu0 %v8450_v3  ;;  %1066 = vmatprep.mubr.bf16.mxu1 %v8450_v3 }
  0x71   :  { %6868 = vmatmul.mubr.msk.bf16.gmra.mrb[48].mxu0 %vm412_vm2, %v8308_v51  ;;  %6900 = vmatmul.mubr.msk.bf16.gmra.mrb[48].mxu1 %vm412_vm2, %v8308_v51 }
  0x72   :  { %723 = vmatprep.mubr.bf16.mxu0 %v8450_v3  ;;  %1076 = vmatprep.mubr.bf16.mxu1 %v8450_v3 }
  0x79   :  { %6869 = vmatmul.mubr.msk.bf16.gmra.mrb[52].mxu0 %vm412_vm2, %v8309_v52  ;;  %6901 = vmatmul.mubr.msk.bf16.gmra.mrb[52].mxu1 %vm412_vm2, %v8309_v52 }
  0x7a   :  { %733 = vmatprep.mubr.bf16.mxu0 %v8450_v3  ;;  %1086 = vmatprep.mubr.bf16.mxu1 %v8450_v3 }
  0x81   :  { %6870 = vmatmul.mubr.msk.bf16.gmra.mrb[56].mxu0 %vm412_vm2, %v8310_v53  ;;  %6902 = vmatmul.mubr.msk.bf16.gmra.mrb[56].mxu1 %vm412_vm2, %v8310_v53 }
  0x82   :  { %743 = vmatprep.mubr.bf16.mxu0 %v8450_v3  ;;  %1096 = vmatprep.mubr.bf16.mxu1 %v8450_v3 }
  0x89   :  { %6871 = vmatmul.mubr.msk.bf16.gmra.mrb[60].mxu0 %vm412_vm2, %v8311_v54  ;;  %6903 = vmatmul.mubr.msk.bf16.gmra.mrb[60].mxu1 %vm412_vm2, %v8311_v54 }
  0x8a   :  { %753 = vmatprep.mubr.bf16.mxu0 %v8450_v3  ;;  %1106 = vmatprep.mubr.bf16.mxu1 %v8450_v3 }
  0x91   :  { %6872 = vmatmul.mubr.msk.bf16.gmra.mrb[64].mxu0 %vm412_vm2, %v8312_v55  ;;  %6904 = vmatmul.mubr.msk.bf16.gmra.mrb[64].mxu1 %vm412_vm2, %v8312_v55 }
  0x92   :  { %763 = vmatprep.mubr.bf16.mxu0 %v8450_v3  ;;  %1116 = vmatprep.mubr.bf16.mxu1 %v8450_v3 }
  0x99   :  { %6873 = vmatmul.mubr.msk.bf16.gmra.mrb[68].mxu0 %vm412_vm2, %v8313_v57  ;;  %6905 = vmatmul.mubr.msk.bf16.gmra.mrb[68].mxu1 %vm412_vm2, %v8313_v57 }
  0x9a   :  { %773 = vmatprep.mubr.bf16.mxu0 %v8450_v3  ;;  %1126 = vmatprep.mubr.bf16.mxu1 %v8450_v3 }
  0xa1   :  { %6874 = vmatmul.mubr.msk.bf16.gmra.mrb[72].mxu0 %vm412_vm2, %v8314_v1  ;;  %6906 = vmatmul.mubr.msk.bf16.gmra.mrb[72].mxu1 %vm412_vm2, %v8314_v1 }
  0xa2   :  { %783 = vmatprep.mubr.bf16.mxu0 %v8450_v3  ;;  %1136 = vmatprep.mubr.bf16.mxu1 %v8450_v3 }
  0xa9   :  { %6875 = vmatmul.mubr.msk.bf16.gmra.mrb[76].mxu0 %vm412_vm2, %v8315_v2  ;;  %6907 = vmatmul.mubr.msk.bf16.gmra.mrb[76].mxu1 %vm412_vm2, %v8315_v2 }
  0xaa   :  { %793 = vmatprep.mubr.bf16.mxu0 %v8450_v3  ;;  %1146 = vmatprep.mubr.bf16.mxu1 %v8450_v3 }
  0xb1   :  { %6876 = vmatmul.mubr.msk.bf16.gmra.mrb[80].mxu0 %vm412_vm2, %v8316_v5  ;;  %6908 = vmatmul.mubr.msk.bf16.gmra.mrb[80].mxu1 %vm412_vm2, %v8316_v5 }
  0xb2   :  { %803 = vmatprep.mubr.bf16.mxu0 %v8450_v3  ;;  %1156 = vmatprep.mubr.bf16.mxu1 %v8450_v3 }
  0xb9   :  { %6877 = vmatmul.mubr.msk.bf16.gmra.mrb[84].mxu0 %vm412_vm2, %v8317_v6  ;;  %6909 = vmatmul.mubr.msk.bf16.gmra.mrb[84].mxu1 %vm412_vm2, %v8317_v6 }
  0xba   :  { %813 = vmatprep.mubr.bf16.mxu0 %v8450_v3  ;;  %1166 = vmatprep.mubr.bf16.mxu1 %v8450_v3 }
  0xc1   :  { %6878 = vmatmul.mubr.msk.bf16.gmra.mrb[88].mxu0 %vm412_vm2, %v8318_v7  ;;  %6910 = vmatmul.mubr.msk.bf16.gmra.mrb[88].mxu1 %vm412_vm2, %v8318_v7 }
  0xc2   :  { %823 = vmatprep.mubr.bf16.mxu0 %v8450_v3  ;;  %1176 = vmatprep.mubr.bf16.mxu1 %v8450_v3 }
  0xc9   :  { %6879 = vmatmul.mubr.msk.bf16.gmra.mrb[92].mxu0 %vm412_vm2, %v8319_v10  ;;  %6911 = vmatmul.mubr.msk.bf16.gmra.mrb[92].mxu1 %vm412_vm2, %v8319_v10 }
  0xca   :  { %833 = vmatprep.mubr.bf16.mxu0 %v8450_v3  ;;  %1186 = vmatprep.mubr.bf16.mxu1 %v8450_v3 }
  0xd1   :  { %6880 = vmatmul.mubr.msk.bf16.gmra.mrb[96].mxu0 %vm412_vm2, %v8320_v13  ;;  %6912 = vmatmul.mubr.msk.bf16.gmra.mrb[96].mxu1 %vm412_vm2, %v8320_v13 }
  0xd2   :  { %843 = vmatprep.mubr.bf16.mxu0 %v8450_v3  ;;  %1196 = vmatprep.mubr.bf16.mxu1 %v8450_v3 }
  0xd9   :  { %6881 = vmatmul.mubr.msk.bf16.gmra.mrb[100].mxu0 %vm412_vm2, %v8321_v14  ;;  %6913 = vmatmul.mubr.msk.bf16.gmra.mrb[100].mxu1 %vm412_vm2, %v8321_v14 }
  0xda   :  { %853 = vmatprep.mubr.bf16.mxu0 %v8450_v3  ;;  %1206 = vmatprep.mubr.bf16.mxu1 %v8450_v3 }
  0xe1   :  { %6882 = vmatmul.mubr.msk.bf16.gmra.mrb[104].mxu0 %vm412_vm2, %v8322_v23  ;;  %6914 = vmatmul.mubr.msk.bf16.gmra.mrb[104].mxu1 %vm412_vm2, %v8322_v23  ;;  %v8324_v23 = vld [vmem:[%s11233_s0 + $0xe0] sm:$0xff]  }
  0xe2   :  { %863 = vmatprep.mubr.bf16.mxu0 %v8450_v3  ;;  %1216 = vmatprep.mubr.bf16.mxu1 %v8450_v3 }
  0xe4   :  { %v595_v31 = vpop.f32.mrb[0].mxu0  ;;  %v948_v32 = vpop.f32.mrb[0].mxu1 }
  0xe5   :  { %v596_v33 = vadd.f32 %v595_v31, %v8772_v27  ;;  %v949_v34 = vadd.f32 %v948_v32, %v8776_v28  ;;  %v597_v35 = vpop.f32.mrb[1].mxu0  ;;  %v950_v36 = vpop.f32.mrb[1].mxu1 }
  0xe6   :  { %v598_v39 = vadd.f32 %v597_v35, %v8782_v29  ;;  %v951_v44 = vadd.f32 %v950_v36, %v8786_v30  ;;  %v599_v45 = vpop.f32.mrb[2].mxu0  ;;  %v952_v46 = vpop.f32.mrb[2].mxu1 }
  0xe7   :  { %v3387_v47 = vmax.f32 %v949_v34, 0.0  ;;  %v600_v48 = vadd.f32 %v599_v45, %v8772_v27  ;;  %v953_v49 = vadd.f32 %v952_v46, %v8776_v28  ;;  %v601_v50 = vpop.f32.mrb[3].mxu0  ;;  %v954_v51 = vpop.f32.mrb[3].mxu1  ;;  %v3385_v55 = vmax.f32 %v596_v33, 0.0 }
  0xe8   :  { %v3388_v52 = vmax.f32 %v951_v44, 0.0  ;;  %v602_v53 = vadd.f32 %v601_v50, %v8782_v29  ;;  %v955_v54 = vadd.f32 %v954_v51, %v8786_v30  ;;  %v3386_v59 = vmax.f32 %v598_v39, 0.0 }
  0xe9   :  { %v3401_v56 = vmax.f32 %v600_v48, 0.0  ;;  %v3403_v57 = vmax.f32 %v953_v49, 0.0  ;;  %6883 = vmatmul.mubr.msk.bf16.gmra.mrb[108].mxu0 %vm412_vm2, %v8323_v38  ;;  %6915 = vmatmul.mubr.msk.bf16.gmra.mrb[108].mxu1 %vm412_vm2, %v8323_v38 }
  0xea   :  { %v3402_v60 = vmax.f32 %v602_v53, 0.0  ;;  %v3404_v62 = vmax.f32 %v955_v54, 0.0  ;;  %873 = vmatprep.mubr.bf16.mxu0 %v8450_v3  ;;  %1226 = vmatprep.mubr.bf16.mxu1 %v8450_v3 }
  0xeb   :  { %v4409_v63 = vadd.f32 %v3401_v56, %v3385_v55  ;;  %v4483_v0 = vadd.f32 %v3403_v57, %v3387_v47 }
  0xec   :  { %v4446_v1 = vadd.f32 %v3402_v60, %v3386_v59  ;;  %v4520_v2 = vadd.f32 %v3404_v62, %v3388_v52  ;;  %v605_v5 = vpop.f32.mrb[4].mxu0  ;;  %v958_v6 = vpop.f32.mrb[4].mxu1 }
  0xed   :  { %v606_v7 = vadd.f32 %v605_v5, %v8772_v27  ;;  %v959_v10 = vadd.f32 %v958_v6, %v8776_v28  ;;  %v607_v13 = vpop.f32.mrb[5].mxu0  ;;  %v960_v14 = vpop.f32.mrb[5].mxu1 }
  0xee   :  { %v608_v24 = vadd.f32 %v607_v13, %v8782_v29  ;;  %v961_v31 = vadd.f32 %v960_v14, %v8786_v30  ;;  %v609_v32 = vpop.f32.mrb[6].mxu0  ;;  %v962_v33 = vpop.f32.mrb[6].mxu1 }
  0xef   :  { %v3417_v34 = vmax.f32 %v606_v7, 0.0  ;;  %v3419_v35 = vmax.f32 %v959_v10, 0.0  ;;  %v610_v36 = vadd.f32 %v609_v32, %v8772_v27  ;;  %v963_v38 = vadd.f32 %v962_v33, %v8776_v28  ;;  %v611_v39 = vpop.f32.mrb[7].mxu0  ;;  %v964_v44 = vpop.f32.mrb[7].mxu1 }
  0xf0   :  { %v3418_v45 = vmax.f32 %v608_v24, 0.0  ;;  %v3420_v46 = vmax.f32 %v961_v31, 0.0  ;;  %v612_v47 = vadd.f32 %v611_v39, %v8782_v29  ;;  %v965_v48 = vadd.f32 %v964_v44, %v8786_v30 }
  0xf1   :  { %v4410_v49 = vadd.f32 %v4409_v63, %v3417_v34  ;;  %v4484_v50 = vadd.f32 %v4483_v0, %v3419_v35  ;;  %v3433_v51 = vmax.f32 %v610_v36, 0.0  ;;  %v3435_v52 = vmax.f32 %v963_v38, 0.0  ;;  %6884 = vmatmul.mubr.msk.bf16.gmra.mrb[112].mxu0 %vm412_vm2, %v8324_v23  ;;  %6916 = vmatmul.mubr.msk.bf16.gmra.mrb[112].mxu1 %vm412_vm2, %v8324_v23 }
  0xf2   :  { %v4447_v53 = vadd.f32 %v4446_v1, %v3418_v45  ;;  %v4521_v54 = vadd.f32 %v4520_v2, %v3420_v46  ;;  %v3434_v55 = vmax.f32 %v612_v47, 0.0  ;;  %v3436_v56 = vmax.f32 %v965_v48, 0.0  ;;  %883 = vmatprep.mubr.bf16.mxu0 %v8450_v3  ;;  %1236 = vmatprep.mubr.bf16.mxu1 %v8450_v3  ;;  %v8325_v1 = vld [vmem:[%s11233_s0 + $0xe8] sm:$0xff]  }
  0xf3   :  { %v4411_v57 = vadd.f32 %v4410_v49, %v3433_v51  ;;  %v4485_v59 = vadd.f32 %v4484_v50, %v3435_v52 }
  0xf4   :  { %v4448_v60 = vadd.f32 %v4447_v53, %v3434_v55  ;;  %v4522_v62 = vadd.f32 %v4521_v54, %v3436_v56  ;;  %v615_v63 = vpop.f32.mrb[8].mxu0  ;;  %v968_v0 = vpop.f32.mrb[8].mxu1 }
  0xf5   :  { %v616_v5 = vadd.f32 %v615_v63, %v8772_v27  ;;  %v969_v6 = vadd.f32 %v968_v0, %v8776_v28  ;;  %v617_v7 = vpop.f32.mrb[9].mxu0  ;;  %v970_v10 = vpop.f32.mrb[9].mxu1 }
  0xf6   :  { %v618_v2 = vadd.f32 %v617_v7, %v8782_v29  ;;  %v971_v13 = vadd.f32 %v970_v10, %v8786_v30  ;;  %v619_v14 = vpop.f32.mrb[10].mxu0  ;;  %v972_v23 = vpop.f32.mrb[10].mxu1 }
  0xf7   :  { %v3449_v24 = vmax.f32 %v616_v5, 0.0  ;;  %v3451_v31 = vmax.f32 %v969_v6, 0.0  ;;  %v620_v32 = vadd.f32 %v619_v14, %v8772_v27  ;;  %v973_v33 = vadd.f32 %v972_v23, %v8776_v28  ;;  %v621_v34 = vpop.f32.mrb[11].mxu0  ;;  %v974_v35 = vpop.f32.mrb[11].mxu1 }
  0xf8   :  { %v3450_v36 = vmax.f32 %v618_v2, 0.0  ;;  %v3452_v38 = vmax.f32 %v971_v13, 0.0  ;;  %v622_v39 = vadd.f32 %v621_v34, %v8782_v29  ;;  %v975_v44 = vadd.f32 %v974_v35, %v8786_v30 }
  0xf9   :  { %v4412_v45 = vadd.f32 %v4411_v57, %v3449_v24  ;;  %v4486_v46 = vadd.f32 %v4485_v59, %v3451_v31  ;;  %v3465_v47 = vmax.f32 %v620_v32, 0.0  ;;  %v3467_v48 = vmax.f32 %v973_v33, 0.0  ;;  %6885 = vmatmul.mubr.msk.bf16.gmra.mrb[116].mxu0 %vm412_vm2, %v8325_v1  ;;  %6917 = vmatmul.mubr.msk.bf16.gmra.mrb[116].mxu1 %vm412_vm2, %v8325_v1 }
  0xfa   :  { %v4449_v49 = vadd.f32 %v4448_v60, %v3450_v36  ;;  %v4523_v50 = vadd.f32 %v4522_v62, %v3452_v38  ;;  %v3466_v51 = vmax.f32 %v622_v39, 0.0  ;;  %v3468_v52 = vmax.f32 %v975_v44, 0.0  ;;  %893 = vmatprep.mubr.bf16.mxu0 %v8450_v3  ;;  %1246 = vmatprep.mubr.bf16.mxu1 %v8450_v3  ;;  %v8326_v60 = vld [vmem:[%s11233_s0 + $0xf0] sm:$0xff]  }
  0xfb   :  { %v4413_v53 = vadd.f32 %v4412_v45, %v3465_v47  ;;  %v4487_v54 = vadd.f32 %v4486_v46, %v3467_v48 }
  0xfc   :  { %v4450_v55 = vadd.f32 %v4449_v49, %v3466_v51  ;;  %v4524_v56 = vadd.f32 %v4523_v50, %v3468_v52  ;;  %v625_v57 = vpop.f32.mrb[12].mxu0  ;;  %v978_v59 = vpop.f32.mrb[12].mxu1 }
  0xfd   :  { %v626_v63 = vadd.f32 %v625_v57, %v8772_v27  ;;  %v979_v0 = vadd.f32 %v978_v59, %v8776_v28  ;;  %v627_v5 = vpop.f32.mrb[13].mxu0  ;;  %v980_v6 = vpop.f32.mrb[13].mxu1 }
  0xfe   :  { %v628_v62 = vadd.f32 %v627_v5, %v8782_v29  ;;  %v981_v7 = vadd.f32 %v980_v6, %v8786_v30  ;;  %v629_v10 = vpop.f32.mrb[14].mxu0  ;;  %v982_v1 = vpop.f32.mrb[14].mxu1 }
  0xff   :  { %v3481_v2 = vmax.f32 %v626_v63, 0.0  ;;  %v3483_v13 = vmax.f32 %v979_v0, 0.0  ;;  %v630_v14 = vadd.f32 %v629_v10, %v8772_v27  ;;  %v983_v23 = vadd.f32 %v982_v1, %v8776_v28  ;;  %v631_v24 = vpop.f32.mrb[15].mxu0  ;;  %v984_v31 = vpop.f32.mrb[15].mxu1 }
 0x100   :  { %v3482_v32 = vmax.f32 %v628_v62, 0.0  ;;  %v3484_v33 = vmax.f32 %v981_v7, 0.0  ;;  %v632_v34 = vadd.f32 %v631_v24, %v8782_v29  ;;  %v985_v35 = vadd.f32 %v984_v31, %v8786_v30 }
 0x101   :  { %v4414_v36 = vadd.f32 %v4413_v53, %v3481_v2  ;;  %v4488_v38 = vadd.f32 %v4487_v54, %v3483_v13  ;;  %v3497_v39 = vmax.f32 %v630_v14, 0.0  ;;  %v3499_v44 = vmax.f32 %v983_v23, 0.0  ;;  %6886 = vmatmul.mubr.msk.bf16.gmra.mrb[120].mxu0 %vm412_vm2, %v8326_v60  ;;  %6918 = vmatmul.mubr.msk.bf16.gmra.mrb[120].mxu1 %vm412_vm2, %v8326_v60 }
 0x102   :  { %v4451_v45 = vadd.f32 %v4450_v55, %v3482_v32  ;;  %v4525_v46 = vadd.f32 %v4524_v56, %v3484_v33  ;;  %v3498_v47 = vmax.f32 %v632_v34, 0.0  ;;  %v3500_v48 = vmax.f32 %v985_v35, 0.0  ;;  %903 = vmatprep.mubr.bf16.mxu0 %v8450_v3  ;;  %1256 = vmatprep.mubr.bf16.mxu1 %v8450_v3  ;;  %v8327_v55 = vld [vmem:[%s11233_s0 + $0xf8] sm:$0xff]  }
 0x103   :  { %v4415_v49 = vadd.f32 %v4414_v36, %v3497_v39  ;;  %v4489_v50 = vadd.f32 %v4488_v38, %v3499_v44 }
 0x104   :  { %v4452_v51 = vadd.f32 %v4451_v45, %v3498_v47  ;;  %v4526_v52 = vadd.f32 %v4525_v46, %v3500_v48  ;;  %v635_v53 = vpop.f32.mrb[16].mxu0  ;;  %v988_v54 = vpop.f32.mrb[16].mxu1 }
 0x105   :  { %v636_v57 = vadd.f32 %v635_v53, %v8772_v27  ;;  %v989_v59 = vadd.f32 %v988_v54, %v8776_v28  ;;  %v637_v63 = vpop.f32.mrb[17].mxu0  ;;  %v990_v0 = vpop.f32.mrb[17].mxu1 }
 0x106   :  { %v638_v56 = vadd.f32 %v637_v63, %v8782_v29  ;;  %v991_v5 = vadd.f32 %v990_v0, %v8786_v30  ;;  %v639_v6 = vpop.f32.mrb[18].mxu0  ;;  %v992_v60 = vpop.f32.mrb[18].mxu1 }
 0x107   :  { %v3513_v62 = vmax.f32 %v636_v57, 0.0  ;;  %v3515_v7 = vmax.f32 %v989_v59, 0.0  ;;  %v640_v10 = vadd.f32 %v639_v6, %v8772_v27  ;;  %v993_v1 = vadd.f32 %v992_v60, %v8776_v28  ;;  %v641_v2 = vpop.f32.mrb[19].mxu0  ;;  %v994_v13 = vpop.f32.mrb[19].mxu1 }
 0x108   :  { %v3514_v14 = vmax.f32 %v638_v56, 0.0  ;;  %v3516_v23 = vmax.f32 %v991_v5, 0.0  ;;  %v642_v24 = vadd.f32 %v641_v2, %v8782_v29  ;;  %v995_v31 = vadd.f32 %v994_v13, %v8786_v30 }
 0x109   :  { %v4416_v32 = vadd.f32 %v4415_v49, %v3513_v62  ;;  %v4490_v33 = vadd.f32 %v4489_v50, %v3515_v7  ;;  %v3529_v34 = vmax.f32 %v640_v10, 0.0  ;;  %v3531_v35 = vmax.f32 %v993_v1, 0.0  ;;  %6887 = vmatmul.mubr.msk.bf16.gmra.mrb[124].mxu0 %vm412_vm2, %v8327_v55  ;;  %6919 = vmatmul.mubr.msk.bf16.gmra.mrb[124].mxu1 %vm412_vm2, %v8327_v55 }
 0x10a   :  { %v4453_v36 = vadd.f32 %v4452_v51, %v3514_v14  ;;  %v4527_v38 = vadd.f32 %v4526_v52, %v3516_v23  ;;  %v3530_v39 = vmax.f32 %v642_v24, 0.0  ;;  %v3532_v44 = vmax.f32 %v995_v31, 0.0  ;;  %1299 = vmatprep.mubr.bf16.mxu0 %v8450_v3  ;;  %1652 = vmatprep.mubr.bf16.mxu1 %v8450_v3 }
 0x10b   :  { %v4417_v45 = vadd.f32 %v4416_v32, %v3529_v34  ;;  %v4491_v46 = vadd.f32 %v4490_v33, %v3531_v35  ;;  %v538_v55 = vand.u32 %v8529_v22, %v8689_v58  ;;  %v544_v56 = vand.u32 %v8529_v22, %v8694_v61 }
 0x10c   :  { %v4454_v47 = vadd.f32 %v4453_v36, %v3530_v39  ;;  %v4528_v48 = vadd.f32 %v4527_v38, %v3532_v44  ;;  %v645_v49 = vpop.f32.mrb[20].mxu0  ;;  %v998_v50 = vpop.f32.mrb[20].mxu1 }
 0x10d   :  { %v646_v53 = vadd.f32 %v645_v49, %v8772_v27  ;;  %v999_v54 = vadd.f32 %v998_v50, %v8776_v28  ;;  %v647_v57 = vpop.f32.mrb[21].mxu0  ;;  %v1000_v59 = vpop.f32.mrb[21].mxu1 }
 0x10e   :  { %v648_v51 = vadd.f32 %v647_v57, %v8782_v29  ;;  %v1001_v52 = vadd.f32 %v1000_v59, %v8786_v30  ;;  %v649_v63 = vpop.f32.mrb[22].mxu0  ;;  %v1002_v0 = vpop.f32.mrb[22].mxu1 }
 0x10f   :  { %v3545_v5 = vmax.f32 %v646_v53, 0.0  ;;  %v3547_v6 = vmax.f32 %v999_v54, 0.0  ;;  %v650_v60 = vadd.f32 %v649_v63, %v8772_v27  ;;  %v1003_v62 = vadd.f32 %v1002_v0, %v8776_v28  ;;  %v651_v7 = vpop.f32.mrb[23].mxu0  ;;  %v1004_v10 = vpop.f32.mrb[23].mxu1 }
 0x110   :  { %v3546_v1 = vmax.f32 %v648_v51, 0.0  ;;  %v3548_v2 = vmax.f32 %v1001_v52, 0.0  ;;  %v652_v13 = vadd.f32 %v651_v7, %v8782_v29  ;;  %v1005_v14 = vadd.f32 %v1004_v10, %v8786_v30 }
 0x111   :  { %v4418_v23 = vadd.f32 %v4417_v45, %v3545_v5  ;;  %v4492_v24 = vadd.f32 %v4491_v46, %v3547_v6  ;;  %v3561_v58 = vmax.f32 %v650_v60, 0.0  ;;  %v3563_v31 = vmax.f32 %v1003_v62, 0.0  ;;  %6920 = vmatmul.mubr.msk.bf16.vlgmr.msra.gmra.mrb[128].mxu0 %vm412_vm2, %v8544_v37  ;;  %6952 = vmatmul.mubr.msk.bf16.vlgmr.msra.gmra.mrb[128].mxu1 %vm412_vm2, %v8544_v37 }
 0x112   :  { %v4455_v61 = vadd.f32 %v4454_v47, %v3546_v1  ;;  %v4529_v32 = vadd.f32 %v4528_v48, %v3548_v2  ;;  %v3562_v33 = vmax.f32 %v652_v13, 0.0  ;;  %v3564_v34 = vmax.f32 %v1005_v14, 0.0  ;;  %1974 = vmatpush1.bf16.msra.mxu0 %v538_v55  ;;  %2327 = vmatpush1.bf16.msra.mxu1 %v544_v56 }
 0x113   :  { %v4419_v35 = vadd.f32 %v4418_v23, %v3561_v58  ;;  %v4493_v36 = vadd.f32 %v4492_v24, %v3563_v31  ;;  %1309 = vmatprep.mubr.bf16.mxu0 %v8450_v3  ;;  %1662 = vmatprep.mubr.bf16.mxu1 %v8450_v3 }
 0x114   :  { %v4456_v38 = vadd.f32 %v4455_v61, %v3562_v33  ;;  %v4530_v39 = vadd.f32 %v4529_v32, %v3564_v34  ;;  %v655_v44 = vpop.f32.mrb[24].mxu0  ;;  %v1008_v45 = vpop.f32.mrb[24].mxu1 }
 0x115   :  { %v656_v46 = vadd.f32 %v655_v44, %v8772_v27  ;;  %v1009_v37 = vadd.f32 %v1008_v45, %v8776_v28  ;;  %v657_v47 = vpop.f32.mrb[25].mxu0  ;;  %v1010_v48 = vpop.f32.mrb[25].mxu1 }
 0x116   :  { %v658_v49 = vadd.f32 %v657_v47, %v8782_v29  ;;  %v1011_v50 = vadd.f32 %v1010_v48, %v8786_v30  ;;  %v659_v53 = vpop.f32.mrb[26].mxu0  ;;  %v1012_v54 = vpop.f32.mrb[26].mxu1 }
 0x117   :  { %v3577_v57 = vmax.f32 %v656_v46, 0.0  ;;  %v3579_v59 = vmax.f32 %v1009_v37, 0.0  ;;  %v660_v51 = vadd.f32 %v659_v53, %v8772_v27  ;;  %v1013_v52 = vadd.f32 %v1012_v54, %v8776_v28  ;;  %v661_v63 = vpop.f32.mrb[27].mxu0  ;;  %v1014_v0 = vpop.f32.mrb[27].mxu1 }
 0x118   :  { %v3578_v55 = vmax.f32 %v658_v49, 0.0  ;;  %v3580_v56 = vmax.f32 %v1011_v50, 0.0  ;;  %v662_v5 = vadd.f32 %v661_v63, %v8782_v29  ;;  %v1015_v6 = vadd.f32 %v1014_v0, %v8786_v30 }
 0x119   :  { %v4420_v60 = vadd.f32 %v4419_v35, %v3577_v57  ;;  %v4494_v62 = vadd.f32 %v4493_v36, %v3579_v59  ;;  %v3593_v7 = vmax.f32 %v660_v51, 0.0  ;;  %v3595_v10 = vmax.f32 %v1013_v52, 0.0  ;;  %6921 = vmatmul.mubr.msk.bf16.gmra.mrb[132].mxu0 %vm412_vm2, %v8557_v40  ;;  %6953 = vmatmul.mubr.msk.bf16.gmra.mrb[132].mxu1 %vm412_vm2, %v8557_v40 }
 0x11a   :  { %v4457_v1 = vadd.f32 %v4456_v38, %v3578_v55  ;;  %v4531_v2 = vadd.f32 %v4530_v39, %v3580_v56  ;;  %v3594_v13 = vmax.f32 %v662_v5, 0.0  ;;  %v3596_v14 = vmax.f32 %v1015_v6, 0.0  ;;  %1319 = vmatprep.mubr.bf16.mxu0 %v8450_v3  ;;  %1672 = vmatprep.mubr.bf16.mxu1 %v8450_v3 }
 0x11b   :  { %v4421_v23 = vadd.f32 %v4420_v60, %v3593_v7  ;;  %v4495_v24 = vadd.f32 %v4494_v62, %v3595_v10 }
 0x11c   :  { %v4458_v58 = vadd.f32 %v4457_v1, %v3594_v13  ;;  %v4532_v31 = vadd.f32 %v4531_v2, %v3596_v14  ;;  %v665_v61 = vpop.f32.mrb[28].mxu0  ;;  %v1018_v32 = vpop.f32.mrb[28].mxu1 }
 0x11d   :  { %v666_v33 = vadd.f32 %v665_v61, %v8772_v27  ;;  %v1019_v34 = vadd.f32 %v1018_v32, %v8776_v28  ;;  %v667_v35 = vpop.f32.mrb[29].mxu0  ;;  %v1020_v40 = vpop.f32.mrb[29].mxu1 }
 0x11e   :  { %v668_v36 = vadd.f32 %v667_v35, %v8782_v29  ;;  %v1021_v38 = vadd.f32 %v1020_v40, %v8786_v30  ;;  %v669_v39 = vpop.f32.mrb[30].mxu0  ;;  %v1022_v44 = vpop.f32.mrb[30].mxu1 }
 0x11f   :  { %v3609_v45 = vmax.f32 %v666_v33, 0.0  ;;  %v3611_v46 = vmax.f32 %v1019_v34, 0.0  ;;  %v670_v37 = vadd.f32 %v669_v39, %v8772_v27  ;;  %v1023_v47 = vadd.f32 %v1022_v44, %v8776_v28  ;;  %v671_v48 = vpop.f32.mrb[31].mxu0  ;;  %v1024_v49 = vpop.f32.mrb[31].mxu1 }
 0x120   :  { %v3610_v50 = vmax.f32 %v668_v36, 0.0  ;;  %v3612_v53 = vmax.f32 %v1021_v38, 0.0  ;;  %v672_v54 = vadd.f32 %v671_v48, %v8782_v29  ;;  %v1025_v57 = vadd.f32 %v1024_v49, %v8786_v30 }
 0x121   :  { %v4422_v59 = vadd.f32 %v4421_v23, %v3609_v45  ;;  %v4496_v51 = vadd.f32 %v4495_v24, %v3611_v46  ;;  %v3625_v52 = vmax.f32 %v670_v37, 0.0  ;;  %v3627_v63 = vmax.f32 %v1023_v47, 0.0  ;;  %6922 = vmatmul.mubr.msk.bf16.gmra.mrb[136].mxu0 %vm412_vm2, %v8568_v41  ;;  %6954 = vmatmul.mubr.msk.bf16.gmra.mrb[136].mxu1 %vm412_vm2, %v8568_v41 }
 0x122   :  { %v4459_v0 = vadd.f32 %v4458_v58, %v3610_v50  ;;  %v4533_v55 = vadd.f32 %v4532_v31, %v3612_v53  ;;  %v3626_v56 = vmax.f32 %v672_v54, 0.0  ;;  %v3628_v5 = vmax.f32 %v1025_v57, 0.0  ;;  %1329 = vmatprep.mubr.bf16.mxu0 %v8450_v3  ;;  %1682 = vmatprep.mubr.bf16.mxu1 %v8450_v3 }
 0x123   :  { %v4423_v6 = vadd.f32 %v4422_v59, %v3625_v52  ;;  %v4497_v60 = vadd.f32 %v4496_v51, %v3627_v63 }
 0x124   :  { %v4460_v62 = vadd.f32 %v4459_v0, %v3626_v56  ;;  %v4534_v7 = vadd.f32 %v4533_v55, %v3628_v5  ;;  %v675_v10 = vpop.f32.mrb[32].mxu0  ;;  %v1028_v1 = vpop.f32.mrb[32].mxu1 }
 0x125   :  { %v676_v2 = vadd.f32 %v675_v10, %v8772_v27  ;;  %v1029_v13 = vadd.f32 %v1028_v1, %v8776_v28  ;;  %v677_v14 = vpop.f32.mrb[33].mxu0  ;;  %v1030_v41 = vpop.f32.mrb[33].mxu1 }
 0x126   :  { %v678_v23 = vadd.f32 %v677_v14, %v8782_v29  ;;  %v1031_v24 = vadd.f32 %v1030_v41, %v8786_v30  ;;  %v679_v58 = vpop.f32.mrb[34].mxu0  ;;  %v1032_v31 = vpop.f32.mrb[34].mxu1 }
 0x127   :  { %v3641_v61 = vmax.f32 %v676_v2, 0.0  ;;  %v3643_v32 = vmax.f32 %v1029_v13, 0.0  ;;  %v680_v33 = vadd.f32 %v679_v58, %v8772_v27  ;;  %v1033_v34 = vadd.f32 %v1032_v31, %v8776_v28  ;;  %v681_v35 = vpop.f32.mrb[35].mxu0  ;;  %v1034_v40 = vpop.f32.mrb[35].mxu1 }
 0x128   :  { %v3642_v36 = vmax.f32 %v678_v23, 0.0  ;;  %v3644_v38 = vmax.f32 %v1031_v24, 0.0  ;;  %v682_v39 = vadd.f32 %v681_v35, %v8782_v29  ;;  %v1035_v44 = vadd.f32 %v1034_v40, %v8786_v30 }
 0x129   :  { %v4424_v45 = vadd.f32 %v4423_v6, %v3641_v61  ;;  %v4498_v46 = vadd.f32 %v4497_v60, %v3643_v32  ;;  %v3657_v37 = vmax.f32 %v680_v33, 0.0  ;;  %v3659_v47 = vmax.f32 %v1033_v34, 0.0  ;;  %6923 = vmatmul.mubr.msk.bf16.gmra.mrb[140].mxu0 %vm412_vm2, %v8579_v42  ;;  %6955 = vmatmul.mubr.msk.bf16.gmra.mrb[140].mxu1 %vm412_vm2, %v8579_v42 }
 0x12a   :  { %v4461_v48 = vadd.f32 %v4460_v62, %v3642_v36  ;;  %v4535_v49 = vadd.f32 %v4534_v7, %v3644_v38  ;;  %v3658_v50 = vmax.f32 %v682_v39, 0.0  ;;  %v3660_v53 = vmax.f32 %v1035_v44, 0.0  ;;  %1339 = vmatprep.mubr.bf16.mxu0 %v8450_v3  ;;  %1692 = vmatprep.mubr.bf16.mxu1 %v8450_v3 }
 0x12b   :  { %v4425_v54 = vadd.f32 %v4424_v45, %v3657_v37  ;;  %v4499_v57 = vadd.f32 %v4498_v46, %v3659_v47 }
 0x12c   :  { %v4462_v59 = vadd.f32 %v4461_v48, %v3658_v50  ;;  %v4536_v51 = vadd.f32 %v4535_v49, %v3660_v53  ;;  %v685_v52 = vpop.f32.mrb[36].mxu0  ;;  %v1038_v63 = vpop.f32.mrb[36].mxu1 }
 0x12d   :  { %v686_v0 = vadd.f32 %v685_v52, %v8772_v27  ;;  %v1039_v55 = vadd.f32 %v1038_v63, %v8776_v28  ;;  %v687_v56 = vpop.f32.mrb[37].mxu0  ;;  %v1040_v42 = vpop.f32.mrb[37].mxu1 }
 0x12e   :  { %v688_v5 = vadd.f32 %v687_v56, %v8782_v29  ;;  %v1041_v6 = vadd.f32 %v1040_v42, %v8786_v30  ;;  %v689_v60 = vpop.f32.mrb[38].mxu0  ;;  %v1042_v62 = vpop.f32.mrb[38].mxu1 }
 0x12f   :  { %v3673_v7 = vmax.f32 %v686_v0, 0.0  ;;  %v3675_v10 = vmax.f32 %v1039_v55, 0.0  ;;  %v690_v1 = vadd.f32 %v689_v60, %v8772_v27  ;;  %v1043_v2 = vadd.f32 %v1042_v62, %v8776_v28  ;;  %v691_v13 = vpop.f32.mrb[39].mxu0  ;;  %v1044_v14 = vpop.f32.mrb[39].mxu1 }
 0x130   :  { %v3674_v41 = vmax.f32 %v688_v5, 0.0  ;;  %v3676_v23 = vmax.f32 %v1041_v6, 0.0  ;;  %v692_v24 = vadd.f32 %v691_v13, %v8782_v29  ;;  %v1045_v58 = vadd.f32 %v1044_v14, %v8786_v30 }
 0x131   :  { %v4426_v31 = vadd.f32 %v4425_v54, %v3673_v7  ;;  %v4500_v61 = vadd.f32 %v4499_v57, %v3675_v10  ;;  %v3689_v32 = vmax.f32 %v690_v1, 0.0  ;;  %v3691_v33 = vmax.f32 %v1043_v2, 0.0  ;;  %6924 = vmatmul.mubr.msk.bf16.gmra.mrb[144].mxu0 %vm412_vm2, %v8590_v43  ;;  %6956 = vmatmul.mubr.msk.bf16.gmra.mrb[144].mxu1 %vm412_vm2, %v8590_v43  ;;  %v8332_v1 = vld [vmem:[%s11233_s0 + $0x28] sm:$0xff]  }
 0x132   :  { %v4463_v34 = vadd.f32 %v4462_v59, %v3674_v41  ;;  %v4537_v35 = vadd.f32 %v4536_v51, %v3676_v23  ;;  %v3690_v40 = vmax.f32 %v692_v24, 0.0  ;;  %v3692_v36 = vmax.f32 %v1045_v58, 0.0  ;;  %1349 = vmatprep.mubr.bf16.mxu0 %v8450_v3  ;;  %1702 = vmatprep.mubr.bf16.mxu1 %v8450_v3 }
 0x133   :  { %v4427_v38 = vadd.f32 %v4426_v31, %v3689_v32  ;;  %v4501_v39 = vadd.f32 %v4500_v61, %v3691_v33 }
 0x134   :  { %v4464_v44 = vadd.f32 %v4463_v34, %v3690_v40  ;;  %v4538_v45 = vadd.f32 %v4537_v35, %v3692_v36  ;;  %v695_v46 = vpop.f32.mrb[40].mxu0  ;;  %v1048_v37 = vpop.f32.mrb[40].mxu1 }
 0x135   :  { %v696_v47 = vadd.f32 %v695_v46, %v8772_v27  ;;  %v1049_v48 = vadd.f32 %v1048_v37, %v8776_v28  ;;  %v697_v49 = vpop.f32.mrb[41].mxu0  ;;  %v1050_v43 = vpop.f32.mrb[41].mxu1 }
 0x136   :  { %v698_v50 = vadd.f32 %v697_v49, %v8782_v29  ;;  %v1051_v53 = vadd.f32 %v1050_v43, %v8786_v30  ;;  %v699_v54 = vpop.f32.mrb[42].mxu0  ;;  %v1052_v57 = vpop.f32.mrb[42].mxu1 }
 0x137   :  { %v3705_v59 = vmax.f32 %v696_v47, 0.0  ;;  %v3707_v51 = vmax.f32 %v1049_v48, 0.0  ;;  %v700_v52 = vadd.f32 %v699_v54, %v8772_v27  ;;  %v1053_v63 = vadd.f32 %v1052_v57, %v8776_v28  ;;  %v701_v0 = vpop.f32.mrb[43].mxu0  ;;  %v1054_v55 = vpop.f32.mrb[43].mxu1 }
 0x138   :  { %v3706_v56 = vmax.f32 %v698_v50, 0.0  ;;  %v3708_v42 = vmax.f32 %v1051_v53, 0.0  ;;  %v702_v5 = vadd.f32 %v701_v0, %v8782_v29  ;;  %v1055_v6 = vadd.f32 %v1054_v55, %v8786_v30 }
 0x139   :  { %v4428_v60 = vadd.f32 %v4427_v38, %v3705_v59  ;;  %v4502_v62 = vadd.f32 %v4501_v39, %v3707_v51  ;;  %v3721_v7 = vmax.f32 %v700_v52, 0.0  ;;  %v3723_v10 = vmax.f32 %v1053_v63, 0.0  ;;  %6925 = vmatmul.mubr.msk.bf16.gmra.mrb[148].mxu0 %vm412_vm2, %v8332_v1  ;;  %6957 = vmatmul.mubr.msk.bf16.gmra.mrb[148].mxu1 %vm412_vm2, %v8332_v1  ;;  %v8333_v63 = vld [vmem:[%s11233_s0 + $0x30] sm:$0xff]  }
 0x13a   :  { %v4465_v2 = vadd.f32 %v4464_v44, %v3706_v56  ;;  %v4539_v13 = vadd.f32 %v4538_v45, %v3708_v42  ;;  %v3722_v14 = vmax.f32 %v702_v5, 0.0  ;;  %v3724_v41 = vmax.f32 %v1055_v6, 0.0  ;;  %1359 = vmatprep.mubr.bf16.mxu0 %v8450_v3  ;;  %1712 = vmatprep.mubr.bf16.mxu1 %v8450_v3 }
 0x13b   :  { %v4429_v23 = vadd.f32 %v4428_v60, %v3721_v7  ;;  %v4503_v24 = vadd.f32 %v4502_v62, %v3723_v10 }
 0x13c   :  { %v4466_v58 = vadd.f32 %v4465_v2, %v3722_v14  ;;  %v4540_v31 = vadd.f32 %v4539_v13, %v3724_v41  ;;  %v705_v61 = vpop.f32.mrb[44].mxu0  ;;  %v1058_v32 = vpop.f32.mrb[44].mxu1 }
 0x13d   :  { %v706_v33 = vadd.f32 %v705_v61, %v8772_v27  ;;  %v1059_v34 = vadd.f32 %v1058_v32, %v8776_v28  ;;  %v707_v35 = vpop.f32.mrb[45].mxu0  ;;  %v1060_v40 = vpop.f32.mrb[45].mxu1 }
 0x13e   :  { %v708_v36 = vadd.f32 %v707_v35, %v8782_v29  ;;  %v1061_v38 = vadd.f32 %v1060_v40, %v8786_v30  ;;  %v709_v39 = vpop.f32.mrb[46].mxu0  ;;  %v1062_v44 = vpop.f32.mrb[46].mxu1 }
 0x13f   :  { %v3737_v45 = vmax.f32 %v706_v33, 0.0  ;;  %v3739_v46 = vmax.f32 %v1059_v34, 0.0  ;;  %v710_v37 = vadd.f32 %v709_v39, %v8772_v27  ;;  %v1063_v47 = vadd.f32 %v1062_v44, %v8776_v28  ;;  %v711_v48 = vpop.f32.mrb[47].mxu0  ;;  %v1064_v49 = vpop.f32.mrb[47].mxu1 }
 0x140   :  { %v3738_v43 = vmax.f32 %v708_v36, 0.0  ;;  %v3740_v50 = vmax.f32 %v1061_v38, 0.0  ;;  %v712_v53 = vadd.f32 %v711_v48, %v8782_v29  ;;  %v1065_v54 = vadd.f32 %v1064_v49, %v8786_v30 }
 0x141   :  { %v4430_v57 = vadd.f32 %v4429_v23, %v3737_v45  ;;  %v4504_v59 = vadd.f32 %v4503_v24, %v3739_v46  ;;  %v3753_v51 = vmax.f32 %v710_v37, 0.0  ;;  %v3755_v52 = vmax.f32 %v1063_v47, 0.0  ;;  %6926 = vmatmul.mubr.msk.bf16.gmra.mrb[152].mxu0 %vm412_vm2, %v8333_v63  ;;  %6958 = vmatmul.mubr.msk.bf16.gmra.mrb[152].mxu1 %vm412_vm2, %v8333_v63  ;;  %v8334_v47 = vld [vmem:[%s11233_s0 + $0x38] sm:$0xff]  }
 0x142   :  { %v4467_v0 = vadd.f32 %v4466_v58, %v3738_v43  ;;  %v4541_v55 = vadd.f32 %v4540_v31, %v3740_v50  ;;  %v3754_v56 = vmax.f32 %v712_v53, 0.0  ;;  %v3756_v42 = vmax.f32 %v1065_v54, 0.0  ;;  %1369 = vmatprep.mubr.bf16.mxu0 %v8450_v3  ;;  %1722 = vmatprep.mubr.bf16.mxu1 %v8450_v3 }
 0x143   :  { %v4431_v5 = vadd.f32 %v4430_v57, %v3753_v51  ;;  %v4505_v6 = vadd.f32 %v4504_v59, %v3755_v52 }
 0x144   :  { %v4468_v60 = vadd.f32 %v4467_v0, %v3754_v56  ;;  %v4542_v62 = vadd.f32 %v4541_v55, %v3756_v42  ;;  %v715_v7 = vpop.f32.mrb[48].mxu0  ;;  %v1068_v10 = vpop.f32.mrb[48].mxu1 }
 0x145   :  { %v716_v1 = vadd.f32 %v715_v7, %v8772_v27  ;;  %v1069_v2 = vadd.f32 %v1068_v10, %v8776_v28  ;;  %v717_v13 = vpop.f32.mrb[49].mxu0  ;;  %v1070_v14 = vpop.f32.mrb[49].mxu1 }
 0x146   :  { %v718_v41 = vadd.f32 %v717_v13, %v8782_v29  ;;  %v1071_v23 = vadd.f32 %v1070_v14, %v8786_v30  ;;  %v719_v24 = vpop.f32.mrb[50].mxu0  ;;  %v1072_v58 = vpop.f32.mrb[50].mxu1 }
 0x147   :  { %v3769_v31 = vmax.f32 %v716_v1, 0.0  ;;  %v3771_v61 = vmax.f32 %v1069_v2, 0.0  ;;  %v720_v32 = vadd.f32 %v719_v24, %v8772_v27  ;;  %v1073_v33 = vadd.f32 %v1072_v58, %v8776_v28  ;;  %v721_v34 = vpop.f32.mrb[51].mxu0  ;;  %v1074_v35 = vpop.f32.mrb[51].mxu1 }
 0x148   :  { %v3770_v40 = vmax.f32 %v718_v41, 0.0  ;;  %v3772_v36 = vmax.f32 %v1071_v23, 0.0  ;;  %v722_v38 = vadd.f32 %v721_v34, %v8782_v29  ;;  %v1075_v39 = vadd.f32 %v1074_v35, %v8786_v30 }
 0x149   :  { %v4432_v44 = vadd.f32 %v4431_v5, %v3769_v31  ;;  %v4506_v45 = vadd.f32 %v4505_v6, %v3771_v61  ;;  %v3785_v46 = vmax.f32 %v720_v32, 0.0  ;;  %v3787_v37 = vmax.f32 %v1073_v33, 0.0  ;;  %6927 = vmatmul.mubr.msk.bf16.gmra.mrb[156].mxu0 %vm412_vm2, %v8334_v47  ;;  %6959 = vmatmul.mubr.msk.bf16.gmra.mrb[156].mxu1 %vm412_vm2, %v8334_v47  ;;  %v8335_v33 = vld [vmem:[%s11233_s0 + $0x40] sm:$0xff]  }
 0x14a   :  { %v4469_v48 = vadd.f32 %v4468_v60, %v3770_v40  ;;  %v4543_v49 = vadd.f32 %v4542_v62, %v3772_v36  ;;  %v3786_v43 = vmax.f32 %v722_v38, 0.0  ;;  %v3788_v50 = vmax.f32 %v1075_v39, 0.0  ;;  %1379 = vmatprep.mubr.bf16.mxu0 %v8450_v3  ;;  %1732 = vmatprep.mubr.bf16.mxu1 %v8450_v3 }
 0x14b   :  { %v4433_v53 = vadd.f32 %v4432_v44, %v3785_v46  ;;  %v4507_v54 = vadd.f32 %v4506_v45, %v3787_v37 }
 0x14c   :  { %v4470_v57 = vadd.f32 %v4469_v48, %v3786_v43  ;;  %v4544_v59 = vadd.f32 %v4543_v49, %v3788_v50  ;;  %v725_v51 = vpop.f32.mrb[52].mxu0  ;;  %v1078_v52 = vpop.f32.mrb[52].mxu1 }
 0x14d   :  { %v726_v63 = vadd.f32 %v725_v51, %v8772_v27  ;;  %v1079_v0 = vadd.f32 %v1078_v52, %v8776_v28  ;;  %v727_v55 = vpop.f32.mrb[53].mxu0  ;;  %v1080_v56 = vpop.f32.mrb[53].mxu1 }
 0x14e   :  { %v728_v42 = vadd.f32 %v727_v55, %v8782_v29  ;;  %v1081_v5 = vadd.f32 %v1080_v56, %v8786_v30  ;;  %v729_v6 = vpop.f32.mrb[54].mxu0  ;;  %v1082_v60 = vpop.f32.mrb[54].mxu1 }
 0x14f   :  { %v3801_v62 = vmax.f32 %v726_v63, 0.0  ;;  %v3803_v7 = vmax.f32 %v1079_v0, 0.0  ;;  %v730_v10 = vadd.f32 %v729_v6, %v8772_v27  ;;  %v1083_v1 = vadd.f32 %v1082_v60, %v8776_v28  ;;  %v731_v2 = vpop.f32.mrb[55].mxu0  ;;  %v1084_v13 = vpop.f32.mrb[55].mxu1 }
 0x150   :  { %v3802_v14 = vmax.f32 %v728_v42, 0.0  ;;  %v3804_v41 = vmax.f32 %v1081_v5, 0.0  ;;  %v732_v23 = vadd.f32 %v731_v2, %v8782_v29  ;;  %v1085_v24 = vadd.f32 %v1084_v13, %v8786_v30 }
 0x151   :  { %v4434_v58 = vadd.f32 %v4433_v53, %v3801_v62  ;;  %v4508_v31 = vadd.f32 %v4507_v54, %v3803_v7  ;;  %v3817_v61 = vmax.f32 %v730_v10, 0.0  ;;  %v3819_v32 = vmax.f32 %v1083_v1, 0.0  ;;  %6928 = vmatmul.mubr.msk.bf16.gmra.mrb[160].mxu0 %vm412_vm2, %v8335_v33  ;;  %6960 = vmatmul.mubr.msk.bf16.gmra.mrb[160].mxu1 %vm412_vm2, %v8335_v33  ;;  %v8336_v1 = vld [vmem:[%s11233_s0 + $0x48] sm:$0xff]  }
 0x152   :  { %v4471_v34 = vadd.f32 %v4470_v57, %v3802_v14  ;;  %v4545_v35 = vadd.f32 %v4544_v59, %v3804_v41  ;;  %v3818_v40 = vmax.f32 %v732_v23, 0.0  ;;  %v3820_v36 = vmax.f32 %v1085_v24, 0.0  ;;  %1389 = vmatprep.mubr.bf16.mxu0 %v8450_v3  ;;  %1742 = vmatprep.mubr.bf16.mxu1 %v8450_v3 }
 0x153   :  { %v4435_v38 = vadd.f32 %v4434_v58, %v3817_v61  ;;  %v4509_v39 = vadd.f32 %v4508_v31, %v3819_v32 }
 0x154   :  { %v4472_v44 = vadd.f32 %v4471_v34, %v3818_v40  ;;  %v4546_v45 = vadd.f32 %v4545_v35, %v3820_v36  ;;  %v735_v46 = vpop.f32.mrb[56].mxu0  ;;  %v1088_v37 = vpop.f32.mrb[56].mxu1 }
 0x155   :  { %v736_v47 = vadd.f32 %v735_v46, %v8772_v27  ;;  %v1089_v48 = vadd.f32 %v1088_v37, %v8776_v28  ;;  %v737_v49 = vpop.f32.mrb[57].mxu0  ;;  %v1090_v43 = vpop.f32.mrb[57].mxu1 }
 0x156   :  { %v738_v50 = vadd.f32 %v737_v49, %v8782_v29  ;;  %v1091_v53 = vadd.f32 %v1090_v43, %v8786_v30  ;;  %v739_v54 = vpop.f32.mrb[58].mxu0  ;;  %v1092_v57 = vpop.f32.mrb[58].mxu1 }
 0x157   :  { %v3833_v59 = vmax.f32 %v736_v47, 0.0  ;;  %v3835_v51 = vmax.f32 %v1089_v48, 0.0  ;;  %v740_v52 = vadd.f32 %v739_v54, %v8772_v27  ;;  %v1093_v63 = vadd.f32 %v1092_v57, %v8776_v28  ;;  %v741_v0 = vpop.f32.mrb[59].mxu0  ;;  %v1094_v55 = vpop.f32.mrb[59].mxu1 }
 0x158   :  { %v3834_v56 = vmax.f32 %v738_v50, 0.0  ;;  %v3836_v42 = vmax.f32 %v1091_v53, 0.0  ;;  %v742_v5 = vadd.f32 %v741_v0, %v8782_v29  ;;  %v1095_v6 = vadd.f32 %v1094_v55, %v8786_v30 }
 0x159   :  { %v4436_v60 = vadd.f32 %v4435_v38, %v3833_v59  ;;  %v4510_v62 = vadd.f32 %v4509_v39, %v3835_v51  ;;  %v3849_v7 = vmax.f32 %v740_v52, 0.0  ;;  %v3851_v10 = vmax.f32 %v1093_v63, 0.0  ;;  %6929 = vmatmul.mubr.msk.bf16.gmra.mrb[164].mxu0 %vm412_vm2, %v8336_v1  ;;  %6961 = vmatmul.mubr.msk.bf16.gmra.mrb[164].mxu1 %vm412_vm2, %v8336_v1  ;;  %v8337_v63 = vld [vmem:[%s11233_s0 + $0x50] sm:$0xff]  }
 0x15a   :  { %v4473_v2 = vadd.f32 %v4472_v44, %v3834_v56  ;;  %v4547_v13 = vadd.f32 %v4546_v45, %v3836_v42  ;;  %v3850_v14 = vmax.f32 %v742_v5, 0.0  ;;  %v3852_v41 = vmax.f32 %v1095_v6, 0.0  ;;  %1399 = vmatprep.mubr.bf16.mxu0 %v8450_v3  ;;  %1752 = vmatprep.mubr.bf16.mxu1 %v8450_v3 }
 0x15b   :  { %v4437_v23 = vadd.f32 %v4436_v60, %v3849_v7  ;;  %v4511_v24 = vadd.f32 %v4510_v62, %v3851_v10 }
 0x15c   :  { %v4474_v58 = vadd.f32 %v4473_v2, %v3850_v14  ;;  %v4548_v31 = vadd.f32 %v4547_v13, %v3852_v41  ;;  %v745_v61 = vpop.f32.mrb[60].mxu0  ;;  %v1098_v32 = vpop.f32.mrb[60].mxu1 }
 0x15d   :  { %v746_v33 = vadd.f32 %v745_v61, %v8772_v27  ;;  %v1099_v34 = vadd.f32 %v1098_v32, %v8776_v28  ;;  %v747_v35 = vpop.f32.mrb[61].mxu0  ;;  %v1100_v40 = vpop.f32.mrb[61].mxu1 }
 0x15e   :  { %v748_v36 = vadd.f32 %v747_v35, %v8782_v29  ;;  %v1101_v38 = vadd.f32 %v1100_v40, %v8786_v30  ;;  %v749_v39 = vpop.f32.mrb[62].mxu0  ;;  %v1102_v44 = vpop.f32.mrb[62].mxu1  ;;  %v8338_v35 = vld [vmem:[%s11233_s0 + $0x58] sm:$0xff]  }
 0x15f   :  { %v3865_v45 = vmax.f32 %v746_v33, 0.0  ;;  %v3867_v46 = vmax.f32 %v1099_v34, 0.0  ;;  %v750_v37 = vadd.f32 %v749_v39, %v8772_v27  ;;  %v1103_v47 = vadd.f32 %v1102_v44, %v8776_v28  ;;  %v751_v48 = vpop.f32.mrb[63].mxu0  ;;  %v1104_v49 = vpop.f32.mrb[63].mxu1 }
 0x160   :  { %v3866_v43 = vmax.f32 %v748_v36, 0.0  ;;  %v3868_v50 = vmax.f32 %v1101_v38, 0.0  ;;  %v752_v53 = vadd.f32 %v751_v48, %v8782_v29  ;;  %v1105_v54 = vadd.f32 %v1104_v49, %v8786_v30 }
 0x161   :  { %v4438_v57 = vadd.f32 %v4437_v23, %v3865_v45  ;;  %v4512_v59 = vadd.f32 %v4511_v24, %v3867_v46  ;;  %v3881_v51 = vmax.f32 %v750_v37, 0.0  ;;  %v3883_v52 = vmax.f32 %v1103_v47, 0.0  ;;  %6930 = vmatmul.mubr.msk.bf16.gmra.mrb[168].mxu0 %vm412_vm2, %v8337_v63  ;;  %6962 = vmatmul.mubr.msk.bf16.gmra.mrb[168].mxu1 %vm412_vm2, %v8337_v63 }
 0x162   :  { %v4475_v0 = vadd.f32 %v4474_v58, %v3866_v43  ;;  %v4549_v55 = vadd.f32 %v4548_v31, %v3868_v50  ;;  %v3882_v56 = vmax.f32 %v752_v53, 0.0  ;;  %v3884_v42 = vmax.f32 %v1105_v54, 0.0  ;;  %1409 = vmatprep.mubr.bf16.mxu0 %v8450_v3  ;;  %1762 = vmatprep.mubr.bf16.mxu1 %v8450_v3 }
 0x163   :  { %v9029_v5 = vadd.f32 %v4438_v57, %v3881_v51  ;;  %v9031_v6 = vadd.f32 %v4512_v59, %v3883_v52 }
 0x164   :  { %v9033_v60 = vadd.f32 %v4475_v0, %v3882_v56  ;;  %v9035_v62 = vadd.f32 %v4549_v55, %v3884_v42  ;;  %v755_v7 = vpop.f32.mrb[64].mxu0  ;;  %v1108_v10 = vpop.f32.mrb[64].mxu1 }
 0x165   :  { %v756_v1 = vadd.f32 %v755_v7, %v8772_v27  ;;  %v1109_v2 = vadd.f32 %v1108_v10, %v8776_v28  ;;  %v757_v13 = vpop.f32.mrb[65].mxu0  ;;  %v1110_v14 = vpop.f32.mrb[65].mxu1 }
 0x166   :  { %v758_v41 = vadd.f32 %v757_v13, %v8782_v29  ;;  %v1111_v23 = vadd.f32 %v1110_v14, %v8786_v30  ;;  %v759_v24 = vpop.f32.mrb[66].mxu0  ;;  %v1112_v58 = vpop.f32.mrb[66].mxu1 }
 0x167   :  { %v761_v31 = vpop.f32.mrb[67].mxu0  ;;  %v1114_v61 = vpop.f32.mrb[67].mxu1  ;;  %v3899_v32 = vmax.f32 %v1109_v2, 0.0  ;;  %v760_v33 = vadd.f32 %v759_v24, %v8772_v27  ;;  %v1113_v34 = vadd.f32 %v1112_v58, %v8776_v28  ;;  %v3897_v39 = vmax.f32 %v756_v1, 0.0 }
 0x168   :  { %v3900_v40 = vmax.f32 %v1111_v23, 0.0  ;;  %v762_v36 = vadd.f32 %v761_v31, %v8782_v29  ;;  %v1115_v38 = vadd.f32 %v1114_v61, %v8786_v30  ;;  %v3898_v46 = vmax.f32 %v758_v41, 0.0  ;;  %v8339_v23 = vld [vmem:[%s11233_s0 + $0x60] sm:$0xff]  }
 0x169   :  { %6931 = vmatmul.mubr.msk.bf16.gmra.mrb[172].mxu0 %vm412_vm2, %v8338_v35  ;;  %6963 = vmatmul.mubr.msk.bf16.gmra.mrb[172].mxu1 %vm412_vm2, %v8338_v35  ;;  %v3913_v44 = vmax.f32 %v760_v33, 0.0  ;;  %v3915_v45 = vmax.f32 %v1113_v34, 0.0 }
 0x16a   :  { %1419 = vmatprep.mubr.bf16.mxu0 %v8450_v3  ;;  %1772 = vmatprep.mubr.bf16.mxu1 %v8450_v3  ;;  %v3914_v37 = vmax.f32 %v762_v36, 0.0  ;;  %v3916_v47 = vmax.f32 %v1115_v38, 0.0 }
 0x16b   :  { %v5001_v43 = vadd.f32 %v3913_v44, %v3897_v39  ;;  %v5075_v50 = vadd.f32 %v3915_v45, %v3899_v32 }
 0x16c   :  { %v765_v48 = vpop.f32.mrb[68].mxu0  ;;  %v1118_v49 = vpop.f32.mrb[68].mxu1  ;;  %v5038_v57 = vadd.f32 %v3914_v37, %v3898_v46  ;;  %v5112_v59 = vadd.f32 %v3916_v47, %v3900_v40 }
 0x16d   :  { %v767_v53 = vpop.f32.mrb[69].mxu0  ;;  %v1120_v54 = vpop.f32.mrb[69].mxu1  ;;  %v766_v51 = vadd.f32 %v765_v48, %v8772_v27  ;;  %v1119_v52 = vadd.f32 %v1118_v49, %v8776_v28 }
 0x16e   :  { %v769_v63 = vpop.f32.mrb[70].mxu0  ;;  %v1122_v0 = vpop.f32.mrb[70].mxu1  ;;  %v768_v55 = vadd.f32 %v767_v53, %v8782_v29  ;;  %v1121_v56 = vadd.f32 %v1120_v54, %v8786_v30 }
 0x16f   :  { %v771_v42 = vpop.f32.mrb[71].mxu0  ;;  %v1124_v7 = vpop.f32.mrb[71].mxu1  ;;  %v3929_v10 = vmax.f32 %v766_v51, 0.0  ;;  %v3931_v1 = vmax.f32 %v1119_v52, 0.0  ;;  %v770_v2 = vadd.f32 %v769_v63, %v8772_v27  ;;  %v1123_v13 = vadd.f32 %v1122_v0, %v8776_v28 }
 0x170   :  { %v3930_v14 = vmax.f32 %v768_v55, 0.0  ;;  %v3932_v41 = vmax.f32 %v1121_v56, 0.0  ;;  %v772_v34 = vadd.f32 %v771_v42, %v8782_v29  ;;  %v1125_v35 = vadd.f32 %v1124_v7, %v8786_v30 }
 0x171   :  { %6932 = vmatmul.mubr.msk.bf16.gmra.mrb[176].mxu0 %vm412_vm2, %v8339_v23  ;;  %6964 = vmatmul.mubr.msk.bf16.gmra.mrb[176].mxu1 %vm412_vm2, %v8339_v23  ;;  %v5002_v24 = vadd.f32 %v5001_v43, %v3929_v10  ;;  %v5076_v58 = vadd.f32 %v5075_v50, %v3931_v1  ;;  %v3945_v31 = vmax.f32 %v770_v2, 0.0  ;;  %v3947_v61 = vmax.f32 %v1123_v13, 0.0  ;;  %v8340_v13 = vld [vmem:[%s11233_s0 + $0x68] sm:$0xff]  }
 0x172   :  { %1429 = vmatprep.mubr.bf16.mxu0 %v8450_v3  ;;  %1782 = vmatprep.mubr.bf16.mxu1 %v8450_v3  ;;  %v5039_v32 = vadd.f32 %v5038_v57, %v3930_v14  ;;  %v5113_v33 = vadd.f32 %v5112_v59, %v3932_v41  ;;  %v3946_v44 = vmax.f32 %v772_v34, 0.0  ;;  %v3948_v45 = vmax.f32 %v1125_v35, 0.0 }
 0x173   :  { %v5003_v40 = vadd.f32 %v5002_v24, %v3945_v31  ;;  %v5077_v36 = vadd.f32 %v5076_v58, %v3947_v61 }
 0x174   :  { %v775_v38 = vpop.f32.mrb[72].mxu0  ;;  %v1128_v39 = vpop.f32.mrb[72].mxu1  ;;  %v5040_v54 = vadd.f32 %v5039_v32, %v3946_v44  ;;  %v5114_v57 = vadd.f32 %v5113_v33, %v3948_v45 }
 0x175   :  { %v776_v46 = vadd.f32 %v775_v38, %v8772_v27  ;;  %v1129_v37 = vadd.f32 %v1128_v39, %v8776_v28  ;;  %v777_v47 = vpop.f32.mrb[73].mxu0  ;;  %v1130_v48 = vpop.f32.mrb[73].mxu1 }
 0x176   :  { %v778_v49 = vadd.f32 %v777_v47, %v8782_v29  ;;  %v1131_v43 = vadd.f32 %v1130_v48, %v8786_v30  ;;  %v779_v50 = vpop.f32.mrb[74].mxu0  ;;  %v1132_v53 = vpop.f32.mrb[74].mxu1 }
 0x177   :  { %v3961_v59 = vmax.f32 %v776_v46, 0.0  ;;  %v3963_v51 = vmax.f32 %v1129_v37, 0.0  ;;  %v781_v52 = vpop.f32.mrb[75].mxu0  ;;  %v1134_v63 = vpop.f32.mrb[75].mxu1  ;;  %v780_v56 = vadd.f32 %v779_v50, %v8772_v27  ;;  %v1133_v42 = vadd.f32 %v1132_v53, %v8776_v28 }
 0x178   :  { %v3962_v0 = vmax.f32 %v778_v49, 0.0  ;;  %v3964_v55 = vmax.f32 %v1131_v43, 0.0  ;;  %v782_v1 = vadd.f32 %v781_v52, %v8782_v29  ;;  %v1135_v2 = vadd.f32 %v1134_v63, %v8786_v30 }
 0x179   :  { %v5004_v7 = vadd.f32 %v5003_v40, %v3961_v59  ;;  %v5078_v10 = vadd.f32 %v5077_v36, %v3963_v51  ;;  %6933 = vmatmul.mubr.msk.bf16.gmra.mrb[180].mxu0 %vm412_vm2, %v8340_v13  ;;  %v3977_v23 = vmax.f32 %v780_v56, 0.0  ;;  %v3979_v24 = vmax.f32 %v1133_v42, 0.0  ;;  %6965 = vmatmul.mubr.msk.bf16.gmra.mrb[180].mxu1 %vm412_vm2, %v8340_v13  ;;  %v8341_v42 = vld [vmem:[%s11233_s0 + $0x70] sm:$0xff]  }
 0x17a   :  { %v5041_v14 = vadd.f32 %v5040_v54, %v3962_v0  ;;  %v5115_v41 = vadd.f32 %v5114_v57, %v3964_v55  ;;  %1439 = vmatprep.mubr.bf16.mxu0 %v8450_v3  ;;  %v3978_v58 = vmax.f32 %v782_v1, 0.0  ;;  %v3980_v31 = vmax.f32 %v1135_v2, 0.0  ;;  %1792 = vmatprep.mubr.bf16.mxu1 %v8450_v3 }
 0x17b   :  { %v5005_v61 = vadd.f32 %v5004_v7, %v3977_v23  ;;  %v5079_v32 = vadd.f32 %v5078_v10, %v3979_v24 }
 0x17c   :  { %v785_v33 = vpop.f32.mrb[76].mxu0  ;;  %v1138_v34 = vpop.f32.mrb[76].mxu1  ;;  %v5042_v35 = vadd.f32 %v5041_v14, %v3978_v58  ;;  %v5116_v40 = vadd.f32 %v5115_v41, %v3980_v31 }
 0x17d   :  { %v786_v36 = vadd.f32 %v785_v33, %v8772_v27  ;;  %v1139_v38 = vadd.f32 %v1138_v34, %v8776_v28  ;;  %v787_v39 = vpop.f32.mrb[77].mxu0  ;;  %v1140_v44 = vpop.f32.mrb[77].mxu1 }
 0x17e   :  { %v788_v45 = vadd.f32 %v787_v39, %v8782_v29  ;;  %v1141_v46 = vadd.f32 %v1140_v44, %v8786_v30  ;;  %v789_v37 = vpop.f32.mrb[78].mxu0  ;;  %v1142_v47 = vpop.f32.mrb[78].mxu1 }
 0x17f   :  { %v3993_v48 = vmax.f32 %v786_v36, 0.0  ;;  %v3995_v49 = vmax.f32 %v1139_v38, 0.0  ;;  %v790_v43 = vadd.f32 %v789_v37, %v8772_v27  ;;  %v1143_v50 = vadd.f32 %v1142_v47, %v8776_v28  ;;  %v791_v53 = vpop.f32.mrb[79].mxu0  ;;  %v1144_v54 = vpop.f32.mrb[79].mxu1 }
 0x180   :  { %v3994_v57 = vmax.f32 %v788_v45, 0.0  ;;  %v3996_v59 = vmax.f32 %v1141_v46, 0.0  ;;  %v792_v51 = vadd.f32 %v791_v53, %v8782_v29  ;;  %v1145_v52 = vadd.f32 %v1144_v54, %v8786_v30 }
 0x181   :  { %v5006_v63 = vadd.f32 %v5005_v61, %v3993_v48  ;;  %v5080_v0 = vadd.f32 %v5079_v32, %v3995_v49  ;;  %v4009_v55 = vmax.f32 %v790_v43, 0.0  ;;  %v4011_v56 = vmax.f32 %v1143_v50, 0.0  ;;  %6934 = vmatmul.mubr.msk.bf16.gmra.mrb[184].mxu0 %vm412_vm2, %v8341_v42  ;;  %6966 = vmatmul.mubr.msk.bf16.gmra.mrb[184].mxu1 %vm412_vm2, %v8341_v42 }
 0x182   :  { %v5043_v7 = vadd.f32 %v5042_v35, %v3994_v57  ;;  %v5117_v10 = vadd.f32 %v5116_v40, %v3996_v59  ;;  %v4010_v1 = vmax.f32 %v792_v51, 0.0  ;;  %v4012_v2 = vmax.f32 %v1145_v52, 0.0  ;;  %1449 = vmatprep.mubr.bf16.mxu0 %v8450_v3  ;;  %1802 = vmatprep.mubr.bf16.mxu1 %v8450_v3  ;;  %v8342_v59 = vld [vmem:[%s11233_s0 + $0x78] sm:$0xff]  }
 0x183   :  { %v5007_v13 = vadd.f32 %v5006_v63, %v4009_v55  ;;  %v5081_v14 = vadd.f32 %v5080_v0, %v4011_v56 }
 0x184   :  { %v5044_v41 = vadd.f32 %v5043_v7, %v4010_v1  ;;  %v5118_v23 = vadd.f32 %v5117_v10, %v4012_v2  ;;  %v795_v24 = vpop.f32.mrb[80].mxu0  ;;  %v1148_v58 = vpop.f32.mrb[80].mxu1 }
 0x185   :  { %v796_v31 = vadd.f32 %v795_v24, %v8772_v27  ;;  %v1149_v61 = vadd.f32 %v1148_v58, %v8776_v28  ;;  %v797_v32 = vpop.f32.mrb[81].mxu0  ;;  %v1150_v33 = vpop.f32.mrb[81].mxu1 }
 0x186   :  { %v798_v34 = vadd.f32 %v797_v32, %v8782_v29  ;;  %v1151_v35 = vadd.f32 %v1150_v33, %v8786_v30  ;;  %v799_v40 = vpop.f32.mrb[82].mxu0  ;;  %v1152_v36 = vpop.f32.mrb[82].mxu1 }
 0x187   :  { %v4025_v38 = vmax.f32 %v796_v31, 0.0  ;;  %v4027_v39 = vmax.f32 %v1149_v61, 0.0  ;;  %v800_v44 = vadd.f32 %v799_v40, %v8772_v27  ;;  %v1153_v45 = vadd.f32 %v1152_v36, %v8776_v28  ;;  %v801_v46 = vpop.f32.mrb[83].mxu0  ;;  %v1154_v37 = vpop.f32.mrb[83].mxu1 }
 0x188   :  { %v4026_v47 = vmax.f32 %v798_v34, 0.0  ;;  %v4028_v48 = vmax.f32 %v1151_v35, 0.0  ;;  %v802_v49 = vadd.f32 %v801_v46, %v8782_v29  ;;  %v1155_v43 = vadd.f32 %v1154_v37, %v8786_v30 }
 0x189   :  { %v5008_v50 = vadd.f32 %v5007_v13, %v4025_v38  ;;  %v5082_v53 = vadd.f32 %v5081_v14, %v4027_v39  ;;  %v4041_v54 = vmax.f32 %v800_v44, 0.0  ;;  %v4043_v57 = vmax.f32 %v1153_v45, 0.0  ;;  %6935 = vmatmul.mubr.msk.bf16.gmra.mrb[188].mxu0 %vm412_vm2, %v8342_v59  ;;  %6967 = vmatmul.mubr.msk.bf16.gmra.mrb[188].mxu1 %vm412_vm2, %v8342_v59 }
 0x18a   :  { %v5045_v51 = vadd.f32 %v5044_v41, %v4026_v47  ;;  %v5119_v52 = vadd.f32 %v5118_v23, %v4028_v48  ;;  %v4042_v63 = vmax.f32 %v802_v49, 0.0  ;;  %v4044_v0 = vmax.f32 %v1155_v43, 0.0  ;;  %1459 = vmatprep.mubr.bf16.mxu0 %v8450_v3  ;;  %1812 = vmatprep.mubr.bf16.mxu1 %v8450_v3  ;;  %v8343_v48 = vld [vmem:[%s11233_s0 + $0x80] sm:$0xff]  }
 0x18b   :  { %v5009_v55 = vadd.f32 %v5008_v50, %v4041_v54  ;;  %v5083_v56 = vadd.f32 %v5082_v53, %v4043_v57 }
 0x18c   :  { %v5046_v42 = vadd.f32 %v5045_v51, %v4042_v63  ;;  %v5120_v7 = vadd.f32 %v5119_v52, %v4044_v0  ;;  %v805_v10 = vpop.f32.mrb[84].mxu0  ;;  %v1158_v1 = vpop.f32.mrb[84].mxu1  ;;  %v95_v0 = vld [vmem:[%s11234_s1 + $0x18] sm:$0xff] }
 0x18d   :  { %v806_v2 = vadd.f32 %v805_v10, %v8772_v27  ;;  %v1159_v13 = vadd.f32 %v1158_v1, %v8776_v28  ;;  %v807_v14 = vpop.f32.mrb[85].mxu0  ;;  %v1160_v41 = vpop.f32.mrb[85].mxu1 }
 0x18e   :  { %v808_v23 = vadd.f32 %v807_v14, %v8782_v29  ;;  %v1161_v24 = vadd.f32 %v1160_v41, %v8786_v30  ;;  %v809_v58 = vpop.f32.mrb[86].mxu0  ;;  %v1162_v31 = vpop.f32.mrb[86].mxu1  ;;  %v9135_v14 = vrot.slane %v95_v0, %v8527_v21  ;;  %v395_v41 = vcombine.high %v95_v0, %v95_v0 }
 0x18f   :  { %v4057_v61 = vmax.f32 %v806_v2, 0.0  ;;  %v4059_v32 = vmax.f32 %v1159_v13, 0.0  ;;  %v810_v33 = vadd.f32 %v809_v58, %v8772_v27  ;;  %v1163_v34 = vadd.f32 %v1162_v31, %v8776_v28  ;;  %v811_v35 = vpop.f32.mrb[87].mxu0  ;;  %v1164_v40 = vpop.f32.mrb[87].mxu1 }
 0x190   :  { %v4058_v36 = vmax.f32 %v808_v23, 0.0  ;;  %v4060_v38 = vmax.f32 %v1161_v24, 0.0  ;;  %v812_v39 = vadd.f32 %v811_v35, %v8782_v29  ;;  %v1165_v44 = vadd.f32 %v1164_v40, %v8786_v30 }
 0x191   :  { %v5010_v45 = vadd.f32 %v5009_v55, %v4057_v61  ;;  %v5084_v46 = vadd.f32 %v5083_v56, %v4059_v32  ;;  %v4073_v37 = vmax.f32 %v810_v33, 0.0  ;;  %v4075_v47 = vmax.f32 %v1163_v34, 0.0  ;;  %6936 = vmatmul.mubr.msk.bf16.gmra.mrb[192].mxu0 %vm412_vm2, %v8343_v48  ;;  %6968 = vmatmul.mubr.msk.bf16.gmra.mrb[192].mxu1 %vm412_vm2, %v8343_v48 }
 0x192   :  { %v5047_v49 = vadd.f32 %v5046_v42, %v4058_v36  ;;  %v5121_v43 = vadd.f32 %v5120_v7, %v4060_v38  ;;  %v4074_v50 = vmax.f32 %v812_v39, 0.0  ;;  %v4076_v53 = vmax.f32 %v1165_v44, 0.0  ;;  %1469 = vmatprep.mubr.bf16.mxu0 %v8450_v3  ;;  %1822 = vmatprep.mubr.bf16.mxu1 %v8450_v3 }
 0x193   :  { %v5011_v54 = vadd.f32 %v5010_v45, %v4073_v37  ;;  %v5085_v57 = vadd.f32 %v5084_v46, %v4075_v47  ;;  %v8344_v45 = vld [vmem:[%s11233_s0 + $0x88] sm:$0xff]  }
 0x194   :  { %v5048_v59 = vadd.f32 %v5047_v49, %v4074_v50  ;;  %v5122_v51 = vadd.f32 %v5121_v43, %v4076_v53  ;;  %v815_v52 = vpop.f32.mrb[88].mxu0  ;;  %v1168_v63 = vpop.f32.mrb[88].mxu1  ;;  %v410_v50 = vcombine.high %v9135_v14, %v9135_v14 }
 0x195   :  { %v816_v55 = vadd.f32 %v815_v52, %v8772_v27  ;;  %v1169_v56 = vadd.f32 %v1168_v63, %v8776_v28  ;;  %v817_v42 = vpop.f32.mrb[89].mxu0  ;;  %v1170_v7 = vpop.f32.mrb[89].mxu1 }
 0x196   :  { %v818_v10 = vadd.f32 %v817_v42, %v8782_v29  ;;  %v1171_v1 = vadd.f32 %v1170_v7, %v8786_v30  ;;  %v819_v2 = vpop.f32.mrb[90].mxu0  ;;  %v1172_v13 = vpop.f32.mrb[90].mxu1 }
 0x197   :  { %v4089_v23 = vmax.f32 %v816_v55, 0.0  ;;  %v4091_v24 = vmax.f32 %v1169_v56, 0.0  ;;  %v820_v58 = vadd.f32 %v819_v2, %v8772_v27  ;;  %v1173_v31 = vadd.f32 %v1172_v13, %v8776_v28  ;;  %v821_v61 = vpop.f32.mrb[91].mxu0  ;;  %v1174_v32 = vpop.f32.mrb[91].mxu1 }
 0x198   :  { %v4090_v33 = vmax.f32 %v818_v10, 0.0  ;;  %v4092_v34 = vmax.f32 %v1171_v1, 0.0  ;;  %v822_v35 = vadd.f32 %v821_v61, %v8782_v29  ;;  %v1175_v40 = vadd.f32 %v1174_v32, %v8786_v30 }
 0x199   :  { %v5012_v36 = vadd.f32 %v5011_v54, %v4089_v23  ;;  %v5086_v38 = vadd.f32 %v5085_v57, %v4091_v24  ;;  %v4105_v39 = vmax.f32 %v820_v58, 0.0  ;;  %v4107_v44 = vmax.f32 %v1173_v31, 0.0  ;;  %6937 = vmatmul.mubr.msk.bf16.gmra.mrb[196].mxu0 %vm412_vm2, %v8344_v45  ;;  %6969 = vmatmul.mubr.msk.bf16.gmra.mrb[196].mxu1 %vm412_vm2, %v8344_v45 }
 0x19a   :  { %v5049_v46 = vadd.f32 %v5048_v59, %v4090_v33  ;;  %v5123_v37 = vadd.f32 %v5122_v51, %v4092_v34  ;;  %v4106_v47 = vmax.f32 %v822_v35, 0.0  ;;  %v4108_v48 = vmax.f32 %v1175_v40, 0.0  ;;  %1479 = vmatprep.mubr.bf16.mxu0 %v8450_v3  ;;  %1832 = vmatprep.mubr.bf16.mxu1 %v8450_v3 }
 0x19b   :  { %v5013_v49 = vadd.f32 %v5012_v36, %v4105_v39  ;;  %v5087_v43 = vadd.f32 %v5086_v38, %v4107_v44  ;;  %v9151_v59 = vrot.slane %v395_v41, %v8527_v21  ;;  %v553_v56 = vand.u32 %v8529_v22, %v410_v50  ;;  %v8345_v38 = vld [vmem:[%s11233_s0 + $0x90] sm:$0xff]  }
 0x19c   :  { %v5050_v53 = vadd.f32 %v5049_v46, %v4106_v47  ;;  %v5124_v54 = vadd.f32 %v5123_v37, %v4108_v48  ;;  %v825_v57 = vpop.f32.mrb[92].mxu0  ;;  %v1178_v52 = vpop.f32.mrb[92].mxu1 }
 0x19d   :  { %v826_v51 = vadd.f32 %v825_v57, %v8772_v27  ;;  %v1179_v63 = vadd.f32 %v1178_v52, %v8776_v28  ;;  %v827_v0 = vpop.f32.mrb[93].mxu0  ;;  %v1180_v55 = vpop.f32.mrb[93].mxu1  ;;  %v411_v2 = vcombine.high %v9151_v59, %v9151_v59  ;;  %2679 = vmatprep.subr.bf16.mxu0 %v553_v56 }
 0x19e   :  { %v828_v42 = vadd.f32 %v827_v0, %v8782_v29  ;;  %v1181_v7 = vadd.f32 %v1180_v55, %v8786_v30  ;;  %v829_v10 = vpop.f32.mrb[94].mxu0  ;;  %v1182_v1 = vpop.f32.mrb[94].mxu1 }
 0x19f   :  { %v4121_v13 = vmax.f32 %v826_v51, 0.0  ;;  %v4123_v21 = vmax.f32 %v1179_v63, 0.0  ;;  %v830_v41 = vadd.f32 %v829_v10, %v8772_v27  ;;  %v1183_v23 = vadd.f32 %v1182_v1, %v8776_v28  ;;  %v831_v24 = vpop.f32.mrb[95].mxu0  ;;  %v1184_v58 = vpop.f32.mrb[95].mxu1 }
 0x1a0   :  { %v4122_v31 = vmax.f32 %v828_v42, 0.0  ;;  %v4124_v61 = vmax.f32 %v1181_v7, 0.0  ;;  %v832_v32 = vadd.f32 %v831_v24, %v8782_v29  ;;  %v1185_v33 = vadd.f32 %v1184_v58, %v8786_v30 }
 0x1a1   :  { %v5014_v34 = vadd.f32 %v5013_v49, %v4121_v13  ;;  %v5088_v35 = vadd.f32 %v5087_v43, %v4123_v21  ;;  %v4137_v40 = vmax.f32 %v830_v41, 0.0  ;;  %v4139_v36 = vmax.f32 %v1183_v23, 0.0  ;;  %6938 = vmatmul.mubr.msk.bf16.gmra.mrb[200].mxu0 %vm412_vm2, %v8345_v38  ;;  %6970 = vmatmul.mubr.msk.bf16.gmra.mrb[200].mxu1 %vm412_vm2, %v8345_v38 }
 0x1a2   :  { %v5051_v39 = vadd.f32 %v5050_v53, %v4122_v31  ;;  %v5125_v44 = vadd.f32 %v5124_v54, %v4124_v61  ;;  %v4138_v45 = vmax.f32 %v832_v32, 0.0  ;;  %v4140_v46 = vmax.f32 %v1185_v33, 0.0  ;;  %1489 = vmatprep.mubr.bf16.mxu0 %v8450_v3  ;;  %1842 = vmatprep.mubr.bf16.mxu1 %v8450_v3  ;;  %v8346_v33 = vld [vmem:[%s11233_s0 + $0x98] sm:$0xff]  }
 0x1a3   :  { %v5015_v37 = vadd.f32 %v5014_v34, %v4137_v40  ;;  %v5089_v47 = vadd.f32 %v5088_v35, %v4139_v36  ;;  %v559_v48 = vand.u32 %v8529_v22, %v411_v2 }
 0x1a4   :  { %v5052_v49 = vadd.f32 %v5051_v39, %v4138_v45  ;;  %v5126_v43 = vadd.f32 %v5125_v44, %v4140_v46  ;;  %v835_v50 = vpop.f32.mrb[96].mxu0  ;;  %v1188_v57 = vpop.f32.mrb[96].mxu1 }
 0x1a5   :  { %v836_v52 = vadd.f32 %v835_v50, %v8772_v27  ;;  %v1189_v53 = vadd.f32 %v1188_v57, %v8776_v28  ;;  %v837_v54 = vpop.f32.mrb[97].mxu0  ;;  %v1190_v51 = vpop.f32.mrb[97].mxu1  ;;  %3032 = vmatprep.subr.bf16.mxu1 %v559_v48 }
 0x1a6   :  { %v838_v63 = vadd.f32 %v837_v54, %v8782_v29  ;;  %v1191_v0 = vadd.f32 %v1190_v51, %v8786_v30  ;;  %v839_v55 = vpop.f32.mrb[98].mxu0  ;;  %v1192_v56 = vpop.f32.mrb[98].mxu1 }
 0x1a7   :  { %v4153_v42 = vmax.f32 %v836_v52, 0.0  ;;  %v4155_v7 = vmax.f32 %v1189_v53, 0.0  ;;  %v840_v10 = vadd.f32 %v839_v55, %v8772_v27  ;;  %v1193_v1 = vadd.f32 %v1192_v56, %v8776_v28  ;;  %v841_v2 = vpop.f32.mrb[99].mxu0  ;;  %v1194_v13 = vpop.f32.mrb[99].mxu1 }
 0x1a8   :  { %v4154_v21 = vmax.f32 %v838_v63, 0.0  ;;  %v4156_v41 = vmax.f32 %v1191_v0, 0.0  ;;  %v842_v23 = vadd.f32 %v841_v2, %v8782_v29  ;;  %v1195_v24 = vadd.f32 %v1194_v13, %v8786_v30 }
 0x1a9   :  { %v5016_v58 = vadd.f32 %v5015_v37, %v4153_v42  ;;  %v5090_v31 = vadd.f32 %v5089_v47, %v4155_v7  ;;  %v4169_v61 = vmax.f32 %v840_v10, 0.0  ;;  %v4171_v32 = vmax.f32 %v1193_v1, 0.0  ;;  %6939 = vmatmul.mubr.msk.bf16.gmra.mrb[204].mxu0 %vm412_vm2, %v8346_v33  ;;  %6971 = vmatmul.mubr.msk.bf16.gmra.mrb[204].mxu1 %vm412_vm2, %v8346_v33 }
 0x1aa   :  { %v5053_v34 = vadd.f32 %v5052_v49, %v4154_v21  ;;  %v5127_v35 = vadd.f32 %v5126_v43, %v4156_v41  ;;  %v4170_v40 = vmax.f32 %v842_v23, 0.0  ;;  %v4172_v36 = vmax.f32 %v1195_v24, 0.0  ;;  %1499 = vmatprep.mubr.bf16.mxu0 %v8450_v3  ;;  %1852 = vmatprep.mubr.bf16.mxu1 %v8450_v3  ;;  %v8347_v23 = vld [vmem:[%s11233_s0 + $0xa0] sm:$0xff]  }
 0x1ab   :  { %v5017_v38 = vadd.f32 %v5016_v58, %v4169_v61  ;;  %v5091_v39 = vadd.f32 %v5090_v31, %v4171_v32 }
 0x1ac   :  { %v5054_v44 = vadd.f32 %v5053_v34, %v4170_v40  ;;  %v5128_v45 = vadd.f32 %v5127_v35, %v4172_v36  ;;  %v845_v46 = vpop.f32.mrb[100].mxu0  ;;  %v1198_v37 = vpop.f32.mrb[100].mxu1 }
 0x1ad   :  { %v846_v47 = vadd.f32 %v845_v46, %v8772_v27  ;;  %v1199_v48 = vadd.f32 %v1198_v37, %v8776_v28  ;;  %v847_v49 = vpop.f32.mrb[101].mxu0  ;;  %v1200_v43 = vpop.f32.mrb[101].mxu1 }
 0x1ae   :  { %v848_v50 = vadd.f32 %v847_v49, %v8782_v29  ;;  %v1201_v57 = vadd.f32 %v1200_v43, %v8786_v30  ;;  %v849_v52 = vpop.f32.mrb[102].mxu0  ;;  %v1202_v53 = vpop.f32.mrb[102].mxu1 }
 0x1af   :  { %v4185_v54 = vmax.f32 %v846_v47, 0.0  ;;  %v4187_v51 = vmax.f32 %v1199_v48, 0.0  ;;  %v850_v63 = vadd.f32 %v849_v52, %v8772_v27  ;;  %v1203_v0 = vadd.f32 %v1202_v53, %v8776_v28  ;;  %v851_v55 = vpop.f32.mrb[103].mxu0  ;;  %v1204_v56 = vpop.f32.mrb[103].mxu1 }
 0x1b0   :  { %v4186_v42 = vmax.f32 %v848_v50, 0.0  ;;  %v4188_v7 = vmax.f32 %v1201_v57, 0.0  ;;  %v852_v10 = vadd.f32 %v851_v55, %v8782_v29  ;;  %v1205_v1 = vadd.f32 %v1204_v56, %v8786_v30 }
 0x1b1   :  { %v5018_v2 = vadd.f32 %v5017_v38, %v4185_v54  ;;  %v5092_v13 = vadd.f32 %v5091_v39, %v4187_v51  ;;  %v4201_v21 = vmax.f32 %v850_v63, 0.0  ;;  %v4203_v41 = vmax.f32 %v1203_v0, 0.0  ;;  %6940 = vmatmul.mubr.msk.bf16.gmra.mrb[208].mxu0 %vm412_vm2, %v8347_v23  ;;  %6972 = vmatmul.mubr.msk.bf16.gmra.mrb[208].mxu1 %vm412_vm2, %v8347_v23 }
 0x1b2   :  { %v5055_v24 = vadd.f32 %v5054_v44, %v4186_v42  ;;  %v5129_v58 = vadd.f32 %v5128_v45, %v4188_v7  ;;  %v4202_v31 = vmax.f32 %v852_v10, 0.0  ;;  %v4204_v61 = vmax.f32 %v1205_v1, 0.0  ;;  %1509 = vmatprep.mubr.bf16.mxu0 %v8450_v3  ;;  %1862 = vmatprep.mubr.bf16.mxu1 %v8450_v3 }
 0x1b3   :  { %v5019_v32 = vadd.f32 %v5018_v2, %v4201_v21  ;;  %v5093_v33 = vadd.f32 %v5092_v13, %v4203_v41  ;;  %v4440_v38 = vrot.slane %v9029_v5, 4  ;;  %v4514_v39 = vrot.slane %v9031_v6, 4  ;;  %v8348_v21 = vld [vmem:[%s11233_s0 + $0xa8] sm:$0xff]  }
 0x1b4   :  { %v5056_v34 = vadd.f32 %v5055_v24, %v4202_v31  ;;  %v5130_v35 = vadd.f32 %v5129_v58, %v4204_v61  ;;  %v855_v40 = vpop.f32.mrb[104].mxu0  ;;  %v1208_v36 = vpop.f32.mrb[104].mxu1  ;;  %v4477_v47 = vrot.slane %v9033_v60, 4  ;;  %v4551_v48 = vrot.slane %v9035_v62, 4 }
 0x1b5   :  { %v856_v44 = vadd.f32 %v855_v40, %v8772_v27  ;;  %v1209_v45 = vadd.f32 %v1208_v36, %v8776_v28  ;;  %v857_v46 = vpop.f32.mrb[105].mxu0  ;;  %v1210_v37 = vpop.f32.mrb[105].mxu1 }
 0x1b6   :  { %v858_v49 = vadd.f32 %v857_v46, %v8782_v29  ;;  %v1211_v43 = vadd.f32 %v1210_v37, %v8786_v30  ;;  %v859_v50 = vpop.f32.mrb[106].mxu0  ;;  %v1212_v57 = vpop.f32.mrb[106].mxu1 }
 0x1b7   :  { %v4217_v52 = vmax.f32 %v856_v44, 0.0  ;;  %v4219_v53 = vmax.f32 %v1209_v45, 0.0  ;;  %v860_v54 = vadd.f32 %v859_v50, %v8772_v27  ;;  %v1213_v51 = vadd.f32 %v1212_v57, %v8776_v28  ;;  %v861_v63 = vpop.f32.mrb[107].mxu0  ;;  %v1214_v0 = vpop.f32.mrb[107].mxu1 }
 0x1b8   :  { %v4218_v55 = vmax.f32 %v858_v49, 0.0  ;;  %v4220_v56 = vmax.f32 %v1211_v43, 0.0  ;;  %v862_v42 = vadd.f32 %v861_v63, %v8782_v29  ;;  %v1215_v7 = vadd.f32 %v1214_v0, %v8786_v30 }
 0x1b9   :  { %v5020_v10 = vadd.f32 %v5019_v32, %v4217_v52  ;;  %v5094_v1 = vadd.f32 %v5093_v33, %v4219_v53  ;;  %v4233_v2 = vmax.f32 %v860_v54, 0.0  ;;  %v4235_v13 = vmax.f32 %v1213_v51, 0.0  ;;  %6941 = vmatmul.mubr.msk.bf16.gmra.mrb[212].mxu0 %vm412_vm2, %v8348_v21  ;;  %6973 = vmatmul.mubr.msk.bf16.gmra.mrb[212].mxu1 %vm412_vm2, %v8348_v21 }
 0x1ba   :  { %v5057_v41 = vadd.f32 %v5056_v34, %v4218_v55  ;;  %v5131_v23 = vadd.f32 %v5130_v35, %v4220_v56  ;;  %v4234_v24 = vmax.f32 %v862_v42, 0.0  ;;  %v4236_v58 = vmax.f32 %v1215_v7, 0.0  ;;  %1519 = vmatprep.mubr.bf16.mxu0 %v8450_v3  ;;  %1872 = vmatprep.mubr.bf16.mxu1 %v8450_v3  ;;  %v8349_v42 = vld [vmem:[%s11233_s0 + $0xb0] sm:$0xff]  }
 0x1bb   :  { %v5021_v31 = vadd.f32 %v5020_v10, %v4233_v2  ;;  %v5095_v61 = vadd.f32 %v5094_v1, %v4235_v13  ;;  %v9222_v44 = vadd.f32 %v4440_v38, %v9029_v5  ;;  %v9225_v34 = vadd.f32 %v4514_v39, %v9031_v6 }
 0x1bc   :  { %v5058_v32 = vadd.f32 %v5057_v41, %v4234_v24  ;;  %v5132_v33 = vadd.f32 %v5131_v23, %v4236_v58  ;;  %v865_v40 = vpop.f32.mrb[108].mxu0  ;;  %v1218_v36 = vpop.f32.mrb[108].mxu1  ;;  %v9230_v49 = vadd.f32 %v4477_v47, %v9033_v60  ;;  %v9233_v43 = vadd.f32 %v4551_v48, %v9035_v62 }
 0x1bd   :  { %v866_v35 = vadd.f32 %v865_v40, %v8772_v27  ;;  %v1219_v45 = vadd.f32 %v1218_v36, %v8776_v28  ;;  %v867_v46 = vpop.f32.mrb[109].mxu0  ;;  %v1220_v37 = vpop.f32.mrb[109].mxu1 }
 0x1be   :  { %v868_v50 = vadd.f32 %v867_v46, %v8782_v29  ;;  %v1221_v5 = vadd.f32 %v1220_v37, %v8786_v30  ;;  %v869_v38 = vpop.f32.mrb[110].mxu0  ;;  %v1222_v57 = vpop.f32.mrb[110].mxu1 }
 0x1bf   :  { %v4249_v6 = vmax.f32 %v866_v35, 0.0  ;;  %v4251_v39 = vmax.f32 %v1219_v45, 0.0  ;;  %v870_v52 = vadd.f32 %v869_v38, %v8772_v27  ;;  %v1223_v53 = vadd.f32 %v1222_v57, %v8776_v28  ;;  %v871_v54 = vpop.f32.mrb[111].mxu0  ;;  %v1224_v51 = vpop.f32.mrb[111].mxu1 }
 0x1c0   :  { %v4250_v63 = vmax.f32 %v868_v50, 0.0  ;;  %v4252_v60 = vmax.f32 %v1221_v5, 0.0  ;;  %v872_v47 = vadd.f32 %v871_v54, %v8782_v29  ;;  %v1225_v62 = vadd.f32 %v1224_v51, %v8786_v30 }
 0x1c1   :  { %v5022_v48 = vadd.f32 %v5021_v31, %v4249_v6  ;;  %v5096_v0 = vadd.f32 %v5095_v61, %v4251_v39  ;;  %v4265_v55 = vmax.f32 %v870_v52, 0.0  ;;  %v4267_v56 = vmax.f32 %v1223_v53, 0.0  ;;  %6942 = vmatmul.mubr.msk.bf16.gmra.mrb[216].mxu0 %vm412_vm2, %v8349_v42  ;;  %6974 = vmatmul.mubr.msk.bf16.gmra.mrb[216].mxu1 %vm412_vm2, %v8349_v42 }
 0x1c2   :  { %v5059_v7 = vadd.f32 %v5058_v32, %v4250_v63  ;;  %v5133_v10 = vadd.f32 %v5132_v33, %v4252_v60  ;;  %v4266_v1 = vmax.f32 %v872_v47, 0.0  ;;  %v4268_v2 = vmax.f32 %v1225_v62, 0.0  ;;  %1529 = vmatprep.mubr.bf16.mxu0 %v8450_v3  ;;  %1882 = vmatprep.mubr.bf16.mxu1 %v8450_v3 }
 0x1c3   :  { %v5023_v13 = vadd.f32 %v5022_v48, %v4265_v55  ;;  %v5097_v21 = vadd.f32 %v5096_v0, %v4267_v56  ;;  %v4442_v31 = vrot.slane %v9222_v44, 2  ;;  %v4516_v61 = vrot.slane %v9225_v34, 2  ;;  %v8350_v55 = vld [vmem:[%s11233_s0 + $0xb8] sm:$0xff]  }
 0x1c4   :  { %v5060_v41 = vadd.f32 %v5059_v7, %v4266_v1  ;;  %v5134_v23 = vadd.f32 %v5133_v10, %v4268_v2  ;;  %v875_v24 = vpop.f32.mrb[112].mxu0  ;;  %v1228_v58 = vpop.f32.mrb[112].mxu1  ;;  %v4479_v35 = vrot.slane %v9230_v49, 2  ;;  %v4553_v45 = vrot.slane %v9233_v43, 2 }
 0x1c5   :  { %v876_v32 = vadd.f32 %v875_v24, %v8772_v27  ;;  %v1229_v33 = vadd.f32 %v1228_v58, %v8776_v28  ;;  %v877_v40 = vpop.f32.mrb[113].mxu0  ;;  %v1230_v36 = vpop.f32.mrb[113].mxu1 }
 0x1c6   :  { %v878_v46 = vadd.f32 %v877_v40, %v8782_v29  ;;  %v1231_v37 = vadd.f32 %v1230_v36, %v8786_v30  ;;  %v879_v50 = vpop.f32.mrb[114].mxu0  ;;  %v1232_v5 = vpop.f32.mrb[114].mxu1 }
 0x1c7   :  { %v4281_v38 = vmax.f32 %v876_v32, 0.0  ;;  %v4283_v57 = vmax.f32 %v1229_v33, 0.0  ;;  %v880_v6 = vadd.f32 %v879_v50, %v8772_v27  ;;  %v1233_v39 = vadd.f32 %v1232_v5, %v8776_v28  ;;  %v881_v52 = vpop.f32.mrb[115].mxu0  ;;  %v1234_v53 = vpop.f32.mrb[115].mxu1 }
 0x1c8   :  { %v4282_v54 = vmax.f32 %v878_v46, 0.0  ;;  %v4284_v51 = vmax.f32 %v1231_v37, 0.0  ;;  %v882_v63 = vadd.f32 %v881_v52, %v8782_v29  ;;  %v1235_v60 = vadd.f32 %v1234_v53, %v8786_v30 }
 0x1c9   :  { %v5024_v47 = vadd.f32 %v5023_v13, %v4281_v38  ;;  %v5098_v62 = vadd.f32 %v5097_v21, %v4283_v57  ;;  %v4297_v48 = vmax.f32 %v880_v6, 0.0  ;;  %v4299_v0 = vmax.f32 %v1233_v39, 0.0  ;;  %6943 = vmatmul.mubr.msk.bf16.gmra.mrb[220].mxu0 %vm412_vm2, %v8350_v55  ;;  %6975 = vmatmul.mubr.msk.bf16.gmra.mrb[220].mxu1 %vm412_vm2, %v8350_v55 }
 0x1ca   :  { %v5061_v56 = vadd.f32 %v5060_v41, %v4282_v54  ;;  %v5135_v42 = vadd.f32 %v5134_v23, %v4284_v51  ;;  %v4298_v7 = vmax.f32 %v882_v63, 0.0  ;;  %v4300_v10 = vmax.f32 %v1235_v60, 0.0  ;;  %1539 = vmatprep.mubr.bf16.mxu0 %v8450_v3  ;;  %1892 = vmatprep.mubr.bf16.mxu1 %v8450_v3 }
 0x1cb   :  { %v5025_v1 = vadd.f32 %v5024_v47, %v4297_v48  ;;  %v5099_v2 = vadd.f32 %v5098_v62, %v4299_v0  ;;  %v9268_v32 = vadd.f32 %v4442_v31, %v9222_v44  ;;  %v9271_v41 = vadd.f32 %v4516_v61, %v9225_v34 }
 0x1cc   :  { %v5062_v13 = vadd.f32 %v5061_v56, %v4298_v7  ;;  %v5136_v21 = vadd.f32 %v5135_v42, %v4300_v10  ;;  %v885_v24 = vpop.f32.mrb[116].mxu0  ;;  %v1238_v58 = vpop.f32.mrb[116].mxu1  ;;  %v9278_v38 = vadd.f32 %v4479_v35, %v9230_v49  ;;  %v9281_v44 = vadd.f32 %v4553_v45, %v9233_v43  ;;  %v8351_v43 = vld [vmem:[%s11233_s0 + $0xc0] sm:$0xff]  }
 0x1cd   :  { %v886_v23 = vadd.f32 %v885_v24, %v8772_v27  ;;  %v1239_v33 = vadd.f32 %v1238_v58, %v8776_v28  ;;  %v887_v40 = vpop.f32.mrb[117].mxu0  ;;  %v1240_v36 = vpop.f32.mrb[117].mxu1 }
 0x1ce   :  { %v888_v46 = vadd.f32 %v887_v40, %v8782_v29  ;;  %v1241_v37 = vadd.f32 %v1240_v36, %v8786_v30  ;;  %v889_v50 = vpop.f32.mrb[118].mxu0  ;;  %v1242_v5 = vpop.f32.mrb[118].mxu1 }
 0x1cf   :  { %v4313_v34 = vmax.f32 %v886_v23, 0.0  ;;  %v4315_v31 = vmax.f32 %v1239_v33, 0.0  ;;  %v890_v61 = vadd.f32 %v889_v50, %v8772_v27  ;;  %v1243_v57 = vadd.f32 %v1242_v5, %v8776_v28  ;;  %v891_v6 = vpop.f32.mrb[119].mxu0  ;;  %v1244_v39 = vpop.f32.mrb[119].mxu1 }
 0x1d0   :  { %v4314_v52 = vmax.f32 %v888_v46, 0.0  ;;  %v4316_v53 = vmax.f32 %v1241_v37, 0.0  ;;  %v892_v54 = vadd.f32 %v891_v6, %v8782_v29  ;;  %v1245_v51 = vadd.f32 %v1244_v39, %v8786_v30 }
 0x1d1   :  { %v5026_v63 = vadd.f32 %v5025_v1, %v4313_v34  ;;  %v5100_v49 = vadd.f32 %v5099_v2, %v4315_v31  ;;  %v4329_v35 = vmax.f32 %v890_v61, 0.0  ;;  %v4331_v60 = vmax.f32 %v1243_v57, 0.0  ;;  %6944 = vmatmul.mubr.msk.bf16.gmra.mrb[224].mxu0 %vm412_vm2, %v8351_v43  ;;  %6976 = vmatmul.mubr.msk.bf16.gmra.mrb[224].mxu1 %vm412_vm2, %v8351_v43 }
 0x1d2   :  { %v5063_v45 = vadd.f32 %v5062_v13, %v4314_v52  ;;  %v5137_v47 = vadd.f32 %v5136_v21, %v4316_v53  ;;  %v4330_v62 = vmax.f32 %v892_v54, 0.0  ;;  %v4332_v48 = vmax.f32 %v1245_v51, 0.0  ;;  %1549 = vmatprep.mubr.bf16.mxu0 %v8450_v3  ;;  %1902 = vmatprep.mubr.bf16.mxu1 %v8450_v3 }
 0x1d3   :  { %v5027_v0 = vadd.f32 %v5026_v63, %v4329_v35  ;;  %v5101_v55 = vadd.f32 %v5100_v49, %v4331_v60  ;;  %v4444_v1 = vrot.slane %v9268_v32, 1  ;;  %v4518_v2 = vrot.slane %v9271_v41, 1  ;;  %v8352_v35 = vld [vmem:[%s11233_s0 + $0xc8] sm:$0xff]  }
 0x1d4   :  { %v5064_v56 = vadd.f32 %v5063_v45, %v4330_v62  ;;  %v5138_v42 = vadd.f32 %v5137_v47, %v4332_v48  ;;  %v895_v7 = vpop.f32.mrb[120].mxu0  ;;  %v1248_v10 = vpop.f32.mrb[120].mxu1  ;;  %v4481_v46 = vrot.slane %v9278_v38, 1  ;;  %v4555_v37 = vrot.slane %v9281_v44, 1  ;;  %v8353_v62 = vld [vmem:[%s11235_s2] sm:$0xff] }
 0x1d5   :  { %v896_v13 = vadd.f32 %v895_v7, %v8772_v27  ;;  %v1249_v21 = vadd.f32 %v1248_v10, %v8776_v28  ;;  %v897_v24 = vpop.f32.mrb[121].mxu0  ;;  %v1250_v58 = vpop.f32.mrb[121].mxu1  ;;  %v9317_v48 = vrot.slane %v8353_v62, %v118_v8  ;;  %v9330_v7 = vrot.slane %v8353_v62, %v130_v12 }
 0x1d6   :  { %v898_v23 = vadd.f32 %v897_v24, %v8782_v29  ;;  %v1251_v33 = vadd.f32 %v1250_v58, %v8786_v30  ;;  %v899_v40 = vpop.f32.mrb[122].mxu0  ;;  %v1252_v36 = vpop.f32.mrb[122].mxu1  ;;  %v4445_v24 = vadd.f32 %v4444_v1, %v9268_v32 }
 0x1d7   :  { %v4345_v50 = vmax.f32 %v896_v13, 0.0  ;;  %v4347_v5 = vmax.f32 %v1249_v21, 0.0  ;;  %v900_v34 = vadd.f32 %v899_v40, %v8772_v27  ;;  %v1253_v31 = vadd.f32 %v1252_v36, %v8776_v28  ;;  %v901_v61 = vpop.f32.mrb[123].mxu0  ;;  %v1254_v57 = vpop.f32.mrb[123].mxu1 }
 0x1d8   :  { %v4346_v6 = vmax.f32 %v898_v23, 0.0  ;;  %v4348_v39 = vmax.f32 %v1251_v33, 0.0  ;;  %v902_v52 = vadd.f32 %v901_v61, %v8782_v29  ;;  %v1255_v53 = vadd.f32 %v1254_v57, %v8786_v30 }
 0x1d9   :  { %v5028_v54 = vadd.f32 %v5027_v0, %v4345_v50  ;;  %v5102_v51 = vadd.f32 %v5101_v55, %v4347_v5  ;;  %v4361_v63 = vmax.f32 %v900_v34, 0.0  ;;  %v4363_v49 = vmax.f32 %v1253_v31, 0.0  ;;  %6945 = vmatmul.mubr.msk.bf16.gmra.mrb[228].mxu0 %vm412_vm2, %v8352_v35  ;;  %6977 = vmatmul.mubr.msk.bf16.gmra.mrb[228].mxu1 %vm412_vm2, %v8352_v35 }
 0x1da   :  { %v5065_v60 = vadd.f32 %v5064_v56, %v4346_v6  ;;  %v5139_v43 = vadd.f32 %v5138_v42, %v4348_v39  ;;  %v4362_v45 = vmax.f32 %v902_v52, 0.0  ;;  %v4364_v47 = vmax.f32 %v1255_v53, 0.0  ;;  %1559 = vmatprep.mubr.bf16.mxu0 %v8450_v3  ;;  %1912 = vmatprep.mubr.bf16.mxu1 %v8450_v3 }
 0x1db   :  { %v9321_v0 = vrot.slane %v8353_v62, %v122_v9  ;;  %v5029_v55 = vadd.f32 %v5028_v54, %v4361_v63  ;;  %v5103_v56 = vadd.f32 %v5102_v51, %v4363_v49  ;;  %v9326_v42 = vrot.slane %v8353_v62, %v126_v11 }
 0x1dc   :  { %v5066_v10 = vadd.f32 %v5065_v60, %v4362_v45  ;;  %v5140_v13 = vadd.f32 %v5139_v43, %v4364_v47  ;;  %v905_v8 = vpop.f32.mrb[124].mxu0  ;;  %v1258_v21 = vpop.f32.mrb[124].mxu1  ;;  %v4519_v9 = vadd.f32 %v4518_v2, %v9271_v41  ;;  %v4482_v5 = vadd.f32 %v4481_v46, %v9278_v38 }
 0x1dd   :  { %v906_v58 = vadd.f32 %v905_v8, %v8772_v27  ;;  %v1259_v23 = vadd.f32 %v1258_v21, %v8776_v28  ;;  %v907_v33 = vpop.f32.mrb[125].mxu0  ;;  %v1260_v40 = vpop.f32.mrb[125].mxu1  ;;  %v4556_v34 = vadd.f32 %v4555_v37, %v9281_v44  ;;  %v8354_v44 = vld [vmem:[%s11233_s0 + $0xd0] sm:$0xff]  }
 0x1de   :  { %v908_v11 = vadd.f32 %v907_v33, %v8782_v29  ;;  %v1261_v36 = vadd.f32 %v1260_v40, %v8786_v30  ;;  %v909_v12 = vpop.f32.mrb[126].mxu0  ;;  %v1262_v50 = vpop.f32.mrb[126].mxu1  ;;  %v9355_v47 = vmul.f32 0.00390625, %v4482_v5 }
 0x1df   :  { %v4377_v31 = vmax.f32 %v906_v58, 0.0  ;;  %v4379_v32 = vmax.f32 %v1259_v23, 0.0  ;;  %v910_v41 = vadd.f32 %v909_v12, %v8772_v27  ;;  %v1263_v1 = vadd.f32 %v1262_v50, %v8776_v28  ;;  %v911_v2 = vpop.f32.mrb[127].mxu0  ;;  %v1264_v61 = vpop.f32.mrb[127].mxu1 }
 0x1e0   :  { %v4378_v57 = vmax.f32 %v908_v11, 0.0  ;;  %v4380_v6 = vmax.f32 %v1261_v36, 0.0  ;;  %v912_v39 = vadd.f32 %v911_v2, %v8782_v29  ;;  %v1265_v52 = vadd.f32 %v1264_v61, %v8786_v30 }
 0x1e1   :  { %v5030_v53 = vadd.f32 %v5029_v55, %v4377_v31  ;;  %v5104_v54 = vadd.f32 %v5103_v56, %v4379_v32  ;;  %v4393_v51 = vmax.f32 %v910_v41, 0.0  ;;  %v4395_v38 = vmax.f32 %v1263_v1, 0.0  ;;  %6946 = vmatmul.mubr.msk.bf16.gmra.mrb[232].mxu0 %vm412_vm2, %v8354_v44  ;;  %6978 = vmatmul.mubr.msk.bf16.gmra.mrb[232].mxu1 %vm412_vm2, %v8354_v44 }
 0x1e2   :  { %v5067_v27 = vadd.f32 %v5066_v10, %v4378_v57  ;;  %v5141_v28 = vadd.f32 %v5140_v13, %v4380_v6  ;;  %v4394_v46 = vmax.f32 %v912_v39, 0.0  ;;  %v4396_v37 = vmax.f32 %v1265_v52, 0.0  ;;  %1569 = vmatprep.mubr.bf16.mxu0 %v8450_v3  ;;  %1922 = vmatprep.mubr.bf16.mxu1 %v8450_v3  ;;  %v8355_v39 = vld [vmem:[%s11233_s0 + $0xd8] sm:$0xff]  }
 0x1e3   :  { %v9350_v29 = vmul.f32 0.00390625, %v4445_v24  ;;  %v9352_v30 = vmul.f32 0.00390625, %v4519_v9  ;;  %v5031_v63 = vadd.f32 %v5030_v53, %v4393_v51  ;;  %v5105_v49 = vadd.f32 %v5104_v54, %v4395_v38 }
 0x1e4   :  { %v5068_v35 = vadd.f32 %v5067_v27, %v4394_v46  ;;  %v5142_v60 = vadd.f32 %v5141_v28, %v4396_v37  ;;  %v1301_v43 = vpop.f32.mrb[128].mxu0  ;;  %v1654_v45 = vpop.f32.mrb[128].mxu1  ;;  %v9357_v62 = vmul.f32 0.00390625, %v4556_v34 }
 0x1e5   :  { %v5032_v55 = vrot.slane %v5031_v63, 4  ;;  %v5106_v56 = vrot.slane %v5105_v49, 4  ;;  %v1302_v10 = vadd.f32 %v1301_v43, %v9317_v48  ;;  %v1655_v13 = vadd.f32 %v1654_v45, %v9326_v42  ;;  %v1303_v8 = vpop.f32.mrb[129].mxu0  ;;  %v1656_v21 = vpop.f32.mrb[129].mxu1 }
 0x1e6   :  { %v5069_v24 = vrot.slane %v5068_v35, 4  ;;  %v5143_v9 = vrot.slane %v5142_v60, 4  ;;  %v1304_v58 = vadd.f32 %v1303_v8, %v9321_v0  ;;  %v1657_v23 = vadd.f32 %v1656_v21, %v9330_v7  ;;  %v1305_v33 = vpop.f32.mrb[130].mxu0  ;;  %v1658_v40 = vpop.f32.mrb[130].mxu1 }
 0x1e7   :  { %v5033_v11 = vadd.f32 %v5032_v55, %v5031_v63  ;;  %v5107_v36 = vadd.f32 %v5106_v56, %v5105_v49  ;;  %v3389_v12 = vmax.f32 %v1302_v10, 0.0  ;;  %v3391_v50 = vmax.f32 %v1655_v13, 0.0  ;;  %v1307_v5 = vpop.f32.mrb[131].mxu0  ;;  %v1660_v34 = vpop.f32.mrb[131].mxu1 }
 0x1e8   :  { %v5070_v31 = vadd.f32 %v5069_v24, %v5068_v35  ;;  %v5144_v32 = vadd.f32 %v5143_v9, %v5142_v60  ;;  %v3390_v41 = vmax.f32 %v1304_v58, 0.0  ;;  %v3392_v1 = vmax.f32 %v1657_v23, 0.0 }
 0x1e9   :  { %v5034_v2 = vrot.slane %v5033_v11, 2  ;;  %v5108_v61 = vrot.slane %v5107_v36, 2  ;;  %v1306_v57 = vadd.f32 %v1305_v33, %v9317_v48  ;;  %v1659_v6 = vadd.f32 %v1658_v40, %v9326_v42  ;;  %6947 = vmatmul.mubr.msk.bf16.gmra.mrb[236].mxu0 %vm412_vm2, %v8355_v39  ;;  %6979 = vmatmul.mubr.msk.bf16.gmra.mrb[236].mxu1 %vm412_vm2, %v8355_v39 }
 0x1ea   :  { %v5071_v52 = vrot.slane %v5070_v31, 2  ;;  %v5145_v53 = vrot.slane %v5144_v32, 2  ;;  %v1308_v54 = vadd.f32 %v1307_v5, %v9321_v0  ;;  %v1661_v51 = vadd.f32 %v1660_v34, %v9330_v7  ;;  %1579 = vmatprep.mubr.bf16.mxu0 %v8450_v3  ;;  %1932 = vmatprep.mubr.bf16.mxu1 %v8450_v3 }
 0x1eb   :  { %v5035_v38 = vadd.f32 %v5034_v2, %v5033_v11  ;;  %v5109_v44 = vadd.f32 %v5108_v61, %v5107_v36  ;;  %v3405_v27 = vmax.f32 %v1306_v57, 0.0  ;;  %v3407_v28 = vmax.f32 %v1659_v6, 0.0  ;;  %v8356_v57 = vld [vmem:[%s11233_s0 + $0xe0] sm:$0xff]  }
 0x1ec   :  { %v3406_v46 = vmax.f32 %v1308_v54, 0.0  ;;  %v3408_v37 = vmax.f32 %v1661_v51, 0.0  ;;  %v1311_v63 = vpop.f32.mrb[132].mxu0  ;;  %v1664_v49 = vpop.f32.mrb[132].mxu1  ;;  %v5072_v35 = vadd.f32 %v5071_v52, %v5070_v31  ;;  %v5146_v60 = vadd.f32 %v5145_v53, %v5144_v32 }
 0x1ed   :  { %v5036_v43 = vrot.slane %v5035_v38, 1  ;;  %v5110_v45 = vrot.slane %v5109_v44, 1  ;;  %v4557_v55 = vadd.f32 %v3405_v27, %v3389_v12  ;;  %v4631_v56 = vadd.f32 %v3407_v28, %v3391_v50  ;;  %v1313_v10 = vpop.f32.mrb[133].mxu0  ;;  %v1666_v13 = vpop.f32.mrb[133].mxu1 }
 0x1ee   :  { %v4594_v8 = vadd.f32 %v3406_v46, %v3390_v41  ;;  %v4668_v21 = vadd.f32 %v3408_v37, %v3392_v1  ;;  %v1312_v24 = vadd.f32 %v1311_v63, %v9317_v48  ;;  %v1665_v9 = vadd.f32 %v1664_v49, %v9326_v42  ;;  %v1315_v58 = vpop.f32.mrb[134].mxu0  ;;  %v1668_v23 = vpop.f32.mrb[134].mxu1 }
 0x1ef   :  { %v5037_v33 = vadd.f32 %v5036_v43, %v5035_v38  ;;  %v5111_v40 = vadd.f32 %v5110_v45, %v5109_v44  ;;  %v1314_v11 = vadd.f32 %v1313_v10, %v9321_v0  ;;  %v1667_v36 = vadd.f32 %v1666_v13, %v9330_v7  ;;  %v1317_v5 = vpop.f32.mrb[135].mxu0  ;;  %v1670_v34 = vpop.f32.mrb[135].mxu1 }
 0x1f0   :  { %v3421_v12 = vmax.f32 %v1312_v24, 0.0  ;;  %v3423_v50 = vmax.f32 %v1665_v9, 0.0  ;;  %v1316_v31 = vadd.f32 %v1315_v58, %v9317_v48  ;;  %v1669_v32 = vadd.f32 %v1668_v23, %v9326_v42 }
 0x1f1   :  { %v9380_v41 = vmul.f32 0.00390625, %v5037_v33  ;;  %v9382_v1 = vmul.f32 0.00390625, %v5111_v40  ;;  %v3422_v2 = vmax.f32 %v1314_v11, 0.0  ;;  %v3424_v61 = vmax.f32 %v1667_v36, 0.0  ;;  %6948 = vmatmul.mubr.msk.bf16.gmra.mrb[240].mxu0 %vm412_vm2, %v8356_v57  ;;  %6980 = vmatmul.mubr.msk.bf16.gmra.mrb[240].mxu1 %vm412_vm2, %v8356_v57 }
 0x1f2   :  { %v4558_v6 = vadd.f32 %v4557_v55, %v3421_v12  ;;  %v4632_v39 = vadd.f32 %v4631_v56, %v3423_v50  ;;  %v3437_v52 = vmax.f32 %v1316_v31, 0.0  ;;  %v3439_v53 = vmax.f32 %v1669_v32, 0.0  ;;  %1589 = vmatprep.mubr.bf16.mxu0 %v8450_v3  ;;  %1942 = vmatprep.mubr.bf16.mxu1 %v8450_v3 }
 0x1f3   :  { %v4595_v54 = vadd.f32 %v4594_v8, %v3422_v2  ;;  %v4669_v51 = vadd.f32 %v4668_v21, %v3424_v61  ;;  %v1318_v38 = vadd.f32 %v1317_v5, %v9321_v0  ;;  %v1671_v44 = vadd.f32 %v1670_v34, %v9330_v7 }
 0x1f4   :  { %v4559_v27 = vadd.f32 %v4558_v6, %v3437_v52  ;;  %v4633_v28 = vadd.f32 %v4632_v39, %v3439_v53  ;;  %v1321_v46 = vpop.f32.mrb[136].mxu0  ;;  %v1674_v37 = vpop.f32.mrb[136].mxu1  ;;  %v5073_v63 = vrot.slane %v5072_v35, 1  ;;  %v5147_v49 = vrot.slane %v5146_v60, 1 }
 0x1f5   :  { %v3438_v43 = vmax.f32 %v1318_v38, 0.0  ;;  %v3440_v45 = vmax.f32 %v1671_v44, 0.0  ;;  %v1322_v55 = vadd.f32 %v1321_v46, %v9317_v48  ;;  %v1675_v56 = vadd.f32 %v1674_v37, %v9326_v42  ;;  %v1323_v10 = vpop.f32.mrb[137].mxu0  ;;  %v1676_v13 = vpop.f32.mrb[137].mxu1 }
 0x1f6   :  { %v1324_v8 = vadd.f32 %v1323_v10, %v9321_v0  ;;  %v1677_v21 = vadd.f32 %v1676_v13, %v9330_v7  ;;  %v1325_v24 = vpop.f32.mrb[138].mxu0  ;;  %v1678_v9 = vpop.f32.mrb[138].mxu1  ;;  %v5074_v58 = vadd.f32 %v5073_v63, %v5072_v35  ;;  %v5148_v23 = vadd.f32 %v5147_v49, %v5146_v60  ;;  %v8357_v35 = vld [vmem:[%s11233_s0 + $0xe8] sm:$0xff]  }
 0x1f7   :  { %v4596_v33 = vadd.f32 %v4595_v54, %v3438_v43  ;;  %v4670_v40 = vadd.f32 %v4669_v51, %v3440_v45  ;;  %v3453_v11 = vmax.f32 %v1322_v55, 0.0  ;;  %v3455_v36 = vmax.f32 %v1675_v56, 0.0  ;;  %v1327_v5 = vpop.f32.mrb[139].mxu0  ;;  %v1680_v34 = vpop.f32.mrb[139].mxu1 }
 0x1f8   :  { %v3454_v12 = vmax.f32 %v1324_v8, 0.0  ;;  %v3456_v50 = vmax.f32 %v1677_v21, 0.0  ;;  %v1326_v31 = vadd.f32 %v1325_v24, %v9317_v48  ;;  %v1679_v32 = vadd.f32 %v1678_v9, %v9326_v42 }
 0x1f9   :  { %v4560_v2 = vadd.f32 %v4559_v27, %v3453_v11  ;;  %v4634_v61 = vadd.f32 %v4633_v28, %v3455_v36  ;;  %v1328_v57 = vadd.f32 %v1327_v5, %v9321_v0  ;;  %v1681_v6 = vadd.f32 %v1680_v34, %v9330_v7  ;;  %6949 = vmatmul.mubr.msk.bf16.gmra.mrb[244].mxu0 %vm412_vm2, %v8357_v35 }
 0x1fa   :  { %v4597_v60 = vadd.f32 %v4596_v33, %v3454_v12  ;;  %v4671_v39 = vadd.f32 %v4670_v40, %v3456_v50  ;;  %v3469_v52 = vmax.f32 %v1326_v31, 0.0  ;;  %v3471_v53 = vmax.f32 %v1679_v32, 0.0  ;;  %6981 = vmatmul.mubr.msk.bf16.gmra.mrb[244].mxu1 %vm412_vm2, %v8357_v35  ;;  %1599 = vmatprep.mubr.bf16.mxu0 %v8450_v3 }
 0x1fb   :  { %v3470_v54 = vmax.f32 %v1328_v57, 0.0  ;;  %v3472_v51 = vmax.f32 %v1681_v6, 0.0  ;;  %1952 = vmatprep.mubr.bf16.mxu1 %v8450_v3  ;;  %v5611_v38 = vmul.f32 0.00390625, %v5074_v58  ;;  %v5613_v44 = vmul.f32 0.00390625, %v5148_v23 }
 0x1fc   :  { %v4561_v27 = vadd.f32 %v4560_v2, %v3469_v52  ;;  %v4635_v28 = vadd.f32 %v4634_v61, %v3471_v53  ;;  %v1331_v46 = vpop.f32.mrb[140].mxu0  ;;  %v1684_v37 = vpop.f32.mrb[140].mxu1  ;;  %v9411_v63 = vsel %vm6177_vm3, %v9380_v41, %v9350_v29  ;;  %v9416_v49 = vsel %vm6177_vm3, %v9382_v1, %v9352_v30 }
 0x1fd   :  { %v4598_v43 = vadd.f32 %v4597_v60, %v3470_v54  ;;  %v4672_v45 = vadd.f32 %v4671_v39, %v3472_v51  ;;  %v1332_v55 = vadd.f32 %v1331_v46, %v9317_v48  ;;  %v1685_v56 = vadd.f32 %v1684_v37, %v9326_v42  ;;  %v1333_v10 = vpop.f32.mrb[141].mxu0  ;;  %v1686_v13 = vpop.f32.mrb[141].mxu1 }
 0x1fe   :  { %v1334_v8 = vadd.f32 %v1333_v10, %v9321_v0  ;;  %v1687_v21 = vadd.f32 %v1686_v13, %v9330_v7  ;;  %v1335_v24 = vpop.f32.mrb[142].mxu0  ;;  %v1688_v29 = vpop.f32.mrb[142].mxu1  ;;  %v9424_v41 = vsel %vm6177_vm3, %v5611_v38, %v9355_v47  ;;  %v9428_v30 = vsel %vm6177_vm3, %v5613_v44, %v9357_v62  ;;  %v8358_v62 = vld [vmem:[%s11233_s0 + $0xf0] sm:$0xff]  }
 0x1ff   :  { %v3485_v1 = vmax.f32 %v1332_v55, 0.0  ;;  %v3487_v9 = vmax.f32 %v1685_v56, 0.0  ;;  %v1336_v58 = vadd.f32 %v1335_v24, %v9317_v48  ;;  %v1689_v23 = vadd.f32 %v1688_v29, %v9326_v42  ;;  %v1337_v33 = vpop.f32.mrb[143].mxu0  ;;  %v1690_v40 = vpop.f32.mrb[143].mxu1 }
 0x200   :  { %v3486_v11 = vmax.f32 %v1334_v8, 0.0  ;;  %v3488_v36 = vmax.f32 %v1687_v21, 0.0  ;;  %v1338_v5 = vadd.f32 %v1337_v33, %v9321_v0  ;;  %v1691_v34 = vadd.f32 %v1690_v40, %v9330_v7  ;;  %v8359_v33 = vld [vmem:[%s11233_s0 + $0xf8] sm:$0xff]  }
 0x201   :  { %v4562_v47 = vadd.f32 %v4561_v27, %v3485_v1  ;;  %v4636_v12 = vadd.f32 %v4635_v28, %v3487_v9  ;;  %v3501_v50 = vmax.f32 %v1336_v58, 0.0  ;;  %v3503_v31 = vmax.f32 %v1689_v23, 0.0  ;;  %6950 = vmatmul.mubr.msk.bf16.gmra.mrb[248].mxu0 %vm412_vm2, %v8358_v62 }
 0x202   :  { %v4599_v32 = vadd.f32 %v4598_v43, %v3486_v11  ;;  %v4673_v2 = vadd.f32 %v4672_v45, %v3488_v36  ;;  %v3502_v61 = vmax.f32 %v1338_v5, 0.0  ;;  %v3504_v57 = vmax.f32 %v1691_v34, 0.0  ;;  %6982 = vmatmul.mubr.msk.bf16.gmra.mrb[248].mxu1 %vm412_vm2, %v8358_v62  ;;  %1609 = vmatprep.mubr.bf16.mxu0 %v8450_v3 }
 0x203   :  { %v4563_v6 = vadd.f32 %v4562_v47, %v3501_v50  ;;  %v4637_v35 = vadd.f32 %v4636_v12, %v3503_v31  ;;  %1962 = vmatprep.mubr.bf16.mxu1 %v8450_v3 }
 0x204   :  { %v4600_v60 = vadd.f32 %v4599_v32, %v3502_v61  ;;  %v4674_v39 = vadd.f32 %v4673_v2, %v3504_v57  ;;  %v1341_v52 = vpop.f32.mrb[144].mxu0  ;;  %v1694_v53 = vpop.f32.mrb[144].mxu1 }
 0x205   :  { %v1342_v54 = vadd.f32 %v1341_v52, %v9317_v48  ;;  %v1695_v51 = vadd.f32 %v1694_v53, %v9326_v42  ;;  %v1343_v38 = vpop.f32.mrb[145].mxu0  ;;  %v1696_v44 = vpop.f32.mrb[145].mxu1  ;;  %v550_v52 = vand.u32 %v8529_v22, %v9135_v14  ;;  %v556_v53 = vand.u32 %v8529_v22, %v9151_v59  ;;  %v8360_v22 = vld [vmem:[%s11233_s0] sm:$0xff]  }
 0x206   :  { %v1344_v27 = vadd.f32 %v1343_v38, %v9321_v0  ;;  %v1697_v28 = vadd.f32 %v1696_v44, %v9330_v7  ;;  %v1345_v46 = vpop.f32.mrb[146].mxu0  ;;  %v1698_v37 = vpop.f32.mrb[146].mxu1 }
 0x207   :  { %v3517_v43 = vmax.f32 %v1342_v54, 0.0  ;;  %v3519_v45 = vmax.f32 %v1695_v51, 0.0  ;;  %v1346_v55 = vadd.f32 %v1345_v46, %v9317_v48  ;;  %v1699_v56 = vadd.f32 %v1698_v37, %v9326_v42  ;;  %v1347_v10 = vpop.f32.mrb[147].mxu0  ;;  %v1700_v13 = vpop.f32.mrb[147].mxu1 }
 0x208   :  { %v3518_v8 = vmax.f32 %v1344_v27, 0.0  ;;  %v3520_v21 = vmax.f32 %v1697_v28, 0.0  ;;  %v1348_v24 = vadd.f32 %v1347_v10, %v9321_v0  ;;  %v1701_v29 = vadd.f32 %v1700_v13, %v9330_v7 }
 0x209   :  { %v4564_v1 = vadd.f32 %v4563_v6, %v3517_v43  ;;  %v4638_v9 = vadd.f32 %v4637_v35, %v3519_v45  ;;  %v3533_v58 = vmax.f32 %v1346_v55, 0.0  ;;  %v3535_v23 = vmax.f32 %v1699_v56, 0.0  ;;  %6951 = vmatmul.mubr.msk.bf16.gmra.mrb[252].mxu0 %vm412_vm2, %v8359_v33 }
 0x20a   :  { %v4601_v40 = vadd.f32 %v4600_v60, %v3518_v8  ;;  %v4675_v11 = vadd.f32 %v4674_v39, %v3520_v21  ;;  %v3534_v36 = vmax.f32 %v1348_v24, 0.0  ;;  %v3536_v5 = vmax.f32 %v1701_v29, 0.0  ;;  %6983 = vmatmul.mubr.msk.bf16.gmra.mrb[252].mxu1 %vm412_vm2, %v8359_v33  ;;  %2005 = vmatprep.mubr.bf16.mxu0 %v8450_v3 }
 0x20b   :  { %v4565_v34 = vadd.f32 %v4564_v1, %v3533_v58  ;;  %v4639_v47 = vadd.f32 %v4638_v9, %v3535_v23  ;;  %2358 = vmatprep.mubr.bf16.mxu1 %v8450_v3 }
 0x20c   :  { %v4602_v12 = vadd.f32 %v4601_v40, %v3534_v36  ;;  %v4676_v50 = vadd.f32 %v4675_v11, %v3536_v5  ;;  %v1351_v31 = vpop.f32.mrb[148].mxu0  ;;  %v1704_v62 = vpop.f32.mrb[148].mxu1 }
 0x20d   :  { %v1352_v32 = vadd.f32 %v1351_v31, %v9317_v48  ;;  %v1705_v2 = vadd.f32 %v1704_v62, %v9326_v42  ;;  %v1353_v61 = vpop.f32.mrb[149].mxu0  ;;  %v1706_v57 = vpop.f32.mrb[149].mxu1 }
 0x20e   :  { %v1354_v6 = vadd.f32 %v1353_v61, %v9321_v0  ;;  %v1707_v35 = vadd.f32 %v1706_v57, %v9330_v7  ;;  %v1355_v60 = vpop.f32.mrb[150].mxu0  ;;  %v1708_v39 = vpop.f32.mrb[150].mxu1 }
 0x20f   :  { %v3549_v54 = vmax.f32 %v1352_v32, 0.0  ;;  %v3551_v51 = vmax.f32 %v1705_v2, 0.0  ;;  %v1356_v38 = vadd.f32 %v1355_v60, %v9317_v48  ;;  %v1709_v44 = vadd.f32 %v1708_v39, %v9326_v42  ;;  %v1357_v27 = vpop.f32.mrb[151].mxu0  ;;  %v1710_v28 = vpop.f32.mrb[151].mxu1 }
 0x210   :  { %v3550_v46 = vmax.f32 %v1354_v6, 0.0  ;;  %v3552_v37 = vmax.f32 %v1707_v35, 0.0  ;;  %v1358_v43 = vadd.f32 %v1357_v27, %v9321_v0  ;;  %v1711_v45 = vadd.f32 %v1710_v28, %v9330_v7 }
 0x211   :  { %v4566_v55 = vadd.f32 %v4565_v34, %v3549_v54  ;;  %v4640_v56 = vadd.f32 %v4639_v47, %v3551_v51  ;;  %v3565_v14 = vmax.f32 %v1356_v38, 0.0  ;;  %v3567_v10 = vmax.f32 %v1709_v44, 0.0  ;;  %6984 = vmatmul.mubr.msk.bf16.vlgmr.msra.gmra.mrb[0].mxu0 %vm412_vm2, %v8360_v22  ;;  %v8361_v51 = vld [vmem:[%s11233_s0 + $0x8] sm:$0xff]  }
 0x212   :  { %v4603_v59 = vadd.f32 %v4602_v12, %v3550_v46  ;;  %v4677_v13 = vadd.f32 %v4676_v50, %v3552_v37  ;;  %v3566_v8 = vmax.f32 %v1358_v43, 0.0  ;;  %v3568_v21 = vmax.f32 %v1711_v45, 0.0  ;;  %7016 = vmatmul.mubr.msk.bf16.vlgmr.msra.gmra.mrb[0].mxu1 %vm412_vm2, %v8360_v22  ;;  %2680 = vmatpush1.bf16.msra.mxu0 %v550_v52 }
 0x213   :  { %v4567_v24 = vadd.f32 %v4566_v55, %v3565_v14  ;;  %v4641_v29 = vadd.f32 %v4640_v56, %v3567_v10  ;;  %3033 = vmatpush1.bf16.msra.mxu1 %v556_v53  ;;  %2015 = vmatprep.mubr.bf16.mxu0 %v8450_v3 }
 0x214   :  { %v4604_v1 = vadd.f32 %v4603_v59, %v3566_v8  ;;  %v4678_v9 = vadd.f32 %v4677_v13, %v3568_v21  ;;  %v1361_v58 = vpop.f32.mrb[152].mxu0  ;;  %v1714_v23 = vpop.f32.mrb[152].mxu1  ;;  %2368 = vmatprep.mubr.bf16.mxu1 %v8450_v3 }
 0x215   :  { %v1362_v33 = vadd.f32 %v1361_v58, %v9317_v48  ;;  %v1715_v40 = vadd.f32 %v1714_v23, %v9326_v42  ;;  %v1363_v11 = vpop.f32.mrb[153].mxu0  ;;  %v1716_v36 = vpop.f32.mrb[153].mxu1 }
 0x216   :  { %v1364_v5 = vadd.f32 %v1363_v11, %v9321_v0  ;;  %v1717_v34 = vadd.f32 %v1716_v36, %v9330_v7  ;;  %v1365_v47 = vpop.f32.mrb[154].mxu0  ;;  %v1718_v12 = vpop.f32.mrb[154].mxu1 }
 0x217   :  { %v3581_v50 = vmax.f32 %v1362_v33, 0.0  ;;  %v3583_v31 = vmax.f32 %v1715_v40, 0.0  ;;  %v1366_v62 = vadd.f32 %v1365_v47, %v9317_v48  ;;  %v1719_v32 = vadd.f32 %v1718_v12, %v9326_v42  ;;  %v1367_v2 = vpop.f32.mrb[155].mxu0  ;;  %v1720_v61 = vpop.f32.mrb[155].mxu1 }
 0x218   :  { %v3582_v57 = vmax.f32 %v1364_v5, 0.0  ;;  %v3584_v6 = vmax.f32 %v1717_v34, 0.0  ;;  %v1368_v35 = vadd.f32 %v1367_v2, %v9321_v0  ;;  %v1721_v60 = vadd.f32 %v1720_v61, %v9330_v7 }
 0x219   :  { %v4568_v39 = vadd.f32 %v4567_v24, %v3581_v50  ;;  %v4642_v52 = vadd.f32 %v4641_v29, %v3583_v31  ;;  %v3597_v53 = vmax.f32 %v1366_v62, 0.0  ;;  %v3599_v54 = vmax.f32 %v1719_v32, 0.0  ;;  %6985 = vmatmul.mubr.msk.bf16.gmra.mrb[4].mxu0 %vm412_vm2, %v8361_v51  ;;  %v8362_v31 = vld [vmem:[%s11233_s0 + $0x10] sm:$0xff]  }
 0x21a   :  { %v4605_v38 = vadd.f32 %v4604_v1, %v3582_v57  ;;  %v4679_v44 = vadd.f32 %v4678_v9, %v3584_v6  ;;  %v3598_v27 = vmax.f32 %v1368_v35, 0.0  ;;  %v3600_v28 = vmax.f32 %v1721_v60, 0.0  ;;  %7017 = vmatmul.mubr.msk.bf16.gmra.mrb[4].mxu1 %vm412_vm2, %v8361_v51  ;;  %2025 = vmatprep.mubr.bf16.mxu0 %v8450_v3 }
 0x21b   :  { %v4569_v46 = vadd.f32 %v4568_v39, %v3597_v53  ;;  %v4643_v37 = vadd.f32 %v4642_v52, %v3599_v54  ;;  %2378 = vmatprep.mubr.bf16.mxu1 %v8450_v3 }
 0x21c   :  { %v4606_v43 = vadd.f32 %v4605_v38, %v3598_v27  ;;  %v4680_v45 = vadd.f32 %v4679_v44, %v3600_v28  ;;  %v1371_v55 = vpop.f32.mrb[156].mxu0  ;;  %v1724_v56 = vpop.f32.mrb[156].mxu1 }
 0x21d   :  { %v1372_v14 = vadd.f32 %v1371_v55, %v9317_v48  ;;  %v1725_v10 = vadd.f32 %v1724_v56, %v9326_v42  ;;  %v1373_v22 = vpop.f32.mrb[157].mxu0  ;;  %v1726_v59 = vpop.f32.mrb[157].mxu1 }
 0x21e   :  { %v1374_v13 = vadd.f32 %v1373_v22, %v9321_v0  ;;  %v1727_v8 = vadd.f32 %v1726_v59, %v9330_v7  ;;  %v1375_v21 = vpop.f32.mrb[158].mxu0  ;;  %v1728_v24 = vpop.f32.mrb[158].mxu1 }
 0x21f   :  { %v3613_v29 = vmax.f32 %v1372_v14, 0.0  ;;  %v3615_v1 = vmax.f32 %v1725_v10, 0.0  ;;  %v1376_v9 = vadd.f32 %v1375_v21, %v9317_v48  ;;  %v1729_v58 = vadd.f32 %v1728_v24, %v9326_v42  ;;  %v1377_v23 = vpop.f32.mrb[159].mxu0  ;;  %v1730_v33 = vpop.f32.mrb[159].mxu1 }
 0x220   :  { %v3614_v40 = vmax.f32 %v1374_v13, 0.0  ;;  %v3616_v11 = vmax.f32 %v1727_v8, 0.0  ;;  %v1378_v36 = vadd.f32 %v1377_v23, %v9321_v0  ;;  %v1731_v5 = vadd.f32 %v1730_v33, %v9330_v7 }
 0x221   :  { %v4570_v34 = vadd.f32 %v4569_v46, %v3613_v29  ;;  %v4644_v47 = vadd.f32 %v4643_v37, %v3615_v1  ;;  %v3629_v12 = vmax.f32 %v1376_v9, 0.0  ;;  %v3631_v50 = vmax.f32 %v1729_v58, 0.0  ;;  %6986 = vmatmul.mubr.msk.bf16.gmra.mrb[8].mxu0 %vm412_vm2, %v8362_v31  ;;  %v8363_v1 = vld [vmem:[%s11233_s0 + $0x18] sm:$0xff]  }
 0x222   :  { %v4607_v62 = vadd.f32 %v4606_v43, %v3614_v40  ;;  %v4681_v32 = vadd.f32 %v4680_v45, %v3616_v11  ;;  %v3630_v2 = vmax.f32 %v1378_v36, 0.0  ;;  %v3632_v61 = vmax.f32 %v1731_v5, 0.0  ;;  %7018 = vmatmul.mubr.msk.bf16.gmra.mrb[8].mxu1 %vm412_vm2, %v8362_v31  ;;  %2035 = vmatprep.mubr.bf16.mxu0 %v8450_v3 }
 0x223   :  { %v4571_v57 = vadd.f32 %v4570_v34, %v3629_v12  ;;  %v4645_v6 = vadd.f32 %v4644_v47, %v3631_v50  ;;  %2388 = vmatprep.mubr.bf16.mxu1 %v8450_v3 }
 0x224   :  { %v4608_v35 = vadd.f32 %v4607_v62, %v3630_v2  ;;  %v4682_v60 = vadd.f32 %v4681_v32, %v3632_v61  ;;  %v1381_v39 = vpop.f32.mrb[160].mxu0  ;;  %v1734_v52 = vpop.f32.mrb[160].mxu1 }
 0x225   :  { %v1382_v53 = vadd.f32 %v1381_v39, %v9317_v48  ;;  %v1735_v54 = vadd.f32 %v1734_v52, %v9326_v42  ;;  %v1383_v51 = vpop.f32.mrb[161].mxu0  ;;  %v1736_v38 = vpop.f32.mrb[161].mxu1 }
 0x226   :  { %v1384_v44 = vadd.f32 %v1383_v51, %v9321_v0  ;;  %v1737_v27 = vadd.f32 %v1736_v38, %v9330_v7  ;;  %v1385_v28 = vpop.f32.mrb[162].mxu0  ;;  %v1738_v46 = vpop.f32.mrb[162].mxu1 }
 0x227   :  { %v3645_v37 = vmax.f32 %v1382_v53, 0.0  ;;  %v3647_v43 = vmax.f32 %v1735_v54, 0.0  ;;  %v1386_v45 = vadd.f32 %v1385_v28, %v9317_v48  ;;  %v1739_v55 = vadd.f32 %v1738_v46, %v9326_v42  ;;  %v1387_v56 = vpop.f32.mrb[163].mxu0  ;;  %v1740_v14 = vpop.f32.mrb[163].mxu1 }
 0x228   :  { %v3646_v10 = vmax.f32 %v1384_v44, 0.0  ;;  %v3648_v22 = vmax.f32 %v1737_v27, 0.0  ;;  %v1388_v59 = vadd.f32 %v1387_v56, %v9321_v0  ;;  %v1741_v13 = vadd.f32 %v1740_v14, %v9330_v7 }
 0x229   :  { %v4572_v8 = vadd.f32 %v4571_v57, %v3645_v37  ;;  %v4646_v21 = vadd.f32 %v4645_v6, %v3647_v43  ;;  %v3661_v24 = vmax.f32 %v1386_v45, 0.0  ;;  %v3663_v29 = vmax.f32 %v1739_v55, 0.0  ;;  %6987 = vmatmul.mubr.msk.bf16.gmra.mrb[12].mxu0 %vm412_vm2, %v8363_v1  ;;  %v8364_v43 = vld [vmem:[%s11233_s0 + $0x20] sm:$0xff]  }
 0x22a   :  { %v4609_v9 = vadd.f32 %v4608_v35, %v3646_v10  ;;  %v4683_v58 = vadd.f32 %v4682_v60, %v3648_v22  ;;  %v3662_v23 = vmax.f32 %v1388_v59, 0.0  ;;  %v3664_v33 = vmax.f32 %v1741_v13, 0.0  ;;  %7019 = vmatmul.mubr.msk.bf16.gmra.mrb[12].mxu1 %vm412_vm2, %v8363_v1  ;;  %2045 = vmatprep.mubr.bf16.mxu0 %v8450_v3 }
 0x22b   :  { %v4573_v40 = vadd.f32 %v4572_v8, %v3661_v24  ;;  %v4647_v11 = vadd.f32 %v4646_v21, %v3663_v29  ;;  %2398 = vmatprep.mubr.bf16.mxu1 %v8450_v3 }
 0x22c   :  { %v4610_v36 = vadd.f32 %v4609_v9, %v3662_v23  ;;  %v4684_v5 = vadd.f32 %v4683_v58, %v3664_v33  ;;  %v1391_v34 = vpop.f32.mrb[164].mxu0  ;;  %v1744_v47 = vpop.f32.mrb[164].mxu1 }
 0x22d   :  { %v1392_v12 = vadd.f32 %v1391_v34, %v9317_v48  ;;  %v1745_v50 = vadd.f32 %v1744_v47, %v9326_v42  ;;  %v1393_v31 = vpop.f32.mrb[165].mxu0  ;;  %v1746_v62 = vpop.f32.mrb[165].mxu1 }
 0x22e   :  { %v1394_v32 = vadd.f32 %v1393_v31, %v9321_v0  ;;  %v1747_v2 = vadd.f32 %v1746_v62, %v9330_v7  ;;  %v1395_v61 = vpop.f32.mrb[166].mxu0  ;;  %v1748_v57 = vpop.f32.mrb[166].mxu1 }
 0x22f   :  { %v3677_v6 = vmax.f32 %v1392_v12, 0.0  ;;  %v3679_v35 = vmax.f32 %v1745_v50, 0.0  ;;  %v1396_v60 = vadd.f32 %v1395_v61, %v9317_v48  ;;  %v1749_v39 = vadd.f32 %v1748_v57, %v9326_v42  ;;  %v1397_v52 = vpop.f32.mrb[167].mxu0  ;;  %v1750_v53 = vpop.f32.mrb[167].mxu1 }
 0x230   :  { %v3678_v54 = vmax.f32 %v1394_v32, 0.0  ;;  %v3680_v51 = vmax.f32 %v1747_v2, 0.0  ;;  %v1398_v38 = vadd.f32 %v1397_v52, %v9321_v0  ;;  %v1751_v44 = vadd.f32 %v1750_v53, %v9330_v7 }
 0x231   :  { %v4574_v27 = vadd.f32 %v4573_v40, %v3677_v6  ;;  %v4648_v28 = vadd.f32 %v4647_v11, %v3679_v35  ;;  %v3693_v46 = vmax.f32 %v1396_v60, 0.0  ;;  %v3695_v37 = vmax.f32 %v1749_v39, 0.0  ;;  %6988 = vmatmul.mubr.msk.bf16.gmra.mrb[16].mxu0 %vm412_vm2, %v8364_v43  ;;  %v8365_v35 = vld [vmem:[%s11233_s0 + $0x28] sm:$0xff]  }
 0x232   :  { %v4611_v45 = vadd.f32 %v4610_v36, %v3678_v54  ;;  %v4685_v55 = vadd.f32 %v4684_v5, %v3680_v51  ;;  %v3694_v56 = vmax.f32 %v1398_v38, 0.0  ;;  %v3696_v14 = vmax.f32 %v1751_v44, 0.0  ;;  %7020 = vmatmul.mubr.msk.bf16.gmra.mrb[16].mxu1 %vm412_vm2, %v8364_v43  ;;  %2055 = vmatprep.mubr.bf16.mxu0 %v8450_v3 }
 0x233   :  { %v4575_v10 = vadd.f32 %v4574_v27, %v3693_v46  ;;  %v4649_v22 = vadd.f32 %v4648_v28, %v3695_v37  ;;  %2408 = vmatprep.mubr.bf16.mxu1 %v8450_v3 }
 0x234   :  { %v4612_v59 = vadd.f32 %v4611_v45, %v3694_v56  ;;  %v4686_v13 = vadd.f32 %v4685_v55, %v3696_v14  ;;  %v1401_v8 = vpop.f32.mrb[168].mxu0  ;;  %v1754_v21 = vpop.f32.mrb[168].mxu1 }
 0x235   :  { %v1402_v24 = vadd.f32 %v1401_v8, %v9317_v48  ;;  %v1755_v29 = vadd.f32 %v1754_v21, %v9326_v42  ;;  %v1403_v1 = vpop.f32.mrb[169].mxu0  ;;  %v1756_v9 = vpop.f32.mrb[169].mxu1 }
 0x236   :  { %v1404_v58 = vadd.f32 %v1403_v1, %v9321_v0  ;;  %v1757_v23 = vadd.f32 %v1756_v9, %v9330_v7  ;;  %v1405_v33 = vpop.f32.mrb[170].mxu0  ;;  %v1758_v40 = vpop.f32.mrb[170].mxu1 }
 0x237   :  { %v3709_v11 = vmax.f32 %v1402_v24, 0.0  ;;  %v3711_v36 = vmax.f32 %v1755_v29, 0.0  ;;  %v1406_v5 = vadd.f32 %v1405_v33, %v9317_v48  ;;  %v1759_v34 = vadd.f32 %v1758_v40, %v9326_v42  ;;  %v1407_v47 = vpop.f32.mrb[171].mxu0  ;;  %v1760_v12 = vpop.f32.mrb[171].mxu1 }
 0x238   :  { %v3710_v50 = vmax.f32 %v1404_v58, 0.0  ;;  %v3712_v31 = vmax.f32 %v1757_v23, 0.0  ;;  %v1408_v62 = vadd.f32 %v1407_v47, %v9321_v0  ;;  %v1761_v32 = vadd.f32 %v1760_v12, %v9330_v7 }
 0x239   :  { %v4576_v2 = vadd.f32 %v4575_v10, %v3709_v11  ;;  %v4650_v61 = vadd.f32 %v4649_v22, %v3711_v36  ;;  %v3725_v57 = vmax.f32 %v1406_v5, 0.0  ;;  %v3727_v6 = vmax.f32 %v1759_v34, 0.0  ;;  %6989 = vmatmul.mubr.msk.bf16.gmra.mrb[20].mxu0 %vm412_vm2, %v8365_v35  ;;  %v8366_v36 = vld [vmem:[%s11233_s0 + $0x30] sm:$0xff]  }
 0x23a   :  { %v4613_v60 = vadd.f32 %v4612_v59, %v3710_v50  ;;  %v4687_v39 = vadd.f32 %v4686_v13, %v3712_v31  ;;  %v3726_v52 = vmax.f32 %v1408_v62, 0.0  ;;  %v3728_v53 = vmax.f32 %v1761_v32, 0.0  ;;  %7021 = vmatmul.mubr.msk.bf16.gmra.mrb[20].mxu1 %vm412_vm2, %v8365_v35  ;;  %2065 = vmatprep.mubr.bf16.mxu0 %v8450_v3 }
 0x23b   :  { %v4577_v54 = vadd.f32 %v4576_v2, %v3725_v57  ;;  %v4651_v51 = vadd.f32 %v4650_v61, %v3727_v6  ;;  %2418 = vmatprep.mubr.bf16.mxu1 %v8450_v3 }
 0x23c   :  { %v4614_v38 = vadd.f32 %v4613_v60, %v3726_v52  ;;  %v4688_v44 = vadd.f32 %v4687_v39, %v3728_v53  ;;  %v1411_v27 = vpop.f32.mrb[172].mxu0  ;;  %v1764_v28 = vpop.f32.mrb[172].mxu1 }
 0x23d   :  { %v1412_v46 = vadd.f32 %v1411_v27, %v9317_v48  ;;  %v1765_v37 = vadd.f32 %v1764_v28, %v9326_v42  ;;  %v1413_v43 = vpop.f32.mrb[173].mxu0  ;;  %v1766_v45 = vpop.f32.mrb[173].mxu1 }
 0x23e   :  { %v1414_v55 = vadd.f32 %v1413_v43, %v9321_v0  ;;  %v1767_v56 = vadd.f32 %v1766_v45, %v9330_v7  ;;  %v1415_v14 = vpop.f32.mrb[174].mxu0  ;;  %v1768_v10 = vpop.f32.mrb[174].mxu1 }
 0x23f   :  { %v3741_v22 = vmax.f32 %v1412_v46, 0.0  ;;  %v3743_v59 = vmax.f32 %v1765_v37, 0.0  ;;  %v1416_v13 = vadd.f32 %v1415_v14, %v9317_v48  ;;  %v1769_v8 = vadd.f32 %v1768_v10, %v9326_v42  ;;  %v1417_v21 = vpop.f32.mrb[175].mxu0  ;;  %v1770_v24 = vpop.f32.mrb[175].mxu1 }
 0x240   :  { %v3742_v29 = vmax.f32 %v1414_v55, 0.0  ;;  %v3744_v1 = vmax.f32 %v1767_v56, 0.0  ;;  %v1418_v9 = vadd.f32 %v1417_v21, %v9321_v0  ;;  %v1771_v58 = vadd.f32 %v1770_v24, %v9330_v7 }
 0x241   :  { %v4578_v23 = vadd.f32 %v4577_v54, %v3741_v22  ;;  %v4652_v33 = vadd.f32 %v4651_v51, %v3743_v59  ;;  %v3757_v40 = vmax.f32 %v1416_v13, 0.0  ;;  %v3759_v11 = vmax.f32 %v1769_v8, 0.0  ;;  %6990 = vmatmul.mubr.msk.bf16.gmra.mrb[24].mxu0 %vm412_vm2, %v8366_v36  ;;  %v8367_v59 = vld [vmem:[%s11233_s0 + $0x38] sm:$0xff]  }
 0x242   :  { %v4615_v5 = vadd.f32 %v4614_v38, %v3742_v29  ;;  %v4689_v34 = vadd.f32 %v4688_v44, %v3744_v1  ;;  %v3758_v47 = vmax.f32 %v1418_v9, 0.0  ;;  %v3760_v12 = vmax.f32 %v1771_v58, 0.0  ;;  %7022 = vmatmul.mubr.msk.bf16.gmra.mrb[24].mxu1 %vm412_vm2, %v8366_v36  ;;  %2075 = vmatprep.mubr.bf16.mxu0 %v8450_v3 }
 0x243   :  { %v4579_v50 = vadd.f32 %v4578_v23, %v3757_v40  ;;  %v4653_v31 = vadd.f32 %v4652_v33, %v3759_v11  ;;  %2428 = vmatprep.mubr.bf16.mxu1 %v8450_v3 }
 0x244   :  { %v4616_v62 = vadd.f32 %v4615_v5, %v3758_v47  ;;  %v4690_v32 = vadd.f32 %v4689_v34, %v3760_v12  ;;  %v1421_v2 = vpop.f32.mrb[176].mxu0  ;;  %v1774_v61 = vpop.f32.mrb[176].mxu1 }
 0x245   :  { %v1422_v57 = vadd.f32 %v1421_v2, %v9317_v48  ;;  %v1775_v6 = vadd.f32 %v1774_v61, %v9326_v42  ;;  %v1423_v35 = vpop.f32.mrb[177].mxu0  ;;  %v1776_v60 = vpop.f32.mrb[177].mxu1 }
 0x246   :  { %v1424_v39 = vadd.f32 %v1423_v35, %v9321_v0  ;;  %v1777_v52 = vadd.f32 %v1776_v60, %v9330_v7  ;;  %v1425_v53 = vpop.f32.mrb[178].mxu0  ;;  %v1778_v54 = vpop.f32.mrb[178].mxu1 }
 0x247   :  { %v3773_v51 = vmax.f32 %v1422_v57, 0.0  ;;  %v3775_v38 = vmax.f32 %v1775_v6, 0.0  ;;  %v1426_v44 = vadd.f32 %v1425_v53, %v9317_v48  ;;  %v1779_v27 = vadd.f32 %v1778_v54, %v9326_v42  ;;  %v1427_v28 = vpop.f32.mrb[179].mxu0  ;;  %v1780_v46 = vpop.f32.mrb[179].mxu1  ;;  %v8368_v54 = vld [vmem:[%s11233_s0 + $0x40] sm:$0xff]  }
 0x248   :  { %v3774_v37 = vmax.f32 %v1424_v39, 0.0  ;;  %v3776_v43 = vmax.f32 %v1777_v52, 0.0  ;;  %v1428_v45 = vadd.f32 %v1427_v28, %v9321_v0  ;;  %v1781_v55 = vadd.f32 %v1780_v46, %v9330_v7 }
 0x249   :  { %v4580_v56 = vadd.f32 %v4579_v50, %v3773_v51  ;;  %v4654_v14 = vadd.f32 %v4653_v31, %v3775_v38  ;;  %v3789_v10 = vmax.f32 %v1426_v44, 0.0  ;;  %v3791_v22 = vmax.f32 %v1779_v27, 0.0  ;;  %6991 = vmatmul.mubr.msk.bf16.gmra.mrb[28].mxu0 %vm412_vm2, %v8367_v59 }
 0x24a   :  { %v4617_v13 = vadd.f32 %v4616_v62, %v3774_v37  ;;  %v4691_v8 = vadd.f32 %v4690_v32, %v3776_v43  ;;  %v3790_v21 = vmax.f32 %v1428_v45, 0.0  ;;  %v3792_v24 = vmax.f32 %v1781_v55, 0.0  ;;  %7023 = vmatmul.mubr.msk.bf16.gmra.mrb[28].mxu1 %vm412_vm2, %v8367_v59  ;;  %2085 = vmatprep.mubr.bf16.mxu0 %v8450_v3 }
 0x24b   :  { %v4581_v29 = vadd.f32 %v4580_v56, %v3789_v10  ;;  %v4655_v1 = vadd.f32 %v4654_v14, %v3791_v22  ;;  %2438 = vmatprep.mubr.bf16.mxu1 %v8450_v3 }
 0x24c   :  { %v4618_v9 = vadd.f32 %v4617_v13, %v3790_v21  ;;  %v4692_v58 = vadd.f32 %v4691_v8, %v3792_v24  ;;  %v1431_v23 = vpop.f32.mrb[180].mxu0  ;;  %v1784_v40 = vpop.f32.mrb[180].mxu1 }
 0x24d   :  { %v1432_v33 = vadd.f32 %v1431_v23, %v9317_v48  ;;  %v1433_v11 = vpop.f32.mrb[181].mxu0  ;;  %v1785_v36 = vadd.f32 %v1784_v40, %v9326_v42  ;;  %v1786_v34 = vpop.f32.mrb[181].mxu1 }
 0x24e   :  { %v1434_v5 = vadd.f32 %v1433_v11, %v9321_v0  ;;  %v1435_v47 = vpop.f32.mrb[182].mxu0  ;;  %v1787_v50 = vadd.f32 %v1786_v34, %v9330_v7  ;;  %v1788_v62 = vpop.f32.mrb[182].mxu1 }
 0x24f   :  { %v3805_v12 = vmax.f32 %v1432_v33, 0.0  ;;  %v1436_v31 = vadd.f32 %v1435_v47, %v9317_v48  ;;  %v1437_v32 = vpop.f32.mrb[183].mxu0  ;;  %v3807_v2 = vmax.f32 %v1785_v36, 0.0  ;;  %v1789_v57 = vadd.f32 %v1788_v62, %v9326_v42  ;;  %v1790_v35 = vpop.f32.mrb[183].mxu1 }
 0x250   :  { %v3806_v61 = vmax.f32 %v1434_v5, 0.0  ;;  %v1438_v6 = vadd.f32 %v1437_v32, %v9321_v0  ;;  %v3808_v39 = vmax.f32 %v1787_v50, 0.0  ;;  %v1791_v53 = vadd.f32 %v1790_v35, %v9330_v7  ;;  %v8369_v50 = vld [vmem:[%s11233_s0 + $0x48] sm:$0xff]  }
 0x251   :  { %v4582_v60 = vadd.f32 %v4581_v29, %v3805_v12  ;;  %v3821_v52 = vmax.f32 %v1436_v31, 0.0  ;;  %6992 = vmatmul.mubr.msk.bf16.gmra.mrb[32].mxu0 %vm412_vm2, %v8368_v54  ;;  %v4656_v51 = vadd.f32 %v4655_v1, %v3807_v2  ;;  %v3823_v44 = vmax.f32 %v1789_v57, 0.0 }
 0x252   :  { %v4619_v38 = vadd.f32 %v4618_v9, %v3806_v61  ;;  %v3822_v27 = vmax.f32 %v1438_v6, 0.0  ;;  %7024 = vmatmul.mubr.msk.bf16.gmra.mrb[32].mxu1 %vm412_vm2, %v8368_v54  ;;  %2095 = vmatprep.mubr.bf16.mxu0 %v8450_v3  ;;  %v4693_v28 = vadd.f32 %v4692_v58, %v3808_v39  ;;  %v3824_v37 = vmax.f32 %v1791_v53, 0.0 }
 0x253   :  { %v4583_v46 = vadd.f32 %v4582_v60, %v3821_v52  ;;  %2448 = vmatprep.mubr.bf16.mxu1 %v8450_v3  ;;  %v4657_v43 = vadd.f32 %v4656_v51, %v3823_v44 }
 0x254   :  { %v4620_v45 = vadd.f32 %v4619_v38, %v3822_v27  ;;  %v1441_v55 = vpop.f32.mrb[184].mxu0  ;;  %v4694_v56 = vadd.f32 %v4693_v28, %v3824_v37  ;;  %v1794_v10 = vpop.f32.mrb[184].mxu1 }
 0x255   :  { %v1442_v14 = vadd.f32 %v1441_v55, %v9317_v48  ;;  %v1443_v22 = vpop.f32.mrb[185].mxu0  ;;  %v1795_v59 = vadd.f32 %v1794_v10, %v9326_v42  ;;  %v1796_v8 = vpop.f32.mrb[185].mxu1 }
 0x256   :  { %v1444_v13 = vadd.f32 %v1443_v22, %v9321_v0  ;;  %v1445_v21 = vpop.f32.mrb[186].mxu0  ;;  %v1797_v29 = vadd.f32 %v1796_v8, %v9330_v7  ;;  %v1798_v9 = vpop.f32.mrb[186].mxu1 }
 0x257   :  { %v3837_v24 = vmax.f32 %v1442_v14, 0.0  ;;  %v1446_v1 = vadd.f32 %v1445_v21, %v9317_v48  ;;  %v1447_v58 = vpop.f32.mrb[187].mxu0  ;;  %v3839_v23 = vmax.f32 %v1795_v59, 0.0  ;;  %v1799_v40 = vadd.f32 %v1798_v9, %v9326_v42  ;;  %v1800_v36 = vpop.f32.mrb[187].mxu1 }
 0x258   :  { %v3838_v33 = vmax.f32 %v1444_v13, 0.0  ;;  %v1448_v11 = vadd.f32 %v1447_v58, %v9321_v0  ;;  %v3840_v34 = vmax.f32 %v1797_v29, 0.0  ;;  %v1801_v12 = vadd.f32 %v1800_v36, %v9330_v7  ;;  %v8370_v29 = vld [vmem:[%s11233_s0 + $0x50] sm:$0xff]  }
 0x259   :  { %v4584_v5 = vadd.f32 %v4583_v46, %v3837_v24  ;;  %v3853_v47 = vmax.f32 %v1446_v1, 0.0  ;;  %6993 = vmatmul.mubr.msk.bf16.gmra.mrb[36].mxu0 %vm412_vm2, %v8369_v50  ;;  %v4658_v31 = vadd.f32 %v4657_v43, %v3839_v23  ;;  %v3855_v32 = vmax.f32 %v1799_v40, 0.0 }
 0x25a   :  { %v4621_v62 = vadd.f32 %v4620_v45, %v3838_v33  ;;  %v3854_v2 = vmax.f32 %v1448_v11, 0.0  ;;  %7025 = vmatmul.mubr.msk.bf16.gmra.mrb[36].mxu1 %vm412_vm2, %v8369_v50  ;;  %2105 = vmatprep.mubr.bf16.mxu0 %v8450_v3  ;;  %v4695_v61 = vadd.f32 %v4694_v56, %v3840_v34  ;;  %v3856_v6 = vmax.f32 %v1801_v12, 0.0 }
 0x25b   :  { %v4585_v57 = vadd.f32 %v4584_v5, %v3853_v47  ;;  %2458 = vmatprep.mubr.bf16.mxu1 %v8450_v3  ;;  %v4659_v35 = vadd.f32 %v4658_v31, %v3855_v32 }
 0x25c   :  { %v4622_v60 = vadd.f32 %v4621_v62, %v3854_v2  ;;  %v1451_v39 = vpop.f32.mrb[188].mxu0  ;;  %v4696_v52 = vadd.f32 %v4695_v61, %v3856_v6  ;;  %v1804_v54 = vpop.f32.mrb[188].mxu1 }
 0x25d   :  { %v1452_v53 = vadd.f32 %v1451_v39, %v9317_v48  ;;  %v1453_v51 = vpop.f32.mrb[189].mxu0  ;;  %v1805_v38 = vadd.f32 %v1804_v54, %v9326_v42  ;;  %v1806_v27 = vpop.f32.mrb[189].mxu1 }
 0x25e   :  { %v1454_v44 = vadd.f32 %v1453_v51, %v9321_v0  ;;  %v1455_v28 = vpop.f32.mrb[190].mxu0  ;;  %v1807_v37 = vadd.f32 %v1806_v27, %v9330_v7  ;;  %v1808_v45 = vpop.f32.mrb[190].mxu1 }
 0x25f   :  { %v3869_v46 = vmax.f32 %v1452_v53, 0.0  ;;  %v1456_v43 = vadd.f32 %v1455_v28, %v9317_v48  ;;  %v1457_v55 = vpop.f32.mrb[191].mxu0  ;;  %v3871_v56 = vmax.f32 %v1805_v38, 0.0  ;;  %v1809_v10 = vadd.f32 %v1808_v45, %v9326_v42  ;;  %v1810_v59 = vpop.f32.mrb[191].mxu1 }
 0x260   :  { %v3870_v14 = vmax.f32 %v1454_v44, 0.0  ;;  %v1458_v22 = vadd.f32 %v1457_v55, %v9321_v0  ;;  %v3872_v8 = vmax.f32 %v1807_v37, 0.0  ;;  %v1811_v24 = vadd.f32 %v1810_v59, %v9330_v7 }
 0x261   :  { %v4586_v13 = vadd.f32 %v4585_v57, %v3869_v46  ;;  %v3885_v21 = vmax.f32 %v1456_v43, 0.0  ;;  %6994 = vmatmul.mubr.msk.bf16.gmra.mrb[40].mxu0 %vm412_vm2, %v8370_v29  ;;  %v4660_v1 = vadd.f32 %v4659_v35, %v3871_v56  ;;  %v3887_v58 = vmax.f32 %v1809_v10, 0.0 }
 0x262   :  { %v4623_v9 = vadd.f32 %v4622_v60, %v3870_v14  ;;  %v3886_v23 = vmax.f32 %v1458_v22, 0.0  ;;  %7026 = vmatmul.mubr.msk.bf16.gmra.mrb[40].mxu1 %vm412_vm2, %v8370_v29  ;;  %2115 = vmatprep.mubr.bf16.mxu0 %v8450_v3  ;;  %v4697_v33 = vadd.f32 %v4696_v52, %v3872_v8  ;;  %v3888_v11 = vmax.f32 %v1811_v24, 0.0  ;;  %v8371_v52 = vld [vmem:[%s11233_s0 + $0x58] sm:$0xff]  }
 0x263   :  { %v9624_v40 = vadd.f32 %v4586_v13, %v3885_v21  ;;  %2468 = vmatprep.mubr.bf16.mxu1 %v8450_v3  ;;  %v9627_v36 = vadd.f32 %v4660_v1, %v3887_v58 }
 0x264   :  { %v9629_v5 = vadd.f32 %v4623_v9, %v3886_v23  ;;  %v1461_v34 = vpop.f32.mrb[192].mxu0  ;;  %v9631_v47 = vadd.f32 %v4697_v33, %v3888_v11  ;;  %v1814_v50 = vpop.f32.mrb[192].mxu1 }
 0x265   :  { %v1462_v12 = vadd.f32 %v1461_v34, %v9317_v48  ;;  %v1463_v31 = vpop.f32.mrb[193].mxu0  ;;  %v1815_v62 = vadd.f32 %v1814_v50, %v9326_v42  ;;  %v1816_v2 = vpop.f32.mrb[193].mxu1 }
 0x266   :  { %v1464_v32 = vadd.f32 %v1463_v31, %v9321_v0  ;;  %v1465_v61 = vpop.f32.mrb[194].mxu0  ;;  %v1817_v57 = vadd.f32 %v1816_v2, %v9330_v7  ;;  %v1818_v6 = vpop.f32.mrb[194].mxu1 }
 0x267   :  { %v1467_v35 = vpop.f32.mrb[195].mxu0  ;;  %v1820_v60 = vpop.f32.mrb[195].mxu1  ;;  %v1466_v39 = vadd.f32 %v1465_v61, %v9317_v48  ;;  %v3903_v53 = vmax.f32 %v1815_v62, 0.0  ;;  %v1819_v54 = vadd.f32 %v1818_v6, %v9326_v42  ;;  %v3901_v38 = vmax.f32 %v1462_v12, 0.0 }
 0x268   :  { %v1468_v51 = vadd.f32 %v1467_v35, %v9321_v0  ;;  %v3904_v44 = vmax.f32 %v1817_v57, 0.0  ;;  %v1821_v28 = vadd.f32 %v1820_v60, %v9330_v7  ;;  %v3902_v46 = vmax.f32 %v1464_v32, 0.0  ;;  %v8372_v32 = vld [vmem:[%s11233_s0 + $0x60] sm:$0xff]  }
 0x269   :  { %6995 = vmatmul.mubr.msk.bf16.gmra.mrb[44].mxu0 %vm412_vm2, %v8371_v52  ;;  %v3917_v27 = vmax.f32 %v1466_v39, 0.0  ;;  %v3919_v37 = vmax.f32 %v1819_v54, 0.0 }
 0x26a   :  { %7027 = vmatmul.mubr.msk.bf16.gmra.mrb[44].mxu1 %vm412_vm2, %v8371_v52  ;;  %2125 = vmatprep.mubr.bf16.mxu0 %v8450_v3  ;;  %v3918_v43 = vmax.f32 %v1468_v51, 0.0  ;;  %v3920_v56 = vmax.f32 %v1821_v28, 0.0 }
 0x26b   :  { %2478 = vmatprep.mubr.bf16.mxu1 %v8450_v3  ;;  %v5149_v55 = vadd.f32 %v3917_v27, %v3901_v38  ;;  %v5223_v59 = vadd.f32 %v3919_v37, %v3903_v53 }
 0x26c   :  { %v1471_v45 = vpop.f32.mrb[196].mxu0  ;;  %v1824_v10 = vpop.f32.mrb[196].mxu1  ;;  %v5186_v13 = vadd.f32 %v3918_v43, %v3902_v46  ;;  %v5260_v29 = vadd.f32 %v3920_v56, %v3904_v44 }
 0x26d   :  { %v1472_v14 = vadd.f32 %v1471_v45, %v9317_v48  ;;  %v1473_v22 = vpop.f32.mrb[197].mxu0  ;;  %v1825_v8 = vadd.f32 %v1824_v10, %v9326_v42  ;;  %v1826_v21 = vpop.f32.mrb[197].mxu1 }
 0x26e   :  { %v1475_v24 = vpop.f32.mrb[198].mxu0  ;;  %v1474_v9 = vadd.f32 %v1473_v22, %v9321_v0  ;;  %v1828_v58 = vpop.f32.mrb[198].mxu1  ;;  %v1827_v11 = vadd.f32 %v1826_v21, %v9330_v7 }
 0x26f   :  { %v3933_v1 = vmax.f32 %v1472_v14, 0.0  ;;  %v1477_v23 = vpop.f32.mrb[199].mxu0  ;;  %v3935_v33 = vmax.f32 %v1825_v8, 0.0  ;;  %v1476_v34 = vadd.f32 %v1475_v24, %v9317_v48  ;;  %v1830_v12 = vpop.f32.mrb[199].mxu1  ;;  %v1829_v62 = vadd.f32 %v1828_v58, %v9326_v42 }
 0x270   :  { %v3934_v31 = vmax.f32 %v1474_v9, 0.0  ;;  %v3936_v61 = vmax.f32 %v1827_v11, 0.0  ;;  %v1478_v60 = vadd.f32 %v1477_v23, %v9321_v0  ;;  %v1831_v39 = vadd.f32 %v1830_v12, %v9330_v7  ;;  %v8373_v11 = vld [vmem:[%s11233_s0 + $0x68] sm:$0xff]  }
 0x271   :  { %v5150_v50 = vadd.f32 %v5149_v55, %v3933_v1  ;;  %6996 = vmatmul.mubr.msk.bf16.gmra.mrb[48].mxu0 %vm412_vm2, %v8372_v32  ;;  %v5224_v2 = vadd.f32 %v5223_v59, %v3935_v33  ;;  %v3949_v57 = vmax.f32 %v1476_v34, 0.0  ;;  %v3951_v35 = vmax.f32 %v1829_v62, 0.0 }
 0x272   :  { %7028 = vmatmul.mubr.msk.bf16.gmra.mrb[48].mxu1 %vm412_vm2, %v8372_v32  ;;  %2135 = vmatprep.mubr.bf16.mxu0 %v8450_v3  ;;  %v5187_v6 = vadd.f32 %v5186_v13, %v3934_v31  ;;  %v5261_v52 = vadd.f32 %v5260_v29, %v3936_v61  ;;  %v3950_v38 = vmax.f32 %v1478_v60, 0.0  ;;  %v3952_v44 = vmax.f32 %v1831_v39, 0.0 }
 0x273   :  { %2488 = vmatprep.mubr.bf16.mxu1 %v8450_v3  ;;  %v5151_v53 = vadd.f32 %v5150_v50, %v3949_v57  ;;  %v5225_v51 = vadd.f32 %v5224_v2, %v3951_v35 }
 0x274   :  { %v1481_v54 = vpop.f32.mrb[200].mxu0  ;;  %v1834_v28 = vpop.f32.mrb[200].mxu1  ;;  %v5188_v56 = vadd.f32 %v5187_v6, %v3950_v38  ;;  %v5262_v14 = vadd.f32 %v5261_v52, %v3952_v44 }
 0x275   :  { %v1482_v27 = vadd.f32 %v1481_v54, %v9317_v48  ;;  %v1483_v46 = vpop.f32.mrb[201].mxu0  ;;  %v1835_v37 = vadd.f32 %v1834_v28, %v9326_v42  ;;  %v1836_v45 = vpop.f32.mrb[201].mxu1 }
 0x276   :  { %v1484_v43 = vadd.f32 %v1483_v46, %v9321_v0  ;;  %v1485_v55 = vpop.f32.mrb[202].mxu0  ;;  %v1837_v22 = vadd.f32 %v1836_v45, %v9330_v7  ;;  %v1838_v59 = vpop.f32.mrb[202].mxu1 }
 0x277   :  { %v3965_v10 = vmax.f32 %v1482_v27, 0.0  ;;  %v1487_v13 = vpop.f32.mrb[203].mxu0  ;;  %v3967_v8 = vmax.f32 %v1835_v37, 0.0  ;;  %v1486_v24 = vadd.f32 %v1485_v55, %v9317_v48  ;;  %v1839_v29 = vadd.f32 %v1838_v59, %v9326_v42  ;;  %v1840_v1 = vpop.f32.mrb[203].mxu1 }
 0x278   :  { %v3966_v21 = vmax.f32 %v1484_v43, 0.0  ;;  %v3968_v58 = vmax.f32 %v1837_v22, 0.0  ;;  %v1488_v23 = vadd.f32 %v1487_v13, %v9321_v0  ;;  %v1841_v33 = vadd.f32 %v1840_v1, %v9330_v7 }
 0x279   :  { %v5152_v9 = vadd.f32 %v5151_v53, %v3965_v10  ;;  %6997 = vmatmul.mubr.msk.bf16.gmra.mrb[52].mxu0 %vm412_vm2, %v8373_v11  ;;  %v5226_v34 = vadd.f32 %v5225_v51, %v3967_v8  ;;  %v3981_v50 = vmax.f32 %v1486_v24, 0.0  ;;  %v3983_v31 = vmax.f32 %v1839_v29, 0.0 }
 0x27a   :  { %v5189_v12 = vadd.f32 %v5188_v56, %v3966_v21  ;;  %7029 = vmatmul.mubr.msk.bf16.gmra.mrb[52].mxu1 %vm412_vm2, %v8373_v11  ;;  %2145 = vmatprep.mubr.bf16.mxu0 %v8450_v3  ;;  %v5263_v62 = vadd.f32 %v5262_v14, %v3968_v58  ;;  %v3982_v32 = vmax.f32 %v1488_v23, 0.0  ;;  %v3984_v2 = vmax.f32 %v1841_v33, 0.0  ;;  %v8374_v21 = vld [vmem:[%s11233_s0 + $0x70] sm:$0xff]  }
 0x27b   :  { %2498 = vmatprep.mubr.bf16.mxu1 %v8450_v3  ;;  %v5153_v61 = vadd.f32 %v5152_v9, %v3981_v50  ;;  %v5227_v57 = vadd.f32 %v5226_v34, %v3983_v31 }
 0x27c   :  { %v1491_v6 = vpop.f32.mrb[204].mxu0  ;;  %v5190_v35 = vadd.f32 %v5189_v12, %v3982_v32  ;;  %v5264_v60 = vadd.f32 %v5263_v62, %v3984_v2  ;;  %v1844_v52 = vpop.f32.mrb[204].mxu1 }
 0x27d   :  { %v1492_v39 = vadd.f32 %v1491_v6, %v9317_v48  ;;  %v1493_v53 = vpop.f32.mrb[205].mxu0  ;;  %v1845_v54 = vadd.f32 %v1844_v52, %v9326_v42  ;;  %v1846_v38 = vpop.f32.mrb[205].mxu1 }
 0x27e   :  { %v1494_v51 = vadd.f32 %v1493_v53, %v9321_v0  ;;  %v1495_v44 = vpop.f32.mrb[206].mxu0  ;;  %v1847_v28 = vadd.f32 %v1846_v38, %v9330_v7  ;;  %v1848_v37 = vpop.f32.mrb[206].mxu1 }
 0x27f   :  { %v3997_v27 = vmax.f32 %v1492_v39, 0.0  ;;  %v1496_v46 = vadd.f32 %v1495_v44, %v9317_v48  ;;  %v1497_v43 = vpop.f32.mrb[207].mxu0  ;;  %v3999_v45 = vmax.f32 %v1845_v54, 0.0  ;;  %v1849_v56 = vadd.f32 %v1848_v37, %v9326_v42  ;;  %v1850_v10 = vpop.f32.mrb[207].mxu1 }
 0x280   :  { %v3998_v55 = vmax.f32 %v1494_v51, 0.0  ;;  %v1498_v14 = vadd.f32 %v1497_v43, %v9321_v0  ;;  %v4000_v59 = vmax.f32 %v1847_v28, 0.0  ;;  %v1851_v8 = vadd.f32 %v1850_v10, %v9330_v7 }
 0x281   :  { %v5154_v22 = vadd.f32 %v5153_v61, %v3997_v27  ;;  %v4013_v13 = vmax.f32 %v1496_v46, 0.0  ;;  %6998 = vmatmul.mubr.msk.bf16.gmra.mrb[56].mxu0 %vm412_vm2, %v8374_v21  ;;  %v5228_v24 = vadd.f32 %v5227_v57, %v3999_v45  ;;  %v4015_v1 = vmax.f32 %v1849_v56, 0.0  ;;  %v8375_v45 = vld [vmem:[%s11233_s0 + $0x78] sm:$0xff]  }
 0x282   :  { %v5191_v29 = vadd.f32 %v5190_v35, %v3998_v55  ;;  %v4014_v9 = vmax.f32 %v1498_v14, 0.0  ;;  %7030 = vmatmul.mubr.msk.bf16.gmra.mrb[56].mxu1 %vm412_vm2, %v8374_v21  ;;  %2155 = vmatprep.mubr.bf16.mxu0 %v8450_v3  ;;  %v5265_v58 = vadd.f32 %v5264_v60, %v4000_v59  ;;  %v4016_v33 = vmax.f32 %v1851_v8, 0.0 }
 0x283   :  { %v5155_v23 = vadd.f32 %v5154_v22, %v4013_v13  ;;  %2508 = vmatprep.mubr.bf16.mxu1 %v8450_v3  ;;  %v5229_v11 = vadd.f32 %v5228_v24, %v4015_v1 }
 0x284   :  { %v5192_v34 = vadd.f32 %v5191_v29, %v4014_v9  ;;  %v1501_v12 = vpop.f32.mrb[208].mxu0  ;;  %v5266_v50 = vadd.f32 %v5265_v58, %v4016_v33  ;;  %v1854_v62 = vpop.f32.mrb[208].mxu1 }
 0x285   :  { %v1502_v31 = vadd.f32 %v1501_v12, %v9317_v48  ;;  %v1503_v32 = vpop.f32.mrb[209].mxu0  ;;  %v1855_v2 = vadd.f32 %v1854_v62, %v9326_v42  ;;  %v1856_v57 = vpop.f32.mrb[209].mxu1 }
 0x286   :  { %v1504_v61 = vadd.f32 %v1503_v32, %v9321_v0  ;;  %v1505_v6 = vpop.f32.mrb[210].mxu0  ;;  %v1857_v60 = vadd.f32 %v1856_v57, %v9330_v7  ;;  %v1858_v52 = vpop.f32.mrb[210].mxu1 }
 0x287   :  { %v4029_v35 = vmax.f32 %v1502_v31, 0.0  ;;  %v1506_v39 = vadd.f32 %v1505_v6, %v9317_v48  ;;  %v1507_v53 = vpop.f32.mrb[211].mxu0  ;;  %v4031_v54 = vmax.f32 %v1855_v2, 0.0  ;;  %v1859_v38 = vadd.f32 %v1858_v52, %v9326_v42  ;;  %v1860_v27 = vpop.f32.mrb[211].mxu1 }
 0x288   :  { %v4030_v51 = vmax.f32 %v1504_v61, 0.0  ;;  %v1508_v44 = vadd.f32 %v1507_v53, %v9321_v0  ;;  %v4032_v46 = vmax.f32 %v1857_v60, 0.0  ;;  %v1861_v43 = vadd.f32 %v1860_v27, %v9330_v7 }
 0x289   :  { %v5156_v28 = vadd.f32 %v5155_v23, %v4029_v35  ;;  %v4045_v37 = vmax.f32 %v1506_v39, 0.0  ;;  %6999 = vmatmul.mubr.msk.bf16.gmra.mrb[60].mxu0 %vm412_vm2, %v8375_v45  ;;  %v5230_v55 = vadd.f32 %v5229_v11, %v4031_v54  ;;  %v4047_v14 = vmax.f32 %v1859_v38, 0.0  ;;  %v8376_v54 = vld [vmem:[%s11233_s0 + $0x80] sm:$0xff]  }
 0x28a   :  { %v5193_v56 = vadd.f32 %v5192_v34, %v4030_v51  ;;  %v4046_v10 = vmax.f32 %v1508_v44, 0.0  ;;  %7031 = vmatmul.mubr.msk.bf16.gmra.mrb[60].mxu1 %vm412_vm2, %v8375_v45  ;;  %2165 = vmatprep.mubr.bf16.mxu0 %v8450_v3  ;;  %v5267_v22 = vadd.f32 %v5266_v50, %v4032_v46  ;;  %v4048_v13 = vmax.f32 %v1861_v43, 0.0 }
 0x28b   :  { %v5157_v59 = vadd.f32 %v5156_v28, %v4045_v37  ;;  %2518 = vmatprep.mubr.bf16.mxu1 %v8450_v3  ;;  %v5231_v8 = vadd.f32 %v5230_v55, %v4047_v14 }
 0x28c   :  { %v5194_v21 = vadd.f32 %v5193_v56, %v4046_v10  ;;  %v1511_v24 = vpop.f32.mrb[212].mxu0  ;;  %v5268_v29 = vadd.f32 %v5267_v22, %v4048_v13  ;;  %v1864_v9 = vpop.f32.mrb[212].mxu1 }
 0x28d   :  { %v1512_v1 = vadd.f32 %v1511_v24, %v9317_v48  ;;  %v1513_v58 = vpop.f32.mrb[213].mxu0  ;;  %v1865_v23 = vadd.f32 %v1864_v9, %v9326_v42  ;;  %v1866_v11 = vpop.f32.mrb[213].mxu1 }
 0x28e   :  { %v1514_v33 = vadd.f32 %v1513_v58, %v9321_v0  ;;  %v1515_v34 = vpop.f32.mrb[214].mxu0  ;;  %v1867_v50 = vadd.f32 %v1866_v11, %v9330_v7  ;;  %v1868_v62 = vpop.f32.mrb[214].mxu1 }
 0x28f   :  { %v4061_v12 = vmax.f32 %v1512_v1, 0.0  ;;  %v1516_v31 = vadd.f32 %v1515_v34, %v9317_v48  ;;  %v1517_v32 = vpop.f32.mrb[215].mxu0  ;;  %v4063_v2 = vmax.f32 %v1865_v23, 0.0  ;;  %v1869_v57 = vadd.f32 %v1868_v62, %v9326_v42  ;;  %v1870_v35 = vpop.f32.mrb[215].mxu1 }
 0x290   :  { %v4062_v61 = vmax.f32 %v1514_v33, 0.0  ;;  %v1518_v6 = vadd.f32 %v1517_v32, %v9321_v0  ;;  %v4064_v39 = vmax.f32 %v1867_v50, 0.0  ;;  %v1871_v53 = vadd.f32 %v1870_v35, %v9330_v7 }
 0x291   :  { %v5158_v60 = vadd.f32 %v5157_v59, %v4061_v12  ;;  %v4077_v52 = vmax.f32 %v1516_v31, 0.0  ;;  %7000 = vmatmul.mubr.msk.bf16.gmra.mrb[64].mxu0 %vm412_vm2, %v8376_v54  ;;  %v5232_v51 = vadd.f32 %v5231_v8, %v4063_v2  ;;  %v4079_v44 = vmax.f32 %v1869_v57, 0.0  ;;  %v8377_v2 = vld [vmem:[%s11233_s0 + $0x88] sm:$0xff]  }
 0x292   :  { %v5195_v38 = vadd.f32 %v5194_v21, %v4062_v61  ;;  %v4078_v27 = vmax.f32 %v1518_v6, 0.0  ;;  %7032 = vmatmul.mubr.msk.bf16.gmra.mrb[64].mxu1 %vm412_vm2, %v8376_v54  ;;  %2175 = vmatprep.mubr.bf16.mxu0 %v8450_v3  ;;  %v5269_v28 = vadd.f32 %v5268_v29, %v4064_v39  ;;  %v4080_v37 = vmax.f32 %v1871_v53, 0.0 }
 0x293   :  { %v5159_v46 = vadd.f32 %v5158_v60, %v4077_v52  ;;  %2528 = vmatprep.mubr.bf16.mxu1 %v8450_v3  ;;  %v5233_v43 = vadd.f32 %v5232_v51, %v4079_v44 }
 0x294   :  { %v5196_v45 = vadd.f32 %v5195_v38, %v4078_v27  ;;  %v1521_v55 = vpop.f32.mrb[216].mxu0  ;;  %v5270_v56 = vadd.f32 %v5269_v28, %v4080_v37  ;;  %v1874_v10 = vpop.f32.mrb[216].mxu1 }
 0x295   :  { %v1522_v14 = vadd.f32 %v1521_v55, %v9317_v48  ;;  %v1523_v22 = vpop.f32.mrb[217].mxu0  ;;  %v1875_v59 = vadd.f32 %v1874_v10, %v9326_v42  ;;  %v1876_v8 = vpop.f32.mrb[217].mxu1 }
 0x296   :  { %v1524_v13 = vadd.f32 %v1523_v22, %v9321_v0  ;;  %v1525_v21 = vpop.f32.mrb[218].mxu0  ;;  %v1877_v29 = vadd.f32 %v1876_v8, %v9330_v7  ;;  %v1878_v9 = vpop.f32.mrb[218].mxu1 }
 0x297   :  { %v4093_v24 = vmax.f32 %v1522_v14, 0.0  ;;  %v1526_v1 = vadd.f32 %v1525_v21, %v9317_v48  ;;  %v1527_v58 = vpop.f32.mrb[219].mxu0  ;;  %v4095_v23 = vmax.f32 %v1875_v59, 0.0  ;;  %v1879_v11 = vadd.f32 %v1878_v9, %v9326_v42  ;;  %v1880_v12 = vpop.f32.mrb[219].mxu1 }
 0x298   :  { %v4094_v33 = vmax.f32 %v1524_v13, 0.0  ;;  %v1528_v34 = vadd.f32 %v1527_v58, %v9321_v0  ;;  %v4096_v31 = vmax.f32 %v1877_v29, 0.0  ;;  %v1881_v32 = vadd.f32 %v1880_v12, %v9330_v7 }
 0x299   :  { %v5160_v50 = vadd.f32 %v5159_v46, %v4093_v24  ;;  %v4109_v62 = vmax.f32 %v1526_v1, 0.0  ;;  %7001 = vmatmul.mubr.msk.bf16.gmra.mrb[68].mxu0 %vm412_vm2, %v8377_v2  ;;  %v5234_v61 = vadd.f32 %v5233_v43, %v4095_v23  ;;  %v4111_v6 = vmax.f32 %v1879_v11, 0.0  ;;  %v8378_v23 = vld [vmem:[%s11233_s0 + $0x90] sm:$0xff]  }
 0x29a   :  { %v5197_v57 = vadd.f32 %v5196_v45, %v4094_v33  ;;  %v4110_v35 = vmax.f32 %v1528_v34, 0.0  ;;  %7033 = vmatmul.mubr.msk.bf16.gmra.mrb[68].mxu1 %vm412_vm2, %v8377_v2  ;;  %2185 = vmatprep.mubr.bf16.mxu0 %v8450_v3  ;;  %v5271_v60 = vadd.f32 %v5270_v56, %v4096_v31  ;;  %v4112_v52 = vmax.f32 %v1881_v32, 0.0 }
 0x29b   :  { %v5161_v39 = vadd.f32 %v5160_v50, %v4109_v62  ;;  %2538 = vmatprep.mubr.bf16.mxu1 %v8450_v3  ;;  %v5235_v53 = vadd.f32 %v5234_v61, %v4111_v6 }
 0x29c   :  { %v5198_v54 = vadd.f32 %v5197_v57, %v4110_v35  ;;  %v1531_v51 = vpop.f32.mrb[220].mxu0  ;;  %v5272_v38 = vadd.f32 %v5271_v60, %v4112_v52  ;;  %v1884_v27 = vpop.f32.mrb[220].mxu1 }
 0x29d   :  { %v1532_v44 = vadd.f32 %v1531_v51, %v9317_v48  ;;  %v1533_v28 = vpop.f32.mrb[221].mxu0  ;;  %v1885_v46 = vadd.f32 %v1884_v27, %v9326_v42  ;;  %v1886_v43 = vpop.f32.mrb[221].mxu1 }
 0x29e   :  { %v1534_v37 = vadd.f32 %v1533_v28, %v9321_v0  ;;  %v1535_v45 = vpop.f32.mrb[222].mxu0  ;;  %v1887_v56 = vadd.f32 %v1886_v43, %v9330_v7  ;;  %v1888_v10 = vpop.f32.mrb[222].mxu1 }
 0x29f   :  { %v4125_v55 = vmax.f32 %v1532_v44, 0.0  ;;  %v1536_v14 = vadd.f32 %v1535_v45, %v9317_v48  ;;  %v1537_v22 = vpop.f32.mrb[223].mxu0  ;;  %v4127_v59 = vmax.f32 %v1885_v46, 0.0  ;;  %v1889_v8 = vadd.f32 %v1888_v10, %v9326_v42  ;;  %v1890_v24 = vpop.f32.mrb[223].mxu1 }
 0x2a0   :  { %v4126_v13 = vmax.f32 %v1534_v37, 0.0  ;;  %v1538_v21 = vadd.f32 %v1537_v22, %v9321_v0  ;;  %v4128_v1 = vmax.f32 %v1887_v56, 0.0  ;;  %v1891_v58 = vadd.f32 %v1890_v24, %v9330_v7 }
 0x2a1   :  { %v5162_v29 = vadd.f32 %v5161_v39, %v4125_v55  ;;  %v4141_v9 = vmax.f32 %v1536_v14, 0.0  ;;  %7002 = vmatmul.mubr.msk.bf16.gmra.mrb[72].mxu0 %vm412_vm2, %v8378_v23  ;;  %v5236_v33 = vadd.f32 %v5235_v53, %v4127_v59  ;;  %v4143_v34 = vmax.f32 %v1889_v8, 0.0  ;;  %v8379_v59 = vld [vmem:[%s11233_s0 + $0x98] sm:$0xff]  }
 0x2a2   :  { %v5199_v11 = vadd.f32 %v5198_v54, %v4126_v13  ;;  %v4142_v12 = vmax.f32 %v1538_v21, 0.0  ;;  %7034 = vmatmul.mubr.msk.bf16.gmra.mrb[72].mxu1 %vm412_vm2, %v8378_v23  ;;  %2195 = vmatprep.mubr.bf16.mxu0 %v8450_v3  ;;  %v5273_v50 = vadd.f32 %v5272_v38, %v4128_v1  ;;  %v4144_v62 = vmax.f32 %v1891_v58, 0.0 }
 0x2a3   :  { %v5163_v31 = vadd.f32 %v5162_v29, %v4141_v9  ;;  %2548 = vmatprep.mubr.bf16.mxu1 %v8450_v3  ;;  %v5237_v32 = vadd.f32 %v5236_v33, %v4143_v34 }
 0x2a4   :  { %v5200_v2 = vadd.f32 %v5199_v11, %v4142_v12  ;;  %v1541_v61 = vpop.f32.mrb[224].mxu0  ;;  %v5274_v57 = vadd.f32 %v5273_v50, %v4144_v62  ;;  %v1894_v35 = vpop.f32.mrb[224].mxu1 }
 0x2a5   :  { %v1542_v6 = vadd.f32 %v1541_v61, %v9317_v48  ;;  %v1543_v60 = vpop.f32.mrb[225].mxu0  ;;  %v1895_v39 = vadd.f32 %v1894_v35, %v9326_v42  ;;  %v1896_v53 = vpop.f32.mrb[225].mxu1 }
 0x2a6   :  { %v1544_v52 = vadd.f32 %v1543_v60, %v9321_v0  ;;  %v1545_v54 = vpop.f32.mrb[226].mxu0  ;;  %v1897_v38 = vadd.f32 %v1896_v53, %v9330_v7  ;;  %v1898_v27 = vpop.f32.mrb[226].mxu1 }
 0x2a7   :  { %v4157_v51 = vmax.f32 %v1542_v6, 0.0  ;;  %v1546_v44 = vadd.f32 %v1545_v54, %v9317_v48  ;;  %v1547_v28 = vpop.f32.mrb[227].mxu0  ;;  %v4159_v46 = vmax.f32 %v1895_v39, 0.0  ;;  %v1899_v43 = vadd.f32 %v1898_v27, %v9326_v42  ;;  %v1900_v55 = vpop.f32.mrb[227].mxu1 }
 0x2a8   :  { %v4158_v37 = vmax.f32 %v1544_v52, 0.0  ;;  %v1548_v45 = vadd.f32 %v1547_v28, %v9321_v0  ;;  %v4160_v14 = vmax.f32 %v1897_v38, 0.0  ;;  %v1901_v22 = vadd.f32 %v1900_v55, %v9330_v7 }
 0x2a9   :  { %v5164_v56 = vadd.f32 %v5163_v31, %v4157_v51  ;;  %v4173_v10 = vmax.f32 %v1546_v44, 0.0  ;;  %7003 = vmatmul.mubr.msk.bf16.gmra.mrb[76].mxu0 %vm412_vm2, %v8379_v59  ;;  %v5238_v13 = vadd.f32 %v5237_v32, %v4159_v46  ;;  %v4175_v21 = vmax.f32 %v1899_v43, 0.0  ;;  %v8380_v46 = vld [vmem:[%s11233_s0 + $0xa0] sm:$0xff]  }
 0x2aa   :  { %v5201_v8 = vadd.f32 %v5200_v2, %v4158_v37  ;;  %v4174_v24 = vmax.f32 %v1548_v45, 0.0  ;;  %7035 = vmatmul.mubr.msk.bf16.gmra.mrb[76].mxu1 %vm412_vm2, %v8379_v59  ;;  %2205 = vmatprep.mubr.bf16.mxu0 %v8450_v3  ;;  %v5275_v29 = vadd.f32 %v5274_v57, %v4160_v14  ;;  %v4176_v9 = vmax.f32 %v1901_v22, 0.0 }
 0x2ab   :  { %v5165_v1 = vadd.f32 %v5164_v56, %v4173_v10  ;;  %2558 = vmatprep.mubr.bf16.mxu1 %v8450_v3  ;;  %v5239_v58 = vadd.f32 %v5238_v13, %v4175_v21 }
 0x2ac   :  { %v5202_v23 = vadd.f32 %v5201_v8, %v4174_v24  ;;  %v1551_v33 = vpop.f32.mrb[228].mxu0  ;;  %v5276_v11 = vadd.f32 %v5275_v29, %v4176_v9  ;;  %v1904_v12 = vpop.f32.mrb[228].mxu1 }
 0x2ad   :  { %v1552_v34 = vadd.f32 %v1551_v33, %v9317_v48  ;;  %v1553_v50 = vpop.f32.mrb[229].mxu0  ;;  %v1905_v31 = vadd.f32 %v1904_v12, %v9326_v42  ;;  %v1906_v32 = vpop.f32.mrb[229].mxu1 }
 0x2ae   :  { %v1554_v62 = vadd.f32 %v1553_v50, %v9321_v0  ;;  %v1555_v2 = vpop.f32.mrb[230].mxu0  ;;  %v1907_v57 = vadd.f32 %v1906_v32, %v9330_v7  ;;  %v1908_v35 = vpop.f32.mrb[230].mxu1 }
 0x2af   :  { %v4189_v61 = vmax.f32 %v1552_v34, 0.0  ;;  %v1556_v6 = vadd.f32 %v1555_v2, %v9317_v48  ;;  %v1557_v60 = vpop.f32.mrb[231].mxu0  ;;  %v4191_v39 = vmax.f32 %v1905_v31, 0.0  ;;  %v1909_v53 = vadd.f32 %v1908_v35, %v9326_v42  ;;  %v1910_v51 = vpop.f32.mrb[231].mxu1 }
 0x2b0   :  { %v4190_v52 = vmax.f32 %v1554_v62, 0.0  ;;  %v1558_v54 = vadd.f32 %v1557_v60, %v9321_v0  ;;  %v4192_v44 = vmax.f32 %v1907_v57, 0.0  ;;  %v1911_v28 = vadd.f32 %v1910_v51, %v9330_v7 }
 0x2b1   :  { %v5166_v38 = vadd.f32 %v5165_v1, %v4189_v61  ;;  %v4205_v27 = vmax.f32 %v1556_v6, 0.0  ;;  %7004 = vmatmul.mubr.msk.bf16.gmra.mrb[80].mxu0 %vm412_vm2, %v8380_v46  ;;  %v5240_v37 = vadd.f32 %v5239_v58, %v4191_v39  ;;  %v4207_v45 = vmax.f32 %v1909_v53, 0.0  ;;  %v8381_v39 = vld [vmem:[%s11233_s0 + $0xa8] sm:$0xff]  }
 0x2b2   :  { %v5203_v43 = vadd.f32 %v5202_v23, %v4190_v52  ;;  %v4206_v55 = vmax.f32 %v1558_v54, 0.0  ;;  %7036 = vmatmul.mubr.msk.bf16.gmra.mrb[80].mxu1 %vm412_vm2, %v8380_v46  ;;  %2215 = vmatprep.mubr.bf16.mxu0 %v8450_v3  ;;  %v5277_v56 = vadd.f32 %v5276_v11, %v4192_v44  ;;  %v4208_v10 = vmax.f32 %v1911_v28, 0.0 }
 0x2b3   :  { %v5167_v14 = vadd.f32 %v5166_v38, %v4205_v27  ;;  %2568 = vmatprep.mubr.bf16.mxu1 %v8450_v3  ;;  %v5241_v22 = vadd.f32 %v5240_v37, %v4207_v45 }
 0x2b4   :  { %v5204_v59 = vadd.f32 %v5203_v43, %v4206_v55  ;;  %v1561_v13 = vpop.f32.mrb[232].mxu0  ;;  %v5278_v8 = vadd.f32 %v5277_v56, %v4208_v10  ;;  %v1914_v24 = vpop.f32.mrb[232].mxu1  ;;  %v4662_v10 = vrot.slane %v9627_v36, 4 }
 0x2b5   :  { %v1562_v21 = vadd.f32 %v1561_v13, %v9317_v48  ;;  %v1563_v29 = vpop.f32.mrb[233].mxu0  ;;  %v1915_v1 = vadd.f32 %v1914_v24, %v9326_v42  ;;  %v1916_v58 = vpop.f32.mrb[233].mxu1 }
 0x2b6   :  { %v1564_v9 = vadd.f32 %v1563_v29, %v9321_v0  ;;  %v1565_v23 = vpop.f32.mrb[234].mxu0  ;;  %v1917_v11 = vadd.f32 %v1916_v58, %v9330_v7  ;;  %v1918_v12 = vpop.f32.mrb[234].mxu1 }
 0x2b7   :  { %v4221_v33 = vmax.f32 %v1562_v21, 0.0  ;;  %v1566_v34 = vadd.f32 %v1565_v23, %v9317_v48  ;;  %v1567_v50 = vpop.f32.mrb[235].mxu0  ;;  %v4223_v31 = vmax.f32 %v1915_v1, 0.0  ;;  %v1919_v32 = vadd.f32 %v1918_v12, %v9326_v42  ;;  %v1920_v61 = vpop.f32.mrb[235].mxu1 }
 0x2b8   :  { %v4222_v62 = vmax.f32 %v1564_v9, 0.0  ;;  %v1568_v2 = vadd.f32 %v1567_v50, %v9321_v0  ;;  %v4224_v6 = vmax.f32 %v1917_v11, 0.0  ;;  %v1921_v60 = vadd.f32 %v1920_v61, %v9330_v7 }
 0x2b9   :  { %v5168_v57 = vadd.f32 %v5167_v14, %v4221_v33  ;;  %v4237_v35 = vmax.f32 %v1566_v34, 0.0  ;;  %7005 = vmatmul.mubr.msk.bf16.gmra.mrb[84].mxu0 %vm412_vm2, %v8381_v39  ;;  %v5242_v52 = vadd.f32 %v5241_v22, %v4223_v31  ;;  %v4239_v54 = vmax.f32 %v1919_v32, 0.0 }
 0x2ba   :  { %v5205_v53 = vadd.f32 %v5204_v59, %v4222_v62  ;;  %v4238_v51 = vmax.f32 %v1568_v2, 0.0  ;;  %7037 = vmatmul.mubr.msk.bf16.gmra.mrb[84].mxu1 %vm412_vm2, %v8381_v39  ;;  %2225 = vmatprep.mubr.bf16.mxu0 %v8450_v3  ;;  %v5279_v38 = vadd.f32 %v5278_v8, %v4224_v6  ;;  %v4240_v27 = vmax.f32 %v1921_v60, 0.0  ;;  %v8382_v2 = vld [vmem:[%s11233_s0 + $0xb0] sm:$0xff]  }
 0x2bb   :  { %v5169_v44 = vadd.f32 %v5168_v57, %v4237_v35  ;;  %2578 = vmatprep.mubr.bf16.mxu1 %v8450_v3  ;;  %v5243_v28 = vadd.f32 %v5242_v52, %v4239_v54  ;;  %v4588_v14 = vrot.slane %v9624_v40, 4  ;;  %v4625_v21 = vrot.slane %v9629_v5, 4 }
 0x2bc   :  { %v5206_v46 = vadd.f32 %v5205_v53, %v4238_v51  ;;  %v1571_v37 = vpop.f32.mrb[236].mxu0  ;;  %v5280_v43 = vadd.f32 %v5279_v38, %v4240_v27  ;;  %v1924_v55 = vpop.f32.mrb[236].mxu1 }
 0x2bd   :  { %v1572_v45 = vadd.f32 %v1571_v37, %v9317_v48  ;;  %v1573_v56 = vpop.f32.mrb[237].mxu0  ;;  %v1925_v22 = vadd.f32 %v1924_v55, %v9326_v42  ;;  %v1926_v13 = vpop.f32.mrb[237].mxu1  ;;  %v4589_v60 = vadd.f32 %v4588_v14, %v9624_v40  ;;  %v9821_v55 = vadd.f32 %v4625_v21, %v9629_v5 }
 0x2be   :  { %v1574_v59 = vadd.f32 %v1573_v56, %v9321_v0  ;;  %v1575_v8 = vpop.f32.mrb[238].mxu0  ;;  %v1927_v29 = vadd.f32 %v1926_v13, %v9330_v7  ;;  %v1928_v9 = vpop.f32.mrb[238].mxu1 }
 0x2bf   :  { %v4253_v24 = vmax.f32 %v1572_v45, 0.0  ;;  %v1576_v1 = vadd.f32 %v1575_v8, %v9317_v48  ;;  %v1577_v58 = vpop.f32.mrb[239].mxu0  ;;  %v4255_v23 = vmax.f32 %v1925_v22, 0.0  ;;  %v1929_v11 = vadd.f32 %v1928_v9, %v9326_v42  ;;  %v1930_v12 = vpop.f32.mrb[239].mxu1 }
 0x2c0   :  { %v4254_v33 = vmax.f32 %v1574_v59, 0.0  ;;  %v1578_v34 = vadd.f32 %v1577_v58, %v9321_v0  ;;  %v4256_v31 = vmax.f32 %v1927_v29, 0.0  ;;  %v1931_v32 = vadd.f32 %v1930_v12, %v9330_v7 }
 0x2c1   :  { %v5170_v50 = vadd.f32 %v5169_v44, %v4253_v24  ;;  %v4269_v62 = vmax.f32 %v1576_v1, 0.0  ;;  %7006 = vmatmul.mubr.msk.bf16.gmra.mrb[88].mxu0 %vm412_vm2, %v8382_v2  ;;  %v5244_v61 = vadd.f32 %v5243_v28, %v4255_v23  ;;  %v4271_v6 = vmax.f32 %v1929_v11, 0.0  ;;  %v8383_v11 = vld [vmem:[%s11233_s0 + $0xb8] sm:$0xff]  }
 0x2c2   :  { %v5207_v57 = vadd.f32 %v5206_v46, %v4254_v33  ;;  %v4270_v35 = vmax.f32 %v1578_v34, 0.0  ;;  %7038 = vmatmul.mubr.msk.bf16.gmra.mrb[88].mxu1 %vm412_vm2, %v8382_v2  ;;  %2235 = vmatprep.mubr.bf16.mxu0 %v8450_v3  ;;  %v5281_v39 = vadd.f32 %v5280_v43, %v4256_v31  ;;  %v4272_v53 = vmax.f32 %v1931_v32, 0.0 }
 0x2c3   :  { %v5171_v52 = vadd.f32 %v5170_v50, %v4269_v62  ;;  %2588 = vmatprep.mubr.bf16.mxu1 %v8450_v3  ;;  %v5245_v54 = vadd.f32 %v5244_v61, %v4271_v6  ;;  %v4699_v44 = vrot.slane %v9631_v47, 4  ;;  %v4663_v45 = vadd.f32 %v4662_v10, %v9627_v36 }
 0x2c4   :  { %v5208_v51 = vadd.f32 %v5207_v57, %v4270_v35  ;;  %v1581_v38 = vpop.f32.mrb[240].mxu0  ;;  %v5282_v27 = vadd.f32 %v5281_v39, %v4272_v53  ;;  %v1934_v46 = vpop.f32.mrb[240].mxu1  ;;  %v4590_v22 = vrot.slane %v4589_v60, 2 }
 0x2c5   :  { %v1582_v28 = vadd.f32 %v1581_v38, %v9317_v48  ;;  %v1583_v37 = vpop.f32.mrb[241].mxu0  ;;  %v1935_v40 = vadd.f32 %v1934_v46, %v9326_v42  ;;  %v1936_v56 = vpop.f32.mrb[241].mxu1  ;;  %v4664_v62 = vrot.slane %v4663_v45, 2  ;;  %v9838_v39 = vadd.f32 %v4699_v44, %v9631_v47 }
 0x2c6   :  { %v1584_v43 = vadd.f32 %v1583_v37, %v9321_v0  ;;  %v1585_v14 = vpop.f32.mrb[242].mxu0  ;;  %v1937_v13 = vadd.f32 %v1936_v56, %v9330_v7  ;;  %v1938_v24 = vpop.f32.mrb[242].mxu1  ;;  %v9841_v38 = vadd.f32 %v4590_v22, %v4589_v60 }
 0x2c7   :  { %v4285_v59 = vmax.f32 %v1582_v28, 0.0  ;;  %v1586_v8 = vadd.f32 %v1585_v14, %v9317_v48  ;;  %v1587_v29 = vpop.f32.mrb[243].mxu0  ;;  %v4287_v1 = vmax.f32 %v1935_v40, 0.0  ;;  %v1939_v36 = vadd.f32 %v1938_v24, %v9326_v42  ;;  %v1940_v10 = vpop.f32.mrb[243].mxu1 }
 0x2c8   :  { %v4286_v9 = vmax.f32 %v1584_v43, 0.0  ;;  %v1588_v5 = vadd.f32 %v1587_v29, %v9321_v0  ;;  %v4288_v58 = vmax.f32 %v1937_v13, 0.0  ;;  %v1941_v33 = vadd.f32 %v1940_v10, %v9330_v7 }
 0x2c9   :  { %v5172_v21 = vadd.f32 %v5171_v52, %v4285_v59  ;;  %v4301_v23 = vmax.f32 %v1586_v8, 0.0  ;;  %7007 = vmatmul.mubr.msk.bf16.gmra.mrb[92].mxu0 %vm412_vm2, %v8383_v11  ;;  %v5246_v34 = vadd.f32 %v5245_v54, %v4287_v1  ;;  %v4303_v50 = vmax.f32 %v1939_v36, 0.0  ;;  %v8384_v36 = vld [vmem:[%s11233_s0 + $0xc0] sm:$0xff]  }
 0x2ca   :  { %v5209_v12 = vadd.f32 %v5208_v51, %v4286_v9  ;;  %v4302_v31 = vmax.f32 %v1588_v5, 0.0  ;;  %7039 = vmatmul.mubr.msk.bf16.gmra.mrb[92].mxu1 %vm412_vm2, %v8383_v11  ;;  %2245 = vmatprep.mubr.bf16.mxu0 %v8450_v3  ;;  %v5283_v32 = vadd.f32 %v5282_v27, %v4288_v58  ;;  %v4304_v61 = vmax.f32 %v1941_v33, 0.0 }
 0x2cb   :  { %v5173_v2 = vadd.f32 %v5172_v21, %v4301_v23  ;;  %2598 = vmatprep.mubr.bf16.mxu1 %v8450_v3  ;;  %v5247_v57 = vadd.f32 %v5246_v34, %v4303_v50  ;;  %v4627_v28 = vrot.slane %v9821_v55, 2  ;;  %v9846_v43 = vadd.f32 %v4664_v62, %v4663_v45  ;;  %v8385_v62 = vld [vmem:[%s11235_s2 + $0x8] sm:$0xff] }
 0x2cc   :  { %v5210_v6 = vadd.f32 %v5209_v12, %v4302_v31  ;;  %v1591_v35 = vpop.f32.mrb[244].mxu0  ;;  %v5284_v52 = vadd.f32 %v5283_v32, %v4304_v61  ;;  %v9866_v32 = vrot.slane %v8385_v62, %v102_v15 }
 0x2cd   :  { %v1592_v53 = vadd.f32 %v1591_v35, %v9317_v48  ;;  %v1944_v54 = vpop.f32.mrb[244].mxu1  ;;  %v1593_v51 = vpop.f32.mrb[245].mxu0  ;;  %v4628_v34 = vadd.f32 %v4627_v28, %v9821_v55  ;;  %v4592_v55 = vrot.slane %v9841_v38, 1 }
 0x2ce   :  { %v1945_v27 = vadd.f32 %v1944_v54, %v9326_v42  ;;  %v1594_v46 = vadd.f32 %v1593_v51, %v9321_v0  ;;  %v1946_v37 = vpop.f32.mrb[245].mxu1  ;;  %v1595_v40 = vpop.f32.mrb[246].mxu0 }
 0x2cf   :  { %v4317_v56 = vmax.f32 %v1592_v53, 0.0  ;;  %v1947_v47 = vadd.f32 %v1946_v37, %v9330_v7  ;;  %v1596_v44 = vadd.f32 %v1595_v40, %v9317_v48  ;;  %v1948_v14 = vpop.f32.mrb[246].mxu1  ;;  %v1597_v59 = vpop.f32.mrb[247].mxu0 }
 0x2d0   :  { %v4319_v13 = vmax.f32 %v1945_v27, 0.0  ;;  %v4318_v60 = vmax.f32 %v1594_v46, 0.0  ;;  %v1949_v22 = vadd.f32 %v1948_v14, %v9326_v42  ;;  %v1598_v8 = vadd.f32 %v1597_v59, %v9321_v0  ;;  %v1950_v24 = vpop.f32.mrb[247].mxu1 }
 0x2d1   :  { %v5174_v29 = vadd.f32 %v5173_v2, %v4317_v56  ;;  %v4320_v1 = vmax.f32 %v1947_v47, 0.0  ;;  %v4333_v9 = vmax.f32 %v1596_v44, 0.0  ;;  %v1951_v45 = vadd.f32 %v1950_v24, %v9330_v7  ;;  %7008 = vmatmul.mubr.msk.bf16.gmra.mrb[96].mxu0 %vm412_vm2, %v8384_v36 }
 0x2d2   :  { %v5248_v5 = vadd.f32 %v5247_v57, %v4319_v13  ;;  %v5211_v10 = vadd.f32 %v5210_v6, %v4318_v60  ;;  %v4335_v21 = vmax.f32 %v1949_v22, 0.0  ;;  %v4334_v58 = vmax.f32 %v1598_v8, 0.0  ;;  %7040 = vmatmul.mubr.msk.bf16.gmra.mrb[96].mxu1 %vm412_vm2, %v8384_v36  ;;  %2255 = vmatprep.mubr.bf16.mxu0 %v8450_v3 }
 0x2d3   :  { %v5285_v23 = vadd.f32 %v5284_v52, %v4320_v1  ;;  %v5175_v33 = vadd.f32 %v5174_v29, %v4333_v9  ;;  %v4336_v11 = vmax.f32 %v1951_v45, 0.0  ;;  %2608 = vmatprep.mubr.bf16.mxu1 %v8450_v3  ;;  %v4701_v2 = vrot.slane %v9838_v39, 2  ;;  %v8386_v29 = vld [vmem:[%s11233_s0 + $0xc8] sm:$0xff]  }
 0x2d4   :  { %v5249_v12 = vadd.f32 %v5248_v5, %v4335_v21  ;;  %v5212_v50 = vadd.f32 %v5211_v10, %v4334_v58  ;;  %v1601_v31 = vpop.f32.mrb[248].mxu0  ;;  %v4666_v52 = vrot.slane %v9846_v43, 1  ;;  %v4629_v56 = vrot.slane %v4628_v34, 1 }
 0x2d5   :  { %v5286_v61 = vadd.f32 %v5285_v23, %v4336_v11  ;;  %v1602_v57 = vadd.f32 %v1601_v31, %v9317_v48  ;;  %v1954_v6 = vpop.f32.mrb[248].mxu1  ;;  %v1603_v35 = vpop.f32.mrb[249].mxu0  ;;  %v4702_v58 = vadd.f32 %v4701_v2, %v9838_v39  ;;  %v9889_v23 = vrot.slane %v8385_v62, %v106_v25 }
 0x2d6   :  { %v1955_v53 = vadd.f32 %v1954_v6, %v9326_v42  ;;  %v1604_v54 = vadd.f32 %v1603_v35, %v9321_v0  ;;  %v1956_v51 = vpop.f32.mrb[249].mxu1  ;;  %v1605_v28 = vpop.f32.mrb[250].mxu0  ;;  %v9897_v31 = vrot.slane %v8385_v62, %v114_v26  ;;  %v4667_v25 = vadd.f32 %v4666_v52, %v9846_v43 }
 0x2d7   :  { %v4349_v27 = vmax.f32 %v1602_v57, 0.0  ;;  %v1957_v15 = vadd.f32 %v1956_v51, %v9330_v7  ;;  %v1606_v46 = vadd.f32 %v1605_v28, %v9317_v48  ;;  %v1958_v37 = vpop.f32.mrb[250].mxu1  ;;  %v1607_v40 = vpop.f32.mrb[251].mxu0  ;;  %v4630_v51 = vadd.f32 %v4629_v56, %v4628_v34  ;;  %v8387_v56 = vld [vmem:[%s11233_s0 + $0xd0] sm:$0xff]  }
 0x2d8   :  { %v4351_v47 = vmax.f32 %v1955_v53, 0.0  ;;  %v4350_v44 = vmax.f32 %v1604_v54, 0.0  ;;  %v1959_v14 = vadd.f32 %v1958_v37, %v9326_v42  ;;  %v1608_v59 = vadd.f32 %v1607_v40, %v9321_v0  ;;  %v1960_v13 = vpop.f32.mrb[251].mxu1 }
 0x2d9   :  { %v5176_v60 = vadd.f32 %v5175_v33, %v4349_v27  ;;  %v4352_v22 = vmax.f32 %v1957_v15, 0.0  ;;  %v4365_v8 = vmax.f32 %v1606_v46, 0.0  ;;  %v1961_v24 = vadd.f32 %v1960_v13, %v9330_v7  ;;  %7009 = vmatmul.mubr.msk.bf16.gmra.mrb[100].mxu0 %vm412_vm2, %v8386_v29 }
 0x2da   :  { %v5250_v1 = vadd.f32 %v5249_v12, %v4351_v47  ;;  %v5213_v9 = vadd.f32 %v5212_v50, %v4350_v44  ;;  %v4367_v45 = vmax.f32 %v1959_v14, 0.0  ;;  %v4366_v36 = vmax.f32 %v1608_v59, 0.0  ;;  %7041 = vmatmul.mubr.msk.bf16.gmra.mrb[100].mxu1 %vm412_vm2, %v8386_v29  ;;  %2265 = vmatprep.mubr.bf16.mxu0 %v8450_v3 }
 0x2db   :  { %v5287_v5 = vadd.f32 %v5286_v61, %v4352_v22  ;;  %v5177_v10 = vadd.f32 %v5176_v60, %v4365_v8  ;;  %v4368_v21 = vmax.f32 %v1961_v24, 0.0  ;;  %2618 = vmatprep.mubr.bf16.mxu1 %v8450_v3  ;;  %v9893_v33 = vrot.slane %v8385_v62, %v110_v16 }
 0x2dc   :  { %v5251_v11 = vadd.f32 %v5250_v1, %v4367_v45  ;;  %v5214_v12 = vadd.f32 %v5213_v9, %v4366_v36  ;;  %v1611_v50 = vpop.f32.mrb[252].mxu0  ;;  %v4593_v61 = vadd.f32 %v4592_v55, %v9841_v38  ;;  %v4703_v55 = vrot.slane %v4702_v58, 1 }
 0x2dd   :  { %v5288_v57 = vadd.f32 %v5287_v5, %v4368_v21  ;;  %v1612_v39 = vadd.f32 %v1611_v50, %v9317_v48  ;;  %v1964_v2 = vpop.f32.mrb[252].mxu1  ;;  %v1613_v6 = vpop.f32.mrb[253].mxu0  ;;  %v9920_v29 = vmul.f32 0.00390625, %v4630_v51 }
 0x2de   :  { %v1965_v35 = vadd.f32 %v1964_v2, %v9326_v42  ;;  %v1614_v16 = vadd.f32 %v1613_v6, %v9321_v0  ;;  %v1966_v53 = vpop.f32.mrb[253].mxu1  ;;  %v1615_v54 = vpop.f32.mrb[254].mxu0 }
 0x2df   :  { %v4381_v28 = vmax.f32 %v1612_v39, 0.0  ;;  %v1967_v4 = vadd.f32 %v1966_v53, %v9330_v7  ;;  %v1616_v26 = vadd.f32 %v1615_v54, %v9317_v48  ;;  %v1968_v38 = vpop.f32.mrb[254].mxu1  ;;  %v1617_v62 = vpop.f32.mrb[255].mxu0 }
 0x2e0   :  { %v4383_v27 = vmax.f32 %v1965_v35, 0.0  ;;  %v4382_v15 = vmax.f32 %v1614_v16, 0.0  ;;  %v1969_v46 = vadd.f32 %v1968_v38, %v9326_v42  ;;  %v1618_v43 = vadd.f32 %v1617_v62, %v9321_v0  ;;  %v1970_v52 = vpop.f32.mrb[255].mxu1 }
 0x2e1   :  { %v5178_v37 = vadd.f32 %v5177_v10, %v4381_v28  ;;  %v4384_v40 = vmax.f32 %v1967_v4, 0.0  ;;  %v4397_v47 = vmax.f32 %v1616_v26, 0.0  ;;  %v1971_v34 = vadd.f32 %v1970_v52, %v9330_v7  ;;  %7010 = vmatmul.mubr.msk.bf16.gmra.mrb[104].mxu0 %vm412_vm2, %v8387_v56 }
 0x2e2   :  { %v5252_v48 = vadd.f32 %v5251_v11, %v4383_v27  ;;  %v5215_v44 = vadd.f32 %v5214_v12, %v4382_v15  ;;  %v4399_v14 = vmax.f32 %v1969_v46, 0.0  ;;  %v4398_v59 = vmax.f32 %v1618_v43, 0.0  ;;  %7042 = vmatmul.mubr.msk.bf16.gmra.mrb[104].mxu1 %vm412_vm2, %v8387_v56  ;;  %2275 = vmatprep.mubr.bf16.mxu0 %v8450_v3 }
 0x2e3   :  { %v9915_v0 = vmul.f32 0.00390625, %v4593_v61  ;;  %v5289_v42 = vadd.f32 %v5288_v57, %v4384_v40  ;;  %v5179_v13 = vadd.f32 %v5178_v37, %v4397_v47  ;;  %v4400_v60 = vmax.f32 %v1971_v34, 0.0  ;;  %2628 = vmatprep.mubr.bf16.mxu1 %v8450_v3 }
 0x2e4   :  { %v9918_v7 = vmul.f32 0.00390625, %v4667_v25  ;;  %v5253_v22 = vadd.f32 %v5252_v48, %v4399_v14  ;;  %v5216_v8 = vadd.f32 %v5215_v44, %v4398_v59  ;;  %v2007_v24 = vpop.f32.mrb[0].mxu0  ;;  %v9923_v10 = vadd.f32 %v4703_v55, %v4702_v58  ;;  %v8388_v55 = vld [vmem:[%s11233_s0 + $0xd8] sm:$0xff]  }
 0x2e5   :  { %v5180_v1 = vrot.slane %v5179_v13, 4  ;;  %v5290_v9 = vadd.f32 %v5289_v42, %v4400_v60  ;;  %v2008_v45 = vadd.f32 %v2007_v24, %v9866_v32  ;;  %v2360_v36 = vpop.f32.mrb[0].mxu1  ;;  %v2009_v5 = vpop.f32.mrb[1].mxu0 }
 0x2e6   :  { %v5254_v21 = vrot.slane %v5253_v22, 4  ;;  %v5217_v11 = vrot.slane %v5216_v8, 4  ;;  %v2361_v12 = vadd.f32 %v2360_v36, %v9893_v33  ;;  %v2010_v50 = vadd.f32 %v2009_v5, %v9889_v23  ;;  %v2362_v61 = vpop.f32.mrb[1].mxu1  ;;  %v2011_v57 = vpop.f32.mrb[2].mxu0 }
 0x2e7   :  { %v5181_v39 = vadd.f32 %v5180_v1, %v5179_v13  ;;  %v5291_v2 = vrot.slane %v5290_v9, 4  ;;  %v3393_v6 = vmax.f32 %v2008_v45, 0.0  ;;  %v2363_v25 = vadd.f32 %v2362_v61, %v9897_v31  ;;  %v2364_v35 = vpop.f32.mrb[2].mxu1  ;;  %v2013_v16 = vpop.f32.mrb[3].mxu0 }
 0x2e8   :  { %v5255_v53 = vadd.f32 %v5254_v21, %v5253_v22  ;;  %v5218_v54 = vadd.f32 %v5217_v11, %v5216_v8  ;;  %v3395_v51 = vmax.f32 %v2361_v12, 0.0  ;;  %v3394_v58 = vmax.f32 %v2010_v50, 0.0  ;;  %v2366_v28 = vpop.f32.mrb[3].mxu1 }
 0x2e9   :  { %v5182_v4 = vrot.slane %v5181_v39, 2  ;;  %v9928_v26 = vadd.f32 %v5291_v2, %v5290_v9  ;;  %v3396_v38 = vmax.f32 %v2363_v25, 0.0  ;;  %v2012_v62 = vadd.f32 %v2011_v57, %v9866_v32  ;;  %7011 = vmatmul.mubr.msk.bf16.gmra.mrb[108].mxu0 %vm412_vm2, %v8388_v55 }
 0x2ea   :  { %v5256_v27 = vrot.slane %v5255_v53, 2  ;;  %v5219_v15 = vrot.slane %v5218_v54, 2  ;;  %v2365_v46 = vadd.f32 %v2364_v35, %v9893_v33  ;;  %v2014_v43 = vadd.f32 %v2013_v16, %v9889_v23  ;;  %7043 = vmatmul.mubr.msk.bf16.gmra.mrb[108].mxu1 %vm412_vm2, %v8388_v55  ;;  %2285 = vmatprep.mubr.bf16.mxu0 %v8450_v3 }
 0x2eb   :  { %v5183_v52 = vadd.f32 %v5182_v4, %v5181_v39  ;;  %v5293_v37 = vrot.slane %v9928_v26, 2  ;;  %v3409_v40 = vmax.f32 %v2012_v62, 0.0  ;;  %v2367_v47 = vadd.f32 %v2366_v28, %v9897_v31  ;;  %2638 = vmatprep.mubr.bf16.mxu1 %v8450_v3 }
 0x2ec   :  { %v5257_v34 = vadd.f32 %v5256_v27, %v5255_v53  ;;  %v3411_v56 = vmax.f32 %v2365_v46, 0.0  ;;  %v3410_v48 = vmax.f32 %v2014_v43, 0.0  ;;  %v2017_v44 = vpop.f32.mrb[4].mxu0  ;;  %v5220_v14 = vadd.f32 %v5219_v15, %v5218_v54 }
 0x2ed   :  { %v5184_v59 = vrot.slane %v5183_v52, 1  ;;  %v4705_v42 = vadd.f32 %v3409_v40, %v3393_v6  ;;  %v3412_v13 = vmax.f32 %v2367_v47, 0.0  ;;  %v2018_v60 = vadd.f32 %v2017_v44, %v9866_v32  ;;  %v2370_v22 = vpop.f32.mrb[4].mxu1  ;;  %v2019_v8 = vpop.f32.mrb[5].mxu0 }
 0x2ee   :  { %v5258_v24 = vrot.slane %v5257_v34, 1  ;;  %v4779_v1 = vadd.f32 %v3411_v56, %v3395_v51  ;;  %v4742_v9 = vadd.f32 %v3410_v48, %v3394_v58  ;;  %v2371_v45 = vadd.f32 %v2370_v22, %v9893_v33  ;;  %v2372_v36 = vpop.f32.mrb[5].mxu1  ;;  %v2021_v5 = vpop.f32.mrb[6].mxu0  ;;  %v8389_v58 = vld [vmem:[%s11233_s0 + $0xe0] sm:$0xff]  }
 0x2ef   :  { %v5185_v21 = vadd.f32 %v5184_v59, %v5183_v52  ;;  %v4816_v11 = vadd.f32 %v3412_v13, %v3396_v38  ;;  %v3425_v12 = vmax.f32 %v2018_v60, 0.0  ;;  %v2020_v50 = vadd.f32 %v2019_v8, %v9889_v23  ;;  %v2374_v61 = vpop.f32.mrb[6].mxu1  ;;  %v2023_v57 = vpop.f32.mrb[7].mxu0 }
 0x2f0   :  { %v5259_v39 = vadd.f32 %v5258_v24, %v5257_v34  ;;  %v3427_v2 = vmax.f32 %v2371_v45, 0.0  ;;  %v2373_v6 = vadd.f32 %v2372_v36, %v9897_v31  ;;  %v2022_v25 = vadd.f32 %v2021_v5, %v9866_v32  ;;  %v2376_v35 = vpop.f32.mrb[7].mxu1 }
 0x2f1   :  { %v9947_v16 = vmul.f32 0.00390625, %v5185_v21  ;;  %v4706_v53 = vadd.f32 %v4705_v42, %v3425_v12  ;;  %v3426_v54 = vmax.f32 %v2020_v50, 0.0  ;;  %v2375_v51 = vadd.f32 %v2374_v61, %v9893_v33  ;;  %7012 = vmatmul.mubr.msk.bf16.gmra.mrb[112].mxu0 %vm412_vm2, %v8389_v58 }
 0x2f2   :  { %v9954_v28 = vmul.f32 0.00390625, %v5259_v39  ;;  %v4780_v4 = vadd.f32 %v4779_v1, %v3427_v2  ;;  %v3428_v38 = vmax.f32 %v2373_v6, 0.0  ;;  %v3441_v62 = vmax.f32 %v2022_v25, 0.0  ;;  %7044 = vmatmul.mubr.msk.bf16.gmra.mrb[112].mxu1 %vm412_vm2, %v8389_v58  ;;  %2295 = vmatprep.mubr.bf16.mxu0 %v8450_v3  ;;  %v8390_v25 = vld [vmem:[%s11233_s0 + $0xe8] sm:$0xff]  }
 0x2f3   :  { %v4743_v55 = vadd.f32 %v4742_v9, %v3426_v54  ;;  %v3443_v27 = vmax.f32 %v2375_v51, 0.0  ;;  %v2024_v15 = vadd.f32 %v2023_v57, %v9889_v23  ;;  %v2377_v46 = vadd.f32 %v2376_v35, %v9897_v31  ;;  %2648 = vmatprep.mubr.bf16.mxu1 %v8450_v3 }
 0x2f4   :  { %v4817_v43 = vadd.f32 %v4816_v11, %v3428_v38  ;;  %v2027_v52 = vpop.f32.mrb[8].mxu0  ;;  %v4707_v40 = vadd.f32 %v4706_v53, %v3441_v62  ;;  %v5221_v47 = vrot.slane %v5220_v14, 1  ;;  %v5294_v34 = vadd.f32 %v5293_v37, %v9928_v26 }
 0x2f5   :  { %v3442_v56 = vmax.f32 %v2024_v15, 0.0  ;;  %v3444_v48 = vmax.f32 %v2377_v46, 0.0  ;;  %v2028_v44 = vadd.f32 %v2027_v52, %v9866_v32  ;;  %v2380_v59 = vpop.f32.mrb[8].mxu1  ;;  %v4781_v42 = vadd.f32 %v4780_v4, %v3443_v27  ;;  %v2029_v13 = vpop.f32.mrb[9].mxu0 }
 0x2f6   :  { %v2381_v60 = vadd.f32 %v2380_v59, %v9893_v33  ;;  %v2030_v22 = vadd.f32 %v2029_v13, %v9889_v23  ;;  %v2382_v8 = vpop.f32.mrb[9].mxu1  ;;  %v2031_v24 = vpop.f32.mrb[10].mxu0  ;;  %v5222_v1 = vadd.f32 %v5221_v47, %v5220_v14  ;;  %v5295_v9 = vrot.slane %v5294_v34, 1 }
 0x2f7   :  { %v3457_v45 = vmax.f32 %v2028_v44, 0.0  ;;  %v4744_v36 = vadd.f32 %v4743_v55, %v3442_v56  ;;  %v2383_v5 = vadd.f32 %v2382_v8, %v9897_v31  ;;  %v4818_v26 = vadd.f32 %v4817_v43, %v3444_v48  ;;  %v2384_v37 = vpop.f32.mrb[10].mxu1  ;;  %v2033_v21 = vpop.f32.mrb[11].mxu0 }
 0x2f8   :  { %v3459_v11 = vmax.f32 %v2381_v60, 0.0  ;;  %v3458_v12 = vmax.f32 %v2030_v22, 0.0  ;;  %v2032_v50 = vadd.f32 %v2031_v24, %v9866_v32  ;;  %v2385_v61 = vadd.f32 %v2384_v37, %v9893_v33  ;;  %v2386_v57 = vpop.f32.mrb[11].mxu1 }
 0x2f9   :  { %v4708_v39 = vadd.f32 %v4707_v40, %v3457_v45  ;;  %v3460_v2 = vmax.f32 %v2383_v5, 0.0  ;;  %v2034_v6 = vadd.f32 %v2033_v21, %v9889_v23  ;;  %v2387_v14 = vadd.f32 %v2386_v57, %v9897_v31  ;;  %7013 = vmatmul.mubr.msk.bf16.gmra.mrb[116].mxu0 %vm412_vm2, %v8390_v25 }
 0x2fa   :  { %v4782_v35 = vadd.f32 %v4781_v42, %v3459_v11  ;;  %v4745_v53 = vadd.f32 %v4744_v36, %v3458_v12  ;;  %v3473_v54 = vmax.f32 %v2032_v50, 0.0  ;;  %v3475_v51 = vmax.f32 %v2385_v61, 0.0  ;;  %7045 = vmatmul.mubr.msk.bf16.gmra.mrb[116].mxu1 %vm412_vm2, %v8390_v25  ;;  %2305 = vmatprep.mubr.bf16.mxu0 %v8450_v3 }
 0x2fb   :  { %v4819_v58 = vadd.f32 %v4818_v26, %v3460_v2  ;;  %v3474_v4 = vmax.f32 %v2034_v6, 0.0  ;;  %v3476_v38 = vmax.f32 %v2387_v14, 0.0  ;;  %2658 = vmatprep.mubr.bf16.mxu1 %v8450_v3  ;;  %v5615_v62 = vmul.f32 0.00390625, %v5222_v1 }
 0x2fc   :  { %v4709_v55 = vadd.f32 %v4708_v39, %v3473_v54  ;;  %v4783_v27 = vadd.f32 %v4782_v35, %v3475_v51  ;;  %v2037_v15 = vpop.f32.mrb[12].mxu0  ;;  %v5296_v46 = vadd.f32 %v5295_v9, %v5294_v34  ;;  %v9980_v43 = vsel %vm6177_vm3, %v9947_v16, %v9915_v0 }
 0x2fd   :  { %v4746_v52 = vadd.f32 %v4745_v53, %v3474_v4  ;;  %v4820_v40 = vadd.f32 %v4819_v58, %v3476_v38  ;;  %v2038_v47 = vadd.f32 %v2037_v15, %v9866_v32  ;;  %v2390_v56 = vpop.f32.mrb[12].mxu1  ;;  %v2039_v48 = vpop.f32.mrb[13].mxu0  ;;  %v9985_v44 = vsel %vm6177_vm3, %v5615_v62, %v9920_v29 }
 0x2fe   :  { %v2391_v59 = vadd.f32 %v2390_v56, %v9893_v33  ;;  %v2040_v42 = vadd.f32 %v2039_v48, %v9889_v23  ;;  %v2392_v34 = vpop.f32.mrb[13].mxu1  ;;  %v2041_v13 = vpop.f32.mrb[14].mxu0  ;;  %v5601_v60 = vmul.f32 0.00390625, %v9923_v10  ;;  %v9993_v0 = vsel %vm6177_vm3, %v9954_v28, %v9918_v7  ;;  %v8391_v28 = vld [vmem:[%s11233_s0 + $0xf0] sm:$0xff]  }
 0x2ff   :  { %v3489_v16 = vmax.f32 %v2038_v47, 0.0  ;;  %v2393_v22 = vadd.f32 %v2392_v34, %v9897_v31  ;;  %v2042_v8 = vadd.f32 %v2041_v13, %v9866_v32  ;;  %v2394_v29 = vpop.f32.mrb[14].mxu1  ;;  %v2043_v24 = vpop.f32.mrb[15].mxu0  ;;  %v5617_v1 = vmul.f32 0.00390625, %v5296_v46 }
 0x300   :  { %v3491_v9 = vmax.f32 %v2391_v59, 0.0  ;;  %v3490_v45 = vmax.f32 %v2040_v42, 0.0  ;;  %v2395_v36 = vadd.f32 %v2394_v29, %v9893_v33  ;;  %v2044_v5 = vadd.f32 %v2043_v24, %v9889_v23  ;;  %v2396_v10 = vpop.f32.mrb[15].mxu1 }
 0x301   :  { %v4710_v26 = vadd.f32 %v4709_v55, %v3489_v16  ;;  %v3492_v37 = vmax.f32 %v2393_v22, 0.0  ;;  %v3505_v21 = vmax.f32 %v2042_v8, 0.0  ;;  %v2397_v7 = vadd.f32 %v2396_v10, %v9897_v31  ;;  %7014 = vmatmul.mubr.msk.bf16.gmra.mrb[120].mxu0 %vm412_vm2, %v8391_v28  ;;  %v8392_v22 = vld [vmem:[%s11233_s0 + $0xf8] sm:$0xff]  }
 0x302   :  { %v4784_v11 = vadd.f32 %v4783_v27, %v3491_v9  ;;  %v4747_v12 = vadd.f32 %v4746_v52, %v3490_v45  ;;  %v3507_v50 = vmax.f32 %v2395_v36, 0.0  ;;  %v3506_v61 = vmax.f32 %v2044_v5, 0.0  ;;  %7046 = vmatmul.mubr.msk.bf16.gmra.mrb[120].mxu1 %vm412_vm2, %v8391_v28  ;;  %2315 = vmatprep.mubr.bf16.mxu0 %v8450_v3 }
 0x303   :  { %v4821_v57 = vadd.f32 %v4820_v40, %v3492_v37  ;;  %v4711_v39 = vadd.f32 %v4710_v26, %v3505_v21  ;;  %v3508_v2 = vmax.f32 %v2397_v7, 0.0  ;;  %2668 = vmatprep.mubr.bf16.mxu1 %v8450_v3  ;;  %v10008_v6 = vsel %vm6177_vm3, %v5617_v1, %v5601_v60 }
 0x304   :  { %v4785_v14 = vadd.f32 %v4784_v11, %v3507_v50  ;;  %v4748_v25 = vadd.f32 %v4747_v12, %v3506_v61  ;;  %v2047_v35 = vpop.f32.mrb[16].mxu0 }
 0x305   :  { %v4822_v53 = vadd.f32 %v4821_v57, %v3508_v2  ;;  %v2048_v54 = vadd.f32 %v2047_v35, %v9866_v32  ;;  %v2400_v51 = vpop.f32.mrb[16].mxu1  ;;  %v2049_v58 = vpop.f32.mrb[17].mxu0 }
 0x306   :  { %v2401_v4 = vadd.f32 %v2400_v51, %v9893_v33  ;;  %v2050_v38 = vadd.f32 %v2049_v58, %v9889_v23  ;;  %v2402_v62 = vpop.f32.mrb[17].mxu1  ;;  %v2051_v55 = vpop.f32.mrb[18].mxu0 }
 0x307   :  { %v3521_v27 = vmax.f32 %v2048_v54, 0.0  ;;  %v2403_v15 = vadd.f32 %v2402_v62, %v9897_v31  ;;  %v2052_v46 = vadd.f32 %v2051_v55, %v9866_v32  ;;  %v2404_v52 = vpop.f32.mrb[18].mxu1  ;;  %v2053_v40 = vpop.f32.mrb[19].mxu0 }
 0x308   :  { %v3523_v47 = vmax.f32 %v2401_v4, 0.0  ;;  %v3522_v56 = vmax.f32 %v2050_v38, 0.0  ;;  %v2405_v48 = vadd.f32 %v2404_v52, %v9893_v33  ;;  %v2054_v59 = vadd.f32 %v2053_v40, %v9889_v23  ;;  %v2406_v42 = vpop.f32.mrb[19].mxu1 }
 0x309   :  { %v4712_v34 = vadd.f32 %v4711_v39, %v3521_v27  ;;  %v3524_v13 = vmax.f32 %v2403_v15, 0.0  ;;  %v3537_v60 = vmax.f32 %v2052_v46, 0.0  ;;  %v2407_v16 = vadd.f32 %v2406_v42, %v9897_v31  ;;  %7015 = vmatmul.mubr.msk.bf16.gmra.mrb[124].mxu0 %vm412_vm2, %v8392_v22  ;;  %v8393_v27 = vld [vmem:[%s11233_s0] sm:$0xff]  }
 0x30a   :  { %v4786_v8 = vadd.f32 %v4785_v14, %v3523_v47  ;;  %v4749_v29 = vadd.f32 %v4748_v25, %v3522_v56  ;;  %v3539_v24 = vmax.f32 %v2405_v48, 0.0  ;;  %v3538_v1 = vmax.f32 %v2054_v59, 0.0  ;;  %7047 = vmatmul.mubr.msk.bf16.gmra.mrb[124].mxu1 %vm412_vm2, %v8392_v22  ;;  %2711 = vmatprep.mubr.bf16.mxu0 %v8450_v3 }
 0x30b   :  { %v4823_v9 = vadd.f32 %v4822_v53, %v3524_v13  ;;  %v4713_v45 = vadd.f32 %v4712_v34, %v3537_v60  ;;  %v3540_v36 = vmax.f32 %v2407_v16, 0.0  ;;  %3064 = vmatprep.mubr.bf16.mxu1 %v8450_v3 }
 0x30c   :  { %v4787_v5 = vadd.f32 %v4786_v8, %v3539_v24  ;;  %v4750_v10 = vadd.f32 %v4749_v29, %v3538_v1  ;;  %v2057_v26 = vpop.f32.mrb[20].mxu0 }
 0x30d   :  { %v4824_v37 = vadd.f32 %v4823_v9, %v3540_v36  ;;  %v2058_v21 = vadd.f32 %v2057_v26, %v9866_v32  ;;  %v2410_v7 = vpop.f32.mrb[20].mxu1  ;;  %v2059_v28 = vpop.f32.mrb[21].mxu0 }
 0x30e   :  { %v2411_v11 = vadd.f32 %v2410_v7, %v9893_v33  ;;  %v2060_v12 = vadd.f32 %v2059_v28, %v9889_v23  ;;  %v2412_v50 = vpop.f32.mrb[21].mxu1  ;;  %v2061_v61 = vpop.f32.mrb[22].mxu0 }
 0x30f   :  { %v3553_v57 = vmax.f32 %v2058_v21, 0.0  ;;  %v2413_v39 = vadd.f32 %v2412_v50, %v9897_v31  ;;  %v2062_v2 = vadd.f32 %v2061_v61, %v9866_v32  ;;  %v2414_v14 = vpop.f32.mrb[22].mxu1  ;;  %v2063_v25 = vpop.f32.mrb[23].mxu0 }
 0x310   :  { %v3555_v35 = vmax.f32 %v2411_v11, 0.0  ;;  %v3554_v53 = vmax.f32 %v2060_v12, 0.0  ;;  %v2415_v54 = vadd.f32 %v2414_v14, %v9893_v33  ;;  %v2064_v51 = vadd.f32 %v2063_v25, %v9889_v23  ;;  %v2416_v58 = vpop.f32.mrb[23].mxu1 }
 0x311   :  { %v4714_v4 = vadd.f32 %v4713_v45, %v3553_v57  ;;  %v3556_v38 = vmax.f32 %v2413_v39, 0.0  ;;  %v3569_v62 = vmax.f32 %v2062_v2, 0.0  ;;  %v2417_v55 = vadd.f32 %v2416_v58, %v9897_v31  ;;  %7048 = vmatmul.mubr.msk.bf16.vlgmr.msra.gmra.mrb[128].mxu0 %vm412_vm2, %v8393_v27  ;;  %v8394_v57 = vld [vmem:[%s11233_s0 + $0x8] sm:$0xff]  }
 0x312   :  { %v4788_v15 = vadd.f32 %v4787_v5, %v3555_v35  ;;  %v4751_v46 = vadd.f32 %v4750_v10, %v3554_v53  ;;  %v3571_v52 = vmax.f32 %v2415_v54, 0.0  ;;  %v3570_v40 = vmax.f32 %v2064_v51, 0.0  ;;  %7080 = vmatmul.mubr.msk.bf16.vlgmr.msra.gmra.mrb[128].mxu1 %vm412_vm2, %v8393_v27  ;;  %2721 = vmatprep.mubr.bf16.mxu0 %v8450_v3 }
 0x313   :  { %v4825_v47 = vadd.f32 %v4824_v37, %v3556_v38  ;;  %v4715_v56 = vadd.f32 %v4714_v4, %v3569_v62  ;;  %v3572_v48 = vmax.f32 %v2417_v55, 0.0  ;;  %3074 = vmatprep.mubr.bf16.mxu1 %v8450_v3 }
 0x314   :  { %v4789_v59 = vadd.f32 %v4788_v15, %v3571_v52  ;;  %v4752_v42 = vadd.f32 %v4751_v46, %v3570_v40  ;;  %v2067_v34 = vpop.f32.mrb[24].mxu0  ;;  %v7634_v15 = vld [vmem:[%s11236_s3 + $0x40] sm:$0xff]  }
 0x315   :  { %v4826_v13 = vadd.f32 %v4825_v47, %v3572_v48  ;;  %v2068_v60 = vadd.f32 %v2067_v34, %v9866_v32  ;;  %v2420_v16 = vpop.f32.mrb[24].mxu1  ;;  %v2069_v22 = vpop.f32.mrb[25].mxu0  ;;  %v7116_v46 = vld [vmem:[%s11236_s3] sm:$0xff]   ;;  %8035 = vmatprep.subr.bf16.mxu0 %v7634_v15 }
 0x316   :  { %v2421_v8 = vadd.f32 %v2420_v16, %v9893_v33  ;;  %v2070_v29 = vadd.f32 %v2069_v22, %v9889_v23  ;;  %v2422_v24 = vpop.f32.mrb[25].mxu1  ;;  %v2071_v1 = vpop.f32.mrb[26].mxu0  ;;  %v7650_v52 = vld [vmem:[%s11236_s3 + $0xc0] sm:$0xff]   ;;  %8037 = vmatpush3.bf16.msra.mxu0 %v7116_v46 }
 0x317   :  { %v3585_v9 = vmax.f32 %v2068_v60, 0.0  ;;  %v2423_v45 = vadd.f32 %v2422_v24, %v9897_v31  ;;  %v2072_v36 = vadd.f32 %v2071_v1, %v9866_v32  ;;  %v2424_v5 = vpop.f32.mrb[26].mxu1  ;;  %v2073_v10 = vpop.f32.mrb[27].mxu0  ;;  %8067 = vmatprep.subr.bf16.mxu1 %v7650_v52 }
 0x318   :  { %v3587_v26 = vmax.f32 %v2421_v8, 0.0  ;;  %v3586_v37 = vmax.f32 %v2070_v29, 0.0  ;;  %v2425_v21 = vadd.f32 %v2424_v5, %v9893_v33  ;;  %v2074_v7 = vadd.f32 %v2073_v10, %v9889_v23  ;;  %v2426_v28 = vpop.f32.mrb[27].mxu1  ;;  %v8395_v10 = vld [vmem:[%s11233_s0 + $0x10] sm:$0xff]  }
 0x319   :  { %v4716_v11 = vadd.f32 %v4715_v56, %v3585_v9  ;;  %v3588_v12 = vmax.f32 %v2423_v45, 0.0  ;;  %v3601_v50 = vmax.f32 %v2072_v36, 0.0  ;;  %v2427_v61 = vadd.f32 %v2426_v28, %v9897_v31  ;;  %7049 = vmatmul.mubr.msk.bf16.gmra.mrb[132].mxu0 %vm412_vm2, %v8394_v57 }
 0x31a   :  { %v4790_v39 = vadd.f32 %v4789_v59, %v3587_v26  ;;  %v4753_v2 = vadd.f32 %v4752_v42, %v3586_v37  ;;  %v3603_v14 = vmax.f32 %v2425_v21, 0.0  ;;  %v3602_v25 = vmax.f32 %v2074_v7, 0.0  ;;  %7081 = vmatmul.mubr.msk.bf16.gmra.mrb[132].mxu1 %vm412_vm2, %v8394_v57  ;;  %2731 = vmatprep.mubr.bf16.mxu0 %v8450_v3  ;;  %v7642_v59 = vld [vmem:[%s11236_s3 + $0x80] sm:$0xff]  }
 0x31b   :  { %v4827_v35 = vadd.f32 %v4826_v13, %v3588_v12  ;;  %v4717_v53 = vadd.f32 %v4716_v11, %v3601_v50  ;;  %v3604_v54 = vmax.f32 %v2427_v61, 0.0  ;;  %3084 = vmatprep.mubr.bf16.mxu1 %v8450_v3  ;;  %8069 = vmatpush3.bf16.msra.mxu1 %v7642_v59 }
 0x31c   :  { %v4791_v51 = vadd.f32 %v4790_v39, %v3603_v14  ;;  %v4754_v58 = vadd.f32 %v4753_v2, %v3602_v25  ;;  %v2077_v4 = vpop.f32.mrb[28].mxu0 }
 0x31d   :  { %v4828_v38 = vadd.f32 %v4827_v35, %v3604_v54  ;;  %v2078_v62 = vadd.f32 %v2077_v4, %v9866_v32  ;;  %v2430_v55 = vpop.f32.mrb[28].mxu1  ;;  %v2079_v27 = vpop.f32.mrb[29].mxu0 }
 0x31e   :  { %v2431_v40 = vadd.f32 %v2430_v55, %v9893_v33  ;;  %v2080_v47 = vadd.f32 %v2079_v27, %v9889_v23  ;;  %v2432_v56 = vpop.f32.mrb[29].mxu1  ;;  %v2081_v48 = vpop.f32.mrb[30].mxu0 }
 0x31f   :  { %v3617_v42 = vmax.f32 %v2078_v62, 0.0  ;;  %v2433_v34 = vadd.f32 %v2432_v56, %v9897_v31  ;;  %v2082_v13 = vadd.f32 %v2081_v48, %v9866_v32  ;;  %v2434_v60 = vpop.f32.mrb[30].mxu1  ;;  %v2083_v16 = vpop.f32.mrb[31].mxu0 }
 0x320   :  { %v3619_v22 = vmax.f32 %v2431_v40, 0.0  ;;  %v3618_v8 = vmax.f32 %v2080_v47, 0.0  ;;  %v2435_v29 = vadd.f32 %v2434_v60, %v9893_v33  ;;  %v2084_v24 = vadd.f32 %v2083_v16, %v9889_v23  ;;  %v2436_v1 = vpop.f32.mrb[31].mxu1 }
 0x321   :  { %v4718_v9 = vadd.f32 %v4717_v53, %v3617_v42  ;;  %v3620_v45 = vmax.f32 %v2433_v34, 0.0  ;;  %v3633_v36 = vmax.f32 %v2082_v13, 0.0  ;;  %v2437_v5 = vadd.f32 %v2436_v1, %v9897_v31  ;;  %7050 = vmatmul.mubr.msk.bf16.gmra.mrb[136].mxu0 %vm412_vm2, %v8395_v10  ;;  %v8396_v42 = vld [vmem:[%s11233_s0 + $0x18] sm:$0xff]  }
 0x322   :  { %v4792_v26 = vadd.f32 %v4791_v51, %v3619_v22  ;;  %v4755_v37 = vadd.f32 %v4754_v58, %v3618_v8  ;;  %v3635_v21 = vmax.f32 %v2435_v29, 0.0  ;;  %v3634_v7 = vmax.f32 %v2084_v24, 0.0  ;;  %7082 = vmatmul.mubr.msk.bf16.gmra.mrb[136].mxu1 %vm412_vm2, %v8395_v10  ;;  %2741 = vmatprep.mubr.bf16.mxu0 %v8450_v3 }
 0x323   :  { %v4829_v28 = vadd.f32 %v4828_v38, %v3620_v45  ;;  %v4719_v11 = vadd.f32 %v4718_v9, %v3633_v36  ;;  %v3636_v12 = vmax.f32 %v2437_v5, 0.0  ;;  %3094 = vmatprep.mubr.bf16.mxu1 %v8450_v3 }
 0x324   :  { %v4793_v50 = vadd.f32 %v4792_v26, %v3635_v21  ;;  %v4756_v61 = vadd.f32 %v4755_v37, %v3634_v7  ;;  %v2087_v57 = vpop.f32.mrb[32].mxu0 }
 0x325   :  { %v4830_v39 = vadd.f32 %v4829_v28, %v3636_v12  ;;  %v2088_v2 = vadd.f32 %v2087_v57, %v9866_v32  ;;  %v2440_v14 = vpop.f32.mrb[32].mxu1  ;;  %v2089_v25 = vpop.f32.mrb[33].mxu0 }
 0x326   :  { %v2441_v35 = vadd.f32 %v2440_v14, %v9893_v33  ;;  %v2090_v53 = vadd.f32 %v2089_v25, %v9889_v23  ;;  %v2442_v54 = vpop.f32.mrb[33].mxu1  ;;  %v2091_v51 = vpop.f32.mrb[34].mxu0 }
 0x327   :  { %v3649_v58 = vmax.f32 %v2088_v2, 0.0  ;;  %v2443_v4 = vadd.f32 %v2442_v54, %v9897_v31  ;;  %v2092_v38 = vadd.f32 %v2091_v51, %v9866_v32  ;;  %v2444_v62 = vpop.f32.mrb[34].mxu1  ;;  %v2093_v55 = vpop.f32.mrb[35].mxu0 }
 0x328   :  { %v3651_v27 = vmax.f32 %v2441_v35, 0.0  ;;  %v3650_v15 = vmax.f32 %v2090_v53, 0.0  ;;  %v2445_v46 = vadd.f32 %v2444_v62, %v9893_v33  ;;  %v2094_v52 = vadd.f32 %v2093_v55, %v9889_v23  ;;  %v2446_v40 = vpop.f32.mrb[35].mxu1 }
 0x329   :  { %v4720_v47 = vadd.f32 %v4719_v11, %v3649_v58  ;;  %v3652_v56 = vmax.f32 %v2443_v4, 0.0  ;;  %v3665_v48 = vmax.f32 %v2092_v38, 0.0  ;;  %v2447_v59 = vadd.f32 %v2446_v40, %v9897_v31  ;;  %7051 = vmatmul.mubr.msk.bf16.gmra.mrb[140].mxu0 %vm412_vm2, %v8396_v42  ;;  %v8397_v58 = vld [vmem:[%s11233_s0 + $0x20] sm:$0xff]  }
 0x32a   :  { %v4794_v34 = vadd.f32 %v4793_v50, %v3651_v27  ;;  %v4757_v13 = vadd.f32 %v4756_v61, %v3650_v15  ;;  %v3667_v60 = vmax.f32 %v2445_v46, 0.0  ;;  %v3666_v16 = vmax.f32 %v2094_v52, 0.0  ;;  %7083 = vmatmul.mubr.msk.bf16.gmra.mrb[140].mxu1 %vm412_vm2, %v8396_v42  ;;  %2751 = vmatprep.mubr.bf16.mxu0 %v8450_v3 }
 0x32b   :  { %v4831_v22 = vadd.f32 %v4830_v39, %v3652_v56  ;;  %v4721_v8 = vadd.f32 %v4720_v47, %v3665_v48  ;;  %v3668_v29 = vmax.f32 %v2447_v59, 0.0  ;;  %3104 = vmatprep.mubr.bf16.mxu1 %v8450_v3 }
 0x32c   :  { %v4795_v24 = vadd.f32 %v4794_v34, %v3667_v60  ;;  %v4758_v1 = vadd.f32 %v4757_v13, %v3666_v16  ;;  %v2097_v9 = vpop.f32.mrb[36].mxu0 }
 0x32d   :  { %v4832_v45 = vadd.f32 %v4831_v22, %v3668_v29  ;;  %v2098_v36 = vadd.f32 %v2097_v9, %v9866_v32  ;;  %v2450_v5 = vpop.f32.mrb[36].mxu1  ;;  %v2099_v10 = vpop.f32.mrb[37].mxu0 }
 0x32e   :  { %v2451_v26 = vadd.f32 %v2450_v5, %v9893_v33  ;;  %v2100_v37 = vadd.f32 %v2099_v10, %v9889_v23  ;;  %v2452_v21 = vpop.f32.mrb[37].mxu1  ;;  %v2101_v7 = vpop.f32.mrb[38].mxu0 }
 0x32f   :  { %v3681_v28 = vmax.f32 %v2098_v36, 0.0  ;;  %v2453_v11 = vadd.f32 %v2452_v21, %v9897_v31  ;;  %v2102_v12 = vadd.f32 %v2101_v7, %v9866_v32  ;;  %v2454_v50 = vpop.f32.mrb[38].mxu1  ;;  %v2103_v61 = vpop.f32.mrb[39].mxu0 }
 0x330   :  { %v3683_v57 = vmax.f32 %v2451_v26, 0.0  ;;  %v3682_v39 = vmax.f32 %v2100_v37, 0.0  ;;  %v2455_v2 = vadd.f32 %v2454_v50, %v9893_v33  ;;  %v2104_v14 = vadd.f32 %v2103_v61, %v9889_v23  ;;  %v2456_v25 = vpop.f32.mrb[39].mxu1 }
 0x331   :  { %v4722_v35 = vadd.f32 %v4721_v8, %v3681_v28  ;;  %v3684_v53 = vmax.f32 %v2453_v11, 0.0  ;;  %v3697_v54 = vmax.f32 %v2102_v12, 0.0  ;;  %v2457_v51 = vadd.f32 %v2456_v25, %v9897_v31  ;;  %7052 = vmatmul.mubr.msk.bf16.gmra.mrb[144].mxu0 %vm412_vm2, %v8397_v58  ;;  %v8398_v28 = vld [vmem:[%s11233_s0 + $0x28] sm:$0xff]  }
 0x332   :  { %v4796_v4 = vadd.f32 %v4795_v24, %v3683_v57  ;;  %v4759_v38 = vadd.f32 %v4758_v1, %v3682_v39  ;;  %v3699_v62 = vmax.f32 %v2455_v2, 0.0  ;;  %v3698_v55 = vmax.f32 %v2104_v14, 0.0  ;;  %7084 = vmatmul.mubr.msk.bf16.gmra.mrb[144].mxu1 %vm412_vm2, %v8397_v58  ;;  %2761 = vmatprep.mubr.bf16.mxu0 %v8450_v3 }
 0x333   :  { %v4833_v27 = vadd.f32 %v4832_v45, %v3684_v53  ;;  %v4723_v15 = vadd.f32 %v4722_v35, %v3697_v54  ;;  %v3700_v46 = vmax.f32 %v2457_v51, 0.0  ;;  %3114 = vmatprep.mubr.bf16.mxu1 %v8450_v3 }
 0x334   :  { %v4797_v52 = vadd.f32 %v4796_v4, %v3699_v62  ;;  %v4760_v40 = vadd.f32 %v4759_v38, %v3698_v55  ;;  %v2107_v47 = vpop.f32.mrb[40].mxu0  ;;  %v7635_v4 = vld [vmem:[%s11236_s3 + $0x48] sm:$0xff]  }
 0x335   :  { %v4834_v56 = vadd.f32 %v4833_v27, %v3700_v46  ;;  %v2108_v48 = vadd.f32 %v2107_v47, %v9866_v32  ;;  %v2460_v59 = vpop.f32.mrb[40].mxu1  ;;  %v2109_v42 = vpop.f32.mrb[41].mxu0  ;;  %v7627_v38 = vld [vmem:[%s11236_s3 + $0x8] sm:$0xff]   ;;  %8039 = vmatprep.subr.bf16.mxu0 %v7635_v4 }
 0x336   :  { %v2461_v34 = vadd.f32 %v2460_v59, %v9893_v33  ;;  %v2110_v13 = vadd.f32 %v2109_v42, %v9889_v23  ;;  %v2462_v60 = vpop.f32.mrb[41].mxu1  ;;  %v2111_v16 = vpop.f32.mrb[42].mxu0  ;;  %v7651_v62 = vld [vmem:[%s11236_s3 + $0xc8] sm:$0xff]   ;;  %8041 = vmatpush3.bf16.msra.mxu0 %v7627_v38 }
 0x337   :  { %v3713_v22 = vmax.f32 %v2108_v48, 0.0  ;;  %v2463_v8 = vadd.f32 %v2462_v60, %v9897_v31  ;;  %v2112_v29 = vadd.f32 %v2111_v16, %v9866_v32  ;;  %v2464_v24 = vpop.f32.mrb[42].mxu1  ;;  %v2113_v1 = vpop.f32.mrb[43].mxu0  ;;  %8071 = vmatprep.subr.bf16.mxu1 %v7651_v62 }
 0x338   :  { %v3715_v9 = vmax.f32 %v2461_v34, 0.0  ;;  %v3714_v45 = vmax.f32 %v2110_v13, 0.0  ;;  %v2465_v36 = vadd.f32 %v2464_v24, %v9893_v33  ;;  %v2114_v5 = vadd.f32 %v2113_v1, %v9889_v23  ;;  %v2466_v10 = vpop.f32.mrb[43].mxu1  ;;  %v8399_v1 = vld [vmem:[%s11233_s0 + $0x30] sm:$0xff]  }
 0x339   :  { %v4724_v26 = vadd.f32 %v4723_v15, %v3713_v22  ;;  %v3716_v37 = vmax.f32 %v2463_v8, 0.0  ;;  %v3729_v21 = vmax.f32 %v2112_v29, 0.0  ;;  %v2467_v7 = vadd.f32 %v2466_v10, %v9897_v31  ;;  %7053 = vmatmul.mubr.msk.bf16.gmra.mrb[148].mxu0 %vm412_vm2, %v8398_v28 }
 0x33a   :  { %v4798_v11 = vadd.f32 %v4797_v52, %v3715_v9  ;;  %v4761_v12 = vadd.f32 %v4760_v40, %v3714_v45  ;;  %v3731_v50 = vmax.f32 %v2465_v36, 0.0  ;;  %v3730_v61 = vmax.f32 %v2114_v5, 0.0  ;;  %7085 = vmatmul.mubr.msk.bf16.gmra.mrb[148].mxu1 %vm412_vm2, %v8398_v28  ;;  %2771 = vmatprep.mubr.bf16.mxu0 %v8450_v3  ;;  %v7643_v52 = vld [vmem:[%s11236_s3 + $0x88] sm:$0xff]  }
 0x33b   :  { %v4835_v57 = vadd.f32 %v4834_v56, %v3716_v37  ;;  %v4725_v39 = vadd.f32 %v4724_v26, %v3729_v21  ;;  %v3732_v2 = vmax.f32 %v2467_v7, 0.0  ;;  %3124 = vmatprep.mubr.bf16.mxu1 %v8450_v3  ;;  %8073 = vmatpush3.bf16.msra.mxu1 %v7643_v52 }
 0x33c   :  { %v4799_v14 = vadd.f32 %v4798_v11, %v3731_v50  ;;  %v4762_v25 = vadd.f32 %v4761_v12, %v3730_v61  ;;  %v2117_v35 = vpop.f32.mrb[44].mxu0 }
 0x33d   :  { %v4836_v53 = vadd.f32 %v4835_v57, %v3732_v2  ;;  %v2118_v54 = vadd.f32 %v2117_v35, %v9866_v32  ;;  %v2470_v51 = vpop.f32.mrb[44].mxu1  ;;  %v2119_v58 = vpop.f32.mrb[45].mxu0 }
 0x33e   :  { %v2471_v55 = vadd.f32 %v2470_v51, %v9893_v33  ;;  %v2120_v27 = vadd.f32 %v2119_v58, %v9889_v23  ;;  %v2472_v15 = vpop.f32.mrb[45].mxu1  ;;  %v2121_v46 = vpop.f32.mrb[46].mxu0 }
 0x33f   :  { %v3745_v40 = vmax.f32 %v2118_v54, 0.0  ;;  %v2473_v47 = vadd.f32 %v2472_v15, %v9897_v31  ;;  %v2122_v56 = vadd.f32 %v2121_v46, %v9866_v32  ;;  %v2474_v48 = vpop.f32.mrb[46].mxu1  ;;  %v2123_v59 = vpop.f32.mrb[47].mxu0 }
 0x340   :  { %v3747_v42 = vmax.f32 %v2471_v55, 0.0  ;;  %v3746_v34 = vmax.f32 %v2120_v27, 0.0  ;;  %v2475_v13 = vadd.f32 %v2474_v48, %v9893_v33  ;;  %v2124_v60 = vadd.f32 %v2123_v59, %v9889_v23  ;;  %v2476_v16 = vpop.f32.mrb[47].mxu1 }
 0x341   :  { %v4726_v22 = vadd.f32 %v4725_v39, %v3745_v40  ;;  %v3748_v8 = vmax.f32 %v2473_v47, 0.0  ;;  %v3761_v29 = vmax.f32 %v2122_v56, 0.0  ;;  %v2477_v24 = vadd.f32 %v2476_v16, %v9897_v31  ;;  %7054 = vmatmul.mubr.msk.bf16.gmra.mrb[152].mxu0 %vm412_vm2, %v8399_v1  ;;  %v8400_v40 = vld [vmem:[%s11233_s0 + $0x38] sm:$0xff]  }
 0x342   :  { %v4800_v9 = vadd.f32 %v4799_v14, %v3747_v42  ;;  %v4763_v45 = vadd.f32 %v4762_v25, %v3746_v34  ;;  %v3763_v36 = vmax.f32 %v2475_v13, 0.0  ;;  %v3762_v5 = vmax.f32 %v2124_v60, 0.0  ;;  %7086 = vmatmul.mubr.msk.bf16.gmra.mrb[152].mxu1 %vm412_vm2, %v8399_v1  ;;  %2781 = vmatprep.mubr.bf16.mxu0 %v8450_v3 }
 0x343   :  { %v4837_v10 = vadd.f32 %v4836_v53, %v3748_v8  ;;  %v4727_v26 = vadd.f32 %v4726_v22, %v3761_v29  ;;  %v3764_v37 = vmax.f32 %v2477_v24, 0.0  ;;  %3134 = vmatprep.mubr.bf16.mxu1 %v8450_v3 }
 0x344   :  { %v4801_v21 = vadd.f32 %v4800_v9, %v3763_v36  ;;  %v4764_v7 = vadd.f32 %v4763_v45, %v3762_v5  ;;  %v2127_v28 = vpop.f32.mrb[48].mxu0 }
 0x345   :  { %v4838_v11 = vadd.f32 %v4837_v10, %v3764_v37  ;;  %v2128_v12 = vadd.f32 %v2127_v28, %v9866_v32  ;;  %v2480_v50 = vpop.f32.mrb[48].mxu1  ;;  %v2129_v61 = vpop.f32.mrb[49].mxu0 }
 0x346   :  { %v2481_v57 = vadd.f32 %v2480_v50, %v9893_v33  ;;  %v2130_v39 = vadd.f32 %v2129_v61, %v9889_v23  ;;  %v2482_v2 = vpop.f32.mrb[49].mxu1  ;;  %v2131_v14 = vpop.f32.mrb[50].mxu0 }
 0x347   :  { %v3777_v25 = vmax.f32 %v2128_v12, 0.0  ;;  %v2483_v35 = vadd.f32 %v2482_v2, %v9897_v31  ;;  %v2132_v53 = vadd.f32 %v2131_v14, %v9866_v32  ;;  %v2484_v54 = vpop.f32.mrb[50].mxu1  ;;  %v2133_v51 = vpop.f32.mrb[51].mxu0 }
 0x348   :  { %v3779_v58 = vmax.f32 %v2481_v57, 0.0  ;;  %v3778_v4 = vmax.f32 %v2130_v39, 0.0  ;;  %v2485_v38 = vadd.f32 %v2484_v54, %v9893_v33  ;;  %v2134_v62 = vadd.f32 %v2133_v51, %v9889_v23  ;;  %v2486_v55 = vpop.f32.mrb[51].mxu1 }
 0x349   :  { %v4728_v27 = vadd.f32 %v4727_v26, %v3777_v25  ;;  %v3780_v15 = vmax.f32 %v2483_v35, 0.0  ;;  %v3793_v46 = vmax.f32 %v2132_v53, 0.0  ;;  %v2487_v52 = vadd.f32 %v2486_v55, %v9897_v31  ;;  %7055 = vmatmul.mubr.msk.bf16.gmra.mrb[156].mxu0 %vm412_vm2, %v8400_v40  ;;  %v8401_v25 = vld [vmem:[%s11233_s0 + $0x40] sm:$0xff]  }
 0x34a   :  { %v4802_v47 = vadd.f32 %v4801_v21, %v3779_v58  ;;  %v4765_v56 = vadd.f32 %v4764_v7, %v3778_v4  ;;  %v3795_v48 = vmax.f32 %v2485_v38, 0.0  ;;  %v3794_v59 = vmax.f32 %v2134_v62, 0.0  ;;  %7087 = vmatmul.mubr.msk.bf16.gmra.mrb[156].mxu1 %vm412_vm2, %v8400_v40  ;;  %2791 = vmatprep.mubr.bf16.mxu0 %v8450_v3 }
 0x34b   :  { %v4839_v42 = vadd.f32 %v4838_v11, %v3780_v15  ;;  %v4729_v34 = vadd.f32 %v4728_v27, %v3793_v46  ;;  %v3796_v13 = vmax.f32 %v2487_v52, 0.0  ;;  %3144 = vmatprep.mubr.bf16.mxu1 %v8450_v3 }
 0x34c   :  { %v4803_v60 = vadd.f32 %v4802_v47, %v3795_v48  ;;  %v4766_v16 = vadd.f32 %v4765_v56, %v3794_v59  ;;  %v2137_v22 = vpop.f32.mrb[52].mxu0 }
 0x34d   :  { %v4840_v8 = vadd.f32 %v4839_v42, %v3796_v13  ;;  %v2138_v29 = vadd.f32 %v2137_v22, %v9866_v32  ;;  %v2490_v24 = vpop.f32.mrb[52].mxu1  ;;  %v2139_v1 = vpop.f32.mrb[53].mxu0 }
 0x34e   :  { %v2491_v9 = vadd.f32 %v2490_v24, %v9893_v33  ;;  %v2140_v45 = vadd.f32 %v2139_v1, %v9889_v23  ;;  %v2492_v36 = vpop.f32.mrb[53].mxu1  ;;  %v2141_v5 = vpop.f32.mrb[54].mxu0 }
 0x34f   :  { %v3809_v10 = vmax.f32 %v2138_v29, 0.0  ;;  %v2493_v26 = vadd.f32 %v2492_v36, %v9897_v31  ;;  %v2142_v37 = vadd.f32 %v2141_v5, %v9866_v32  ;;  %v2494_v21 = vpop.f32.mrb[54].mxu1  ;;  %v2143_v7 = vpop.f32.mrb[55].mxu0 }
 0x350   :  { %v3811_v28 = vmax.f32 %v2491_v9, 0.0  ;;  %v3810_v11 = vmax.f32 %v2140_v45, 0.0  ;;  %v2495_v12 = vadd.f32 %v2494_v21, %v9893_v33  ;;  %v2144_v50 = vadd.f32 %v2143_v7, %v9889_v23  ;;  %v2496_v61 = vpop.f32.mrb[55].mxu1 }
 0x351   :  { %v4730_v57 = vadd.f32 %v4729_v34, %v3809_v10  ;;  %v3812_v39 = vmax.f32 %v2493_v26, 0.0  ;;  %v3825_v2 = vmax.f32 %v2142_v37, 0.0  ;;  %v2497_v14 = vadd.f32 %v2496_v61, %v9897_v31  ;;  %7056 = vmatmul.mubr.msk.bf16.gmra.mrb[160].mxu0 %vm412_vm2, %v8401_v25  ;;  %v8402_v10 = vld [vmem:[%s11233_s0 + $0x48] sm:$0xff]  }
 0x352   :  { %v4804_v35 = vadd.f32 %v4803_v60, %v3811_v28  ;;  %v4767_v53 = vadd.f32 %v4766_v16, %v3810_v11  ;;  %v3827_v54 = vmax.f32 %v2495_v12, 0.0  ;;  %v3826_v51 = vmax.f32 %v2144_v50, 0.0  ;;  %7088 = vmatmul.mubr.msk.bf16.gmra.mrb[160].mxu1 %vm412_vm2, %v8401_v25  ;;  %2801 = vmatprep.mubr.bf16.mxu0 %v8450_v3 }
 0x353   :  { %v4841_v58 = vadd.f32 %v4840_v8, %v3812_v39  ;;  %v4731_v4 = vadd.f32 %v4730_v57, %v3825_v2  ;;  %v3828_v38 = vmax.f32 %v2497_v14, 0.0  ;;  %3154 = vmatprep.mubr.bf16.mxu1 %v8450_v3 }
 0x354   :  { %v4805_v62 = vadd.f32 %v4804_v35, %v3827_v54  ;;  %v4768_v55 = vadd.f32 %v4767_v53, %v3826_v51  ;;  %v2147_v27 = vpop.f32.mrb[56].mxu0  ;;  %v7636_v35 = vld [vmem:[%s11236_s3 + $0x50] sm:$0xff]  }
 0x355   :  { %v4842_v15 = vadd.f32 %v4841_v58, %v3828_v38  ;;  %v2148_v46 = vadd.f32 %v2147_v27, %v9866_v32  ;;  %v2500_v52 = vpop.f32.mrb[56].mxu1  ;;  %v2149_v40 = vpop.f32.mrb[57].mxu0  ;;  %v7628_v53 = vld [vmem:[%s11236_s3 + $0x10] sm:$0xff]   ;;  %8043 = vmatprep.subr.bf16.mxu0 %v7636_v35 }
 0x356   :  { %v2501_v47 = vadd.f32 %v2500_v52, %v9893_v33  ;;  %v2150_v56 = vadd.f32 %v2149_v40, %v9889_v23  ;;  %v2502_v48 = vpop.f32.mrb[57].mxu1  ;;  %v2151_v59 = vpop.f32.mrb[58].mxu0  ;;  %v7652_v54 = vld [vmem:[%s11236_s3 + $0xd0] sm:$0xff]   ;;  %8045 = vmatpush3.bf16.msra.mxu0 %v7628_v53 }
 0x357   :  { %v3841_v42 = vmax.f32 %v2148_v46, 0.0  ;;  %v2503_v34 = vadd.f32 %v2502_v48, %v9897_v31  ;;  %v2152_v13 = vadd.f32 %v2151_v59, %v9866_v32  ;;  %v2504_v60 = vpop.f32.mrb[58].mxu1  ;;  %v2153_v16 = vpop.f32.mrb[59].mxu0  ;;  %8075 = vmatprep.subr.bf16.mxu1 %v7652_v54 }
 0x358   :  { %v3843_v22 = vmax.f32 %v2501_v47, 0.0  ;;  %v3842_v8 = vmax.f32 %v2150_v56, 0.0  ;;  %v2505_v29 = vadd.f32 %v2504_v60, %v9893_v33  ;;  %v2154_v24 = vadd.f32 %v2153_v16, %v9889_v23  ;;  %v2506_v1 = vpop.f32.mrb[59].mxu1  ;;  %v8403_v16 = vld [vmem:[%s11233_s0 + $0x50] sm:$0xff]  }
 0x359   :  { %v4732_v9 = vadd.f32 %v4731_v4, %v3841_v42  ;;  %v3844_v45 = vmax.f32 %v2503_v34, 0.0  ;;  %v3857_v36 = vmax.f32 %v2152_v13, 0.0  ;;  %v2507_v5 = vadd.f32 %v2506_v1, %v9897_v31  ;;  %7057 = vmatmul.mubr.msk.bf16.gmra.mrb[164].mxu0 %vm412_vm2, %v8402_v10 }
 0x35a   :  { %v4806_v26 = vadd.f32 %v4805_v62, %v3843_v22  ;;  %v4769_v37 = vadd.f32 %v4768_v55, %v3842_v8  ;;  %v3859_v21 = vmax.f32 %v2505_v29, 0.0  ;;  %v3858_v7 = vmax.f32 %v2154_v24, 0.0  ;;  %7089 = vmatmul.mubr.msk.bf16.gmra.mrb[164].mxu1 %vm412_vm2, %v8402_v10  ;;  %2811 = vmatprep.mubr.bf16.mxu0 %v8450_v3  ;;  %v7644_v62 = vld [vmem:[%s11236_s3 + $0x90] sm:$0xff]  }
 0x35b   :  { %v4843_v28 = vadd.f32 %v4842_v15, %v3844_v45  ;;  %v4733_v11 = vadd.f32 %v4732_v9, %v3857_v36  ;;  %v3860_v12 = vmax.f32 %v2507_v5, 0.0  ;;  %3164 = vmatprep.mubr.bf16.mxu1 %v8450_v3  ;;  %8077 = vmatpush3.bf16.msra.mxu1 %v7644_v62 }
 0x35c   :  { %v4807_v50 = vadd.f32 %v4806_v26, %v3859_v21  ;;  %v4770_v61 = vadd.f32 %v4769_v37, %v3858_v7  ;;  %v2157_v57 = vpop.f32.mrb[60].mxu0 }
 0x35d   :  { %v4844_v39 = vadd.f32 %v4843_v28, %v3860_v12  ;;  %v2158_v2 = vadd.f32 %v2157_v57, %v9866_v32  ;;  %v2510_v14 = vpop.f32.mrb[60].mxu1  ;;  %v2159_v25 = vpop.f32.mrb[61].mxu0 }
 0x35e   :  { %v2511_v51 = vadd.f32 %v2510_v14, %v9893_v33  ;;  %v2160_v58 = vadd.f32 %v2159_v25, %v9889_v23  ;;  %v2512_v4 = vpop.f32.mrb[61].mxu1  ;;  %v2161_v38 = vpop.f32.mrb[62].mxu0  ;;  %v8404_v25 = vld [vmem:[%s11233_s0 + $0x58] sm:$0xff]  }
 0x35f   :  { %v3873_v55 = vmax.f32 %v2158_v2, 0.0  ;;  %v2513_v27 = vadd.f32 %v2512_v4, %v9897_v31  ;;  %v2162_v15 = vadd.f32 %v2161_v38, %v9866_v32  ;;  %v2514_v46 = vpop.f32.mrb[62].mxu1  ;;  %v2163_v52 = vpop.f32.mrb[63].mxu0 }
 0x360   :  { %v3875_v40 = vmax.f32 %v2511_v51, 0.0  ;;  %v3874_v47 = vmax.f32 %v2160_v58, 0.0  ;;  %v2515_v56 = vadd.f32 %v2514_v46, %v9893_v33  ;;  %v2164_v48 = vadd.f32 %v2163_v52, %v9889_v23  ;;  %v2516_v59 = vpop.f32.mrb[63].mxu1 }
 0x361   :  { %v4734_v42 = vadd.f32 %v4733_v11, %v3873_v55  ;;  %v3876_v34 = vmax.f32 %v2513_v27, 0.0  ;;  %v3889_v13 = vmax.f32 %v2162_v15, 0.0  ;;  %v2517_v60 = vadd.f32 %v2516_v59, %v9897_v31  ;;  %7058 = vmatmul.mubr.msk.bf16.gmra.mrb[168].mxu0 %vm412_vm2, %v8403_v16 }
 0x362   :  { %v4808_v22 = vadd.f32 %v4807_v50, %v3875_v40  ;;  %v4771_v8 = vadd.f32 %v4770_v61, %v3874_v47  ;;  %v3891_v29 = vmax.f32 %v2515_v56, 0.0  ;;  %v3890_v24 = vmax.f32 %v2164_v48, 0.0  ;;  %7090 = vmatmul.mubr.msk.bf16.gmra.mrb[168].mxu1 %vm412_vm2, %v8403_v16  ;;  %2821 = vmatprep.mubr.bf16.mxu0 %v8450_v3 }
 0x363   :  { %v4845_v1 = vadd.f32 %v4844_v39, %v3876_v34  ;;  %v10225_v9 = vadd.f32 %v4734_v42, %v3889_v13  ;;  %v3892_v45 = vmax.f32 %v2517_v60, 0.0  ;;  %3174 = vmatprep.mubr.bf16.mxu1 %v8450_v3 }
 0x364   :  { %v10228_v36 = vadd.f32 %v4808_v22, %v3891_v29  ;;  %v10230_v5 = vadd.f32 %v4771_v8, %v3890_v24  ;;  %v2167_v10 = vpop.f32.mrb[64].mxu0 }
 0x365   :  { %v10232_v26 = vadd.f32 %v4845_v1, %v3892_v45  ;;  %v2168_v37 = vadd.f32 %v2167_v10, %v9866_v32  ;;  %v2520_v21 = vpop.f32.mrb[64].mxu1  ;;  %v2169_v7 = vpop.f32.mrb[65].mxu0 }
 0x366   :  { %v2521_v28 = vadd.f32 %v2520_v21, %v9893_v33  ;;  %v2170_v11 = vadd.f32 %v2169_v7, %v9889_v23  ;;  %v2522_v12 = vpop.f32.mrb[65].mxu1  ;;  %v2171_v50 = vpop.f32.mrb[66].mxu0  ;;  %v8405_v7 = vld [vmem:[%s11233_s0 + $0x60] sm:$0xff]  }
 0x367   :  { %v2523_v61 = vadd.f32 %v2522_v12, %v9897_v31  ;;  %v2524_v57 = vpop.f32.mrb[66].mxu1  ;;  %v2173_v39 = vpop.f32.mrb[67].mxu0  ;;  %v2172_v14 = vadd.f32 %v2171_v50, %v9866_v32  ;;  %v3905_v51 = vmax.f32 %v2168_v37, 0.0 }
 0x368   :  { %v2526_v2 = vpop.f32.mrb[67].mxu1  ;;  %v3907_v35 = vmax.f32 %v2521_v28, 0.0  ;;  %v2525_v53 = vadd.f32 %v2524_v57, %v9893_v33  ;;  %v2174_v54 = vadd.f32 %v2173_v39, %v9889_v23  ;;  %v3906_v62 = vmax.f32 %v2170_v11, 0.0 }
 0x369   :  { %7059 = vmatmul.mubr.msk.bf16.gmra.mrb[172].mxu0 %vm412_vm2, %v8404_v25  ;;  %v3908_v58 = vmax.f32 %v2523_v61, 0.0  ;;  %v3921_v4 = vmax.f32 %v2172_v14, 0.0  ;;  %v2527_v38 = vadd.f32 %v2526_v2, %v9897_v31 }
 0x36a   :  { %7091 = vmatmul.mubr.msk.bf16.gmra.mrb[172].mxu1 %vm412_vm2, %v8404_v25  ;;  %2831 = vmatprep.mubr.bf16.mxu0 %v8450_v3  ;;  %v3923_v55 = vmax.f32 %v2525_v53, 0.0  ;;  %v3922_v27 = vmax.f32 %v2174_v54, 0.0 }
 0x36b   :  { %3184 = vmatprep.mubr.bf16.mxu1 %v8450_v3  ;;  %v5297_v46 = vadd.f32 %v3921_v4, %v3905_v51  ;;  %v3924_v52 = vmax.f32 %v2527_v38, 0.0 }
 0x36c   :  { %v2177_v15 = vpop.f32.mrb[68].mxu0  ;;  %v5371_v56 = vadd.f32 %v3923_v55, %v3907_v35  ;;  %v5334_v48 = vadd.f32 %v3922_v27, %v3906_v62 }
 0x36d   :  { %v2530_v40 = vpop.f32.mrb[68].mxu1  ;;  %v2179_v47 = vpop.f32.mrb[69].mxu0  ;;  %v2178_v59 = vadd.f32 %v2177_v15, %v9866_v32  ;;  %v5408_v13 = vadd.f32 %v3924_v52, %v3908_v58 }
 0x36e   :  { %v2532_v42 = vpop.f32.mrb[69].mxu1  ;;  %v2181_v34 = vpop.f32.mrb[70].mxu0  ;;  %v2531_v60 = vadd.f32 %v2530_v40, %v9893_v33  ;;  %v2180_v16 = vadd.f32 %v2179_v47, %v9889_v23 }
 0x36f   :  { %v2534_v22 = vpop.f32.mrb[70].mxu1  ;;  %v2183_v8 = vpop.f32.mrb[71].mxu0  ;;  %v3937_v29 = vmax.f32 %v2178_v59, 0.0  ;;  %v2533_v24 = vadd.f32 %v2532_v42, %v9897_v31  ;;  %v2182_v1 = vadd.f32 %v2181_v34, %v9866_v32 }
 0x370   :  { %v2536_v45 = vpop.f32.mrb[71].mxu1  ;;  %v3939_v10 = vmax.f32 %v2531_v60, 0.0  ;;  %v3938_v37 = vmax.f32 %v2180_v16, 0.0  ;;  %v2535_v21 = vadd.f32 %v2534_v22, %v9893_v33  ;;  %v2184_v39 = vadd.f32 %v2183_v8, %v9889_v23 }
 0x371   :  { %7060 = vmatmul.mubr.msk.bf16.gmra.mrb[176].mxu0 %vm412_vm2, %v8405_v7  ;;  %v5298_v28 = vadd.f32 %v5297_v46, %v3937_v29  ;;  %v3940_v11 = vmax.f32 %v2533_v24, 0.0  ;;  %v3953_v12 = vmax.f32 %v2182_v1, 0.0  ;;  %v2537_v25 = vadd.f32 %v2536_v45, %v9897_v31  ;;  %v8406_v24 = vld [vmem:[%s11233_s0 + $0x68] sm:$0xff]  }
 0x372   :  { %7092 = vmatmul.mubr.msk.bf16.gmra.mrb[176].mxu1 %vm412_vm2, %v8405_v7  ;;  %2841 = vmatprep.mubr.bf16.mxu0 %v8450_v3  ;;  %v5372_v50 = vadd.f32 %v5371_v56, %v3939_v10  ;;  %v5335_v61 = vadd.f32 %v5334_v48, %v3938_v37  ;;  %v3955_v57 = vmax.f32 %v2535_v21, 0.0  ;;  %v3954_v54 = vmax.f32 %v2184_v39, 0.0 }
 0x373   :  { %3194 = vmatprep.mubr.bf16.mxu1 %v8450_v3  ;;  %v5409_v2 = vadd.f32 %v5408_v13, %v3940_v11  ;;  %v5299_v14 = vadd.f32 %v5298_v28, %v3953_v12  ;;  %v3956_v38 = vmax.f32 %v2537_v25, 0.0 }
 0x374   :  { %v2187_v35 = vpop.f32.mrb[72].mxu0  ;;  %v5373_v53 = vadd.f32 %v5372_v50, %v3955_v57  ;;  %v5336_v46 = vadd.f32 %v5335_v61, %v3954_v54 }
 0x375   :  { %v2188_v51 = vadd.f32 %v2187_v35, %v9866_v32  ;;  %v2540_v58 = vpop.f32.mrb[72].mxu1  ;;  %v2189_v4 = vpop.f32.mrb[73].mxu0  ;;  %v5410_v59 = vadd.f32 %v5409_v2, %v3956_v38 }
 0x376   :  { %v2541_v62 = vadd.f32 %v2540_v58, %v9893_v33  ;;  %v2190_v55 = vadd.f32 %v2189_v4, %v9889_v23  ;;  %v2542_v27 = vpop.f32.mrb[73].mxu1  ;;  %v2191_v15 = vpop.f32.mrb[74].mxu0  ;;  %v7629_v58 = vld [vmem:[%s11236_s3 + $0x18] sm:$0xff]  }
 0x377   :  { %v3969_v52 = vmax.f32 %v2188_v51, 0.0  ;;  %v2543_v40 = vadd.f32 %v2542_v27, %v9897_v31  ;;  %v2192_v47 = vadd.f32 %v2191_v15, %v9866_v32  ;;  %v2544_v56 = vpop.f32.mrb[74].mxu1  ;;  %v2193_v48 = vpop.f32.mrb[75].mxu0  ;;  %v7637_v51 = vld [vmem:[%s11236_s3 + $0x58] sm:$0xff]  }
 0x378   :  { %v3971_v42 = vmax.f32 %v2541_v62, 0.0  ;;  %v3970_v34 = vmax.f32 %v2190_v55, 0.0  ;;  %v2545_v13 = vadd.f32 %v2544_v56, %v9893_v33  ;;  %v2546_v60 = vpop.f32.mrb[75].mxu1  ;;  %v2194_v29 = vadd.f32 %v2193_v48, %v9889_v23  ;;  %v7653_v4 = vld [vmem:[%s11236_s3 + $0xd8] sm:$0xff]   ;;  %8047 = vmatprep.subr.bf16.mxu0 %v7637_v51 }
 0x379   :  { %v5300_v16 = vadd.f32 %v5299_v14, %v3969_v52  ;;  %v3972_v22 = vmax.f32 %v2543_v40, 0.0  ;;  %v3985_v8 = vmax.f32 %v2192_v47, 0.0  ;;  %7061 = vmatmul.mubr.msk.bf16.gmra.mrb[180].mxu0 %vm412_vm2, %v8406_v24  ;;  %v2547_v37 = vadd.f32 %v2546_v60, %v9897_v31  ;;  %8079 = vmatprep.subr.bf16.mxu1 %v7653_v4  ;;  %v8407_v60 = vld [vmem:[%s11233_s0 + $0x70] sm:$0xff]  }
 0x37a   :  { %v5374_v1 = vadd.f32 %v5373_v53, %v3971_v42  ;;  %v5337_v45 = vadd.f32 %v5336_v46, %v3970_v34  ;;  %v3987_v10 = vmax.f32 %v2545_v13, 0.0  ;;  %7093 = vmatmul.mubr.msk.bf16.gmra.mrb[180].mxu1 %vm412_vm2, %v8406_v24  ;;  %2851 = vmatprep.mubr.bf16.mxu0 %v8450_v3  ;;  %v3986_v28 = vmax.f32 %v2194_v29, 0.0  ;;  %v7645_v46 = vld [vmem:[%s11236_s3 + $0x98] sm:$0xff]  }
 0x37b   :  { %v5411_v21 = vadd.f32 %v5410_v59, %v3972_v22  ;;  %v5301_v7 = vadd.f32 %v5300_v16, %v3985_v8  ;;  %3204 = vmatprep.mubr.bf16.mxu1 %v8450_v3  ;;  %v3988_v12 = vmax.f32 %v2547_v37, 0.0  ;;  %8049 = vmatpush3.bf16.msra.mxu0 %v7629_v58  ;;  %v7654_v37 = vld [vmem:[%s11236_s3 + $0xe0] sm:$0xff]  }
 0x37c   :  { %v5375_v11 = vadd.f32 %v5374_v1, %v3987_v10  ;;  %v2197_v50 = vpop.f32.mrb[76].mxu0  ;;  %v5338_v61 = vadd.f32 %v5337_v45, %v3986_v28  ;;  %8081 = vmatpush3.bf16.msra.mxu1 %v7645_v46  ;;  %v7638_v10 = vld [vmem:[%s11236_s3 + $0x60] sm:$0xff]  }
 0x37d   :  { %v2198_v57 = vadd.f32 %v2197_v50, %v9866_v32  ;;  %v2550_v39 = vpop.f32.mrb[76].mxu1  ;;  %v2199_v2 = vpop.f32.mrb[77].mxu0  ;;  %v5412_v14 = vadd.f32 %v5411_v21, %v3988_v12  ;;  %8051 = vmatprep.subr.bf16.mxu0 %v7638_v10  ;;  %8083 = vmatprep.subr.bf16.mxu1 %v7654_v37  ;;  %v7646_v12 = vld [vmem:[%s11236_s3 + $0xa0] sm:$0xff]  }
 0x37e   :  { %v2551_v25 = vadd.f32 %v2550_v39, %v9893_v33  ;;  %v2200_v35 = vadd.f32 %v2199_v2, %v9889_v23  ;;  %v2552_v53 = vpop.f32.mrb[77].mxu1  ;;  %v2201_v54 = vpop.f32.mrb[78].mxu0 }
 0x37f   :  { %v4001_v38 = vmax.f32 %v2198_v57, 0.0  ;;  %v2553_v62 = vadd.f32 %v2552_v53, %v9897_v31  ;;  %v2202_v55 = vadd.f32 %v2201_v54, %v9866_v32  ;;  %v2554_v27 = vpop.f32.mrb[78].mxu1  ;;  %v2203_v15 = vpop.f32.mrb[79].mxu0 }
 0x380   :  { %v4003_v52 = vmax.f32 %v2551_v25, 0.0  ;;  %v4002_v40 = vmax.f32 %v2200_v35, 0.0  ;;  %v2555_v47 = vadd.f32 %v2554_v27, %v9893_v33  ;;  %v2204_v56 = vadd.f32 %v2203_v15, %v9889_v23  ;;  %v2556_v48 = vpop.f32.mrb[79].mxu1  ;;  %8085 = vmatpush3.bf16.msra.mxu1 %v7646_v12 }
 0x381   :  { %v5302_v59 = vadd.f32 %v5301_v7, %v4001_v38  ;;  %v4004_v42 = vmax.f32 %v2553_v62, 0.0  ;;  %v4017_v34 = vmax.f32 %v2202_v55, 0.0  ;;  %v2557_v13 = vadd.f32 %v2556_v48, %v9897_v31  ;;  %7062 = vmatmul.mubr.msk.bf16.gmra.mrb[184].mxu0 %vm412_vm2, %v8407_v60  ;;  %v7639_v38 = vld [vmem:[%s11236_s3 + $0x68] sm:$0xff]  }
 0x382   :  { %v5376_v16 = vadd.f32 %v5375_v11, %v4003_v52  ;;  %v5339_v22 = vadd.f32 %v5338_v61, %v4002_v40  ;;  %v4019_v8 = vmax.f32 %v2555_v47, 0.0  ;;  %v4018_v29 = vmax.f32 %v2204_v56, 0.0  ;;  %7094 = vmatmul.mubr.msk.bf16.gmra.mrb[184].mxu1 %vm412_vm2, %v8407_v60  ;;  %2861 = vmatprep.mubr.bf16.mxu0 %v8450_v3  ;;  %v7630_v11 = vld [vmem:[%s11236_s3 + $0x20] sm:$0xff]   ;;  %v7655_v62 = vld [vmem:[%s11236_s3 + $0xe8] sm:$0xff]  }
 0x383   :  { %v5413_v24 = vadd.f32 %v5412_v14, %v4004_v42  ;;  %v5303_v1 = vadd.f32 %v5302_v59, %v4017_v34  ;;  %v4020_v45 = vmax.f32 %v2557_v13, 0.0  ;;  %3214 = vmatprep.mubr.bf16.mxu1 %v8450_v3  ;;  %8053 = vmatpush3.bf16.msra.mxu0 %v7630_v11  ;;  %v7631_v40 = vld [vmem:[%s11236_s3 + $0x28] sm:$0xff]   ;;  %v8408_v34 = vld [vmem:[%s11233_s0 + $0x78] sm:$0xff]  }
 0x384   :  { %v5377_v21 = vadd.f32 %v5376_v16, %v4019_v8  ;;  %v5340_v7 = vadd.f32 %v5339_v22, %v4018_v29  ;;  %v2207_v28 = vpop.f32.mrb[80].mxu0  ;;  %8055 = vmatprep.subr.bf16.mxu0 %v7639_v38  ;;  %8087 = vmatprep.subr.bf16.mxu1 %v7655_v62  ;;  %v7647_v47 = vld [vmem:[%s11236_s3 + $0xa8] sm:$0xff]  }
 0x385   :  { %v5414_v50 = vadd.f32 %v5413_v24, %v4020_v45  ;;  %v2208_v61 = vadd.f32 %v2207_v28, %v9866_v32  ;;  %v2560_v57 = vpop.f32.mrb[80].mxu1  ;;  %v2209_v39 = vpop.f32.mrb[81].mxu0  ;;  %8089 = vmatpush3.bf16.msra.mxu1 %v7647_v47  ;;  %v7656_v45 = vld [vmem:[%s11236_s3 + $0xf0] sm:$0xff]  }
 0x386   :  { %v2561_v2 = vadd.f32 %v2560_v57, %v9893_v33  ;;  %v2210_v14 = vadd.f32 %v2209_v39, %v9889_v23  ;;  %v2562_v25 = vpop.f32.mrb[81].mxu1  ;;  %v2211_v35 = vpop.f32.mrb[82].mxu0  ;;  %8091 = vmatprep.subr.bf16.mxu1 %v7656_v45  ;;  %v7648_v28 = vld [vmem:[%s11236_s3 + $0xb0] sm:$0xff]  }
 0x387   :  { %v4033_v53 = vmax.f32 %v2208_v61, 0.0  ;;  %v2563_v54 = vadd.f32 %v2562_v25, %v9897_v31  ;;  %v2212_v51 = vadd.f32 %v2211_v35, %v9866_v32  ;;  %v2564_v58 = vpop.f32.mrb[82].mxu1  ;;  %v2213_v4 = vpop.f32.mrb[83].mxu0  ;;  %8057 = vmatpush3.bf16.msra.mxu0 %v7631_v40  ;;  %v8409_v40 = vld [vmem:[%s11233_s0 + $0x80] sm:$0xff]  }
 0x388   :  { %v4035_v55 = vmax.f32 %v2561_v2, 0.0  ;;  %v4034_v27 = vmax.f32 %v2210_v14, 0.0  ;;  %v2565_v15 = vadd.f32 %v2564_v58, %v9893_v33  ;;  %v2214_v46 = vadd.f32 %v2213_v4, %v9889_v23  ;;  %v2566_v52 = vpop.f32.mrb[83].mxu1 }
 0x389   :  { %v5304_v56 = vadd.f32 %v5303_v1, %v4033_v53  ;;  %v4036_v48 = vmax.f32 %v2563_v54, 0.0  ;;  %v4049_v59 = vmax.f32 %v2212_v51, 0.0  ;;  %v2567_v42 = vadd.f32 %v2566_v52, %v9897_v31  ;;  %7063 = vmatmul.mubr.msk.bf16.gmra.mrb[188].mxu0 %vm412_vm2, %v8408_v34  ;;  %v7640_v1 = vld [vmem:[%s11236_s3 + $0x70] sm:$0xff]   ;;  %8093 = vmatpush3.bf16.msra.mxu1 %v7648_v28  ;;  %v7682_v28 = vld [vmem:[%s11236_s3 + $0x1c0] sm:$0xff]  }
 0x38a   :  { %v5378_v13 = vadd.f32 %v5377_v21, %v4035_v55  ;;  %v5341_v60 = vadd.f32 %v5340_v7, %v4034_v27  ;;  %v4051_v16 = vmax.f32 %v2565_v15, 0.0  ;;  %v4050_v22 = vmax.f32 %v2214_v46, 0.0  ;;  %7095 = vmatmul.mubr.msk.bf16.gmra.mrb[188].mxu1 %vm412_vm2, %v8408_v34  ;;  %2871 = vmatprep.mubr.bf16.mxu0 %v8450_v3  ;;  %v7632_v7 = vld [vmem:[%s11236_s3 + $0x30] sm:$0xff]   ;;  %v7657_v34 = vld [vmem:[%s11236_s3 + $0xf8] sm:$0xff]  }
 0x38b   :  { %v5415_v8 = vadd.f32 %v5414_v50, %v4036_v48  ;;  %v5305_v29 = vadd.f32 %v5304_v56, %v4049_v59  ;;  %v4052_v24 = vmax.f32 %v2567_v42, 0.0  ;;  %3224 = vmatprep.mubr.bf16.mxu1 %v8450_v3  ;;  %8059 = vmatprep.subr.bf16.mxu0 %v7640_v1  ;;  %v7641_v42 = vld [vmem:[%s11236_s3 + $0x78] sm:$0xff]  }
 0x38c   :  { %v5379_v10 = vadd.f32 %v5378_v13, %v4051_v16  ;;  %v5342_v37 = vadd.f32 %v5341_v60, %v4050_v22  ;;  %v2217_v21 = vpop.f32.mrb[84].mxu0  ;;  %8061 = vmatpush3.bf16.msra.mxu0 %v7632_v7  ;;  %v7633_v22 = vld [vmem:[%s11236_s3 + $0x38] sm:$0xff]   ;;  %8095 = vmatprep.subr.bf16.mxu1 %v7657_v34  ;;  %v7666_v7 = vld [vmem:[%s11236_s3 + $0x140] sm:$0xff]  }
 0x38d   :  { %v5416_v11 = vadd.f32 %v5415_v8, %v4052_v24  ;;  %v2218_v12 = vadd.f32 %v2217_v21, %v9866_v32  ;;  %v2570_v50 = vpop.f32.mrb[84].mxu1  ;;  %v2219_v61 = vpop.f32.mrb[85].mxu0  ;;  %8063 = vmatprep.subr.bf16.mxu0 %v7641_v42  ;;  %v7649_v8 = vld [vmem:[%s11236_s3 + $0xb8] sm:$0xff]  }
 0x38e   :  { %v2571_v57 = vadd.f32 %v2570_v50, %v9893_v33  ;;  %v2220_v39 = vadd.f32 %v2219_v61, %v9889_v23  ;;  %v2572_v2 = vpop.f32.mrb[85].mxu1  ;;  %v2221_v14 = vpop.f32.mrb[86].mxu0  ;;  %8097 = vmatpush3.bf16.msra.mxu1 %v7649_v8 }
 0x38f   :  { %v4065_v25 = vmax.f32 %v2218_v12, 0.0  ;;  %v2573_v35 = vadd.f32 %v2572_v2, %v9897_v31  ;;  %v2222_v53 = vadd.f32 %v2221_v14, %v9866_v32  ;;  %v2574_v54 = vpop.f32.mrb[86].mxu1  ;;  %v2223_v51 = vpop.f32.mrb[87].mxu0  ;;  %8131 = vmatprep.subr.bf16.mxu1 %v7682_v28 }
 0x390   :  { %v4067_v58 = vmax.f32 %v2571_v57, 0.0  ;;  %v4066_v4 = vmax.f32 %v2220_v39, 0.0  ;;  %v2575_v38 = vadd.f32 %v2574_v54, %v9893_v33  ;;  %v2224_v62 = vadd.f32 %v2223_v51, %v9889_v23  ;;  %v2576_v55 = vpop.f32.mrb[87].mxu1  ;;  %8065 = vmatpush3.bf16.msra.mxu0 %v7633_v22 }
 0x391   :  { %v5306_v27 = vadd.f32 %v5305_v29, %v4065_v25  ;;  %v4068_v15 = vmax.f32 %v2573_v35, 0.0  ;;  %v4081_v46 = vmax.f32 %v2222_v53, 0.0  ;;  %v2577_v52 = vadd.f32 %v2576_v55, %v9897_v31  ;;  %7064 = vmatmul.mubr.msk.bf16.gmra.mrb[192].mxu0 %vm412_vm2, %v8409_v40  ;;  %8099 = vmatprep.subr.bf16.mxu0 %v7666_v7 }
 0x392   :  { %v5380_v47 = vadd.f32 %v5379_v10, %v4067_v58  ;;  %v5343_v56 = vadd.f32 %v5342_v37, %v4066_v4  ;;  %v4083_v48 = vmax.f32 %v2575_v38, 0.0  ;;  %v4082_v59 = vmax.f32 %v2224_v62, 0.0  ;;  %7096 = vmatmul.mubr.msk.bf16.gmra.mrb[192].mxu1 %vm412_vm2, %v8409_v40  ;;  %2881 = vmatprep.mubr.bf16.mxu0 %v8450_v3 }
 0x393   :  { %v5417_v13 = vadd.f32 %v5416_v11, %v4068_v15  ;;  %v5307_v60 = vadd.f32 %v5306_v27, %v4081_v46  ;;  %v4084_v16 = vmax.f32 %v2577_v52, 0.0  ;;  %3234 = vmatprep.mubr.bf16.mxu1 %v8450_v3  ;;  %v8410_v27 = vld [vmem:[%s11233_s0 + $0x88] sm:$0xff]  }
 0x394   :  { %v5381_v29 = vadd.f32 %v5380_v47, %v4083_v48  ;;  %v5344_v24 = vadd.f32 %v5343_v56, %v4082_v59  ;;  %v2227_v1 = vpop.f32.mrb[88].mxu0 }
 0x395   :  { %v5418_v45 = vadd.f32 %v5417_v13, %v4084_v16  ;;  %v2228_v10 = vadd.f32 %v2227_v1, %v9866_v32  ;;  %v2580_v37 = vpop.f32.mrb[88].mxu1  ;;  %v2229_v21 = vpop.f32.mrb[89].mxu0 }
 0x396   :  { %v2581_v11 = vadd.f32 %v2580_v37, %v9893_v33  ;;  %v2230_v12 = vadd.f32 %v2229_v21, %v9889_v23  ;;  %v2582_v50 = vpop.f32.mrb[89].mxu1  ;;  %v2231_v61 = vpop.f32.mrb[90].mxu0 }
 0x397   :  { %v4097_v57 = vmax.f32 %v2228_v10, 0.0  ;;  %v2583_v39 = vadd.f32 %v2582_v50, %v9897_v31  ;;  %v2232_v2 = vadd.f32 %v2231_v61, %v9866_v32  ;;  %v2584_v14 = vpop.f32.mrb[90].mxu1  ;;  %v2233_v25 = vpop.f32.mrb[91].mxu0 }
 0x398   :  { %v4099_v35 = vmax.f32 %v2581_v11, 0.0  ;;  %v4098_v53 = vmax.f32 %v2230_v12, 0.0  ;;  %v2585_v54 = vadd.f32 %v2584_v14, %v9893_v33  ;;  %v2234_v51 = vadd.f32 %v2233_v25, %v9889_v23  ;;  %v2586_v58 = vpop.f32.mrb[91].mxu1  ;;  %v8411_v25 = vld [vmem:[%s11233_s0 + $0x90] sm:$0xff]  }
 0x399   :  { %v5308_v4 = vadd.f32 %v5307_v60, %v4097_v57  ;;  %v4100_v38 = vmax.f32 %v2583_v39, 0.0  ;;  %v4113_v62 = vmax.f32 %v2232_v2, 0.0  ;;  %v2587_v55 = vadd.f32 %v2586_v58, %v9897_v31  ;;  %7065 = vmatmul.mubr.msk.bf16.gmra.mrb[196].mxu0 %vm412_vm2, %v8410_v27 }
 0x39a   :  { %v5382_v15 = vadd.f32 %v5381_v29, %v4099_v35  ;;  %v5345_v46 = vadd.f32 %v5344_v24, %v4098_v53  ;;  %v4115_v52 = vmax.f32 %v2585_v54, 0.0  ;;  %v4114_v40 = vmax.f32 %v2234_v51, 0.0  ;;  %7097 = vmatmul.mubr.msk.bf16.gmra.mrb[196].mxu1 %vm412_vm2, %v8410_v27  ;;  %2891 = vmatprep.mubr.bf16.mxu0 %v8450_v3 }
 0x39b   :  { %v5419_v47 = vadd.f32 %v5418_v45, %v4100_v38  ;;  %v5309_v56 = vadd.f32 %v5308_v4, %v4113_v62  ;;  %v4116_v48 = vmax.f32 %v2587_v55, 0.0  ;;  %3244 = vmatprep.mubr.bf16.mxu1 %v8450_v3 }
 0x39c   :  { %v5383_v59 = vadd.f32 %v5382_v15, %v4115_v52  ;;  %v5346_v42 = vadd.f32 %v5345_v46, %v4114_v40  ;;  %v2237_v34 = vpop.f32.mrb[92].mxu0 }
 0x39d   :  { %v5420_v13 = vadd.f32 %v5419_v47, %v4116_v48  ;;  %v2238_v60 = vadd.f32 %v2237_v34, %v9866_v32  ;;  %v2590_v16 = vpop.f32.mrb[92].mxu1  ;;  %v2239_v22 = vpop.f32.mrb[93].mxu0 }
 0x39e   :  { %v2591_v8 = vadd.f32 %v2590_v16, %v9893_v33  ;;  %v2240_v29 = vadd.f32 %v2239_v22, %v9889_v23  ;;  %v2592_v24 = vpop.f32.mrb[93].mxu1  ;;  %v2241_v1 = vpop.f32.mrb[94].mxu0 }
 0x39f   :  { %v4129_v10 = vmax.f32 %v2238_v60, 0.0  ;;  %v2593_v45 = vadd.f32 %v2592_v24, %v9897_v31  ;;  %v2242_v37 = vadd.f32 %v2241_v1, %v9866_v32  ;;  %v2594_v21 = vpop.f32.mrb[94].mxu1  ;;  %v2243_v7 = vpop.f32.mrb[95].mxu0 }
 0x3a0   :  { %v4131_v28 = vmax.f32 %v2591_v8, 0.0  ;;  %v4130_v11 = vmax.f32 %v2240_v29, 0.0  ;;  %v2595_v12 = vadd.f32 %v2594_v21, %v9893_v33  ;;  %v2244_v50 = vadd.f32 %v2243_v7, %v9889_v23  ;;  %v2596_v61 = vpop.f32.mrb[95].mxu1  ;;  %v8412_v7 = vld [vmem:[%s11233_s0 + $0x98] sm:$0xff]  }
 0x3a1   :  { %v5310_v57 = vadd.f32 %v5309_v56, %v4129_v10  ;;  %v4132_v39 = vmax.f32 %v2593_v45, 0.0  ;;  %v4145_v2 = vmax.f32 %v2242_v37, 0.0  ;;  %v2597_v14 = vadd.f32 %v2596_v61, %v9897_v31  ;;  %7066 = vmatmul.mubr.msk.bf16.gmra.mrb[200].mxu0 %vm412_vm2, %v8411_v25 }
 0x3a2   :  { %v5384_v35 = vadd.f32 %v5383_v59, %v4131_v28  ;;  %v5347_v53 = vadd.f32 %v5346_v42, %v4130_v11  ;;  %v4147_v54 = vmax.f32 %v2595_v12, 0.0  ;;  %v4146_v51 = vmax.f32 %v2244_v50, 0.0  ;;  %7098 = vmatmul.mubr.msk.bf16.gmra.mrb[200].mxu1 %vm412_vm2, %v8411_v25  ;;  %2901 = vmatprep.mubr.bf16.mxu0 %v8450_v3 }
 0x3a3   :  { %v5421_v58 = vadd.f32 %v5420_v13, %v4132_v39  ;;  %v5311_v4 = vadd.f32 %v5310_v57, %v4145_v2  ;;  %v4148_v38 = vmax.f32 %v2597_v14, 0.0  ;;  %3254 = vmatprep.mubr.bf16.mxu1 %v8450_v3 }
 0x3a4   :  { %v5385_v62 = vadd.f32 %v5384_v35, %v4147_v54  ;;  %v5348_v55 = vadd.f32 %v5347_v53, %v4146_v51  ;;  %v2247_v27 = vpop.f32.mrb[96].mxu0 }
 0x3a5   :  { %v5422_v15 = vadd.f32 %v5421_v58, %v4148_v38  ;;  %v2248_v46 = vadd.f32 %v2247_v27, %v9866_v32  ;;  %v2600_v52 = vpop.f32.mrb[96].mxu1  ;;  %v2249_v40 = vpop.f32.mrb[97].mxu0 }
 0x3a6   :  { %v2601_v47 = vadd.f32 %v2600_v52, %v9893_v33  ;;  %v2250_v56 = vadd.f32 %v2249_v40, %v9889_v23  ;;  %v2602_v48 = vpop.f32.mrb[97].mxu1  ;;  %v2251_v59 = vpop.f32.mrb[98].mxu0 }
 0x3a7   :  { %v4161_v42 = vmax.f32 %v2248_v46, 0.0  ;;  %v2603_v34 = vadd.f32 %v2602_v48, %v9897_v31  ;;  %v2252_v13 = vadd.f32 %v2251_v59, %v9866_v32  ;;  %v2604_v60 = vpop.f32.mrb[98].mxu1  ;;  %v2253_v16 = vpop.f32.mrb[99].mxu0 }
 0x3a8   :  { %v4163_v22 = vmax.f32 %v2601_v47, 0.0  ;;  %v4162_v8 = vmax.f32 %v2250_v56, 0.0  ;;  %v2605_v29 = vadd.f32 %v2604_v60, %v9893_v33  ;;  %v2254_v24 = vadd.f32 %v2253_v16, %v9889_v23  ;;  %v2606_v1 = vpop.f32.mrb[99].mxu1  ;;  %v8413_v16 = vld [vmem:[%s11233_s0 + $0xa0] sm:$0xff]  }
 0x3a9   :  { %v5312_v10 = vadd.f32 %v5311_v4, %v4161_v42  ;;  %v4164_v45 = vmax.f32 %v2603_v34, 0.0  ;;  %v4177_v37 = vmax.f32 %v2252_v13, 0.0  ;;  %v2607_v21 = vadd.f32 %v2606_v1, %v9897_v31  ;;  %7067 = vmatmul.mubr.msk.bf16.gmra.mrb[204].mxu0 %vm412_vm2, %v8412_v7 }
 0x3aa   :  { %v5386_v28 = vadd.f32 %v5385_v62, %v4163_v22  ;;  %v5349_v11 = vadd.f32 %v5348_v55, %v4162_v8  ;;  %v4179_v12 = vmax.f32 %v2605_v29, 0.0  ;;  %v4178_v50 = vmax.f32 %v2254_v24, 0.0  ;;  %7099 = vmatmul.mubr.msk.bf16.gmra.mrb[204].mxu1 %vm412_vm2, %v8412_v7  ;;  %2911 = vmatprep.mubr.bf16.mxu0 %v8450_v3 }
 0x3ab   :  { %v5423_v61 = vadd.f32 %v5422_v15, %v4164_v45  ;;  %v5313_v57 = vadd.f32 %v5312_v10, %v4177_v37  ;;  %v4180_v39 = vmax.f32 %v2607_v21, 0.0  ;;  %3264 = vmatprep.mubr.bf16.mxu1 %v8450_v3 }
 0x3ac   :  { %v5387_v2 = vadd.f32 %v5386_v28, %v4179_v12  ;;  %v5350_v14 = vadd.f32 %v5349_v11, %v4178_v50  ;;  %v2257_v25 = vpop.f32.mrb[100].mxu0 }
 0x3ad   :  { %v5424_v35 = vadd.f32 %v5423_v61, %v4180_v39  ;;  %v2258_v53 = vadd.f32 %v2257_v25, %v9866_v32  ;;  %v2610_v54 = vpop.f32.mrb[100].mxu1  ;;  %v2259_v51 = vpop.f32.mrb[101].mxu0 }
 0x3ae   :  { %v2611_v58 = vadd.f32 %v2610_v54, %v9893_v33  ;;  %v2260_v4 = vadd.f32 %v2259_v51, %v9889_v23  ;;  %v2612_v38 = vpop.f32.mrb[101].mxu1  ;;  %v2261_v62 = vpop.f32.mrb[102].mxu0 }
 0x3af   :  { %v4193_v55 = vmax.f32 %v2258_v53, 0.0  ;;  %v2613_v27 = vadd.f32 %v2612_v38, %v9897_v31  ;;  %v2262_v15 = vadd.f32 %v2261_v62, %v9866_v32  ;;  %v2614_v46 = vpop.f32.mrb[102].mxu1  ;;  %v2263_v52 = vpop.f32.mrb[103].mxu0 }
 0x3b0   :  { %v4195_v40 = vmax.f32 %v2611_v58, 0.0  ;;  %v4194_v47 = vmax.f32 %v2260_v4, 0.0  ;;  %v2615_v56 = vadd.f32 %v2614_v46, %v9893_v33  ;;  %v2264_v48 = vadd.f32 %v2263_v52, %v9889_v23  ;;  %v2616_v59 = vpop.f32.mrb[103].mxu1  ;;  %v8414_v52 = vld [vmem:[%s11233_s0 + $0xa8] sm:$0xff]  }
 0x3b1   :  { %v5314_v42 = vadd.f32 %v5313_v57, %v4193_v55  ;;  %v4196_v34 = vmax.f32 %v2613_v27, 0.0  ;;  %v4209_v13 = vmax.f32 %v2262_v15, 0.0  ;;  %v2617_v60 = vadd.f32 %v2616_v59, %v9897_v31  ;;  %7068 = vmatmul.mubr.msk.bf16.gmra.mrb[208].mxu0 %vm412_vm2, %v8413_v16 }
 0x3b2   :  { %v5388_v22 = vadd.f32 %v5387_v2, %v4195_v40  ;;  %v5351_v8 = vadd.f32 %v5350_v14, %v4194_v47  ;;  %v4211_v29 = vmax.f32 %v2615_v56, 0.0  ;;  %v4210_v24 = vmax.f32 %v2264_v48, 0.0  ;;  %7100 = vmatmul.mubr.msk.bf16.gmra.mrb[208].mxu1 %vm412_vm2, %v8413_v16  ;;  %2921 = vmatprep.mubr.bf16.mxu0 %v8450_v3 }
 0x3b3   :  { %v5425_v1 = vadd.f32 %v5424_v35, %v4196_v34  ;;  %v5315_v10 = vadd.f32 %v5314_v42, %v4209_v13  ;;  %v4212_v45 = vmax.f32 %v2617_v60, 0.0  ;;  %3274 = vmatprep.mubr.bf16.mxu1 %v8450_v3 }
 0x3b4   :  { %v5389_v37 = vadd.f32 %v5388_v22, %v4211_v29  ;;  %v5352_v21 = vadd.f32 %v5351_v8, %v4210_v24  ;;  %v2267_v7 = vpop.f32.mrb[104].mxu0 }
 0x3b5   :  { %v5426_v28 = vadd.f32 %v5425_v1, %v4212_v45  ;;  %v2268_v11 = vadd.f32 %v2267_v7, %v9866_v32  ;;  %v2620_v12 = vpop.f32.mrb[104].mxu1  ;;  %v2269_v50 = vpop.f32.mrb[105].mxu0  ;;  %v4736_v1 = vrot.slane %v10225_v9, 4 }
 0x3b6   :  { %v2621_v61 = vadd.f32 %v2620_v12, %v9893_v33  ;;  %v2270_v57 = vadd.f32 %v2269_v50, %v9889_v23  ;;  %v2622_v39 = vpop.f32.mrb[105].mxu1  ;;  %v2271_v2 = vpop.f32.mrb[106].mxu0 }
 0x3b7   :  { %v4225_v14 = vmax.f32 %v2268_v11, 0.0  ;;  %v2623_v25 = vadd.f32 %v2622_v39, %v9897_v31  ;;  %v2272_v35 = vadd.f32 %v2271_v2, %v9866_v32  ;;  %v2624_v53 = vpop.f32.mrb[106].mxu1  ;;  %v2273_v54 = vpop.f32.mrb[107].mxu0 }
 0x3b8   :  { %v4227_v51 = vmax.f32 %v2621_v61, 0.0  ;;  %v4226_v58 = vmax.f32 %v2270_v57, 0.0  ;;  %v2625_v4 = vadd.f32 %v2624_v53, %v9893_v33  ;;  %v2274_v38 = vadd.f32 %v2273_v54, %v9889_v23  ;;  %v2626_v62 = vpop.f32.mrb[107].mxu1 }
 0x3b9   :  { %v5316_v55 = vadd.f32 %v5315_v10, %v4225_v14  ;;  %v4228_v27 = vmax.f32 %v2623_v25, 0.0  ;;  %v4241_v15 = vmax.f32 %v2272_v35, 0.0  ;;  %v2627_v46 = vadd.f32 %v2626_v62, %v9897_v31  ;;  %7069 = vmatmul.mubr.msk.bf16.gmra.mrb[212].mxu0 %vm412_vm2, %v8414_v52 }
 0x3ba   :  { %v5390_v40 = vadd.f32 %v5389_v37, %v4227_v51  ;;  %v5353_v47 = vadd.f32 %v5352_v21, %v4226_v58  ;;  %v4243_v56 = vmax.f32 %v2625_v4, 0.0  ;;  %v4242_v48 = vmax.f32 %v2274_v38, 0.0  ;;  %7101 = vmatmul.mubr.msk.bf16.gmra.mrb[212].mxu1 %vm412_vm2, %v8414_v52  ;;  %2931 = vmatprep.mubr.bf16.mxu0 %v8450_v3  ;;  %v8415_v4 = vld [vmem:[%s11233_s0 + $0xb0] sm:$0xff]  }
 0x3bb   :  { %v5427_v59 = vadd.f32 %v5426_v28, %v4228_v27  ;;  %v5317_v42 = vadd.f32 %v5316_v55, %v4241_v15  ;;  %v4244_v34 = vmax.f32 %v2627_v46, 0.0  ;;  %3284 = vmatprep.mubr.bf16.mxu1 %v8450_v3  ;;  %v4810_v10 = vrot.slane %v10228_v36, 4 }
 0x3bc   :  { %v5391_v13 = vadd.f32 %v5390_v40, %v4243_v56  ;;  %v5354_v60 = vadd.f32 %v5353_v47, %v4242_v48  ;;  %v2277_v16 = vpop.f32.mrb[108].mxu0  ;;  %v4773_v28 = vrot.slane %v10230_v5, 4  ;;  %v4737_v15 = vadd.f32 %v4736_v1, %v10225_v9 }
 0x3bd   :  { %v5428_v22 = vadd.f32 %v5427_v59, %v4244_v34  ;;  %v2278_v8 = vadd.f32 %v2277_v16, %v9866_v32  ;;  %v2630_v29 = vpop.f32.mrb[108].mxu1  ;;  %v2279_v24 = vpop.f32.mrb[109].mxu0  ;;  %v4847_v59 = vrot.slane %v10232_v26, 4  ;;  %v10487_v16 = vadd.f32 %v4810_v10, %v10228_v36 }
 0x3be   :  { %v2631_v45 = vadd.f32 %v2630_v29, %v9893_v33  ;;  %v2280_v37 = vadd.f32 %v2279_v24, %v9889_v23  ;;  %v2632_v21 = vpop.f32.mrb[109].mxu1  ;;  %v2281_v7 = vpop.f32.mrb[110].mxu0  ;;  %v10490_v9 = vadd.f32 %v4773_v28, %v10230_v5  ;;  %v4738_v1 = vrot.slane %v4737_v15, 2 }
 0x3bf   :  { %v4257_v11 = vmax.f32 %v2278_v8, 0.0  ;;  %v2633_v12 = vadd.f32 %v2632_v21, %v9897_v31  ;;  %v2282_v50 = vadd.f32 %v2281_v7, %v9866_v32  ;;  %v2634_v61 = vpop.f32.mrb[110].mxu1  ;;  %v2283_v57 = vpop.f32.mrb[111].mxu0 }
 0x3c0   :  { %v4259_v39 = vmax.f32 %v2631_v45, 0.0  ;;  %v4258_v2 = vmax.f32 %v2280_v37, 0.0  ;;  %v2635_v14 = vadd.f32 %v2634_v61, %v9893_v33  ;;  %v2284_v25 = vadd.f32 %v2283_v57, %v9889_v23  ;;  %v2636_v35 = vpop.f32.mrb[111].mxu1 }
 0x3c1   :  { %v5318_v53 = vadd.f32 %v5317_v42, %v4257_v11  ;;  %v4260_v54 = vmax.f32 %v2633_v12, 0.0  ;;  %v4273_v51 = vmax.f32 %v2282_v50, 0.0  ;;  %v2637_v58 = vadd.f32 %v2636_v35, %v9897_v31  ;;  %7070 = vmatmul.mubr.msk.bf16.gmra.mrb[216].mxu0 %vm412_vm2, %v8415_v4 }
 0x3c2   :  { %v5392_v38 = vadd.f32 %v5391_v13, %v4259_v39  ;;  %v5355_v62 = vadd.f32 %v5354_v60, %v4258_v2  ;;  %v4275_v55 = vmax.f32 %v2635_v14, 0.0  ;;  %v4274_v27 = vmax.f32 %v2284_v25, 0.0  ;;  %7102 = vmatmul.mubr.msk.bf16.gmra.mrb[216].mxu1 %vm412_vm2, %v8415_v4  ;;  %2941 = vmatprep.mubr.bf16.mxu0 %v8450_v3  ;;  %v8416_v2 = vld [vmem:[%s11233_s0 + $0xb8] sm:$0xff]  }
 0x3c3   :  { %v5429_v46 = vadd.f32 %v5428_v22, %v4260_v54  ;;  %v5319_v52 = vadd.f32 %v5318_v53, %v4273_v51  ;;  %v4276_v40 = vmax.f32 %v2637_v58, 0.0  ;;  %3294 = vmatprep.mubr.bf16.mxu1 %v8450_v3  ;;  %v4848_v54 = vadd.f32 %v4847_v59, %v10232_v26 }
 0x3c4   :  { %v5393_v47 = vadd.f32 %v5392_v38, %v4275_v55  ;;  %v5356_v56 = vadd.f32 %v5355_v62, %v4274_v27  ;;  %v2287_v48 = vpop.f32.mrb[112].mxu0  ;;  %v4812_v27 = vrot.slane %v10487_v16, 2 }
 0x3c5   :  { %v5430_v42 = vadd.f32 %v5429_v46, %v4276_v40  ;;  %v2288_v34 = vadd.f32 %v2287_v48, %v9866_v32  ;;  %v2640_v13 = vpop.f32.mrb[112].mxu1  ;;  %v2289_v60 = vpop.f32.mrb[113].mxu0  ;;  %v4775_v48 = vrot.slane %v10490_v9, 2 }
 0x3c6   :  { %v2641_v22 = vadd.f32 %v2640_v13, %v9893_v33  ;;  %v2290_v8 = vadd.f32 %v2289_v60, %v9889_v23  ;;  %v2642_v29 = vpop.f32.mrb[113].mxu1  ;;  %v2291_v24 = vpop.f32.mrb[114].mxu0  ;;  %v4849_v13 = vrot.slane %v4848_v54, 2 }
 0x3c7   :  { %v4289_v45 = vmax.f32 %v2288_v34, 0.0  ;;  %v2643_v37 = vadd.f32 %v2642_v29, %v9897_v31  ;;  %v2292_v21 = vadd.f32 %v2291_v24, %v9866_v32  ;;  %v2644_v7 = vpop.f32.mrb[114].mxu1  ;;  %v2293_v11 = vpop.f32.mrb[115].mxu0 }
 0x3c8   :  { %v4291_v12 = vmax.f32 %v2641_v22, 0.0  ;;  %v4290_v36 = vmax.f32 %v2290_v8, 0.0  ;;  %v2645_v10 = vadd.f32 %v2644_v7, %v9893_v33  ;;  %v2294_v5 = vadd.f32 %v2293_v11, %v9889_v23  ;;  %v2646_v28 = vpop.f32.mrb[115].mxu1 }
 0x3c9   :  { %v5320_v50 = vadd.f32 %v5319_v52, %v4289_v45  ;;  %v4292_v61 = vmax.f32 %v2643_v37, 0.0  ;;  %v4305_v57 = vmax.f32 %v2292_v21, 0.0  ;;  %v2647_v39 = vadd.f32 %v2646_v28, %v9897_v31  ;;  %7071 = vmatmul.mubr.msk.bf16.gmra.mrb[220].mxu0 %vm412_vm2, %v8416_v2 }
 0x3ca   :  { %v5394_v14 = vadd.f32 %v5393_v47, %v4291_v12  ;;  %v5357_v25 = vadd.f32 %v5356_v56, %v4290_v36  ;;  %v4307_v35 = vmax.f32 %v2645_v10, 0.0  ;;  %v4306_v53 = vmax.f32 %v2294_v5, 0.0  ;;  %7103 = vmatmul.mubr.msk.bf16.gmra.mrb[220].mxu1 %vm412_vm2, %v8416_v2  ;;  %2951 = vmatprep.mubr.bf16.mxu0 %v8450_v3  ;;  %v8417_v10 = vld [vmem:[%s11233_s0 + $0xc0] sm:$0xff]  }
 0x3cb   :  { %v5431_v51 = vadd.f32 %v5430_v42, %v4292_v61  ;;  %v5321_v58 = vadd.f32 %v5320_v50, %v4305_v57  ;;  %v4308_v4 = vmax.f32 %v2647_v39, 0.0  ;;  %3304 = vmatprep.mubr.bf16.mxu1 %v8450_v3  ;;  %v10509_v56 = vadd.f32 %v4738_v1, %v4737_v15 }
 0x3cc   :  { %v5395_v38 = vadd.f32 %v5394_v14, %v4307_v35  ;;  %v5358_v62 = vadd.f32 %v5357_v25, %v4306_v53  ;;  %v2297_v55 = vpop.f32.mrb[116].mxu0  ;;  %v4813_v57 = vadd.f32 %v4812_v27, %v10487_v16 }
 0x3cd   :  { %v5432_v46 = vadd.f32 %v5431_v51, %v4308_v4  ;;  %v2298_v52 = vadd.f32 %v2297_v55, %v9866_v32  ;;  %v2650_v40 = vpop.f32.mrb[116].mxu1  ;;  %v2299_v47 = vpop.f32.mrb[117].mxu0  ;;  %v4776_v51 = vadd.f32 %v4775_v48, %v10490_v9  ;;  %v4740_v55 = vrot.slane %v10509_v56, 1 }
 0x3ce   :  { %v2651_v26 = vadd.f32 %v2650_v40, %v9893_v33  ;;  %v2300_v59 = vadd.f32 %v2299_v47, %v9889_v23  ;;  %v2652_v42 = vpop.f32.mrb[117].mxu1  ;;  %v2301_v34 = vpop.f32.mrb[118].mxu0  ;;  %v4814_v47 = vrot.slane %v4813_v57, 1 }
 0x3cf   :  { %v4321_v60 = vmax.f32 %v2298_v52, 0.0  ;;  %v2653_v22 = vadd.f32 %v2652_v42, %v9897_v31  ;;  %v2302_v8 = vadd.f32 %v2301_v34, %v9866_v32  ;;  %v2654_v29 = vpop.f32.mrb[118].mxu1  ;;  %v2303_v24 = vpop.f32.mrb[119].mxu0  ;;  %v10530_v52 = vadd.f32 %v4849_v13, %v4848_v54 }
 0x3d0   :  { %v4323_v45 = vmax.f32 %v2651_v26, 0.0  ;;  %v4322_v37 = vmax.f32 %v2300_v59, 0.0  ;;  %v2655_v15 = vadd.f32 %v2654_v29, %v9893_v33  ;;  %v2304_v1 = vadd.f32 %v2303_v24, %v9889_v23  ;;  %v2656_v21 = vpop.f32.mrb[119].mxu1 }
 0x3d1   :  { %v5322_v7 = vadd.f32 %v5321_v58, %v4321_v60  ;;  %v4324_v11 = vmax.f32 %v2653_v22, 0.0  ;;  %v4337_v12 = vmax.f32 %v2302_v8, 0.0  ;;  %v2657_v36 = vadd.f32 %v2656_v21, %v9897_v31  ;;  %7072 = vmatmul.mubr.msk.bf16.gmra.mrb[224].mxu0 %vm412_vm2, %v8417_v10 }
 0x3d2   :  { %v5396_v5 = vadd.f32 %v5395_v38, %v4323_v45  ;;  %v5359_v28 = vadd.f32 %v5358_v62, %v4322_v37  ;;  %v4339_v50 = vmax.f32 %v2655_v15, 0.0  ;;  %v4338_v61 = vmax.f32 %v2304_v1, 0.0  ;;  %7104 = vmatmul.mubr.msk.bf16.gmra.mrb[224].mxu1 %vm412_vm2, %v8417_v10  ;;  %2961 = vmatprep.mubr.bf16.mxu0 %v8450_v3  ;;  %v8418_v37 = vld [vmem:[%s11233_s0 + $0xc8] sm:$0xff]  }
 0x3d3   :  { %v5433_v39 = vadd.f32 %v5432_v46, %v4324_v11  ;;  %v5323_v2 = vadd.f32 %v5322_v7, %v4337_v12  ;;  %v4340_v14 = vmax.f32 %v2657_v36, 0.0  ;;  %3314 = vmatprep.mubr.bf16.mxu1 %v8450_v3  ;;  %v4777_v10 = vrot.slane %v4776_v51, 1 }
 0x3d4   :  { %v5397_v25 = vadd.f32 %v5396_v5, %v4339_v50  ;;  %v5360_v35 = vadd.f32 %v5359_v28, %v4338_v61  ;;  %v2307_v53 = vpop.f32.mrb[120].mxu0  ;;  %v4741_v61 = vadd.f32 %v4740_v55, %v10509_v56 }
 0x3d5   :  { %v5434_v58 = vadd.f32 %v5433_v39, %v4340_v14  ;;  %v2308_v4 = vadd.f32 %v2307_v53, %v9866_v32  ;;  %v2660_v38 = vpop.f32.mrb[120].mxu1  ;;  %v2309_v62 = vpop.f32.mrb[121].mxu0 }
 0x3d6   :  { %v2661_v16 = vadd.f32 %v2660_v38, %v9893_v33  ;;  %v2310_v27 = vadd.f32 %v2309_v62, %v9889_v23  ;;  %v2662_v46 = vpop.f32.mrb[121].mxu1  ;;  %v2311_v40 = vpop.f32.mrb[122].mxu0  ;;  %v4851_v62 = vrot.slane %v10530_v52, 1 }
 0x3d7   :  { %v4353_v26 = vmax.f32 %v2308_v4, 0.0  ;;  %v2663_v59 = vadd.f32 %v2662_v46, %v9897_v31  ;;  %v2312_v9 = vadd.f32 %v2311_v40, %v9866_v32  ;;  %v2664_v48 = vpop.f32.mrb[122].mxu1  ;;  %v2313_v42 = vpop.f32.mrb[123].mxu0  ;;  %v4778_v40 = vadd.f32 %v4777_v10, %v4776_v51 }
 0x3d8   :  { %v4355_v34 = vmax.f32 %v2661_v16, 0.0  ;;  %v4354_v60 = vmax.f32 %v2310_v27, 0.0  ;;  %v2665_v22 = vadd.f32 %v2664_v48, %v9893_v33  ;;  %v2314_v54 = vadd.f32 %v2313_v42, %v9889_v23  ;;  %v2666_v13 = vpop.f32.mrb[123].mxu1 }
 0x3d9   :  { %v5324_v8 = vadd.f32 %v5323_v2, %v4353_v26  ;;  %v4356_v29 = vmax.f32 %v2663_v59, 0.0  ;;  %v4369_v24 = vmax.f32 %v2312_v9, 0.0  ;;  %v2667_v45 = vadd.f32 %v2666_v13, %v9897_v31  ;;  %7073 = vmatmul.mubr.msk.bf16.gmra.mrb[228].mxu0 %vm412_vm2, %v8418_v37 }
 0x3da   :  { %v5398_v15 = vadd.f32 %v5397_v25, %v4355_v34  ;;  %v5361_v1 = vadd.f32 %v5360_v35, %v4354_v60  ;;  %v4371_v21 = vmax.f32 %v2665_v22, 0.0  ;;  %v4370_v7 = vmax.f32 %v2314_v54, 0.0  ;;  %7105 = vmatmul.mubr.msk.bf16.gmra.mrb[228].mxu1 %vm412_vm2, %v8418_v37  ;;  %2971 = vmatprep.mubr.bf16.mxu0 %v8450_v3  ;;  %v8419_v22 = vld [vmem:[%s11233_s0 + $0xd0] sm:$0xff]  }
 0x3db   :  { %v5435_v11 = vadd.f32 %v5434_v58, %v4356_v29  ;;  %v5325_v12 = vadd.f32 %v5324_v8, %v4369_v24  ;;  %v4372_v36 = vmax.f32 %v2667_v45, 0.0  ;;  %3324 = vmatprep.mubr.bf16.mxu1 %v8450_v3  ;;  %v4815_v35 = vadd.f32 %v4814_v47, %v4813_v57 }
 0x3dc   :  { %v5399_v5 = vadd.f32 %v5398_v15, %v4371_v21  ;;  %v5362_v28 = vadd.f32 %v5361_v1, %v4370_v7  ;;  %v2317_v50 = vpop.f32.mrb[124].mxu0  ;;  %v10567_v15 = vmul.f32 0.00390625, %v4778_v40  ;;  %v8420_v40 = vld [vmem:[%s11233_s0 + $0xd8] sm:$0xff]  }
 0x3dd   :  { %v5436_v39 = vadd.f32 %v5435_v11, %v4372_v36  ;;  %v2318_v2 = vadd.f32 %v2317_v50, %v9866_v32  ;;  %v2670_v14 = vpop.f32.mrb[124].mxu1  ;;  %v2319_v25 = vpop.f32.mrb[125].mxu0  ;;  %v10571_v36 = vadd.f32 %v4851_v62, %v10530_v52 }
 0x3de   :  { %v2671_v53 = vadd.f32 %v2670_v14, %v9893_v33  ;;  %v2320_v58 = vadd.f32 %v2319_v25, %v9889_v23  ;;  %v2672_v4 = vpop.f32.mrb[125].mxu1  ;;  %v2321_v38 = vpop.f32.mrb[126].mxu0 }
 0x3df   :  { %v4385_v16 = vmax.f32 %v2318_v2, 0.0  ;;  %v2673_v27 = vadd.f32 %v2672_v4, %v9897_v31  ;;  %v2322_v46 = vadd.f32 %v2321_v38, %v9866_v32  ;;  %v2674_v56 = vpop.f32.mrb[126].mxu1  ;;  %v2323_v55 = vpop.f32.mrb[127].mxu0 }
 0x3e0   :  { %v4387_v26 = vmax.f32 %v2671_v53, 0.0  ;;  %v4386_v59 = vmax.f32 %v2320_v58, 0.0  ;;  %v2675_v57 = vadd.f32 %v2674_v56, %v9893_v33  ;;  %v2324_v47 = vadd.f32 %v2323_v55, %v9889_v23  ;;  %v2676_v9 = vpop.f32.mrb[127].mxu1 }
 0x3e1   :  { %v5326_v48 = vadd.f32 %v5325_v12, %v4385_v16  ;;  %v4388_v42 = vmax.f32 %v2673_v27, 0.0  ;;  %v4401_v34 = vmax.f32 %v2322_v46, 0.0  ;;  %v2677_v60 = vadd.f32 %v2676_v9, %v9897_v31  ;;  %7074 = vmatmul.mubr.msk.bf16.gmra.mrb[232].mxu0 %vm412_vm2, %v8419_v22 }
 0x3e2   :  { %v5400_v32 = vadd.f32 %v5399_v5, %v4387_v26  ;;  %v5363_v51 = vadd.f32 %v5362_v28, %v4386_v59  ;;  %v4403_v54 = vmax.f32 %v2675_v57, 0.0  ;;  %v4402_v13 = vmax.f32 %v2324_v47, 0.0  ;;  %7106 = vmatmul.mubr.msk.bf16.gmra.mrb[232].mxu1 %vm412_vm2, %v8419_v22  ;;  %2981 = vmatprep.mubr.bf16.mxu0 %v8450_v3 }
 0x3e3   :  { %v10562_v23 = vmul.f32 0.00390625, %v4741_v61  ;;  %v5437_v33 = vadd.f32 %v5436_v39, %v4388_v42  ;;  %v5327_v8 = vadd.f32 %v5326_v48, %v4401_v34  ;;  %v4404_v29 = vmax.f32 %v2677_v60, 0.0  ;;  %3334 = vmatprep.mubr.bf16.mxu1 %v8450_v3 }
 0x3e4   :  { %v10565_v31 = vmul.f32 0.00390625, %v4815_v35  ;;  %v5401_v24 = vadd.f32 %v5400_v32, %v4403_v54  ;;  %v5364_v45 = vadd.f32 %v5363_v51, %v4402_v13  ;;  %v2713_v37 = vpop.f32.mrb[128].mxu0 }
 0x3e5   :  { %v5328_v1 = vrot.slane %v5327_v8, 4  ;;  %v5438_v21 = vadd.f32 %v5437_v33, %v4404_v29  ;;  %v2714_v7 = vadd.f32 %v2713_v37, %v8512_v17  ;;  %v3066_v11 = vpop.f32.mrb[128].mxu1  ;;  %v2715_v12 = vpop.f32.mrb[129].mxu0 }
 0x3e6   :  { %v5402_v10 = vrot.slane %v5401_v24, 4  ;;  %v5365_v5 = vrot.slane %v5364_v45, 4  ;;  %v3067_v28 = vadd.f32 %v3066_v11, %v8520_v19  ;;  %v2716_v50 = vadd.f32 %v2715_v12, %v8516_v18  ;;  %v3068_v61 = vpop.f32.mrb[129].mxu1  ;;  %v2717_v39 = vpop.f32.mrb[130].mxu0 }
 0x3e7   :  { %v5329_v2 = vadd.f32 %v5328_v1, %v5327_v8  ;;  %v5439_v14 = vrot.slane %v5438_v21, 4  ;;  %v3397_v25 = vmax.f32 %v2714_v7, 0.0  ;;  %v3069_v35 = vadd.f32 %v3068_v61, %v8524_v20  ;;  %v3070_v53 = vpop.f32.mrb[130].mxu1  ;;  %v2719_v58 = vpop.f32.mrb[131].mxu0 }
 0x3e8   :  { %v5403_v4 = vadd.f32 %v5402_v10, %v5401_v24  ;;  %v5366_v38 = vadd.f32 %v5365_v5, %v5364_v45  ;;  %v3399_v16 = vmax.f32 %v3067_v28, 0.0  ;;  %v3398_v52 = vmax.f32 %v2716_v50, 0.0  ;;  %v3072_v62 = vpop.f32.mrb[131].mxu1 }
 0x3e9   :  { %v5330_v27 = vrot.slane %v5329_v2, 2  ;;  %v5440_v46 = vadd.f32 %v5439_v14, %v5438_v21  ;;  %v3400_v56 = vmax.f32 %v3069_v35, 0.0  ;;  %v2718_v55 = vadd.f32 %v2717_v39, %v8512_v17  ;;  %7075 = vmatmul.mubr.msk.bf16.gmra.mrb[236].mxu0 %vm412_vm2, %v8420_v40 }
 0x3ea   :  { %v5404_v26 = vrot.slane %v5403_v4, 2  ;;  %v5367_v59 = vrot.slane %v5366_v38, 2  ;;  %v3071_v57 = vadd.f32 %v3070_v53, %v8520_v19  ;;  %v2720_v47 = vadd.f32 %v2719_v58, %v8516_v18  ;;  %7107 = vmatmul.mubr.msk.bf16.gmra.mrb[236].mxu1 %vm412_vm2, %v8420_v40  ;;  %2991 = vmatprep.mubr.bf16.mxu0 %v8450_v3 }
 0x3eb   :  { %v5331_v9 = vadd.f32 %v5330_v27, %v5329_v2  ;;  %v5441_v48 = vrot.slane %v5440_v46, 2  ;;  %v3413_v42 = vmax.f32 %v2718_v55, 0.0  ;;  %v3073_v34 = vadd.f32 %v3072_v62, %v8524_v20  ;;  %3344 = vmatprep.mubr.bf16.mxu1 %v8450_v3 }
 0x3ec   :  { %v5405_v60 = vadd.f32 %v5404_v26, %v5403_v4  ;;  %v5368_v22 = vadd.f32 %v5367_v59, %v5366_v38  ;;  %v3415_v32 = vmax.f32 %v3071_v57, 0.0  ;;  %v3414_v51 = vmax.f32 %v2720_v47, 0.0  ;;  %v2723_v54 = vpop.f32.mrb[132].mxu0 }
 0x3ed   :  { %v5332_v13 = vrot.slane %v5331_v9, 1  ;;  %v10587_v33 = vadd.f32 %v5441_v48, %v5440_v46  ;;  %v4853_v8 = vadd.f32 %v3413_v42, %v3397_v25  ;;  %v3416_v29 = vmax.f32 %v3073_v34, 0.0  ;;  %v3076_v24 = vpop.f32.mrb[132].mxu1  ;;  %v2725_v45 = vpop.f32.mrb[133].mxu0 }
 0x3ee   :  { %v5406_v37 = vrot.slane %v5405_v60, 1  ;;  %v4927_v1 = vadd.f32 %v3415_v32, %v3399_v16  ;;  %v4890_v21 = vadd.f32 %v3414_v51, %v3398_v52  ;;  %v2724_v7 = vadd.f32 %v2723_v54, %v8512_v17  ;;  %v3078_v11 = vpop.f32.mrb[133].mxu1  ;;  %v2727_v12 = vpop.f32.mrb[134].mxu0  ;;  %v8421_v52 = vld [vmem:[%s11233_s0 + $0xe0] sm:$0xff]  }
 0x3ef   :  { %v5333_v10 = vadd.f32 %v5332_v13, %v5331_v9  ;;  %v4964_v5 = vadd.f32 %v3416_v29, %v3400_v56  ;;  %v3077_v28 = vadd.f32 %v3076_v24, %v8520_v19  ;;  %v2726_v50 = vadd.f32 %v2725_v45, %v8516_v18  ;;  %v3080_v61 = vpop.f32.mrb[134].mxu1  ;;  %v2729_v39 = vpop.f32.mrb[135].mxu0 }
 0x3f0   :  { %v5407_v2 = vadd.f32 %v5406_v37, %v5405_v60  ;;  %v3429_v14 = vmax.f32 %v2724_v7, 0.0  ;;  %v3079_v25 = vadd.f32 %v3078_v11, %v8524_v20  ;;  %v2728_v35 = vadd.f32 %v2727_v12, %v8512_v17  ;;  %v3082_v53 = vpop.f32.mrb[135].mxu1 }
 0x3f1   :  { %v10594_v58 = vmul.f32 0.00390625, %v5333_v10  ;;  %v3431_v4 = vmax.f32 %v3077_v28, 0.0  ;;  %v3430_v38 = vmax.f32 %v2726_v50, 0.0  ;;  %v3081_v16 = vadd.f32 %v3080_v61, %v8520_v19  ;;  %7076 = vmatmul.mubr.msk.bf16.gmra.mrb[240].mxu0 %vm412_vm2, %v8421_v52 }
 0x3f2   :  { %v10601_v62 = vmul.f32 0.00390625, %v5407_v2  ;;  %v4854_v27 = vadd.f32 %v4853_v8, %v3429_v14  ;;  %v3432_v46 = vmax.f32 %v3079_v25, 0.0  ;;  %v3445_v56 = vmax.f32 %v2728_v35, 0.0  ;;  %7108 = vmatmul.mubr.msk.bf16.gmra.mrb[240].mxu1 %vm412_vm2, %v8421_v52  ;;  %3001 = vmatprep.mubr.bf16.mxu0 %v8450_v3 }
 0x3f3   :  { %v4928_v55 = vadd.f32 %v4927_v1, %v3431_v4  ;;  %v4891_v40 = vadd.f32 %v4890_v21, %v3430_v38  ;;  %v3447_v26 = vmax.f32 %v3081_v16, 0.0  ;;  %v2730_v59 = vadd.f32 %v2729_v39, %v8516_v18  ;;  %3354 = vmatprep.mubr.bf16.mxu1 %v8450_v3 }
 0x3f4   :  { %v4965_v57 = vadd.f32 %v4964_v5, %v3432_v46  ;;  %v4855_v47 = vadd.f32 %v4854_v27, %v3445_v56  ;;  %v3083_v9 = vadd.f32 %v3082_v53, %v8524_v20  ;;  %v2733_v48 = vpop.f32.mrb[136].mxu0  ;;  %v5369_v42 = vrot.slane %v5368_v22, 1 }
 0x3f5   :  { %v4929_v34 = vadd.f32 %v4928_v55, %v3447_v26  ;;  %v3446_v60 = vmax.f32 %v2730_v59, 0.0  ;;  %v2734_v32 = vadd.f32 %v2733_v48, %v8512_v17  ;;  %v3086_v51 = vpop.f32.mrb[136].mxu1  ;;  %v2735_v54 = vpop.f32.mrb[137].mxu0  ;;  %v5443_v13 = vrot.slane %v10587_v33, 1 }
 0x3f6   :  { %v3448_v8 = vmax.f32 %v3083_v9, 0.0  ;;  %v3087_v29 = vadd.f32 %v3086_v51, %v8520_v19  ;;  %v2736_v24 = vadd.f32 %v2735_v54, %v8516_v18  ;;  %v3088_v45 = vpop.f32.mrb[137].mxu1  ;;  %v2737_v37 = vpop.f32.mrb[138].mxu0  ;;  %v5370_v1 = vadd.f32 %v5369_v42, %v5368_v22  ;;  %v8422_v22 = vld [vmem:[%s11233_s0 + $0xe8] sm:$0xff]  }
 0x3f7   :  { %v4892_v21 = vadd.f32 %v4891_v40, %v3446_v60  ;;  %v3461_v7 = vmax.f32 %v2734_v32, 0.0  ;;  %v3089_v11 = vadd.f32 %v3088_v45, %v8524_v20  ;;  %v2738_v12 = vadd.f32 %v2737_v37, %v8512_v17  ;;  %v3090_v10 = vpop.f32.mrb[138].mxu1  ;;  %v2739_v5 = vpop.f32.mrb[139].mxu0 }
 0x3f8   :  { %v4966_v28 = vadd.f32 %v4965_v57, %v3448_v8  ;;  %v3463_v50 = vmax.f32 %v3087_v29, 0.0  ;;  %v3462_v61 = vmax.f32 %v2736_v24, 0.0  ;;  %v3091_v39 = vadd.f32 %v3090_v10, %v8520_v19  ;;  %v3092_v2 = vpop.f32.mrb[139].mxu1 }
 0x3f9   :  { %v4856_v14 = vadd.f32 %v4855_v47, %v3461_v7  ;;  %v3464_v25 = vmax.f32 %v3089_v11, 0.0  ;;  %v3477_v35 = vmax.f32 %v2738_v12, 0.0  ;;  %v2740_v53 = vadd.f32 %v2739_v5, %v8516_v18  ;;  %7077 = vmatmul.mubr.msk.bf16.gmra.mrb[244].mxu0 %vm412_vm2, %v8422_v22  ;;  %v8423_v5 = vld [vmem:[%s11233_s0 + $0xf0] sm:$0xff]  }
 0x3fa   :  { %v4930_v4 = vadd.f32 %v4929_v34, %v3463_v50  ;;  %v4893_v38 = vadd.f32 %v4892_v21, %v3462_v61  ;;  %v3479_v16 = vmax.f32 %v3091_v39, 0.0  ;;  %v3093_v52 = vadd.f32 %v3092_v2, %v8524_v20  ;;  %7109 = vmatmul.mubr.msk.bf16.gmra.mrb[244].mxu1 %vm412_vm2, %v8422_v22  ;;  %3011 = vmatprep.mubr.bf16.mxu0 %v8450_v3 }
 0x3fb   :  { %v4967_v27 = vadd.f32 %v4966_v28, %v3464_v25  ;;  %v4857_v46 = vadd.f32 %v4856_v14, %v3477_v35  ;;  %v3478_v56 = vmax.f32 %v2740_v53, 0.0  ;;  %3364 = vmatprep.mubr.bf16.mxu1 %v8450_v3  ;;  %v5619_v55 = vmul.f32 0.00390625, %v5370_v1 }
 0x3fc   :  { %v4931_v40 = vadd.f32 %v4930_v4, %v3479_v16  ;;  %v3480_v26 = vmax.f32 %v3093_v52, 0.0  ;;  %v2743_v59 = vpop.f32.mrb[140].mxu0  ;;  %v5444_v57 = vadd.f32 %v5443_v13, %v10587_v33  ;;  %v10628_v47 = vsel %vm6177_vm3, %v10594_v58, %v10562_v23 }
 0x3fd   :  { %v4894_v9 = vadd.f32 %v4893_v38, %v3478_v56  ;;  %v2744_v48 = vadd.f32 %v2743_v59, %v8512_v17  ;;  %v3096_v42 = vpop.f32.mrb[140].mxu1  ;;  %v2745_v34 = vpop.f32.mrb[141].mxu0  ;;  %v10633_v60 = vsel %vm6177_vm3, %v5619_v55, %v10567_v15  ;;  %v10638_v32 = vsel %vm6177_vm3, %v10601_v62, %v10565_v31 }
 0x3fe   :  { %v4968_v33 = vadd.f32 %v4967_v27, %v3480_v26  ;;  %v3097_v51 = vadd.f32 %v3096_v42, %v8520_v19  ;;  %v2746_v23 = vadd.f32 %v2745_v34, %v8516_v18  ;;  %v3098_v58 = vpop.f32.mrb[141].mxu1  ;;  %v2747_v54 = vpop.f32.mrb[142].mxu0  ;;  %v5605_v13 = vmul.f32 0.00390625, %v10571_v36 }
 0x3ff   :  { %v3493_v8 = vmax.f32 %v2744_v48, 0.0  ;;  %v3099_v29 = vadd.f32 %v3098_v58, %v8524_v20  ;;  %v2748_v15 = vadd.f32 %v2747_v54, %v8512_v17  ;;  %v3100_v24 = vpop.f32.mrb[142].mxu1  ;;  %v2749_v45 = vpop.f32.mrb[143].mxu0  ;;  %v5621_v37 = vmul.f32 0.00390625, %v5444_v57 }
 0x400   :  { %v3495_v1 = vmax.f32 %v3097_v51, 0.0  ;;  %v3494_v31 = vmax.f32 %v2746_v23, 0.0  ;;  %v3101_v62 = vadd.f32 %v3100_v24, %v8520_v19  ;;  %v2750_v21 = vadd.f32 %v2749_v45, %v8516_v18  ;;  %v3102_v7 = vpop.f32.mrb[143].mxu1 }
 0x401   :  { %v4858_v11 = vadd.f32 %v4857_v46, %v3493_v8  ;;  %v3496_v12 = vmax.f32 %v3099_v29, 0.0  ;;  %v3509_v10 = vmax.f32 %v2748_v15, 0.0  ;;  %v3103_v36 = vadd.f32 %v3102_v7, %v8524_v20  ;;  %7078 = vmatmul.mubr.msk.bf16.gmra.mrb[248].mxu0 %vm412_vm2, %v8423_v5  ;;  %v8424_v8 = vld [vmem:[%s11233_s0 + $0xf8] sm:$0xff]  }
 0x402   :  { %v4932_v28 = vadd.f32 %v4931_v40, %v3495_v1  ;;  %v4895_v50 = vadd.f32 %v4894_v9, %v3494_v31  ;;  %v3511_v61 = vmax.f32 %v3101_v62, 0.0  ;;  %v3510_v39 = vmax.f32 %v2750_v21, 0.0  ;;  %7110 = vmatmul.mubr.msk.bf16.gmra.mrb[248].mxu1 %vm412_vm2, %v8423_v5  ;;  %3021 = vmatprep.mubr.bf16.mxu0 %v8450_v3 }
 0x403   :  { %v4969_v2 = vadd.f32 %v4968_v33, %v3496_v12  ;;  %v4859_v14 = vadd.f32 %v4858_v11, %v3509_v10  ;;  %v3512_v25 = vmax.f32 %v3103_v36, 0.0  ;;  %3374 = vmatprep.mubr.bf16.mxu1 %v8450_v3  ;;  %v10656_v35 = vsel %vm6177_vm3, %v5621_v37, %v5605_v13 }
 0x404   :  { %v4933_v53 = vadd.f32 %v4932_v28, %v3511_v61  ;;  %v4896_v22 = vadd.f32 %v4895_v50, %v3510_v39  ;;  %v2753_v4 = vpop.f32.mrb[144].mxu0 }
 0x405   :  { %v4970_v38 = vadd.f32 %v4969_v2, %v3512_v25  ;;  %v2754_v16 = vadd.f32 %v2753_v4, %v8512_v17  ;;  %v3106_v52 = vpop.f32.mrb[144].mxu1  ;;  %v2755_v27 = vpop.f32.mrb[145].mxu0  ;;  %v7658_v25 = vld [vmem:[%s11236_s3 + $0x100] sm:$0xff]  }
 0x406   :  { %v3107_v46 = vadd.f32 %v3106_v52, %v8520_v19  ;;  %v2756_v56 = vadd.f32 %v2755_v27, %v8516_v18  ;;  %v3108_v55 = vpop.f32.mrb[145].mxu1  ;;  %v2757_v40 = vpop.f32.mrb[146].mxu0  ;;  %v7674_v52 = vld [vmem:[%s11236_s3 + $0x180] sm:$0xff]  }
 0x407   :  { %v3525_v26 = vmax.f32 %v2754_v16, 0.0  ;;  %v3109_v3 = vadd.f32 %v3108_v55, %v8524_v20  ;;  %v2758_v59 = vadd.f32 %v2757_v40, %v8512_v17  ;;  %v3110_v57 = vpop.f32.mrb[146].mxu1  ;;  %v2759_v9 = vpop.f32.mrb[147].mxu0  ;;  %v7667_v40 = vld [vmem:[%s11236_s3 + $0x148] sm:$0xff]  }
 0x408   :  { %v3527_v48 = vmax.f32 %v3107_v46, 0.0  ;;  %v3526_v42 = vmax.f32 %v2756_v56, 0.0  ;;  %v3111_v34 = vadd.f32 %v3110_v57, %v8520_v19  ;;  %v2760_v33 = vadd.f32 %v2759_v9, %v8516_v18  ;;  %v3112_v51 = vpop.f32.mrb[147].mxu1  ;;  %v7683_v9 = vld [vmem:[%s11236_s3 + $0x1c8] sm:$0xff]  }
 0x409   :  { %v4860_v23 = vadd.f32 %v4859_v14, %v3525_v26  ;;  %v3528_v58 = vmax.f32 %v3109_v3, 0.0  ;;  %v3541_v54 = vmax.f32 %v2758_v59, 0.0  ;;  %v3113_v13 = vadd.f32 %v3112_v51, %v8524_v20  ;;  %7079 = vmatmul.mubr.msk.bf16.gmra.mrb[252].mxu0 %vm412_vm2, %v8424_v8 }
 0x40a   :  { %v4934_v29 = vadd.f32 %v4933_v53, %v3527_v48  ;;  %v4897_v15 = vadd.f32 %v4896_v22, %v3526_v42  ;;  %v3543_v24 = vmax.f32 %v3111_v34, 0.0  ;;  %v3542_v45 = vmax.f32 %v2760_v33, 0.0  ;;  %7111 = vmatmul.mubr.msk.bf16.gmra.mrb[252].mxu1 %vm412_vm2, %v8424_v8  ;;  %6274 = vmatprep.mubr.f32.mxu0 %v9424_v41 }
 0x40b   :  { %v4971_v37 = vadd.f32 %v4970_v38, %v3528_v58  ;;  %v4861_v1 = vadd.f32 %v4860_v23, %v3541_v54  ;;  %v3544_v31 = vmax.f32 %v3113_v13, 0.0  ;;  %6344 = vmatprep.mubr.f32.mxu1 %v9428_v30  ;;  %v7675_v23 = vld [vmem:[%s11236_s3 + $0x188] sm:$0xff]   ;;  %v7668_v58 = vld [vmem:[%s11236_s3 + $0x150] sm:$0xff]  }
 0x40c   :  { %v4935_v62 = vadd.f32 %v4934_v29, %v3543_v24  ;;  %v4898_v21 = vadd.f32 %v4897_v15, %v3542_v45  ;;  %v2763_v7 = vpop.f32.mrb[148].mxu0 }
 0x40d   :  { %v4972_v11 = vadd.f32 %v4971_v37, %v3544_v31  ;;  %v2764_v12 = vadd.f32 %v2763_v7, %v8512_v17  ;;  %v3116_v10 = vpop.f32.mrb[148].mxu1  ;;  %v2765_v36 = vpop.f32.mrb[149].mxu0  ;;  %v7660_v7 = vld [vmem:[%s11236_s3 + $0x110] sm:$0xff]  }
 0x40e   :  { %v3117_v5 = vadd.f32 %v3116_v10, %v8520_v19  ;;  %v2766_v28 = vadd.f32 %v2765_v36, %v8516_v18  ;;  %v3118_v50 = vpop.f32.mrb[149].mxu1  ;;  %v2767_v61 = vpop.f32.mrb[150].mxu0 }
 0x40f   :  { %v3557_v41 = vmax.f32 %v2764_v12, 0.0  ;;  %v3119_v39 = vadd.f32 %v3118_v50, %v8524_v20  ;;  %v2768_v2 = vadd.f32 %v2767_v61, %v8512_v17  ;;  %v3120_v30 = vpop.f32.mrb[150].mxu1  ;;  %v2769_v14 = vpop.f32.mrb[151].mxu0  ;;  %v7669_v50 = vld [vmem:[%s11236_s3 + $0x158] sm:$0xff]  }
 0x410   :  { %v3559_v53 = vmax.f32 %v3117_v5, 0.0  ;;  %v3558_v22 = vmax.f32 %v2766_v28, 0.0  ;;  %v3121_v4 = vadd.f32 %v3120_v30, %v8520_v19  ;;  %v2770_v38 = vadd.f32 %v2769_v14, %v8516_v18  ;;  %v3122_v16 = vpop.f32.mrb[151].mxu1  ;;  %v7676_v28 = vld [vmem:[%s11236_s3 + $0x190] sm:$0xff]   ;;  %v7685_v30 = vld [vmem:[%s11236_s3 + $0x1d8] sm:$0xff]  }
 0x411   :  { %v4862_v27 = vadd.f32 %v4861_v1, %v3557_v41  ;;  %v3560_v46 = vmax.f32 %v3119_v39, 0.0  ;;  %v3573_v56 = vmax.f32 %v2768_v2, 0.0  ;;  %v3123_v55 = vadd.f32 %v3122_v16, %v8524_v20  ;;  %6275 = vmatmul.mubr.f32.vlgmr.msra.gmra.mrb[0].mxu0 %v9411_v63  ;;  %v7659_v63 = vld [vmem:[%s11236_s3 + $0x108] sm:$0xff]  }
 0x412   :  { %v4936_v26 = vadd.f32 %v4935_v62, %v3559_v53  ;;  %v4899_v3 = vadd.f32 %v4898_v21, %v3558_v22  ;;  %v3575_v59 = vmax.f32 %v3121_v4, 0.0  ;;  %v3574_v57 = vmax.f32 %v2770_v38, 0.0  ;;  %6345 = vmatmul.mubr.f32.vlgmr.msra.gmra.mrb[0].mxu1 %v9416_v49  ;;  %8101 = vmatpush3.bf16.msra.mxu0 %v7658_v25 }
 0x413   :  { %v4973_v48 = vadd.f32 %v4972_v11, %v3560_v46  ;;  %v4863_v42 = vadd.f32 %v4862_v27, %v3573_v56  ;;  %v3576_v34 = vmax.f32 %v3123_v55, 0.0  ;;  %8133 = vmatpush3.bf16.msra.mxu1 %v7674_v52  ;;  %6414 = vmatprep.mubr.f32.mxu0 %v9985_v44  ;;  %v7661_v52 = vld [vmem:[%s11236_s3 + $0x118] sm:$0xff]  }
 0x414   :  { %v4937_v33 = vadd.f32 %v4936_v26, %v3575_v59  ;;  %v4900_v51 = vadd.f32 %v4899_v3, %v3574_v57  ;;  %6484 = vmatprep.mubr.f32.mxu1 %v10008_v6  ;;  %v2773_v49 = vpop.f32.mrb[152].mxu0  ;;  %8103 = vmatprep.subr.bf16.mxu0 %v7667_v40  ;;  %v7684_v6 = vld [vmem:[%s11236_s3 + $0x1d0] sm:$0xff]   ;;  %v7677_v55 = vld [vmem:[%s11236_s3 + $0x198] sm:$0xff]   ;;  %v7670_v40 = vld [vmem:[%s11236_s3 + $0x160] sm:$0xff]  }
 0x415   :  { %v4974_v54 = vadd.f32 %v4973_v48, %v3576_v34  ;;  %v2774_v44 = vadd.f32 %v2773_v49, %v8512_v17  ;;  %v3126_v13 = vpop.f32.mrb[152].mxu1  ;;  %8135 = vmatprep.subr.bf16.mxu1 %v7683_v9  ;;  %v2775_v8 = vpop.f32.mrb[153].mxu0  ;;  %v7686_v9 = vld [vmem:[%s11236_s3 + $0x1e0] sm:$0xff]  }
 0x416   :  { %v3127_v29 = vadd.f32 %v3126_v13, %v8520_v19  ;;  %v2776_v15 = vadd.f32 %v2775_v8, %v8516_v18  ;;  %v3128_v24 = vpop.f32.mrb[153].mxu1  ;;  %8105 = vmatpush3.bf16.msra.mxu0 %v7659_v63  ;;  %v2777_v45 = vpop.f32.mrb[154].mxu0 }
 0x417   :  { %v3589_v37 = vmax.f32 %v2774_v44, 0.0  ;;  %v3129_v1 = vadd.f32 %v3128_v24, %v8524_v20  ;;  %8137 = vmatpush3.bf16.msra.mxu1 %v7675_v23  ;;  %v2778_v31 = vadd.f32 %v2777_v45, %v8512_v17  ;;  %v3130_v62 = vpop.f32.mrb[154].mxu1  ;;  %v2779_v21 = vpop.f32.mrb[155].mxu0  ;;  %8107 = vmatprep.subr.bf16.mxu0 %v7668_v58  ;;  %v7671_v24 = vld [vmem:[%s11236_s3 + $0x168] sm:$0xff]  }
 0x418   :  { %v3591_v11 = vmax.f32 %v3127_v29, 0.0  ;;  %v3590_v12 = vmax.f32 %v2776_v15, 0.0  ;;  %v3131_v10 = vadd.f32 %v3130_v62, %v8520_v19  ;;  %v2780_v36 = vadd.f32 %v2779_v21, %v8516_v18  ;;  %v3132_v5 = vpop.f32.mrb[155].mxu1  ;;  %8139 = vmatprep.subr.bf16.mxu1 %v7684_v6  ;;  %v7678_v15 = vld [vmem:[%s11236_s3 + $0x1a0] sm:$0xff]   ;;  %v7687_v62 = vld [vmem:[%s11236_s3 + $0x1e8] sm:$0xff]  }
 0x419   :  { %v4864_v61 = vadd.f32 %v4863_v42, %v3589_v37  ;;  %v3592_v41 = vmax.f32 %v3129_v1, 0.0  ;;  %v3605_v39 = vmax.f32 %v2778_v31, 0.0  ;;  %v3133_v2 = vadd.f32 %v3132_v5, %v8524_v20 }
 0x41a   :  { %v4938_v14 = vadd.f32 %v4937_v33, %v3591_v11  ;;  %v4901_v25 = vadd.f32 %v4900_v51, %v3590_v12  ;;  %v3607_v53 = vmax.f32 %v3131_v10, 0.0  ;;  %v3606_v22 = vmax.f32 %v2780_v36, 0.0  ;;  %8109 = vmatpush3.bf16.msra.mxu0 %v7660_v7 }
 0x41b   :  { %v4975_v4 = vadd.f32 %v4974_v54, %v3592_v41  ;;  %v4865_v38 = vadd.f32 %v4864_v61, %v3605_v39  ;;  %v3608_v16 = vmax.f32 %v3133_v2, 0.0  ;;  %8141 = vmatpush3.bf16.msra.mxu1 %v7676_v28  ;;  %8111 = vmatprep.subr.bf16.mxu0 %v7669_v50  ;;  %v7662_v54 = vld [vmem:[%s11236_s3 + $0x120] sm:$0xff]   ;;  %v7663_v28 = vld [vmem:[%s11236_s3 + $0x128] sm:$0xff]   ;;  %v7672_v2 = vld [vmem:[%s11236_s3 + $0x170] sm:$0xff]  }
 0x41c   :  { %v4939_v27 = vadd.f32 %v4938_v14, %v3607_v53  ;;  %v4902_v46 = vadd.f32 %v4901_v25, %v3606_v22  ;;  %v2783_v56 = vpop.f32.mrb[156].mxu0  ;;  %8143 = vmatprep.subr.bf16.mxu1 %v7685_v30  ;;  %v7679_v39 = vld [vmem:[%s11236_s3 + $0x1a8] sm:$0xff]   ;;  %v7688_v22 = vld [vmem:[%s11236_s3 + $0x1f0] sm:$0xff]  }
 0x41d   :  { %v4976_v26 = vadd.f32 %v4975_v4, %v3608_v16  ;;  %v2784_v3 = vadd.f32 %v2783_v56, %v8512_v17  ;;  %v3136_v59 = vpop.f32.mrb[156].mxu1  ;;  %v2785_v57 = vpop.f32.mrb[157].mxu0 }
 0x41e   :  { %v3137_v48 = vadd.f32 %v3136_v59, %v8520_v19  ;;  %v2786_v42 = vadd.f32 %v2785_v57, %v8516_v18  ;;  %v3138_v34 = vpop.f32.mrb[157].mxu1  ;;  %8113 = vmatpush3.bf16.msra.mxu0 %v7661_v52  ;;  %v2787_v63 = vpop.f32.mrb[158].mxu0 }
 0x41f   :  { %v3621_v33 = vmax.f32 %v2784_v3, 0.0  ;;  %v3139_v51 = vadd.f32 %v3138_v34, %v8524_v20  ;;  %8145 = vmatpush3.bf16.msra.mxu1 %v7677_v55  ;;  %v2788_v49 = vadd.f32 %v2787_v63, %v8512_v17  ;;  %v3140_v23 = vpop.f32.mrb[158].mxu1  ;;  %v2789_v58 = vpop.f32.mrb[159].mxu0  ;;  %8115 = vmatprep.subr.bf16.mxu0 %v7670_v40  ;;  %v7673_v34 = vld [vmem:[%s11236_s3 + $0x178] sm:$0xff]  }
 0x420   :  { %v3623_v44 = vmax.f32 %v3137_v48, 0.0  ;;  %v3622_v13 = vmax.f32 %v2786_v42, 0.0  ;;  %v3141_v8 = vadd.f32 %v3140_v23, %v8520_v19  ;;  %v2790_v6 = vadd.f32 %v2789_v58, %v8516_v18  ;;  %v3142_v29 = vpop.f32.mrb[159].mxu1  ;;  %8147 = vmatprep.subr.bf16.mxu1 %v7686_v9  ;;  %v7680_v42 = vld [vmem:[%s11236_s3 + $0x1b0] sm:$0xff]   ;;  %v7689_v23 = vld [vmem:[%s11236_s3 + $0x1f8] sm:$0xff]  }
 0x421   :  { %v4866_v45 = vadd.f32 %v4865_v38, %v3621_v33  ;;  %v3624_v37 = vmax.f32 %v3139_v51, 0.0  ;;  %v3637_v1 = vmax.f32 %v2788_v49, 0.0  ;;  %v3143_v31 = vadd.f32 %v3142_v29, %v8524_v20 }
 0x422   :  { %v4940_v21 = vadd.f32 %v4939_v27, %v3623_v44  ;;  %v4903_v7 = vadd.f32 %v4902_v46, %v3622_v13  ;;  %v3639_v11 = vmax.f32 %v3141_v8, 0.0  ;;  %v3638_v12 = vmax.f32 %v2790_v6, 0.0  ;;  %8117 = vmatpush3.bf16.msra.mxu0 %v7662_v54 }
 0x423   :  { %v4977_v10 = vadd.f32 %v4976_v26, %v3624_v37  ;;  %v4867_v36 = vadd.f32 %v4866_v45, %v3637_v1  ;;  %v3640_v5 = vmax.f32 %v3143_v31, 0.0  ;;  %8149 = vmatpush3.bf16.msra.mxu1 %v7678_v15  ;;  %8119 = vmatprep.subr.bf16.mxu0 %v7671_v24  ;;  %v7664_v26 = vld [vmem:[%s11236_s3 + $0x130] sm:$0xff]   ;;  %v7665_v15 = vld [vmem:[%s11236_s3 + $0x138] sm:$0xff]   ;;  %v7698_v31 = vld [vmem:[%s11236_s3 + $0x240] sm:$0xff]  }
 0x424   :  { %v4941_v50 = vadd.f32 %v4940_v21, %v3639_v11  ;;  %v4904_v61 = vadd.f32 %v4903_v7, %v3638_v12  ;;  %v2793_v41 = vpop.f32.mrb[160].mxu0  ;;  %8151 = vmatprep.subr.bf16.mxu1 %v7687_v62  ;;  %v7681_v1 = vld [vmem:[%s11236_s3 + $0x1b8] sm:$0xff]   ;;  %v7714_v12 = vld [vmem:[%s11236_s3 + $0x2c0] sm:$0xff]  }
 0x425   :  { %v4978_v30 = vadd.f32 %v4977_v10, %v3640_v5  ;;  %v2794_v14 = vadd.f32 %v2793_v41, %v8512_v17  ;;  %v3146_v25 = vpop.f32.mrb[160].mxu1  ;;  %v2795_v53 = vpop.f32.mrb[161].mxu0 }
 0x426   :  { %v3147_v4 = vadd.f32 %v3146_v25, %v8520_v19  ;;  %v2796_v38 = vadd.f32 %v2795_v53, %v8516_v18  ;;  %v3148_v16 = vpop.f32.mrb[161].mxu1  ;;  %8121 = vmatpush3.bf16.msra.mxu0 %v7663_v28  ;;  %v2797_v52 = vpop.f32.mrb[162].mxu0 }
 0x427   :  { %v3653_v27 = vmax.f32 %v2794_v14, 0.0  ;;  %v3149_v46 = vadd.f32 %v3148_v16, %v8524_v20  ;;  %8153 = vmatpush3.bf16.msra.mxu1 %v7679_v39  ;;  %v2798_v56 = vadd.f32 %v2797_v52, %v8512_v17  ;;  %v3150_v55 = vpop.f32.mrb[162].mxu1  ;;  %v2799_v40 = vpop.f32.mrb[163].mxu0  ;;  %8123 = vmatprep.subr.bf16.mxu0 %v7672_v2 }
 0x428   :  { %v3655_v3 = vmax.f32 %v3147_v4, 0.0  ;;  %v3654_v59 = vmax.f32 %v2796_v38, 0.0  ;;  %v3151_v57 = vadd.f32 %v3150_v55, %v8520_v19  ;;  %v2800_v9 = vadd.f32 %v2799_v40, %v8516_v18  ;;  %v3152_v48 = vpop.f32.mrb[163].mxu1  ;;  %8155 = vmatprep.subr.bf16.mxu1 %v7688_v22  ;;  %v7706_v38 = vld [vmem:[%s11236_s3 + $0x280] sm:$0xff]  }
 0x429   :  { %v4868_v63 = vadd.f32 %v4867_v36, %v3653_v27  ;;  %v3656_v33 = vmax.f32 %v3149_v46, 0.0  ;;  %v3669_v51 = vmax.f32 %v2798_v56, 0.0  ;;  %v3153_v49 = vadd.f32 %v3152_v48, %v8524_v20  ;;  %v7699_v56 = vld [vmem:[%s11236_s3 + $0x248] sm:$0xff]  }
 0x42a   :  { %v4942_v58 = vadd.f32 %v4941_v50, %v3655_v3  ;;  %v4905_v54 = vadd.f32 %v4904_v61, %v3654_v59  ;;  %v3671_v44 = vmax.f32 %v3151_v57, 0.0  ;;  %v3670_v13 = vmax.f32 %v2800_v9, 0.0  ;;  %8125 = vmatpush3.bf16.msra.mxu0 %v7664_v26  ;;  %v7715_v59 = vld [vmem:[%s11236_s3 + $0x2c8] sm:$0xff]  }
 0x42b   :  { %v4979_v8 = vadd.f32 %v4978_v30, %v3656_v33  ;;  %v4869_v6 = vadd.f32 %v4868_v63, %v3669_v51  ;;  %v3672_v29 = vmax.f32 %v3153_v49, 0.0  ;;  %8157 = vmatpush3.bf16.msra.mxu1 %v7680_v42  ;;  %8127 = vmatprep.subr.bf16.mxu0 %v7673_v34  ;;  %v7690_v30 = vld [vmem:[%s11236_s3 + $0x200] sm:$0xff]   ;;  %v7707_v63 = vld [vmem:[%s11236_s3 + $0x288] sm:$0xff]   ;;  %v7700_v33 = vld [vmem:[%s11236_s3 + $0x250] sm:$0xff]  }
 0x42c   :  { %v4943_v24 = vadd.f32 %v4942_v58, %v3671_v44  ;;  %v4906_v45 = vadd.f32 %v4905_v54, %v3670_v13  ;;  %v2803_v37 = vpop.f32.mrb[164].mxu0  ;;  %8159 = vmatprep.subr.bf16.mxu1 %v7689_v23 }
 0x42d   :  { %v4980_v62 = vadd.f32 %v4979_v8, %v3672_v29  ;;  %v2804_v21 = vadd.f32 %v2803_v37, %v8512_v17  ;;  %v3156_v7 = vpop.f32.mrb[164].mxu1  ;;  %v2805_v11 = vpop.f32.mrb[165].mxu0 }
 0x42e   :  { %v3157_v10 = vadd.f32 %v3156_v7, %v8520_v19  ;;  %v2806_v36 = vadd.f32 %v2805_v11, %v8516_v18  ;;  %v3158_v5 = vpop.f32.mrb[165].mxu1  ;;  %8129 = vmatpush3.bf16.msra.mxu0 %v7665_v15  ;;  %v2807_v28 = vpop.f32.mrb[166].mxu0  ;;  %v7708_v7 = vld [vmem:[%s11236_s3 + $0x290] sm:$0xff]   ;;  %v7701_v11 = vld [vmem:[%s11236_s3 + $0x258] sm:$0xff]  }
 0x42f   :  { %v3685_v50 = vmax.f32 %v2804_v21, 0.0  ;;  %v3159_v61 = vadd.f32 %v3158_v5, %v8524_v20  ;;  %8161 = vmatpush3.bf16.msra.mxu1 %v7681_v1  ;;  %v2808_v41 = vadd.f32 %v2807_v28, %v8512_v17  ;;  %v3160_v39 = vpop.f32.mrb[166].mxu1  ;;  %v2809_v2 = vpop.f32.mrb[167].mxu0  ;;  %8163 = vmatprep.subr.bf16.mxu0 %v7698_v31  ;;  %v7717_v28 = vld [vmem:[%s11236_s3 + $0x2d8] sm:$0xff]  }
 0x430   :  { %v3687_v14 = vmax.f32 %v3157_v10, 0.0  ;;  %v3686_v25 = vmax.f32 %v2806_v36, 0.0  ;;  %v3161_v53 = vadd.f32 %v3160_v39, %v8520_v19  ;;  %v2810_v22 = vadd.f32 %v2809_v2, %v8516_v18  ;;  %v3162_v4 = vpop.f32.mrb[167].mxu1  ;;  %8195 = vmatprep.subr.bf16.mxu1 %v7714_v12 }
 0x431   :  { %v4870_v16 = vadd.f32 %v4869_v6, %v3685_v50  ;;  %v3688_v52 = vmax.f32 %v3159_v61, 0.0  ;;  %v3701_v27 = vmax.f32 %v2808_v41, 0.0  ;;  %v3163_v46 = vadd.f32 %v3162_v4, %v8524_v20  ;;  %6415 = vmatmul.mubr.f32.vlgmr.msra.gmra.mrb[2].mxu0 %v9980_v43  ;;  %v7691_v43 = vld [vmem:[%s11236_s3 + $0x208] sm:$0xff]  }
 0x432   :  { %v4944_v55 = vadd.f32 %v4943_v24, %v3687_v14  ;;  %v4907_v40 = vadd.f32 %v4906_v45, %v3686_v25  ;;  %v3703_v26 = vmax.f32 %v3161_v53, 0.0  ;;  %v3702_v3 = vmax.f32 %v2810_v22, 0.0  ;;  %6485 = vmatmul.mubr.f32.vlgmr.msra.gmra.mrb[2].mxu1 %v9993_v0  ;;  %8165 = vmatpush3.bf16.msra.mxu0 %v7690_v30  ;;  %v7692_v45 = vld [vmem:[%s11236_s3 + $0x210] sm:$0xff]   ;;  %v7693_v25 = vld [vmem:[%s11236_s3 + $0x218] sm:$0xff]  }
 0x433   :  { %v4981_v57 = vadd.f32 %v4980_v62, %v3688_v52  ;;  %v4871_v9 = vadd.f32 %v4870_v16, %v3701_v27  ;;  %v3704_v48 = vmax.f32 %v3163_v46, 0.0  ;;  %6554 = vmatprep.mubr.f32.mxu0 %v10633_v60  ;;  %8197 = vmatpush3.bf16.msra.mxu1 %v7706_v38  ;;  %v7709_v38 = vld [vmem:[%s11236_s3 + $0x298] sm:$0xff]   ;;  %v7702_v16 = vld [vmem:[%s11236_s3 + $0x260] sm:$0xff]  }
 0x434   :  { %v4945_v42 = vadd.f32 %v4944_v55, %v3703_v26  ;;  %v4908_v34 = vadd.f32 %v4907_v40, %v3702_v3  ;;  %6624 = vmatprep.mubr.f32.mxu1 %v10656_v35  ;;  %v2813_v0 = vpop.f32.mrb[168].mxu0  ;;  %8167 = vmatprep.subr.bf16.mxu0 %v7699_v56  ;;  %v7716_v35 = vld [vmem:[%s11236_s3 + $0x2d0] sm:$0xff]   ;;  %v7718_v55 = vld [vmem:[%s11236_s3 + $0x2e0] sm:$0xff]  }
 0x435   :  { %v4982_v60 = vadd.f32 %v4981_v57, %v3704_v48  ;;  %v2814_v51 = vadd.f32 %v2813_v0, %v8512_v17  ;;  %v3166_v49 = vpop.f32.mrb[168].mxu1  ;;  %8199 = vmatprep.subr.bf16.mxu1 %v7715_v59  ;;  %v2815_v23 = vpop.f32.mrb[169].mxu0 }
 0x436   :  { %v3167_v58 = vadd.f32 %v3166_v49, %v8520_v19  ;;  %v2816_v54 = vadd.f32 %v2815_v23, %v8516_v18  ;;  %v3168_v44 = vpop.f32.mrb[169].mxu1  ;;  %8169 = vmatpush3.bf16.msra.mxu0 %v7691_v43  ;;  %v2817_v13 = vpop.f32.mrb[170].mxu0  ;;  %v7710_v49 = vld [vmem:[%s11236_s3 + $0x2a0] sm:$0xff]   ;;  %v7703_v23 = vld [vmem:[%s11236_s3 + $0x268] sm:$0xff]  }
 0x437   :  { %v3717_v8 = vmax.f32 %v2814_v51, 0.0  ;;  %v3169_v6 = vadd.f32 %v3168_v44, %v8524_v20  ;;  %8201 = vmatpush3.bf16.msra.mxu1 %v7707_v63  ;;  %v2818_v29 = vadd.f32 %v2817_v13, %v8512_v17  ;;  %v3170_v15 = vpop.f32.mrb[170].mxu1  ;;  %v2819_v24 = vpop.f32.mrb[171].mxu0  ;;  %8171 = vmatprep.subr.bf16.mxu0 %v7700_v33  ;;  %v7719_v13 = vld [vmem:[%s11236_s3 + $0x2e8] sm:$0xff]  }
 0x438   :  { %v3719_v37 = vmax.f32 %v3167_v58, 0.0  ;;  %v3718_v1 = vmax.f32 %v2816_v54, 0.0  ;;  %v3171_v31 = vadd.f32 %v3170_v15, %v8520_v19  ;;  %v2820_v62 = vadd.f32 %v2819_v24, %v8516_v18  ;;  %v3172_v21 = vpop.f32.mrb[171].mxu1  ;;  %8203 = vmatprep.subr.bf16.mxu1 %v7716_v35 }
 0x439   :  { %v4872_v12 = vadd.f32 %v4871_v9, %v3717_v8  ;;  %v3720_v10 = vmax.f32 %v3169_v6, 0.0  ;;  %v3733_v36 = vmax.f32 %v2818_v29, 0.0  ;;  %v3173_v5 = vadd.f32 %v3172_v21, %v8524_v20 }
 0x43a   :  { %v4946_v50 = vadd.f32 %v4945_v42, %v3719_v37  ;;  %v4909_v61 = vadd.f32 %v4908_v34, %v3718_v1  ;;  %v3735_v41 = vmax.f32 %v3171_v31, 0.0  ;;  %v3734_v39 = vmax.f32 %v2820_v62, 0.0  ;;  %8173 = vmatpush3.bf16.msra.mxu0 %v7692_v45  ;;  %v7694_v34 = vld [vmem:[%s11236_s3 + $0x220] sm:$0xff]   ;;  %v7695_v1 = vld [vmem:[%s11236_s3 + $0x228] sm:$0xff]  }
 0x43b   :  { %v4983_v2 = vadd.f32 %v4982_v60, %v3720_v10  ;;  %v4873_v30 = vadd.f32 %v4872_v12, %v3733_v36  ;;  %v3736_v14 = vmax.f32 %v3173_v5, 0.0  ;;  %8205 = vmatpush3.bf16.msra.mxu1 %v7708_v7  ;;  %8175 = vmatprep.subr.bf16.mxu0 %v7701_v11  ;;  %v7711_v7 = vld [vmem:[%s11236_s3 + $0x2a8] sm:$0xff]   ;;  %v7704_v11 = vld [vmem:[%s11236_s3 + $0x270] sm:$0xff]  }
 0x43c   :  { %v4947_v53 = vadd.f32 %v4946_v50, %v3735_v41  ;;  %v4910_v22 = vadd.f32 %v4909_v61, %v3734_v39  ;;  %v2823_v4 = vpop.f32.mrb[172].mxu0  ;;  %8207 = vmatprep.subr.bf16.mxu1 %v7717_v28  ;;  %v7720_v28 = vld [vmem:[%s11236_s3 + $0x2f0] sm:$0xff]  }
 0x43d   :  { %v4984_v52 = vadd.f32 %v4983_v2, %v3736_v14  ;;  %v2824_v27 = vadd.f32 %v2823_v4, %v8512_v17  ;;  %v3176_v46 = vpop.f32.mrb[172].mxu1  ;;  %v2825_v56 = vpop.f32.mrb[173].mxu0 }
 0x43e   :  { %v3177_v40 = vadd.f32 %v3176_v46, %v8520_v19  ;;  %v2826_v26 = vadd.f32 %v2825_v56, %v8516_v18  ;;  %v3178_v3 = vpop.f32.mrb[173].mxu1  ;;  %8177 = vmatpush3.bf16.msra.mxu0 %v7693_v25  ;;  %v2827_v59 = vpop.f32.mrb[174].mxu0  ;;  %v7712_v46 = vld [vmem:[%s11236_s3 + $0x2b0] sm:$0xff]   ;;  %v7705_v56 = vld [vmem:[%s11236_s3 + $0x278] sm:$0xff]  }
 0x43f   :  { %v3749_v57 = vmax.f32 %v2824_v27, 0.0  ;;  %v3179_v9 = vadd.f32 %v3178_v3, %v8524_v20  ;;  %8209 = vmatpush3.bf16.msra.mxu1 %v7709_v38  ;;  %v2828_v48 = vadd.f32 %v2827_v59, %v8512_v17  ;;  %v3180_v43 = vpop.f32.mrb[174].mxu1  ;;  %v2829_v42 = vpop.f32.mrb[175].mxu0  ;;  %8179 = vmatprep.subr.bf16.mxu0 %v7702_v16  ;;  %v7721_v59 = vld [vmem:[%s11236_s3 + $0x2f8] sm:$0xff]  }
 0x440   :  { %v3751_v0 = vmax.f32 %v3177_v40, 0.0  ;;  %v3750_v63 = vmax.f32 %v2826_v26, 0.0  ;;  %v3181_v33 = vadd.f32 %v3180_v43, %v8520_v19  ;;  %v2830_v60 = vadd.f32 %v2829_v42, %v8516_v18  ;;  %v3182_v51 = vpop.f32.mrb[175].mxu1  ;;  %8211 = vmatprep.subr.bf16.mxu1 %v7718_v55 }
 0x441   :  { %v4874_v35 = vadd.f32 %v4873_v30, %v3749_v57  ;;  %v3752_v58 = vmax.f32 %v3179_v9, 0.0  ;;  %v3765_v54 = vmax.f32 %v2828_v48, 0.0  ;;  %v3183_v44 = vadd.f32 %v3182_v51, %v8524_v20 }
 0x442   :  { %v4948_v8 = vadd.f32 %v4947_v53, %v3751_v0  ;;  %v4911_v6 = vadd.f32 %v4910_v22, %v3750_v63  ;;  %v3767_v29 = vmax.f32 %v3181_v33, 0.0  ;;  %v3766_v15 = vmax.f32 %v2830_v60, 0.0  ;;  %8181 = vmatpush3.bf16.msra.mxu0 %v7694_v34  ;;  %v7696_v22 = vld [vmem:[%s11236_s3 + $0x230] sm:$0xff]   ;;  %v7697_v63 = vld [vmem:[%s11236_s3 + $0x238] sm:$0xff]  }
 0x443   :  { %v4985_v24 = vadd.f32 %v4984_v52, %v3752_v58  ;;  %v4875_v45 = vadd.f32 %v4874_v35, %v3765_v54  ;;  %v3768_v37 = vmax.f32 %v3183_v44, 0.0  ;;  %8213 = vmatpush3.bf16.msra.mxu1 %v7710_v49  ;;  %8183 = vmatprep.subr.bf16.mxu0 %v7703_v23  ;;  %v7713_v49 = vld [vmem:[%s11236_s3 + $0x2b8] sm:$0xff]  }
 0x444   :  { %v4949_v31 = vadd.f32 %v4948_v8, %v3767_v29  ;;  %v4912_v62 = vadd.f32 %v4911_v6, %v3766_v15  ;;  %v2833_v21 = vpop.f32.mrb[176].mxu0  ;;  %8215 = vmatprep.subr.bf16.mxu1 %v7719_v13 }
 0x445   :  { %v4986_v12 = vadd.f32 %v4985_v24, %v3768_v37  ;;  %v2834_v10 = vadd.f32 %v2833_v21, %v8512_v17  ;;  %v3186_v36 = vpop.f32.mrb[176].mxu1  ;;  %v2835_v5 = vpop.f32.mrb[177].mxu0 }
 0x446   :  { %v3187_v50 = vadd.f32 %v3186_v36, %v8520_v19  ;;  %v2836_v61 = vadd.f32 %v2835_v5, %v8516_v18  ;;  %v3188_v41 = vpop.f32.mrb[177].mxu1  ;;  %8185 = vmatpush3.bf16.msra.mxu0 %v7695_v1  ;;  %v2837_v39 = vpop.f32.mrb[178].mxu0 }
 0x447   :  { %v3781_v2 = vmax.f32 %v2834_v10, 0.0  ;;  %v3189_v30 = vadd.f32 %v3188_v41, %v8524_v20  ;;  %8217 = vmatpush3.bf16.msra.mxu1 %v7711_v7  ;;  %v2838_v14 = vadd.f32 %v2837_v39, %v8512_v17  ;;  %v3190_v25 = vpop.f32.mrb[178].mxu1  ;;  %v2839_v53 = vpop.f32.mrb[179].mxu0  ;;  %8187 = vmatprep.subr.bf16.mxu0 %v7704_v11 }
 0x448   :  { %v3783_v4 = vmax.f32 %v3187_v50, 0.0  ;;  %v3782_v38 = vmax.f32 %v2836_v61, 0.0  ;;  %v3191_v16 = vadd.f32 %v3190_v25, %v8520_v19  ;;  %v2840_v52 = vadd.f32 %v2839_v53, %v8516_v18  ;;  %v3192_v27 = vpop.f32.mrb[179].mxu1  ;;  %8219 = vmatprep.subr.bf16.mxu1 %v7720_v28 }
 0x449   :  { %v4876_v55 = vadd.f32 %v4875_v45, %v3781_v2  ;;  %v3784_v40 = vmax.f32 %v3189_v30, 0.0  ;;  %v3797_v26 = vmax.f32 %v2838_v14, 0.0  ;;  %v3193_v3 = vadd.f32 %v3192_v27, %v8524_v20 }
 0x44a   :  { %v4950_v57 = vadd.f32 %v4949_v31, %v3783_v4  ;;  %v4913_v9 = vadd.f32 %v4912_v62, %v3782_v38  ;;  %v3799_v48 = vmax.f32 %v3191_v16, 0.0  ;;  %v3798_v43 = vmax.f32 %v2840_v52, 0.0  ;;  %8189 = vmatpush3.bf16.msra.mxu0 %v7696_v22 }
 0x44b   :  { %v4987_v42 = vadd.f32 %v4986_v12, %v3784_v40  ;;  %v4877_v34 = vadd.f32 %v4876_v55, %v3797_v26  ;;  %v3800_v0 = vmax.f32 %v3193_v3, 0.0  ;;  %8221 = vmatpush3.bf16.msra.mxu1 %v7712_v46  ;;  %8191 = vmatprep.subr.bf16.mxu0 %v7705_v56 }
 0x44c   :  { %v4951_v33 = vadd.f32 %v4950_v57, %v3799_v48  ;;  %v4914_v60 = vadd.f32 %v4913_v9, %v3798_v43  ;;  %v2843_v51 = vpop.f32.mrb[180].mxu0  ;;  %8223 = vmatprep.subr.bf16.mxu1 %v7721_v59 }
 0x44d   :  { %v4988_v23 = vadd.f32 %v4987_v42, %v3800_v0  ;;  %v2844_v35 = vadd.f32 %v2843_v51, %v8512_v17  ;;  %v3196_v58 = vpop.f32.mrb[180].mxu1  ;;  %v2845_v54 = vpop.f32.mrb[181].mxu0 }
 0x44e   :  { %v3197_v44 = vadd.f32 %v3196_v58, %v8520_v19  ;;  %v2846_v13 = vadd.f32 %v2845_v54, %v8516_v18  ;;  %v3198_v8 = vpop.f32.mrb[181].mxu1  ;;  %8193 = vmatpush3.bf16.msra.mxu0 %v7697_v63  ;;  %v2847_v6 = vpop.f32.mrb[182].mxu0 }
 0x44f   :  { %v3813_v29 = vmax.f32 %v2844_v35, 0.0  ;;  %v3199_v15 = vadd.f32 %v3198_v8, %v8524_v20  ;;  %8225 = vmatpush3.bf16.msra.mxu1 %v7713_v49  ;;  %v2848_v24 = vadd.f32 %v2847_v6, %v8512_v17  ;;  %v3200_v45 = vpop.f32.mrb[182].mxu1  ;;  %v2849_v37 = vpop.f32.mrb[183].mxu0 }
 0x450   :  { %v3815_v1 = vmax.f32 %v3197_v44, 0.0  ;;  %v3814_v31 = vmax.f32 %v2846_v13, 0.0  ;;  %v3201_v62 = vadd.f32 %v3200_v45, %v8520_v19  ;;  %v2850_v21 = vadd.f32 %v2849_v37, %v8516_v18  ;;  %v3202_v7 = vpop.f32.mrb[183].mxu1  ;;  %v7730_v44 = vld [vmem:[%s11236_s3 + $0x340] sm:$0xff]   ;;  %v7731_v37 = vld [vmem:[%s11236_s3 + $0x348] sm:$0xff]  }
 0x451   :  { %v4878_v11 = vadd.f32 %v4877_v34, %v3813_v29  ;;  %v3816_v12 = vmax.f32 %v3199_v15, 0.0  ;;  %v3829_v10 = vmax.f32 %v2848_v24, 0.0  ;;  %v3203_v36 = vadd.f32 %v3202_v7, %v8524_v20  ;;  %6555 = vmatmul.mubr.f32.vlgmr.msra.gmra.mrb[4].mxu0 %v10628_v47  ;;  %v7746_v13 = vld [vmem:[%s11236_s3 + $0x3c0] sm:$0xff]   ;;  %8227 = vmatprep.subr.bf16.mxu0 %v7730_v44  ;;  %v7747_v7 = vld [vmem:[%s11236_s3 + $0x3c8] sm:$0xff]  }
 0x452   :  { %v4952_v5 = vadd.f32 %v4951_v33, %v3815_v1  ;;  %v4915_v28 = vadd.f32 %v4914_v60, %v3814_v31  ;;  %v3831_v50 = vmax.f32 %v3201_v62, 0.0  ;;  %v3830_v61 = vmax.f32 %v2850_v21, 0.0  ;;  %6625 = vmatmul.mubr.f32.vlgmr.msra.gmra.mrb[4].mxu1 %v10638_v32  ;;  %8259 = vmatprep.subr.bf16.mxu1 %v7746_v13  ;;  %v7722_v24 = vld [vmem:[%s11236_s3 + $0x300] sm:$0xff]  }
 0x453   :  { %v4989_v41 = vadd.f32 %v4988_v23, %v3816_v12  ;;  %v4879_v39 = vadd.f32 %v4878_v11, %v3829_v10  ;;  %v3832_v2 = vmax.f32 %v3203_v36, 0.0  ;;  %v7738_v45 = vld [vmem:[%s11236_s3 + $0x380] sm:$0xff]   ;;  %8229 = vmatpush3.bf16.msra.mxu0 %v7722_v24 }
 0x454   :  { %v4953_v30 = vadd.f32 %v4952_v5, %v3831_v50  ;;  %v4916_v14 = vadd.f32 %v4915_v28, %v3830_v61  ;;  %v2853_v25 = vpop.f32.mrb[184].mxu0  ;;  %8261 = vmatpush3.bf16.msra.mxu1 %v7738_v45  ;;  %8231 = vmatprep.subr.bf16.mxu0 %v7731_v37  ;;  %v7723_v28 = vld [vmem:[%s11236_s3 + $0x308] sm:$0xff]  }
 0x455   :  { %v4990_v53 = vadd.f32 %v4989_v41, %v3832_v2  ;;  %v2854_v22 = vadd.f32 %v2853_v25, %v8512_v17  ;;  %v3206_v4 = vpop.f32.mrb[184].mxu1  ;;  %v2855_v38 = vpop.f32.mrb[185].mxu0  ;;  %8263 = vmatprep.subr.bf16.mxu1 %v7747_v7  ;;  %v7739_v50 = vld [vmem:[%s11236_s3 + $0x388] sm:$0xff]  }
 0x456   :  { %v3207_v16 = vadd.f32 %v3206_v4, %v8520_v19  ;;  %v2856_v47 = vadd.f32 %v2855_v38, %v8516_v18  ;;  %v3208_v52 = vpop.f32.mrb[185].mxu1  ;;  %v2857_v27 = vpop.f32.mrb[186].mxu0 }
 0x457   :  { %v3845_v46 = vmax.f32 %v2854_v22, 0.0  ;;  %v3209_v32 = vadd.f32 %v3208_v52, %v8524_v20  ;;  %v2858_v56 = vadd.f32 %v2857_v27, %v8512_v17  ;;  %v3210_v55 = vpop.f32.mrb[186].mxu1  ;;  %v2859_v40 = vpop.f32.mrb[187].mxu0  ;;  %8233 = vmatpush3.bf16.msra.mxu0 %v7723_v28 }
 0x458   :  { %v3847_v26 = vmax.f32 %v3207_v16, 0.0  ;;  %v3846_v3 = vmax.f32 %v2856_v47, 0.0  ;;  %v3211_v59 = vadd.f32 %v3210_v55, %v8520_v19  ;;  %v2860_v57 = vadd.f32 %v2859_v40, %v8516_v18  ;;  %v3212_v9 = vpop.f32.mrb[187].mxu1  ;;  %8265 = vmatpush3.bf16.msra.mxu1 %v7739_v50 }
 0x459   :  { %v4880_v48 = vadd.f32 %v4879_v39, %v3845_v46  ;;  %v3848_v43 = vmax.f32 %v3209_v32, 0.0  ;;  %v3861_v42 = vmax.f32 %v2858_v56, 0.0  ;;  %v3213_v34 = vadd.f32 %v3212_v9, %v8524_v20 }
 0x45a   :  { %v4954_v0 = vadd.f32 %v4953_v30, %v3847_v26  ;;  %v4917_v63 = vadd.f32 %v4916_v14, %v3846_v3  ;;  %v3863_v33 = vmax.f32 %v3211_v59, 0.0  ;;  %v3862_v60 = vmax.f32 %v2860_v57, 0.0 }
 0x45b   :  { %v4991_v51 = vadd.f32 %v4990_v53, %v3848_v43  ;;  %v4881_v49 = vadd.f32 %v4880_v48, %v3861_v42  ;;  %v3864_v23 = vmax.f32 %v3213_v34, 0.0 }
 0x45c   :  { %v4955_v35 = vadd.f32 %v4954_v0, %v3863_v33  ;;  %v4918_v58 = vadd.f32 %v4917_v63, %v3862_v60  ;;  %v2863_v54 = vpop.f32.mrb[188].mxu0 }
 0x45d   :  { %v4992_v8 = vadd.f32 %v4991_v51, %v3864_v23  ;;  %v2864_v6 = vadd.f32 %v2863_v54, %v8512_v17  ;;  %v3216_v29 = vpop.f32.mrb[188].mxu1  ;;  %v2865_v15 = vpop.f32.mrb[189].mxu0 }
 0x45e   :  { %v3217_v1 = vadd.f32 %v3216_v29, %v8520_v19  ;;  %v2866_v31 = vadd.f32 %v2865_v15, %v8516_v18  ;;  %v3218_v62 = vpop.f32.mrb[189].mxu1  ;;  %v2867_v21 = vpop.f32.mrb[190].mxu0  ;;  %v7732_v29 = vld [vmem:[%s11236_s3 + $0x350] sm:$0xff]  }
 0x45f   :  { %v3877_v11 = vmax.f32 %v2864_v6, 0.0  ;;  %v3219_v12 = vadd.f32 %v3218_v62, %v8524_v20  ;;  %v2868_v10 = vadd.f32 %v2867_v21, %v8512_v17  ;;  %v3220_v36 = vpop.f32.mrb[190].mxu1  ;;  %v2869_v5 = vpop.f32.mrb[191].mxu0  ;;  %v7748_v15 = vld [vmem:[%s11236_s3 + $0x3d0] sm:$0xff]   ;;  %8235 = vmatprep.subr.bf16.mxu0 %v7732_v29 }
 0x460   :  { %v3879_v61 = vmax.f32 %v3217_v1, 0.0  ;;  %v3878_v41 = vmax.f32 %v2866_v31, 0.0  ;;  %v3221_v39 = vadd.f32 %v3220_v36, %v8520_v19  ;;  %v2870_v2 = vadd.f32 %v2869_v5, %v8516_v18  ;;  %v3222_v30 = vpop.f32.mrb[191].mxu1  ;;  %8267 = vmatprep.subr.bf16.mxu1 %v7748_v15  ;;  %v7724_v31 = vld [vmem:[%s11236_s3 + $0x310] sm:$0xff]  }
 0x461   :  { %v4882_v14 = vadd.f32 %v4881_v49, %v3877_v11  ;;  %v3880_v25 = vmax.f32 %v3219_v12, 0.0  ;;  %v3893_v53 = vmax.f32 %v2868_v10, 0.0  ;;  %v3223_v22 = vadd.f32 %v3222_v30, %v8524_v20  ;;  %v7740_v62 = vld [vmem:[%s11236_s3 + $0x390] sm:$0xff]   ;;  %8237 = vmatpush3.bf16.msra.mxu0 %v7724_v31  ;;  %v7727_v31 = vld [vmem:[%s11236_s3 + $0x328] sm:$0xff]  }
 0x462   :  { %v4956_v4 = vadd.f32 %v4955_v35, %v3879_v61  ;;  %v4919_v38 = vadd.f32 %v4918_v58, %v3878_v41  ;;  %v3895_v16 = vmax.f32 %v3221_v39, 0.0  ;;  %v3894_v47 = vmax.f32 %v2870_v2, 0.0  ;;  %8269 = vmatpush3.bf16.msra.mxu1 %v7740_v62  ;;  %v7743_v62 = vld [vmem:[%s11236_s3 + $0x3a8] sm:$0xff]  }
 0x463   :  { %v4993_v52 = vadd.f32 %v4992_v8, %v3880_v25  ;;  %v10981_v27 = vadd.f32 %v4882_v14, %v3893_v53  ;;  %v3896_v46 = vmax.f32 %v3223_v22, 0.0  ;;  %v7733_v14 = vld [vmem:[%s11236_s3 + $0x358] sm:$0xff]  }
 0x464   :  { %v10983_v32 = vadd.f32 %v4956_v4, %v3895_v16  ;;  %v10985_v56 = vadd.f32 %v4919_v38, %v3894_v47  ;;  %v2873_v55 = vpop.f32.mrb[192].mxu0  ;;  %v7749_v25 = vld [vmem:[%s11236_s3 + $0x3d8] sm:$0xff]   ;;  %8239 = vmatprep.subr.bf16.mxu0 %v7733_v14 }
 0x465   :  { %v10987_v40 = vadd.f32 %v4993_v52, %v3896_v46  ;;  %v2874_v26 = vadd.f32 %v2873_v55, %v8512_v17  ;;  %v3226_v3 = vpop.f32.mrb[192].mxu1  ;;  %v2875_v59 = vpop.f32.mrb[193].mxu0  ;;  %8271 = vmatprep.subr.bf16.mxu1 %v7749_v25  ;;  %v7725_v38 = vld [vmem:[%s11236_s3 + $0x318] sm:$0xff]   ;;  %v7734_v55 = vld [vmem:[%s11236_s3 + $0x360] sm:$0xff]  }
 0x466   :  { %v3227_v57 = vadd.f32 %v3226_v3, %v8520_v19  ;;  %v2876_v9 = vadd.f32 %v2875_v59, %v8516_v18  ;;  %v3228_v48 = vpop.f32.mrb[193].mxu1  ;;  %v2877_v43 = vpop.f32.mrb[194].mxu0  ;;  %v7741_v16 = vld [vmem:[%s11236_s3 + $0x398] sm:$0xff]   ;;  %8241 = vmatpush3.bf16.msra.mxu0 %v7725_v38  ;;  %v7744_v38 = vld [vmem:[%s11236_s3 + $0x3b0] sm:$0xff]  }
 0x467   :  { %v3229_v42 = vadd.f32 %v3228_v48, %v8524_v20  ;;  %v3230_v34 = vpop.f32.mrb[194].mxu1  ;;  %v2879_v0 = vpop.f32.mrb[195].mxu0  ;;  %v2878_v33 = vadd.f32 %v2877_v43, %v8512_v17  ;;  %v3909_v23 = vmax.f32 %v2874_v26, 0.0  ;;  %8273 = vmatpush3.bf16.msra.mxu1 %v7741_v16  ;;  %8243 = vmatprep.subr.bf16.mxu0 %v7734_v55  ;;  %v7726_v48 = vld [vmem:[%s11236_s3 + $0x320] sm:$0xff]   ;;  %v7753_v55 = vld [vmem:[%s11236_s3 + $0x3f8] sm:$0xff]  }
 0x468   :  { %v3232_v63 = vpop.f32.mrb[195].mxu1  ;;  %v3911_v60 = vmax.f32 %v3227_v57, 0.0  ;;  %v3231_v51 = vadd.f32 %v3230_v34, %v8520_v19  ;;  %v2880_v49 = vadd.f32 %v2879_v0, %v8516_v18  ;;  %v3910_v44 = vmax.f32 %v2876_v9, 0.0  ;;  %v7750_v9 = vld [vmem:[%s11236_s3 + $0x3e0] sm:$0xff]  }
 0x469   :  { %v3912_v35 = vmax.f32 %v3229_v42, 0.0  ;;  %v3925_v58 = vmax.f32 %v2878_v33, 0.0  ;;  %v3233_v54 = vadd.f32 %v3232_v63, %v8524_v20  ;;  %v7742_v43 = vld [vmem:[%s11236_s3 + $0x3a0] sm:$0xff]   ;;  %8275 = vmatprep.subr.bf16.mxu1 %v7750_v9  ;;  %v7735_v33 = vld [vmem:[%s11236_s3 + $0x368] sm:$0xff]  }
 0x46a   :  { %v3927_v13 = vmax.f32 %v3231_v51, 0.0  ;;  %v3926_v8 = vmax.f32 %v2880_v49, 0.0  ;;  %8245 = vmatpush3.bf16.msra.mxu0 %v7726_v48 }
 0x46b   :  { %v5445_v24 = vadd.f32 %v3925_v58, %v3909_v23  ;;  %v3928_v45 = vmax.f32 %v3233_v54, 0.0  ;;  %8277 = vmatpush3.bf16.msra.mxu1 %v7742_v43  ;;  %8247 = vmatprep.subr.bf16.mxu0 %v7735_v33 }
 0x46c   :  { %v2883_v6 = vpop.f32.mrb[196].mxu0  ;;  %v5519_v21 = vadd.f32 %v3927_v13, %v3911_v60  ;;  %v5482_v7 = vadd.f32 %v3926_v8, %v3910_v44  ;;  %v7751_v60 = vld [vmem:[%s11236_s3 + $0x3e8] sm:$0xff]  }
 0x46d   :  { %v3236_v37 = vpop.f32.mrb[196].mxu1  ;;  %v2885_v1 = vpop.f32.mrb[197].mxu0  ;;  %v2884_v11 = vadd.f32 %v2883_v6, %v8512_v17  ;;  %v5556_v36 = vadd.f32 %v3928_v45, %v3912_v35  ;;  %8279 = vmatprep.subr.bf16.mxu1 %v7751_v60 }
 0x46e   :  { %v3238_v12 = vpop.f32.mrb[197].mxu1  ;;  %v2887_v10 = vpop.f32.mrb[198].mxu0  ;;  %v3237_v5 = vadd.f32 %v3236_v37, %v8520_v19  ;;  %v2886_v28 = vadd.f32 %v2885_v1, %v8516_v18  ;;  %8249 = vmatpush3.bf16.msra.mxu0 %v7727_v31 }
 0x46f   :  { %v3240_v50 = vpop.f32.mrb[198].mxu1  ;;  %v2889_v61 = vpop.f32.mrb[199].mxu0  ;;  %v3941_v41 = vmax.f32 %v2884_v11, 0.0  ;;  %v3239_v39 = vadd.f32 %v3238_v12, %v8524_v20  ;;  %v2888_v2 = vadd.f32 %v2887_v10, %v8512_v17  ;;  %8281 = vmatpush3.bf16.msra.mxu1 %v7743_v62 }
 0x470   :  { %v3242_v30 = vpop.f32.mrb[199].mxu1  ;;  %v3943_v53 = vmax.f32 %v3237_v5, 0.0  ;;  %v3942_v22 = vmax.f32 %v2886_v28, 0.0  ;;  %v3241_v4 = vadd.f32 %v3240_v50, %v8520_v19  ;;  %v2890_v57 = vadd.f32 %v2889_v61, %v8516_v18  ;;  %v7752_v5 = vld [vmem:[%s11236_s3 + $0x3f0] sm:$0xff]  }
 0x471   :  { %v5446_v47 = vadd.f32 %v5445_v24, %v3941_v41  ;;  %v3944_v52 = vmax.f32 %v3239_v39, 0.0  ;;  %v3957_v46 = vmax.f32 %v2888_v2, 0.0  ;;  %v3243_v0 = vadd.f32 %v3242_v30, %v8524_v20  ;;  %8283 = vmatprep.subr.bf16.mxu1 %v7752_v5 }
 0x472   :  { %v5520_v26 = vadd.f32 %v5519_v21, %v3943_v53  ;;  %v5483_v3 = vadd.f32 %v5482_v7, %v3942_v22  ;;  %v3959_v59 = vmax.f32 %v3241_v4, 0.0  ;;  %v3958_v49 = vmax.f32 %v2890_v57, 0.0  ;;  %v7728_v4 = vld [vmem:[%s11236_s3 + $0x330] sm:$0xff]  }
 0x473   :  { %v5557_v42 = vadd.f32 %v5556_v36, %v3944_v52  ;;  %v5447_v34 = vadd.f32 %v5446_v47, %v3957_v46  ;;  %v3960_v54 = vmax.f32 %v3243_v0, 0.0  ;;  %v7736_v36 = vld [vmem:[%s11236_s3 + $0x370] sm:$0xff]   ;;  %v7737_v46 = vld [vmem:[%s11236_s3 + $0x378] sm:$0xff]   ;;  %8285 = vmatpush3.bf16.msra.mxu1 %v7744_v38 }
 0x474   :  { %v2893_v63 = vpop.f32.mrb[200].mxu0  ;;  %v5521_v51 = vadd.f32 %v5520_v26, %v3959_v59  ;;  %v5484_v29 = vadd.f32 %v5483_v3, %v3958_v49  ;;  %8251 = vmatprep.subr.bf16.mxu0 %v7736_v36  ;;  %8287 = vmatprep.subr.bf16.mxu1 %v7753_v55  ;;  %v7729_v49 = vld [vmem:[%s11236_s3 + $0x338] sm:$0xff]  }
 0x475   :  { %v2894_v23 = vadd.f32 %v2893_v63, %v8512_v17  ;;  %v3246_v35 = vpop.f32.mrb[200].mxu1  ;;  %v2895_v58 = vpop.f32.mrb[201].mxu0  ;;  %v5558_v21 = vadd.f32 %v5557_v42, %v3960_v54  ;;  %8253 = vmatpush3.bf16.msra.mxu0 %v7728_v4 }
 0x476   :  { %v3247_v44 = vadd.f32 %v3246_v35, %v8520_v19  ;;  %v2896_v13 = vadd.f32 %v2895_v58, %v8516_v18  ;;  %v3248_v8 = vpop.f32.mrb[201].mxu1  ;;  %v2897_v6 = vpop.f32.mrb[202].mxu0  ;;  %8255 = vmatprep.subr.bf16.mxu0 %v7737_v46 }
 0x477   :  { %v3973_v15 = vmax.f32 %v2894_v23, 0.0  ;;  %v3249_v24 = vadd.f32 %v3248_v8, %v8524_v20  ;;  %v2898_v45 = vadd.f32 %v2897_v6, %v8512_v17  ;;  %v3250_v37 = vpop.f32.mrb[202].mxu1  ;;  %v2899_v1 = vpop.f32.mrb[203].mxu0  ;;  %v7745_v23 = vld [vmem:[%s11236_s3 + $0x3b8] sm:$0xff]  }
 0x478   :  { %v3975_v7 = vmax.f32 %v3247_v44, 0.0  ;;  %v3974_v11 = vmax.f32 %v2896_v13, 0.0  ;;  %v3251_v12 = vadd.f32 %v3250_v37, %v8520_v19  ;;  %v3252_v10 = vpop.f32.mrb[203].mxu1  ;;  %v2900_v41 = vadd.f32 %v2899_v1, %v8516_v18  ;;  %8289 = vmatpush3.bf16.msra.mxu1 %v7745_v23 }
 0x479   :  { %v5448_v28 = vadd.f32 %v5447_v34, %v3973_v15  ;;  %v3976_v50 = vmax.f32 %v3249_v24, 0.0  ;;  %v3989_v61 = vmax.f32 %v2898_v45, 0.0  ;;  %v3253_v14 = vadd.f32 %v3252_v10, %v8524_v20  ;;  %8257 = vmatpush3.bf16.msra.mxu0 %v7729_v49 }
 0x47a   :  { %v5522_v39 = vadd.f32 %v5521_v51, %v3975_v7  ;;  %v5485_v2 = vadd.f32 %v5484_v29, %v3974_v11  ;;  %v3991_v30 = vmax.f32 %v3251_v12, 0.0  ;;  %v3990_v22 = vmax.f32 %v2900_v41, 0.0 }
 0x47b   :  { %v5559_v25 = vadd.f32 %v5558_v21, %v3976_v50  ;;  %v5449_v53 = vadd.f32 %v5448_v28, %v3989_v61  ;;  %v3992_v47 = vmax.f32 %v3253_v14, 0.0 }
 0x47c   :  { %v5523_v16 = vadd.f32 %v5522_v39, %v3991_v30  ;;  %v2903_v52 = vpop.f32.mrb[204].mxu0  ;;  %v5486_v26 = vadd.f32 %v5485_v2, %v3990_v22 }
 0x47d   :  { %v2904_v3 = vadd.f32 %v2903_v52, %v8512_v17  ;;  %v3256_v59 = vpop.f32.mrb[204].mxu1  ;;  %v2905_v57 = vpop.f32.mrb[205].mxu0  ;;  %v5560_v9 = vadd.f32 %v5559_v25, %v3992_v47 }
 0x47e   :  { %v3257_v48 = vadd.f32 %v3256_v59, %v8520_v19  ;;  %v2906_v43 = vadd.f32 %v2905_v57, %v8516_v18  ;;  %v3258_v42 = vpop.f32.mrb[205].mxu1  ;;  %v2907_v34 = vpop.f32.mrb[206].mxu0 }
 0x47f   :  { %v4005_v0 = vmax.f32 %v2904_v3, 0.0  ;;  %v3259_v63 = vadd.f32 %v3258_v42, %v8524_v20  ;;  %v2908_v33 = vadd.f32 %v2907_v34, %v8512_v17  ;;  %v3260_v60 = vpop.f32.mrb[206].mxu1  ;;  %v2909_v51 = vpop.f32.mrb[207].mxu0 }
 0x480   :  { %v4007_v35 = vmax.f32 %v3257_v48, 0.0  ;;  %v4006_v58 = vmax.f32 %v2906_v43, 0.0  ;;  %v3261_v54 = vadd.f32 %v3260_v60, %v8520_v19  ;;  %v2910_v44 = vadd.f32 %v2909_v51, %v8516_v18  ;;  %v3262_v13 = vpop.f32.mrb[207].mxu1 }
 0x481   :  { %v5450_v8 = vadd.f32 %v5449_v53, %v4005_v0  ;;  %v4008_v6 = vmax.f32 %v3259_v63, 0.0  ;;  %v4021_v29 = vmax.f32 %v2908_v33, 0.0  ;;  %v3263_v15 = vadd.f32 %v3262_v13, %v8524_v20 }
 0x482   :  { %v5524_v24 = vadd.f32 %v5523_v16, %v4007_v35  ;;  %v5487_v45 = vadd.f32 %v5486_v26, %v4006_v58  ;;  %v4023_v37 = vmax.f32 %v3261_v54, 0.0  ;;  %v4022_v1 = vmax.f32 %v2910_v44, 0.0 }
 0x483   :  { %v5561_v31 = vadd.f32 %v5560_v9, %v4008_v6  ;;  %v5451_v62 = vadd.f32 %v5450_v8, %v4021_v29  ;;  %v4024_v21 = vmax.f32 %v3263_v15, 0.0 }
 0x484   :  { %v5525_v7 = vadd.f32 %v5524_v24, %v4023_v37  ;;  %v5488_v11 = vadd.f32 %v5487_v45, %v4022_v1  ;;  %v2913_v12 = vpop.f32.mrb[208].mxu0 }
 0x485   :  { %v5562_v10 = vadd.f32 %v5561_v31, %v4024_v21  ;;  %v2914_v36 = vadd.f32 %v2913_v12, %v8512_v17  ;;  %v3266_v5 = vpop.f32.mrb[208].mxu1  ;;  %v2915_v28 = vpop.f32.mrb[209].mxu0 }
 0x486   :  { %v3267_v50 = vadd.f32 %v3266_v5, %v8520_v19  ;;  %v2916_v61 = vadd.f32 %v2915_v28, %v8516_v18  ;;  %v3268_v41 = vpop.f32.mrb[209].mxu1  ;;  %v2917_v39 = vpop.f32.mrb[210].mxu0 }
 0x487   :  { %v4037_v2 = vmax.f32 %v2914_v36, 0.0  ;;  %v3269_v30 = vadd.f32 %v3268_v41, %v8524_v20  ;;  %v2918_v14 = vadd.f32 %v2917_v39, %v8512_v17  ;;  %v3270_v25 = vpop.f32.mrb[210].mxu1  ;;  %v2919_v53 = vpop.f32.mrb[211].mxu0 }
 0x488   :  { %v4039_v22 = vmax.f32 %v3267_v50, 0.0  ;;  %v4038_v4 = vmax.f32 %v2916_v61, 0.0  ;;  %v3271_v38 = vadd.f32 %v3270_v25, %v8520_v19  ;;  %v2920_v16 = vadd.f32 %v2919_v53, %v8516_v18  ;;  %v3272_v47 = vpop.f32.mrb[211].mxu1 }
 0x489   :  { %v5452_v52 = vadd.f32 %v5451_v62, %v4037_v2  ;;  %v4040_v46 = vmax.f32 %v3269_v30, 0.0  ;;  %v4053_v55 = vmax.f32 %v2918_v14, 0.0  ;;  %v3273_v26 = vadd.f32 %v3272_v47, %v8524_v20 }
 0x48a   :  { %v5526_v3 = vadd.f32 %v5525_v7, %v4039_v22  ;;  %v5489_v59 = vadd.f32 %v5488_v11, %v4038_v4  ;;  %v4055_v57 = vmax.f32 %v3271_v38, 0.0  ;;  %v4054_v9 = vmax.f32 %v2920_v16, 0.0 }
 0x48b   :  { %v5563_v48 = vadd.f32 %v5562_v10, %v4040_v46  ;;  %v5453_v43 = vadd.f32 %v5452_v52, %v4053_v55  ;;  %v4056_v42 = vmax.f32 %v3273_v26, 0.0 }
 0x48c   :  { %v5527_v34 = vadd.f32 %v5526_v3, %v4055_v57  ;;  %v5490_v0 = vadd.f32 %v5489_v59, %v4054_v9  ;;  %v2923_v63 = vpop.f32.mrb[212].mxu0 }
 0x48d   :  { %v5564_v33 = vadd.f32 %v5563_v48, %v4056_v42  ;;  %v2924_v60 = vadd.f32 %v2923_v63, %v8512_v17  ;;  %v3276_v51 = vpop.f32.mrb[212].mxu1  ;;  %v2925_v49 = vpop.f32.mrb[213].mxu0 }
 0x48e   :  { %v3277_v23 = vadd.f32 %v3276_v51, %v8520_v19  ;;  %v2926_v35 = vadd.f32 %v2925_v49, %v8516_v18  ;;  %v3278_v58 = vpop.f32.mrb[213].mxu1  ;;  %v2927_v54 = vpop.f32.mrb[214].mxu0 }
 0x48f   :  { %v4069_v44 = vmax.f32 %v2924_v60, 0.0  ;;  %v3279_v13 = vadd.f32 %v3278_v58, %v8524_v20  ;;  %v2928_v8 = vadd.f32 %v2927_v54, %v8512_v17  ;;  %v3280_v6 = vpop.f32.mrb[214].mxu1  ;;  %v2929_v29 = vpop.f32.mrb[215].mxu0 }
 0x490   :  { %v4071_v15 = vmax.f32 %v3277_v23, 0.0  ;;  %v4070_v24 = vmax.f32 %v2926_v35, 0.0  ;;  %v3281_v45 = vadd.f32 %v3280_v6, %v8520_v19  ;;  %v2930_v37 = vadd.f32 %v2929_v29, %v8516_v18  ;;  %v3282_v1 = vpop.f32.mrb[215].mxu1 }
 0x491   :  { %v5454_v31 = vadd.f32 %v5453_v43, %v4069_v44  ;;  %v4072_v62 = vmax.f32 %v3279_v13, 0.0  ;;  %v4085_v21 = vmax.f32 %v2928_v8, 0.0  ;;  %v3283_v7 = vadd.f32 %v3282_v1, %v8524_v20 }
 0x492   :  { %v5528_v11 = vadd.f32 %v5527_v34, %v4071_v15  ;;  %v5491_v12 = vadd.f32 %v5490_v0, %v4070_v24  ;;  %v4087_v10 = vmax.f32 %v3281_v45, 0.0  ;;  %v4086_v36 = vmax.f32 %v2930_v37, 0.0 }
 0x493   :  { %v5565_v5 = vadd.f32 %v5564_v33, %v4072_v62  ;;  %v5455_v28 = vadd.f32 %v5454_v31, %v4085_v21  ;;  %v4088_v50 = vmax.f32 %v3283_v7, 0.0 }
 0x494   :  { %v5529_v61 = vadd.f32 %v5528_v11, %v4087_v10  ;;  %v5492_v41 = vadd.f32 %v5491_v12, %v4086_v36  ;;  %v2933_v39 = vpop.f32.mrb[216].mxu0 }
 0x495   :  { %v5566_v2 = vadd.f32 %v5565_v5, %v4088_v50  ;;  %v2934_v30 = vadd.f32 %v2933_v39, %v8512_v17  ;;  %v3286_v14 = vpop.f32.mrb[216].mxu1  ;;  %v2935_v25 = vpop.f32.mrb[217].mxu0 }
 0x496   :  { %v3287_v53 = vadd.f32 %v3286_v14, %v8520_v19  ;;  %v2936_v22 = vadd.f32 %v2935_v25, %v8516_v18  ;;  %v3288_v4 = vpop.f32.mrb[217].mxu1  ;;  %v2937_v38 = vpop.f32.mrb[218].mxu0 }
 0x497   :  { %v4101_v16 = vmax.f32 %v2934_v30, 0.0  ;;  %v3289_v47 = vadd.f32 %v3288_v4, %v8524_v20  ;;  %v2938_v52 = vadd.f32 %v2937_v38, %v8512_v17  ;;  %v3290_v46 = vpop.f32.mrb[218].mxu1  ;;  %v2939_v55 = vpop.f32.mrb[219].mxu0 }
 0x498   :  { %v4103_v26 = vmax.f32 %v3287_v53, 0.0  ;;  %v4102_v3 = vmax.f32 %v2936_v22, 0.0  ;;  %v3291_v59 = vadd.f32 %v3290_v46, %v8520_v19  ;;  %v2940_v57 = vadd.f32 %v2939_v55, %v8516_v18  ;;  %v3292_v9 = vpop.f32.mrb[219].mxu1 }
 0x499   :  { %v5456_v48 = vadd.f32 %v5455_v28, %v4101_v16  ;;  %v4104_v43 = vmax.f32 %v3289_v47, 0.0  ;;  %v4117_v42 = vmax.f32 %v2938_v52, 0.0  ;;  %v3293_v34 = vadd.f32 %v3292_v9, %v8524_v20 }
 0x49a   :  { %v5530_v0 = vadd.f32 %v5529_v61, %v4103_v26  ;;  %v5493_v63 = vadd.f32 %v5492_v41, %v4102_v3  ;;  %v4119_v33 = vmax.f32 %v3291_v59, 0.0  ;;  %v4118_v60 = vmax.f32 %v2940_v57, 0.0 }
 0x49b   :  { %v5567_v51 = vadd.f32 %v5566_v2, %v4104_v43  ;;  %v5457_v49 = vadd.f32 %v5456_v48, %v4117_v42  ;;  %v4120_v23 = vmax.f32 %v3293_v34, 0.0 }
 0x49c   :  { %v5531_v35 = vadd.f32 %v5530_v0, %v4119_v33  ;;  %v5494_v58 = vadd.f32 %v5493_v63, %v4118_v60  ;;  %v2943_v54 = vpop.f32.mrb[220].mxu0 }
 0x49d   :  { %v5568_v44 = vadd.f32 %v5567_v51, %v4120_v23  ;;  %v2944_v13 = vadd.f32 %v2943_v54, %v8512_v17  ;;  %v3296_v8 = vpop.f32.mrb[220].mxu1  ;;  %v2945_v6 = vpop.f32.mrb[221].mxu0 }
 0x49e   :  { %v3297_v29 = vadd.f32 %v3296_v8, %v8520_v19  ;;  %v2946_v15 = vadd.f32 %v2945_v6, %v8516_v18  ;;  %v3298_v24 = vpop.f32.mrb[221].mxu1  ;;  %v2947_v45 = vpop.f32.mrb[222].mxu0 }
 0x49f   :  { %v4133_v37 = vmax.f32 %v2944_v13, 0.0  ;;  %v3299_v1 = vadd.f32 %v3298_v24, %v8524_v20  ;;  %v2948_v31 = vadd.f32 %v2947_v45, %v8512_v17  ;;  %v3300_v62 = vpop.f32.mrb[222].mxu1  ;;  %v2949_v21 = vpop.f32.mrb[223].mxu0 }
 0x4a0   :  { %v4135_v7 = vmax.f32 %v3297_v29, 0.0  ;;  %v4134_v11 = vmax.f32 %v2946_v15, 0.0  ;;  %v3301_v12 = vadd.f32 %v3300_v62, %v8520_v19  ;;  %v2950_v10 = vadd.f32 %v2949_v21, %v8516_v18  ;;  %v3302_v36 = vpop.f32.mrb[223].mxu1 }
 0x4a1   :  { %v5458_v5 = vadd.f32 %v5457_v49, %v4133_v37  ;;  %v4136_v28 = vmax.f32 %v3299_v1, 0.0  ;;  %v4149_v50 = vmax.f32 %v2948_v31, 0.0  ;;  %v3303_v61 = vadd.f32 %v3302_v36, %v8524_v20 }
 0x4a2   :  { %v5532_v41 = vadd.f32 %v5531_v35, %v4135_v7  ;;  %v5495_v39 = vadd.f32 %v5494_v58, %v4134_v11  ;;  %v4151_v2 = vmax.f32 %v3301_v12, 0.0  ;;  %v4150_v30 = vmax.f32 %v2950_v10, 0.0 }
 0x4a3   :  { %v5569_v14 = vadd.f32 %v5568_v44, %v4136_v28  ;;  %v5459_v25 = vadd.f32 %v5458_v5, %v4149_v50  ;;  %v4152_v53 = vmax.f32 %v3303_v61, 0.0 }
 0x4a4   :  { %v5533_v22 = vadd.f32 %v5532_v41, %v4151_v2  ;;  %v5496_v4 = vadd.f32 %v5495_v39, %v4150_v30  ;;  %v2953_v38 = vpop.f32.mrb[224].mxu0 }
 0x4a5   :  { %v5570_v16 = vadd.f32 %v5569_v14, %v4152_v53  ;;  %v2954_v47 = vadd.f32 %v2953_v38, %v8512_v17  ;;  %v3306_v52 = vpop.f32.mrb[224].mxu1  ;;  %v2955_v46 = vpop.f32.mrb[225].mxu0 }
 0x4a6   :  { %v3307_v55 = vadd.f32 %v3306_v52, %v8520_v19  ;;  %v2956_v26 = vadd.f32 %v2955_v46, %v8516_v18  ;;  %v3308_v3 = vpop.f32.mrb[225].mxu1  ;;  %v2957_v59 = vpop.f32.mrb[226].mxu0 }
 0x4a7   :  { %v4165_v57 = vmax.f32 %v2954_v47, 0.0  ;;  %v3309_v9 = vadd.f32 %v3308_v3, %v8524_v20  ;;  %v2958_v48 = vadd.f32 %v2957_v59, %v8512_v17  ;;  %v3310_v43 = vpop.f32.mrb[226].mxu1  ;;  %v2959_v42 = vpop.f32.mrb[227].mxu0 }
 0x4a8   :  { %v4167_v34 = vmax.f32 %v3307_v55, 0.0  ;;  %v4166_v0 = vmax.f32 %v2956_v26, 0.0  ;;  %v3311_v63 = vadd.f32 %v3310_v43, %v8520_v19  ;;  %v2960_v33 = vadd.f32 %v2959_v42, %v8516_v18  ;;  %v3312_v60 = vpop.f32.mrb[227].mxu1 }
 0x4a9   :  { %v5460_v51 = vadd.f32 %v5459_v25, %v4165_v57  ;;  %v4168_v49 = vmax.f32 %v3309_v9, 0.0  ;;  %v4181_v23 = vmax.f32 %v2958_v48, 0.0  ;;  %v3313_v35 = vadd.f32 %v3312_v60, %v8524_v20 }
 0x4aa   :  { %v5534_v58 = vadd.f32 %v5533_v22, %v4167_v34  ;;  %v5497_v54 = vadd.f32 %v5496_v4, %v4166_v0  ;;  %v4183_v44 = vmax.f32 %v3311_v63, 0.0  ;;  %v4182_v13 = vmax.f32 %v2960_v33, 0.0 }
 0x4ab   :  { %v5571_v8 = vadd.f32 %v5570_v16, %v4168_v49  ;;  %v5461_v6 = vadd.f32 %v5460_v51, %v4181_v23  ;;  %v4184_v29 = vmax.f32 %v3313_v35, 0.0 }
 0x4ac   :  { %v5535_v15 = vadd.f32 %v5534_v58, %v4183_v44  ;;  %v5498_v24 = vadd.f32 %v5497_v54, %v4182_v13  ;;  %v2963_v45 = vpop.f32.mrb[228].mxu0 }
 0x4ad   :  { %v5572_v37 = vadd.f32 %v5571_v8, %v4184_v29  ;;  %v2964_v1 = vadd.f32 %v2963_v45, %v8512_v17  ;;  %v3316_v31 = vpop.f32.mrb[228].mxu1  ;;  %v2965_v62 = vpop.f32.mrb[229].mxu0 }
 0x4ae   :  { %v3317_v21 = vadd.f32 %v3316_v31, %v8520_v19  ;;  %v2966_v7 = vadd.f32 %v2965_v62, %v8516_v18  ;;  %v3318_v11 = vpop.f32.mrb[229].mxu1  ;;  %v2967_v12 = vpop.f32.mrb[230].mxu0 }
 0x4af   :  { %v4197_v10 = vmax.f32 %v2964_v1, 0.0  ;;  %v3319_v36 = vadd.f32 %v3318_v11, %v8524_v20  ;;  %v2968_v5 = vadd.f32 %v2967_v12, %v8512_v17  ;;  %v3320_v28 = vpop.f32.mrb[230].mxu1  ;;  %v2969_v50 = vpop.f32.mrb[231].mxu0 }
 0x4b0   :  { %v4199_v61 = vmax.f32 %v3317_v21, 0.0  ;;  %v4198_v41 = vmax.f32 %v2966_v7, 0.0  ;;  %v3321_v39 = vadd.f32 %v3320_v28, %v8520_v19  ;;  %v2970_v2 = vadd.f32 %v2969_v50, %v8516_v18  ;;  %v3322_v30 = vpop.f32.mrb[231].mxu1 }
 0x4b1   :  { %v5462_v14 = vadd.f32 %v5461_v6, %v4197_v10  ;;  %v4200_v25 = vmax.f32 %v3319_v36, 0.0  ;;  %v4213_v53 = vmax.f32 %v2968_v5, 0.0  ;;  %v3323_v22 = vadd.f32 %v3322_v30, %v8524_v20 }
 0x4b2   :  { %v5536_v4 = vadd.f32 %v5535_v15, %v4199_v61  ;;  %v5499_v38 = vadd.f32 %v5498_v24, %v4198_v41  ;;  %v4215_v16 = vmax.f32 %v3321_v39, 0.0  ;;  %v4214_v47 = vmax.f32 %v2970_v2, 0.0 }
 0x4b3   :  { %v5573_v52 = vadd.f32 %v5572_v37, %v4200_v25  ;;  %v5463_v46 = vadd.f32 %v5462_v14, %v4213_v53  ;;  %v4216_v55 = vmax.f32 %v3323_v22, 0.0 }
 0x4b4   :  { %v5537_v26 = vadd.f32 %v5536_v4, %v4215_v16  ;;  %v5500_v3 = vadd.f32 %v5499_v38, %v4214_v47  ;;  %v2973_v59 = vpop.f32.mrb[232].mxu0 }
 0x4b5   :  { %v5574_v57 = vadd.f32 %v5573_v52, %v4216_v55  ;;  %v2974_v9 = vadd.f32 %v2973_v59, %v8512_v17  ;;  %v3326_v48 = vpop.f32.mrb[232].mxu1  ;;  %v2975_v43 = vpop.f32.mrb[233].mxu0 }
 0x4b6   :  { %v3327_v42 = vadd.f32 %v3326_v48, %v8520_v19  ;;  %v2976_v34 = vadd.f32 %v2975_v43, %v8516_v18  ;;  %v3328_v0 = vpop.f32.mrb[233].mxu1  ;;  %v2977_v63 = vpop.f32.mrb[234].mxu0 }
 0x4b7   :  { %v4229_v33 = vmax.f32 %v2974_v9, 0.0  ;;  %v3329_v60 = vadd.f32 %v3328_v0, %v8524_v20  ;;  %v2978_v51 = vadd.f32 %v2977_v63, %v8512_v17  ;;  %v3330_v49 = vpop.f32.mrb[234].mxu1  ;;  %v2979_v23 = vpop.f32.mrb[235].mxu0 }
 0x4b8   :  { %v4231_v35 = vmax.f32 %v3327_v42, 0.0  ;;  %v4230_v58 = vmax.f32 %v2976_v34, 0.0  ;;  %v3331_v54 = vadd.f32 %v3330_v49, %v8520_v19  ;;  %v2980_v44 = vadd.f32 %v2979_v23, %v8516_v18  ;;  %v3332_v13 = vpop.f32.mrb[235].mxu1 }
 0x4b9   :  { %v5464_v8 = vadd.f32 %v5463_v46, %v4229_v33  ;;  %v4232_v6 = vmax.f32 %v3329_v60, 0.0  ;;  %v4245_v29 = vmax.f32 %v2978_v51, 0.0  ;;  %v3333_v15 = vadd.f32 %v3332_v13, %v8524_v20 }
 0x4ba   :  { %v5538_v24 = vadd.f32 %v5537_v26, %v4231_v35  ;;  %v5501_v45 = vadd.f32 %v5500_v3, %v4230_v58  ;;  %v4247_v37 = vmax.f32 %v3331_v54, 0.0  ;;  %v4246_v1 = vmax.f32 %v2980_v44, 0.0 }
 0x4bb   :  { %v5575_v31 = vadd.f32 %v5574_v57, %v4232_v6  ;;  %v5465_v62 = vadd.f32 %v5464_v8, %v4245_v29  ;;  %v4248_v21 = vmax.f32 %v3333_v15, 0.0 }
 0x4bc   :  { %v5539_v7 = vadd.f32 %v5538_v24, %v4247_v37  ;;  %v5502_v11 = vadd.f32 %v5501_v45, %v4246_v1  ;;  %v2983_v12 = vpop.f32.mrb[236].mxu0 }
 0x4bd   :  { %v5576_v10 = vadd.f32 %v5575_v31, %v4248_v21  ;;  %v2984_v36 = vadd.f32 %v2983_v12, %v8512_v17  ;;  %v3336_v5 = vpop.f32.mrb[236].mxu1  ;;  %v2985_v28 = vpop.f32.mrb[237].mxu0 }
 0x4be   :  { %v3337_v50 = vadd.f32 %v3336_v5, %v8520_v19  ;;  %v2986_v61 = vadd.f32 %v2985_v28, %v8516_v18  ;;  %v3338_v41 = vpop.f32.mrb[237].mxu1  ;;  %v2987_v39 = vpop.f32.mrb[238].mxu0 }
 0x4bf   :  { %v4261_v2 = vmax.f32 %v2984_v36, 0.0  ;;  %v3339_v30 = vadd.f32 %v3338_v41, %v8524_v20  ;;  %v2988_v14 = vadd.f32 %v2987_v39, %v8512_v17  ;;  %v3340_v25 = vpop.f32.mrb[238].mxu1  ;;  %v2989_v53 = vpop.f32.mrb[239].mxu0 }
 0x4c0   :  { %v4263_v22 = vmax.f32 %v3337_v50, 0.0  ;;  %v4262_v4 = vmax.f32 %v2986_v61, 0.0  ;;  %v3341_v38 = vadd.f32 %v3340_v25, %v8520_v19  ;;  %v2990_v16 = vadd.f32 %v2989_v53, %v8516_v18  ;;  %v3342_v47 = vpop.f32.mrb[239].mxu1 }
 0x4c1   :  { %v5466_v52 = vadd.f32 %v5465_v62, %v4261_v2  ;;  %v4264_v46 = vmax.f32 %v3339_v30, 0.0  ;;  %v4277_v55 = vmax.f32 %v2988_v14, 0.0  ;;  %v3343_v26 = vadd.f32 %v3342_v47, %v8524_v20 }
 0x4c2   :  { %v5540_v3 = vadd.f32 %v5539_v7, %v4263_v22  ;;  %v5503_v59 = vadd.f32 %v5502_v11, %v4262_v4  ;;  %v4279_v57 = vmax.f32 %v3341_v38, 0.0  ;;  %v4278_v9 = vmax.f32 %v2990_v16, 0.0 }
 0x4c3   :  { %v5577_v48 = vadd.f32 %v5576_v10, %v4264_v46  ;;  %v5467_v43 = vadd.f32 %v5466_v52, %v4277_v55  ;;  %v4280_v42 = vmax.f32 %v3343_v26, 0.0  ;;  %v4884_v16 = vrot.slane %v10981_v27, 4 }
 0x4c4   :  { %v5541_v34 = vadd.f32 %v5540_v3, %v4279_v57  ;;  %v5504_v0 = vadd.f32 %v5503_v59, %v4278_v9  ;;  %v2993_v63 = vpop.f32.mrb[240].mxu0 }
 0x4c5   :  { %v5578_v33 = vadd.f32 %v5577_v48, %v4280_v42  ;;  %v2994_v60 = vadd.f32 %v2993_v63, %v8512_v17  ;;  %v3346_v51 = vpop.f32.mrb[240].mxu1  ;;  %v2995_v49 = vpop.f32.mrb[241].mxu0 }
 0x4c6   :  { %v3347_v23 = vadd.f32 %v3346_v51, %v8520_v19  ;;  %v2996_v35 = vadd.f32 %v2995_v49, %v8516_v18  ;;  %v3348_v58 = vpop.f32.mrb[241].mxu1  ;;  %v2997_v54 = vpop.f32.mrb[242].mxu0  ;;  %v4958_v49 = vrot.slane %v10983_v32, 4 }
 0x4c7   :  { %v4293_v44 = vmax.f32 %v2994_v60, 0.0  ;;  %v3349_v13 = vadd.f32 %v3348_v58, %v8524_v20  ;;  %v2998_v8 = vadd.f32 %v2997_v54, %v8512_v17  ;;  %v3350_v6 = vpop.f32.mrb[242].mxu1  ;;  %v2999_v29 = vpop.f32.mrb[243].mxu0 }
 0x4c8   :  { %v4295_v15 = vmax.f32 %v3347_v23, 0.0  ;;  %v4294_v24 = vmax.f32 %v2996_v35, 0.0  ;;  %v3351_v45 = vadd.f32 %v3350_v6, %v8520_v19  ;;  %v3000_v37 = vadd.f32 %v2999_v29, %v8516_v18  ;;  %v3352_v1 = vpop.f32.mrb[243].mxu1 }
 0x4c9   :  { %v5468_v31 = vadd.f32 %v5467_v43, %v4293_v44  ;;  %v4296_v62 = vmax.f32 %v3349_v13, 0.0  ;;  %v4309_v21 = vmax.f32 %v2998_v8, 0.0  ;;  %v3353_v7 = vadd.f32 %v3352_v1, %v8524_v20 }
 0x4ca   :  { %v5542_v11 = vadd.f32 %v5541_v34, %v4295_v15  ;;  %v5505_v12 = vadd.f32 %v5504_v0, %v4294_v24  ;;  %v4311_v10 = vmax.f32 %v3351_v45, 0.0  ;;  %v4310_v36 = vmax.f32 %v3000_v37, 0.0 }
 0x4cb   :  { %v5579_v5 = vadd.f32 %v5578_v33, %v4296_v62  ;;  %v5469_v28 = vadd.f32 %v5468_v31, %v4309_v21  ;;  %v4312_v50 = vmax.f32 %v3353_v7, 0.0  ;;  %v4921_v8 = vrot.slane %v10985_v56, 4 }
 0x4cc   :  { %v5543_v61 = vadd.f32 %v5542_v11, %v4311_v10  ;;  %v5506_v41 = vadd.f32 %v5505_v12, %v4310_v36  ;;  %v3003_v39 = vpop.f32.mrb[244].mxu0  ;;  %v11178_v45 = vadd.f32 %v4884_v16, %v10981_v27  ;;  %v4995_v37 = vrot.slane %v10987_v40, 4 }
 0x4cd   :  { %v5580_v2 = vadd.f32 %v5579_v5, %v4312_v50  ;;  %v3004_v30 = vadd.f32 %v3003_v39, %v8512_v17  ;;  %v3356_v14 = vpop.f32.mrb[244].mxu1  ;;  %v3005_v25 = vpop.f32.mrb[245].mxu0  ;;  %v11184_v7 = vadd.f32 %v4958_v49, %v10983_v32 }
 0x4ce   :  { %v3357_v53 = vadd.f32 %v3356_v14, %v8520_v19  ;;  %v3006_v22 = vadd.f32 %v3005_v25, %v8516_v18  ;;  %v3358_v4 = vpop.f32.mrb[245].mxu1  ;;  %v3007_v38 = vpop.f32.mrb[246].mxu0 }
 0x4cf   :  { %v4325_v47 = vmax.f32 %v3004_v30, 0.0  ;;  %v3359_v52 = vadd.f32 %v3358_v4, %v8524_v20  ;;  %v3008_v46 = vadd.f32 %v3007_v38, %v8512_v17  ;;  %v3360_v55 = vpop.f32.mrb[246].mxu1  ;;  %v3009_v26 = vpop.f32.mrb[247].mxu0  ;;  %v4922_v4 = vadd.f32 %v4921_v8, %v10985_v56 }
 0x4d0   :  { %v4327_v3 = vmax.f32 %v3357_v53, 0.0  ;;  %v4326_v59 = vmax.f32 %v3006_v22, 0.0  ;;  %v3361_v57 = vadd.f32 %v3360_v55, %v8520_v19  ;;  %v3010_v9 = vadd.f32 %v3009_v26, %v8516_v18  ;;  %v3362_v48 = vpop.f32.mrb[247].mxu1 }
 0x4d1   :  { %v5470_v43 = vadd.f32 %v5469_v28, %v4325_v47  ;;  %v4328_v42 = vmax.f32 %v3359_v52, 0.0  ;;  %v4341_v34 = vmax.f32 %v3008_v46, 0.0  ;;  %v3363_v0 = vadd.f32 %v3362_v48, %v8524_v20 }
 0x4d2   :  { %v5544_v63 = vadd.f32 %v5543_v61, %v4327_v3  ;;  %v5507_v33 = vadd.f32 %v5506_v41, %v4326_v59  ;;  %v4343_v60 = vmax.f32 %v3361_v57, 0.0  ;;  %v4342_v51 = vmax.f32 %v3010_v9, 0.0 }
 0x4d3   :  { %v5581_v23 = vadd.f32 %v5580_v2, %v4328_v42  ;;  %v5471_v35 = vadd.f32 %v5470_v43, %v4341_v34  ;;  %v4344_v58 = vmax.f32 %v3363_v0, 0.0  ;;  %v4886_v26 = vrot.slane %v11178_v45, 2 }
 0x4d4   :  { %v5545_v54 = vadd.f32 %v5544_v63, %v4343_v60  ;;  %v5508_v44 = vadd.f32 %v5507_v33, %v4342_v51  ;;  %v3013_v13 = vpop.f32.mrb[248].mxu0  ;;  %v4960_v48 = vrot.slane %v11184_v7, 2  ;;  %v4996_v43 = vadd.f32 %v4995_v37, %v10987_v40 }
 0x4d5   :  { %v5582_v6 = vadd.f32 %v5581_v23, %v4344_v58  ;;  %v3014_v29 = vadd.f32 %v3013_v13, %v8512_v17  ;;  %v3366_v15 = vpop.f32.mrb[248].mxu1  ;;  %v3015_v24 = vpop.f32.mrb[249].mxu0  ;;  %v4923_v63 = vrot.slane %v4922_v4, 2 }
 0x4d6   :  { %v3367_v1 = vadd.f32 %v3366_v15, %v8520_v19  ;;  %v3016_v31 = vadd.f32 %v3015_v24, %v8516_v18  ;;  %v3368_v62 = vpop.f32.mrb[249].mxu1  ;;  %v3017_v21 = vpop.f32.mrb[250].mxu0 }
 0x4d7   :  { %v4357_v11 = vmax.f32 %v3014_v29, 0.0  ;;  %v3369_v12 = vadd.f32 %v3368_v62, %v8524_v20  ;;  %v3018_v10 = vadd.f32 %v3017_v21, %v8512_v17  ;;  %v3370_v36 = vpop.f32.mrb[250].mxu1  ;;  %v3019_v5 = vpop.f32.mrb[251].mxu0 }
 0x4d8   :  { %v4359_v27 = vmax.f32 %v3367_v1, 0.0  ;;  %v4358_v28 = vmax.f32 %v3016_v31, 0.0  ;;  %v3371_v50 = vadd.f32 %v3370_v36, %v8520_v19  ;;  %v3020_v61 = vadd.f32 %v3019_v5, %v8516_v18  ;;  %v3372_v41 = vpop.f32.mrb[251].mxu1 }
 0x4d9   :  { %v5472_v39 = vadd.f32 %v5471_v35, %v4357_v11  ;;  %v4360_v2 = vmax.f32 %v3369_v12, 0.0  ;;  %v4373_v30 = vmax.f32 %v3018_v10, 0.0  ;;  %v3373_v32 = vadd.f32 %v3372_v41, %v8524_v20 }
 0x4da   :  { %v5546_v14 = vadd.f32 %v5545_v54, %v4359_v27  ;;  %v5509_v25 = vadd.f32 %v5508_v44, %v4358_v28  ;;  %v4375_v53 = vmax.f32 %v3371_v50, 0.0  ;;  %v4374_v22 = vmax.f32 %v3020_v61, 0.0 }
 0x4db   :  { %v5583_v38 = vadd.f32 %v5582_v6, %v4360_v2  ;;  %v5473_v16 = vadd.f32 %v5472_v39, %v4373_v30  ;;  %v4376_v47 = vmax.f32 %v3373_v32, 0.0  ;;  %v4997_v31 = vrot.slane %v4996_v43, 2 }
 0x4dc   :  { %v5547_v52 = vadd.f32 %v5546_v14, %v4375_v53  ;;  %v5510_v46 = vadd.f32 %v5509_v25, %v4374_v22  ;;  %v3023_v55 = vpop.f32.mrb[252].mxu0  ;;  %v4924_v50 = vadd.f32 %v4923_v63, %v4922_v4 }
 0x4dd   :  { %v5584_v3 = vadd.f32 %v5583_v38, %v4376_v47  ;;  %v3024_v59 = vadd.f32 %v3023_v55, %v8512_v17  ;;  %v3376_v57 = vpop.f32.mrb[252].mxu1  ;;  %v3025_v9 = vpop.f32.mrb[253].mxu0  ;;  %v4998_v30 = vadd.f32 %v4997_v31, %v4996_v43 }
 0x4de   :  { %v3377_v42 = vadd.f32 %v3376_v57, %v8520_v19  ;;  %v3026_v56 = vadd.f32 %v3025_v9, %v8516_v18  ;;  %v3378_v34 = vpop.f32.mrb[253].mxu1  ;;  %v3027_v0 = vpop.f32.mrb[254].mxu0 }
 0x4df   :  { %v4389_v33 = vmax.f32 %v3024_v59, 0.0  ;;  %v3379_v60 = vadd.f32 %v3378_v34, %v8524_v20  ;;  %v3028_v51 = vadd.f32 %v3027_v0, %v8512_v17  ;;  %v3380_v49 = vpop.f32.mrb[254].mxu1  ;;  %v3029_v23 = vpop.f32.mrb[255].mxu0  ;;  %v4999_v59 = vrot.slane %v4998_v30, 1 }
 0x4e0   :  { %v4391_v35 = vmax.f32 %v3377_v42, 0.0  ;;  %v4390_v58 = vmax.f32 %v3026_v56, 0.0  ;;  %v3381_v54 = vadd.f32 %v3380_v49, %v8520_v19  ;;  %v3030_v40 = vadd.f32 %v3029_v23, %v8516_v18  ;;  %v3382_v44 = vpop.f32.mrb[255].mxu1 }
 0x4e1   :  { %v5474_v13 = vadd.f32 %v5473_v16, %v4389_v33  ;;  %v4392_v8 = vmax.f32 %v3379_v60, 0.0  ;;  %v4405_v6 = vmax.f32 %v3028_v51, 0.0  ;;  %v3383_v29 = vadd.f32 %v3382_v44, %v8524_v20  ;;  %v7112_v20 = vld [vmem:[%s11237_s4] ss:$0 sm:$0xff] }
 0x4e2   :  { %v5548_v15 = vadd.f32 %v5547_v52, %v4391_v35  ;;  %v5511_v24 = vadd.f32 %v5510_v46, %v4390_v58  ;;  %v4407_v37 = vmax.f32 %v3381_v54, 0.0  ;;  %v4406_v1 = vmax.f32 %v3030_v40, 0.0 }
 0x4e3   :  { %v5585_v17 = vadd.f32 %v5584_v3, %v4392_v8  ;;  %v5475_v62 = vadd.f32 %v5474_v13, %v4405_v6  ;;  %v4408_v21 = vmax.f32 %v3383_v29, 0.0  ;;  %v4887_v19 = vadd.f32 %v4886_v26, %v11178_v45 }
 0x4e4   :  { %v5549_v11 = vadd.f32 %v5548_v15, %v4407_v37  ;;  %v5512_v12 = vadd.f32 %v5511_v24, %v4406_v1  ;;  %v7786_v10 = vpop.f32.mrb[0].mxu0  ;;  %v4961_v18 = vadd.f32 %v4960_v48, %v11184_v7  ;;  %v4925_v26 = vrot.slane %v4924_v50, 1 }
 0x4e5   :  { %v5476_v36 = vrot.slane %v5475_v62, 4  ;;  %v5586_v5 = vadd.f32 %v5585_v17, %v4408_v21  ;;  %v7821_v27 = vpop.f32.mrb[0].mxu1  ;;  %v7787_v28 = vpop.f32.mrb[1].mxu0  ;;  %v4888_v22 = vrot.slane %v4887_v19, 1  ;;  %v5000_v60 = vadd.f32 %v4999_v59, %v4998_v30 }
 0x4e6   :  { %v5550_v61 = vrot.slane %v5549_v11, 4  ;;  %v5513_v41 = vrot.slane %v5512_v12, 4  ;;  %v7788_v39 = vadd.f32 %v7787_v28, %v7786_v10  ;;  %v7822_v2 = vpop.f32.mrb[1].mxu1  ;;  %v4962_v38 = vrot.slane %v4961_v18, 1 }
 0x4e7   :  { %v5477_v32 = vadd.f32 %v5476_v36, %v5475_v62  ;;  %v5587_v14 = vrot.slane %v5586_v5, 4  ;;  %v7823_v25 = vadd.f32 %v7822_v2, %v7821_v27  ;;  %v4889_v48 = vadd.f32 %v4888_v22, %v4887_v19 }
 0x4e8   :  { %v5551_v45 = vadd.f32 %v5550_v61, %v5549_v11  ;;  %v5514_v53 = vadd.f32 %v5513_v41, %v5512_v12  ;;  %v6277_v7 = vadd.f32 %v7788_v39, %v7112_v20  ;;  %v4963_v56 = vadd.f32 %v4962_v38, %v4961_v18 }
 0x4e9   :  { %v5478_v16 = vrot.slane %v5477_v32, 2  ;;  %v5588_v47 = vadd.f32 %v5587_v14, %v5586_v5  ;;  %v4926_v0 = vadd.f32 %v4925_v26, %v4924_v50  ;;  %v5606_v35 = vmul.f32 0.00390625, %v4889_v48 }
 0x4ea   :  { %v5552_v52 = vrot.slane %v5551_v45, 2  ;;  %v5515_v46 = vrot.slane %v5514_v53, 2  ;;  %v6347_v55 = vadd.f32 %v7823_v25, %v6277_v7  ;;  %v5608_v40 = vmul.f32 0.00390625, %v4963_v56 }
 0x4eb   :  { %v5479_v4 = vadd.f32 %v5478_v16, %v5477_v32  ;;  %v5589_v3 = vrot.slane %v5588_v47, 2  ;;  %v5607_v13 = vmul.f32 0.00390625, %v4926_v0  ;;  %v5609_v6 = vmul.f32 0.00390625, %v5000_v60  ;;  %v7113_v0 = vld [vmem:[%s11238_s5] ss:$0 sm:$0xff] }
 0x4ec   :  { %v5553_v57 = vadd.f32 %v5552_v52, %v5551_v45  ;;  %v5516_v9 = vadd.f32 %v5515_v46, %v5514_v53 }
 0x4ed   :  { %v5480_v43 = vrot.slane %v5479_v4, 1  ;;  %v5590_v42 = vadd.f32 %v5589_v3, %v5588_v47 }
 0x4ee   :  { %v5554_v34 = vrot.slane %v5553_v57, 1  ;;  %v5517_v63 = vrot.slane %v5516_v9, 1 }
 0x4ef   :  { %v5481_v33 = vadd.f32 %v5480_v43, %v5479_v4  ;;  %v5591_v51 = vrot.slane %v5590_v42, 1 }
 0x4f0   :  { %v5555_v49 = vadd.f32 %v5554_v34, %v5553_v57  ;;  %v5518_v23 = vadd.f32 %v5517_v63, %v5516_v9 }
 0x4f1   :  { %v5622_v58 = vmul.f32 0.00390625, %v5481_v33  ;;  %v5592_v54 = vadd.f32 %v5591_v51, %v5590_v42  ;;  %v7114_v33 = vld [vmem:[%s11239_s6] ss:$0 sm:$0xff] }
 0x4f2   :  { %v5624_v44 = vmul.f32 0.00390625, %v5555_v49  ;;  %v5623_v8 = vmul.f32 0.00390625, %v5518_v23 }
 0x4f3   :  { %v5625_v29 = vmul.f32 0.00390625, %v5592_v54  ;;  %v6190_v15 = vsel %vm6177_vm3, %v5622_v58, %v5606_v35 }
 0x4f4   :  { %v6191_v24 = vsel %vm6177_vm3, %v5623_v8, %v5607_v13  ;;  %v6192_v37 = vsel %vm6177_vm3, %v5624_v44, %v5608_v40 }
 0x4f5   :  { %6694 = vmatprep.mubr.f32.mxu0 %v6191_v24  ;;  %v6193_v1 = vsel %vm6177_vm3, %v5625_v29, %v5609_v6 }
 0x4f6   :  { %6764 = vmatprep.mubr.f32.mxu1 %v6193_v1  ;;  %6695 = vmatmul.mubr.f32.vlgmr.msra.gmra.mrb[6].mxu0 %v6190_v15 }
 0x4f7   :  { %6765 = vmatmul.mubr.f32.vlgmr.msra.gmra.mrb[6].mxu1 %v6192_v37 }
 0x504   :  { %v7856_v31 = vpop.f32.mrb[2].mxu0 }
 0x505   :  { %v7891_v17 = vpop.f32.mrb[2].mxu1  ;;  %v7857_v62 = vpop.f32.mrb[3].mxu0 }
 0x506   :  { %v7858_v21 = vadd.f32 %v7857_v62, %v7856_v31  ;;  %v7892_v11 = vpop.f32.mrb[3].mxu1 }
 0x507   :  { %v7893_v12 = vadd.f32 %v7892_v11, %v7891_v17 }
 0x508   :  { %v6417_v10 = vadd.f32 %v7858_v21, %v6347_v55 }
 0x50a   :  { %v6487_v19 = vadd.f32 %v7893_v12, %v6417_v10 }
 0x524   :  { %v7926_v18 = vpop.f32.mrb[4].mxu0 }
 0x525   :  { %v7961_v36 = vpop.f32.mrb[4].mxu1  ;;  %v7927_v5 = vpop.f32.mrb[5].mxu0 }
 0x526   :  { %v7928_v27 = vadd.f32 %v7927_v5, %v7926_v18  ;;  %v7962_v20 = vpop.f32.mrb[5].mxu1 }
 0x527   :  { %v7963_v28 = vadd.f32 %v7962_v20, %v7961_v36 }
 0x528   :  { %v6557_v50 = vadd.f32 %v7928_v27, %v6487_v19 }
 0x52a   :  { %v6627_v61 = vadd.f32 %v7963_v28, %v6557_v50 }
 0x5c9   :  { %v7996_v41 = vpop.f32.mrb[6].mxu0 }
 0x5ca   :  { %v8031_v39 = vpop.f32.mrb[6].mxu1  ;;  %v7997_v2 = vpop.f32.mrb[7].mxu0 }
 0x5cb   :  { %v7998_v30 = vadd.f32 %v7997_v2, %v7996_v41  ;;  %v8032_v32 = vpop.f32.mrb[7].mxu1 }
 0x5cc   :  { %v8033_v14 = vadd.f32 %v8032_v32, %v8031_v39 }
 0x5cd   :  { %v6697_v25 = vadd.f32 %v7998_v30, %v6627_v61 }
 0x5cf   :  { %v6767_v45 = vadd.f32 %v8033_v14, %v6697_v25 }
 0x5d1   :  { %v6771_v53 = vsel %vm6770_vm4, %v6767_v45, 0.0 }
 0x5d2   :  { %v6772_v7 = vrot.slane %v6771_v53, 4 }
 0x5d4   :  { %v6773_v22 = vadd.f32 %v6772_v7, %v6771_v53 }
 0x5d6   :  { %v6774_v38 = vrot.slane %v6773_v22, 2 }
 0x5d8   :  { %v6775_v16 = vadd.f32 %v6774_v38, %v6773_v22 }
 0x5da   :  { %v6776_v47 = vrot.slane %v6775_v16, 1 }
 0x5dc   :  { %v6777_v52 = vadd.f32 %v6776_v47, %v6775_v16 }
 0x5de   :  { %v6779_v46 = vmul.f32 0.5, %v6777_v52 }
 0x5e0   :  { %v6780_v55 = vsub.f32 %v6767_v45, %v6779_v46 }
 0x5e2   :  { %v6781_v26 = vmul.f32 %v6780_v55, %v6780_v55 }
 0x5e4   :  { %v6782_v4 = vsel %vm6770_vm4, %v6781_v26, 0.0 }
 0x5e5   :  { %v6783_v3 = vrot.slane %v6782_v4, 4 }
 0x5e7   :  { %v6784_v59 = vadd.f32 %v6783_v3, %v6782_v4 }
 0x5e9   :  { %v6785_v57 = vrot.slane %v6784_v59, 2 }
 0x5eb   :  { %v6786_v9 = vadd.f32 %v6785_v57, %v6784_v59 }
 0x5ed   :  { %v6787_v48 = vrot.slane %v6786_v9, 1 }
 0x5ef   :  { %v6788_v43 = vadd.f32 %v6787_v48, %v6786_v9 }
 0x5f1   :  { %v6789_v42 = vmul.f32 0.5, %v6788_v43 }
 0x5f3   :  { %v6790_v56 = vadd.f32 1e-05, %v6789_v42 }
 0x5f5   :  { %8330 = vrsqrt.f32 %v6790_v56 }
 0x5ff   :  { %v8331_v34 = vpop.eup %8330 }
 0x600   :  { %v6792_v63 = vmul.f32 %v8331_v34, %v6780_v55 }
 0x602   :  { %v6800_v60 = vmul.f32 %v7113_v0, %v6792_v63 }
 0x604   :  { %v6808_v51 = vadd.f32 %v7114_v33, %v6800_v60 }
 0x606   :  { %6809 = vst.msk [vmem:[#allocation2] sm:$0x3] %vm6770_vm4, %v6808_v51 }
 0x607   :  { %8436 = shalt.err (!%p8433_p4)
}
 0x608   :  { %s8437_s28 = scalar_lea.hbm %s11240_s7, 32 }
 0x609   :  { %p8438_p5 = scmp.ne.s32.totalorder %s11240_s7, %s8437_s28  ;;  %p8441_p6 = scmp.lt.u32.totalorder %s8437_s28, %s11240_s7 }
 0x60b   :  { %p8443_p7 = pnand %p8441_p6, %p8438_p5 }
 0x60d   :  { %8446 = shalt.err (!%p8443_p7)
}
 0x60e   :  { %6819 = dma.vmem_to_hbm [thread:$0]  %s6817_s25, 32, %s11240_s7, [#allocation3]  }
 0x60f   :  { %8447 = dma.done.wait [#allocation3], 32  }
 0x610   :  { %8448 = vsyncadd [#allocation3], 4294967264 }
 0x611   :  { %6823 = vsyncpa [#allocation3], 1 }

</bundles_post_ra>
